<compile_context>
chip_gen: v7x
topology: tpu7x:2x2x1
jax: 0.10.0
libtpu: 0.0.40
codegen_flags: <defaults>
</compile_context>

<pallas_src>
import functools

import jax
import jax.numpy as jnp
from jax.experimental import pallas as pl
from jax.experimental.pallas import tpu as pltpu

NUM_HIDDENS = 256
NUM_HEADS = 4
HEAD_DIM = NUM_HIDDENS // NUM_HEADS
FFN_HIDDEN = 1024
NUM_LAYERS = 4
VOCAB_IN = 1000
VOCAB_OUT = 1000
VOCAB_PAD = 1024          # pad logits N to a multiple of 128 for unmasked stores
MAX_LEN = 256
LN_EPS = 1e-5
SCALE = 1.0 / (HEAD_DIM ** 0.5)   # folded into Q projection weights at init


# ---------------------------------------------------------------------------
# Fused decoder-stack + classifier kernel
# grid=(NUM_LAYERS,): per-layer weights streamed via BlockSpec, activation
# carried in a VMEM scratch, logits written only at the last layer.
# ---------------------------------------------------------------------------
def _decoder_stack_kernel(
    x0_ref, xen_ref, om_ref, im_ref,
    wqkv_s_ref, bqkv_s_ref, wo_s_ref, bo_s_ref, g1_ref, be1_ref,
    wq_c_ref, bq_c_ref, wkv_c_ref, bkv_c_ref, wo_c_ref, bo_c_ref, g2_ref, be2_ref,
    w1_ref, bf1_ref, w2_ref, bf2_ref, g3_ref, be3_ref,
    wcls_ref,
    logits_ref,                      # output: (B*S, VOCAB_PAD) f32
    x_ref,                           # scratch: (B*S, 256) f32 carried activation
    *, B, S, S_en,
):
    layer = pl.program_id(0)
    H = NUM_HIDDENS

    @pl.when(layer == 0)
    def _init():
        x_ref[...] = x0_ref[...]

    x = x_ref[...]                       # (B*S, 256) f32 residual stream
    xb = x.astype(jnp.bfloat16)          # bf16 shadow for the matmuls
    om = om_ref[...]                     # (B, S)    f32 valid mask (decoder keys)
    im = im_ref[...]                     # (B, S_en) f32 valid mask (encoder keys)

    def layer_norm(z, gamma, beta):
        mean = jnp.mean(z, axis=-1, keepdims=True)
        var = jnp.mean(jnp.square(z - mean), axis=-1, keepdims=True)
        return (z - mean) * jax.lax.rsqrt(var + LN_EPS) * gamma + beta

    def mha(q2d, k2d, v2d, Sq, Sk, valid_rows, causal):
        # q2d: (B*Sq, 256) f32; k2d/v2d: (B*Sk, 256) f32.
        # Build head-major batched tensors (NH*B, S, HD) with lane slices +
        # major-dim concatenation only (no in-kernel transposes), then run ONE
        # batched score matmul, ONE masked softmax, ONE batched P@V.
        def to_heads(x2d, Sx):
            parts = [
                x2d[:, h * HEAD_DIM:(h + 1) * HEAD_DIM]
                .reshape(B, Sx, HEAD_DIM).astype(jnp.bfloat16)
                for h in range(NUM_HEADS)
            ]
            return jnp.concatenate(parts, axis=0)        # (NH*B, Sx, HD)

        q3 = to_heads(q2d, Sq)
        k3 = to_heads(k2d, Sk)
        v3 = to_heads(v2d, Sk)

        valid = (valid_rows > 0.0)[:, None, :]           # (B, 1, Sk) bool
        if causal:
            ri = jax.lax.broadcasted_iota(jnp.int32, (Sq, Sk), 0)
            ci = jax.lax.broadcasted_iota(jnp.int32, (Sq, Sk), 1)
            keep = jnp.logical_and(valid, (ci <= ri)[None, :, :])   # (B, Sq, Sk)
        else:
            keep = valid                                            # (B, 1, Sk)
        neg = jnp.where(keep, jnp.float32(0.0), jnp.float32(-1e9))
        neg = jnp.concatenate([neg] * NUM_HEADS, axis=0)  # (NH*B, Sq|1, Sk)

        # SCALE already folded into the Q projection weights.
        s = jnp.einsum('bqd,bkd->bqk', q3, k3,
                       preferred_element_type=jnp.float32)          # (NH*B,Sq,Sk)
        s = s + neg
        s = s - jnp.max(s, axis=-1, keepdims=True)
        p = jnp.exp(s)
        p = p * pl.reciprocal(jnp.sum(p, axis=-1, keepdims=True), approx=True)
        o3 = jnp.einsum('bqk,bkd->bqd', p.astype(jnp.bfloat16), v3,
                        preferred_element_type=jnp.float32)         # (NH*B,Sq,HD)
        return jnp.concatenate(
            [o3[h * B:(h + 1) * B].reshape(B * Sq, HEAD_DIM)
             for h in range(NUM_HEADS)], axis=1)                    # (B*Sq, 256)

    # ---- self attention (fused QKV) + output proj + AddNorm(ln1) ----
    qkv = jnp.dot(xb, wqkv_s_ref[0],
                  preferred_element_type=jnp.float32) + bqkv_s_ref[0]
    a = mha(qkv[:, :H], qkv[:, H:2 * H], qkv[:, 2 * H:3 * H],
            S, S, om, causal=True)
    a = jnp.dot(a.astype(jnp.bfloat16), wo_s_ref[0],
                preferred_element_type=jnp.float32) + bo_s_ref[0]
    x = layer_norm(x + a, g1_ref[0], be1_ref[0])
    xb = x.astype(jnp.bfloat16)

    # ---- cross attention (fused KV) + output proj + AddNorm(ln2) ----
    q = jnp.dot(xb, wq_c_ref[0],
                preferred_element_type=jnp.float32) + bq_c_ref[0]
    kv = jnp.dot(xen_ref[...], wkv_c_ref[0],
                 preferred_element_type=jnp.float32) + bkv_c_ref[0]
    a = mha(q, kv[:, :H], kv[:, H:2 * H], S, S_en, im, causal=False)
    a = jnp.dot(a.astype(jnp.bfloat16), wo_c_ref[0],
                preferred_element_type=jnp.float32) + bo_c_ref[0]
    x = layer_norm(x + a, g2_ref[0], be2_ref[0])
    xb = x.astype(jnp.bfloat16)

    # ---- position-wise FFN + AddNorm(ln3) ----
    hdn = jnp.dot(xb, w1_ref[0],
                  preferred_element_type=jnp.float32) + bf1_ref[0]
    hdn = jnp.maximum(hdn, 0.0)
    y = jnp.dot(hdn.astype(jnp.bfloat16), w2_ref[0],
                preferred_element_type=jnp.float32) + bf2_ref[0]
    x = layer_norm(x + y, g3_ref[0], be3_ref[0])

    x_ref[...] = x

    # ---- fused classifier (bias-free Linear(256, 1000) padded to 1024) ----
    @pl.when(layer == NUM_LAYERS - 1)
    def _cls():
        logits_ref[...] = jnp.dot(x.astype(jnp.bfloat16), wcls_ref[...],
                                  preferred_element_type=jnp.float32)


def decoder_stack(params, x0, xen, om, im):
    M, H = x0.shape
    Men = xen.shape[0]
    B, S = om.shape
    S_en = im.shape[1]
    F = FFN_HIDDEN

    def const2d(shape):
        return pl.BlockSpec(shape, lambda l: (0, 0))

    def perlayer(shape):
        return pl.BlockSpec((1,) + shape, lambda l: (l, 0, 0))

    in_specs = [
        const2d((M, H)), const2d((Men, H)), const2d((B, S)), const2d((B, S_en)),
        perlayer((H, 3 * H)), perlayer((1, 3 * H)),
        perlayer((H, H)), perlayer((1, H)), perlayer((1, H)), perlayer((1, H)),
        perlayer((H, H)), perlayer((1, H)),
        perlayer((H, 2 * H)), perlayer((1, 2 * H)),
        perlayer((H, H)), perlayer((1, H)), perlayer((1, H)), perlayer((1, H)),
        perlayer((H, F)), perlayer((1, F)),
        perlayer((F, H)), perlayer((1, H)), perlayer((1, H)), perlayer((1, H)),
        const2d((H, VOCAB_PAD)),
    ]

    kernel = functools.partial(_decoder_stack_kernel, B=B, S=S, S_en=S_en)

    return pl.pallas_call(
        kernel,
        grid=(NUM_LAYERS,),
        out_shape=jax.ShapeDtypeStruct((M, VOCAB_PAD), jnp.float32),
        in_specs=in_specs,
        out_specs=const2d((M, VOCAB_PAD)),
        scratch_shapes=[pltpu.VMEM((M, H), jnp.float32)],
        compiler_params=pltpu.CompilerParams(
            dimension_semantics=("arbitrary",),          # layers are sequential
            vmem_limit_bytes=32 * 1024 * 1024,
        ),
    )(
        x0, xen, om, im,
        params["wqkv_s"], params["bqkv_s"], params["wo_s"], params["bo_s"],
        params["g1"], params["be1"],
        params["wq_c"], params["bq_c"], params["wkv_c"], params["bkv_c"],
        params["wo_c"], params["bo_c"], params["g2"], params["be2"],
        params["w1"], params["bf1"], params["w2"], params["bf2"],
        params["g3"], params["be3"],
        params["dense_w_pad"],
    )


# ---------------------------------------------------------------------------
# Forward pass glue (embedding gather + reshapes only)
# ---------------------------------------------------------------------------
def decoder_forward(params, X_t, O_m, X_en, I_m):
    B, S = X_t.shape
    S_en = X_en.shape[1]
    # EBD: word embedding + learned positional embedding (gather in JAX glue).
    x0 = (params["word_ebd"][X_t] + params["pos_ebd"][:S][None, :, :]).astype(
        jnp.float32).reshape(B * S, NUM_HIDDENS)
    xen = X_en.reshape(B * S_en, NUM_HIDDENS).astype(jnp.bfloat16)
    logits = decoder_stack(params, x0, xen,
                           O_m.astype(jnp.float32), I_m.astype(jnp.float32))
    return logits[:, :VOCAB_OUT].reshape(B, S, VOCAB_OUT)


# ---------------------------------------------------------------------------
# Deterministic parameter init (weights bf16, biases / LN params f32).
# SCALE is folded into the Q projection weights (and would be folded into the
# Q biases too, but they are zero).
# ---------------------------------------------------------------------------
def init_params(key):
    keys = iter(jax.random.split(key, 16))

    def randn(shape, scale=0.02):
        return scale * jax.random.normal(next(keys), shape, jnp.float32)

    L, H, F = NUM_LAYERS, NUM_HIDDENS, FFN_HIDDEN

    # self-attention: fused QKV (Q columns pre-scaled) + output projection
    wq_s = randn((L, H, H)) * SCALE
    wk_s = randn((L, H, H))
    wv_s = randn((L, H, H))
    wqkv_s = jnp.concatenate([wq_s, wk_s, wv_s], axis=-1).astype(jnp.bfloat16)

    # cross-attention: separate Q (pre-scaled), fused KV, output projection
    wq_c = (randn((L, H, H)) * SCALE).astype(jnp.bfloat16)
    wk_c = randn((L, H, H))
    wv_c = randn((L, H, H))
    wkv_c = jnp.concatenate([wk_c, wv_c], axis=-1).astype(jnp.bfloat16)

    params = {
        "word_ebd": randn((VOCAB_IN, H)),
        "pos_ebd": randn((MAX_LEN, H)),
        "wqkv_s": wqkv_s,
        "bqkv_s": jnp.zeros((L, 1, 3 * H), jnp.float32),
        "wo_s": randn((L, H, H)).astype(jnp.bfloat16),
        "bo_s": jnp.zeros((L, 1, H), jnp.float32),
        "g1": jnp.ones((L, 1, H), jnp.float32),
        "be1": jnp.zeros((L, 1, H), jnp.float32),
        "wq_c": wq_c,
        "bq_c": jnp.zeros((L, 1, H), jnp.float32),
        "wkv_c": wkv_c,
        "bkv_c": jnp.zeros((L, 1, 2 * H), jnp.float32),
        "wo_c": randn((L, H, H)).astype(jnp.bfloat16),
        "bo_c": jnp.zeros((L, 1, H), jnp.float32),
        "g2": jnp.ones((L, 1, H), jnp.float32),
        "be2": jnp.zeros((L, 1, H), jnp.float32),
        "w1": randn((L, H, F)).astype(jnp.bfloat16),
        "bf1": jnp.zeros((L, 1, F), jnp.float32),
        "w2": randn((L, F, H)).astype(jnp.bfloat16),
        "bf2": jnp.zeros((L, 1, H), jnp.float32),
        "g3": jnp.ones((L, 1, H), jnp.float32),
        "be3": jnp.zeros((L, 1, H), jnp.float32),
    }
    # final Linear(256, 1000, bias=False): pad N to 1024 with zero columns
    dw = randn((H, VOCAB_OUT)).astype(jnp.bfloat16)
    params["dense_w_pad"] = jnp.pad(dw, ((0, 0), (0, VOCAB_PAD - VOCAB_OUT)))
    return params


if __name__ == "__main__":
    key = jax.random.PRNGKey(0)
    pk, dk = jax.random.split(key)
    params = init_params(pk)

    B, S, S_en = 2, 8, 8
    ks = jax.random.split(dk, 3)
    X_t = jax.random.randint(ks[0], (B, S), 0, VOCAB_IN)                  # token ids
    X_en = jax.random.normal(ks[1], (B, S_en, NUM_HIDDENS), jnp.float32)  # encoder out
    # valid-length style masks (1 = valid, 0 = padding)
    O_m = (jnp.arange(S)[None, :] < jnp.array([[8], [6]])).astype(jnp.float32)
    I_m = (jnp.arange(S_en)[None, :] < jnp.array([[8], [5]])).astype(jnp.float32)

    fwd = jax.jit(decoder_forward)
    out = fwd(params, X_t, O_m, X_en, I_m)
    jax.block_until_ready(out)
    assert out.shape == (B, S, VOCAB_OUT) and out.dtype == jnp.float32
    print("KERNEL_OK")
</pallas_src>

<mosaic_0001>
module attributes {stable_mosaic.version = 11 : i64} {
  func.func @_decoder_stack_kernel(%arg0: i32, %arg1: memref<16x256xf32, #tpu.memory_space<vmem>>, %arg2: memref<16x256xbf16, #tpu.memory_space<vmem>>, %arg3: memref<2x8xf32, #tpu.memory_space<vmem>>, %arg4: memref<2x8xf32, #tpu.memory_space<vmem>>, %arg5: memref<1x256x768xbf16, #tpu.memory_space<vmem>>, %arg6: memref<1x1x768xf32, #tpu.memory_space<vmem>>, %arg7: memref<1x256x256xbf16, #tpu.memory_space<vmem>>, %arg8: memref<1x1x256xf32, #tpu.memory_space<vmem>>, %arg9: memref<1x1x256xf32, #tpu.memory_space<vmem>>, %arg10: memref<1x1x256xf32, #tpu.memory_space<vmem>>, %arg11: memref<1x256x256xbf16, #tpu.memory_space<vmem>>, %arg12: memref<1x1x256xf32, #tpu.memory_space<vmem>>, %arg13: memref<1x256x512xbf16, #tpu.memory_space<vmem>>, %arg14: memref<1x1x512xf32, #tpu.memory_space<vmem>>, %arg15: memref<1x256x256xbf16, #tpu.memory_space<vmem>>, %arg16: memref<1x1x256xf32, #tpu.memory_space<vmem>>, %arg17: memref<1x1x256xf32, #tpu.memory_space<vmem>>, %arg18: memref<1x1x256xf32, #tpu.memory_space<vmem>>, %arg19: memref<1x256x1024xbf16, #tpu.memory_space<vmem>>, %arg20: memref<1x1x1024xf32, #tpu.memory_space<vmem>>, %arg21: memref<1x1024x256xbf16, #tpu.memory_space<vmem>>, %arg22: memref<1x1x256xf32, #tpu.memory_space<vmem>>, %arg23: memref<1x1x256xf32, #tpu.memory_space<vmem>>, %arg24: memref<1x1x256xf32, #tpu.memory_space<vmem>>, %arg25: memref<256x1024xbf16, #tpu.memory_space<vmem>>, %arg26: memref<16x1024xf32, #tpu.memory_space<vmem>>, %arg27: memref<16x256xf32, #tpu.memory_space<vmem>>) attributes {dimension_semantics = [#tpu.dimension_semantics<arbitrary>], iteration_bounds = array<i64: 4>, scalar_prefetch = 0 : i64, scratch_operands = 1 : i64, tpu.core_type = #tpu.core_type<tc>, window_params = [{pipeline_mode = #tpu.pipeline_mode<synchronous>, transform_indices = @transform_0, window_bounds = array<i64: 16, 256>}, {pipeline_mode = #tpu.pipeline_mode<synchronous>, transform_indices = @transform_1, window_bounds = array<i64: 16, 256>}, {pipeline_mode = #tpu.pipeline_mode<synchronous>, transform_indices = @transform_2, window_bounds = array<i64: 2, 8>}, {pipeline_mode = #tpu.pipeline_mode<synchronous>, transform_indices = @transform_3, window_bounds = array<i64: 2, 8>}, {transform_indices = @transform_4, window_bounds = array<i64: 1, 256, 768>}, {transform_indices = @transform_5, window_bounds = array<i64: 1, 1, 768>}, {transform_indices = @transform_6, window_bounds = array<i64: 1, 256, 256>}, {transform_indices = @transform_7, window_bounds = array<i64: 1, 1, 256>}, {transform_indices = @transform_8, window_bounds = array<i64: 1, 1, 256>}, {transform_indices = @transform_9, window_bounds = array<i64: 1, 1, 256>}, {transform_indices = @transform_10, window_bounds = array<i64: 1, 256, 256>}, {transform_indices = @transform_11, window_bounds = array<i64: 1, 1, 256>}, {transform_indices = @transform_12, window_bounds = array<i64: 1, 256, 512>}, {transform_indices = @transform_13, window_bounds = array<i64: 1, 1, 512>}, {transform_indices = @transform_14, window_bounds = array<i64: 1, 256, 256>}, {transform_indices = @transform_15, window_bounds = array<i64: 1, 1, 256>}, {transform_indices = @transform_16, window_bounds = array<i64: 1, 1, 256>}, {transform_indices = @transform_17, window_bounds = array<i64: 1, 1, 256>}, {transform_indices = @transform_18, window_bounds = array<i64: 1, 256, 1024>}, {transform_indices = @transform_19, window_bounds = array<i64: 1, 1, 1024>}, {transform_indices = @transform_20, window_bounds = array<i64: 1, 1024, 256>}, {transform_indices = @transform_21, window_bounds = array<i64: 1, 1, 256>}, {transform_indices = @transform_22, window_bounds = array<i64: 1, 1, 256>}, {transform_indices = @transform_23, window_bounds = array<i64: 1, 1, 256>}, {pipeline_mode = #tpu.pipeline_mode<synchronous>, transform_indices = @transform_24, window_bounds = array<i64: 256, 1024>}, {pipeline_mode = #tpu.pipeline_mode<synchronous>, transform_indices = @transform_25, window_bounds = array<i64: 16, 1024>}]} {
    %c0_i32 = arith.constant 0 : i32
    %0 = arith.cmpi eq, %arg0, %c0_i32 : i32
    %1 = arith.extui %0 : i1 to i32
    %c0_i32_0 = arith.constant 0 : i32
    %2 = arith.cmpi ne, %1, %c0_i32_0 : i32
    scf.if %2 {
      %c0_107 = arith.constant 0 : index
      %c0_108 = arith.constant 0 : index
      %300 = vector.load %arg1[%c0_107, %c0_108] : memref<16x256xf32, #tpu.memory_space<vmem>>, vector<16x256xf32>
      %c0_109 = arith.constant 0 : index
      %c0_110 = arith.constant 0 : index
      %301 = vector.load %arg27[%c0_109, %c0_110] : memref<16x256xf32, #tpu.memory_space<vmem>>, vector<16x256xf32>
      tpu.vector_store %arg27[%c0_109, %c0_110], %300 {strides = array<i32>} : memref<16x256xf32, #tpu.memory_space<vmem>>, vector<16x256xf32>,
    } else {
    }
    %c0 = arith.constant 0 : index
    %c0_1 = arith.constant 0 : index
    %3 = vector.load %arg27[%c0, %c0_1] : memref<16x256xf32, #tpu.memory_space<vmem>>, vector<16x256xf32>
    %4 = arith.truncf %3 : vector<16x256xf32> to vector<16x256xbf16>
    %c0_2 = arith.constant 0 : index
    %c0_3 = arith.constant 0 : index
    %5 = vector.load %arg3[%c0_2, %c0_3] : memref<2x8xf32, #tpu.memory_space<vmem>>, vector<2x8xf32>
    %c0_4 = arith.constant 0 : index
    %c0_5 = arith.constant 0 : index
    %6 = vector.load %arg4[%c0_4, %c0_5] : memref<2x8xf32, #tpu.memory_space<vmem>>, vector<2x8xf32>
    %c0_6 = arith.constant 0 : index
    %c0_7 = arith.constant 0 : index
    %c0_8 = arith.constant 0 : index
    %7 = vector.load %arg5[%c0_6, %c0_7, %c0_8] : memref<1x256x768xbf16, #tpu.memory_space<vmem>>, vector<1x256x768xbf16>
    %8 = vector.shape_cast %7 : vector<1x256x768xbf16> to vector<256x768xbf16>
    %cst = arith.constant dense<0.000000e+00> : vector<16x768xf32>
    %9 = tpu.matmul %4, %8, %cst {dimension_numbers = #tpu.dot_dimension_numbers<[1], [0], [0], [1], [0, 0, 1, 1], [], []>} : vector<16x256xbf16>, vector<256x768xbf16>, vector<16x768xf32> -> vector<16x768xf32>
    %c0_9 = arith.constant 0 : index
    %c0_10 = arith.constant 0 : index
    %c0_11 = arith.constant 0 : index
    %10 = vector.load %arg6[%c0_9, %c0_10, %c0_11] : memref<1x1x768xf32, #tpu.memory_space<vmem>>, vector<1x1x768xf32>
    %11 = vector.shape_cast %10 : vector<1x1x768xf32> to vector<1x768xf32>
    %12 = vector.broadcast %11 : vector<1x768xf32> to vector<16x768xf32>
    %13 = arith.addf %9, %12 : vector<16x768xf32>
    %14 = vector.extract_strided_slice %13 {offsets = [0, 0], sizes = [16, 256], strides = [1, 1]} : vector<16x768xf32> to vector<16x256xf32>
    %15 = vector.extract_strided_slice %13 {offsets = [0, 256], sizes = [16, 256], strides = [1, 1]} : vector<16x768xf32> to vector<16x256xf32>
    %16 = vector.extract_strided_slice %13 {offsets = [0, 512], sizes = [16, 256], strides = [1, 1]} : vector<16x768xf32> to vector<16x256xf32>
    %17 = vector.extract_strided_slice %14 {offsets = [0, 0], sizes = [16, 64], strides = [1, 1]} : vector<16x256xf32> to vector<16x64xf32>
    %18 = vector.shape_cast %17 : vector<16x64xf32> to vector<2x8x64xf32>
    %19 = arith.truncf %18 : vector<2x8x64xf32> to vector<2x8x64xbf16>
    %20 = vector.extract_strided_slice %14 {offsets = [0, 64], sizes = [16, 64], strides = [1, 1]} : vector<16x256xf32> to vector<16x64xf32>
    %21 = vector.shape_cast %20 : vector<16x64xf32> to vector<2x8x64xf32>
    %22 = arith.truncf %21 : vector<2x8x64xf32> to vector<2x8x64xbf16>
    %23 = vector.extract_strided_slice %14 {offsets = [0, 128], sizes = [16, 64], strides = [1, 1]} : vector<16x256xf32> to vector<16x64xf32>
    %24 = vector.shape_cast %23 : vector<16x64xf32> to vector<2x8x64xf32>
    %25 = arith.truncf %24 : vector<2x8x64xf32> to vector<2x8x64xbf16>
    %26 = vector.extract_strided_slice %14 {offsets = [0, 192], sizes = [16, 64], strides = [1, 1]} : vector<16x256xf32> to vector<16x64xf32>
    %27 = vector.shape_cast %26 : vector<16x64xf32> to vector<2x8x64xf32>
    %28 = arith.truncf %27 : vector<2x8x64xf32> to vector<2x8x64xbf16>
    %29 = tpu.concatenate %19, %22, %25, %28 in 0 : vector<2x8x64xbf16>, vector<2x8x64xbf16>, vector<2x8x64xbf16>, vector<2x8x64xbf16> -> vector<8x8x64xbf16>
    %30 = vector.extract_strided_slice %15 {offsets = [0, 0], sizes = [16, 64], strides = [1, 1]} : vector<16x256xf32> to vector<16x64xf32>
    %31 = vector.shape_cast %30 : vector<16x64xf32> to vector<2x8x64xf32>
    %32 = arith.truncf %31 : vector<2x8x64xf32> to vector<2x8x64xbf16>
    %33 = vector.extract_strided_slice %15 {offsets = [0, 64], sizes = [16, 64], strides = [1, 1]} : vector<16x256xf32> to vector<16x64xf32>
    %34 = vector.shape_cast %33 : vector<16x64xf32> to vector<2x8x64xf32>
    %35 = arith.truncf %34 : vector<2x8x64xf32> to vector<2x8x64xbf16>
    %36 = vector.extract_strided_slice %15 {offsets = [0, 128], sizes = [16, 64], strides = [1, 1]} : vector<16x256xf32> to vector<16x64xf32>
    %37 = vector.shape_cast %36 : vector<16x64xf32> to vector<2x8x64xf32>
    %38 = arith.truncf %37 : vector<2x8x64xf32> to vector<2x8x64xbf16>
    %39 = vector.extract_strided_slice %15 {offsets = [0, 192], sizes = [16, 64], strides = [1, 1]} : vector<16x256xf32> to vector<16x64xf32>
    %40 = vector.shape_cast %39 : vector<16x64xf32> to vector<2x8x64xf32>
    %41 = arith.truncf %40 : vector<2x8x64xf32> to vector<2x8x64xbf16>
    %42 = tpu.concatenate %32, %35, %38, %41 in 0 : vector<2x8x64xbf16>, vector<2x8x64xbf16>, vector<2x8x64xbf16>, vector<2x8x64xbf16> -> vector<8x8x64xbf16>
    %43 = vector.extract_strided_slice %16 {offsets = [0, 0], sizes = [16, 64], strides = [1, 1]} : vector<16x256xf32> to vector<16x64xf32>
    %44 = vector.shape_cast %43 : vector<16x64xf32> to vector<2x8x64xf32>
    %45 = arith.truncf %44 : vector<2x8x64xf32> to vector<2x8x64xbf16>
    %46 = vector.extract_strided_slice %16 {offsets = [0, 64], sizes = [16, 64], strides = [1, 1]} : vector<16x256xf32> to vector<16x64xf32>
    %47 = vector.shape_cast %46 : vector<16x64xf32> to vector<2x8x64xf32>
    %48 = arith.truncf %47 : vector<2x8x64xf32> to vector<2x8x64xbf16>
    %49 = vector.extract_strided_slice %16 {offsets = [0, 128], sizes = [16, 64], strides = [1, 1]} : vector<16x256xf32> to vector<16x64xf32>
    %50 = vector.shape_cast %49 : vector<16x64xf32> to vector<2x8x64xf32>
    %51 = arith.truncf %50 : vector<2x8x64xf32> to vector<2x8x64xbf16>
    %52 = vector.extract_strided_slice %16 {offsets = [0, 192], sizes = [16, 64], strides = [1, 1]} : vector<16x256xf32> to vector<16x64xf32>
    %53 = vector.shape_cast %52 : vector<16x64xf32> to vector<2x8x64xf32>
    %54 = arith.truncf %53 : vector<2x8x64xf32> to vector<2x8x64xbf16>
    %55 = tpu.concatenate %45, %48, %51, %54 in 0 : vector<2x8x64xbf16>, vector<2x8x64xbf16>, vector<2x8x64xbf16>, vector<2x8x64xbf16> -> vector<8x8x64xbf16>
    %cst_12 = arith.constant 0.000000e+00 : f32
    %56 = vector.broadcast %cst_12 : f32 to vector<2x8xf32>
    %57 = arith.cmpf ogt, %5, %56 : vector<2x8xf32>
    %58 = vector.shape_cast %57 : vector<2x8xi1> to vector<2x1x8xi1>
    %59 = tpu.iota {dimensions = array<i32: 0>} : vector<8x8xi32>
    %60 = tpu.iota {dimensions = array<i32: 1>} : vector<8x8xi32>
    %61 = arith.cmpi sle, %60, %59 : vector<8x8xi32>
    %62 = vector.shape_cast %61 : vector<8x8xi1> to vector<1x8x8xi1>
    %63 = vector.broadcast %58 : vector<2x1x8xi1> to vector<2x8x8xi1>
    %64 = vector.broadcast %62 : vector<1x8x8xi1> to vector<2x8x8xi1>
    %65 = arith.andi %63, %64 : vector<2x8x8xi1>
    %cst_13 = arith.constant 0.000000e+00 : f32
    %cst_14 = arith.constant -1.000000e+09 : f32
    %66 = vector.broadcast %cst_13 : f32 to vector<2x8x8xf32>
    %67 = vector.broadcast %cst_14 : f32 to vector<2x8x8xf32>
    %68 = arith.select %65, %66, %67 : vector<2x8x8xi1>, vector<2x8x8xf32>
    %69 = tpu.concatenate %68, %68, %68, %68 in 0 : vector<2x8x8xf32>, vector<2x8x8xf32>, vector<2x8x8xf32>, vector<2x8x8xf32> -> vector<8x8x8xf32>
    "tpu.trace_start"() <{level = 10 : i32, message = "bqd,bkd->bqk"}> : () -> ()
    %cst_15 = arith.constant dense<0.000000e+00> : vector<8x8x8xf32>
    %70 = tpu.matmul %29, %42, %cst_15 {dimension_numbers = #tpu.dot_dimension_numbers<[2], [2], [1], [1], [0, 0, 0, 1, 1, 1], [0], [0]>} : vector<8x8x64xbf16>, vector<8x8x64xbf16>, vector<8x8x8xf32> -> vector<8x8x8xf32>
    "tpu.trace_stop"() : () -> ()
    %71 = arith.addf %70, %69 : vector<8x8x8xf32>
    %cst_16 = arith.constant dense<0xFF800000> : vector<8x8xf32>
    %72 = vector.multi_reduction <maximumf>, %71, %cst_16 [2] : vector<8x8x8xf32> to vector<8x8xf32>
    %73 = vector.shape_cast %72 : vector<8x8xf32> to vector<8x8x1xf32>
    %74 = vector.broadcast %73 : vector<8x8x1xf32> to vector<8x8x8xf32>
    %75 = arith.subf %71, %74 : vector<8x8x8xf32>
    %76 = math.exp %75 : vector<8x8x8xf32>
    %cst_17 = arith.constant dense<0.000000e+00> : vector<8x8xf32>
    %77 = vector.multi_reduction <add>, %76, %cst_17 [2] : vector<8x8x8xf32> to vector<8x8xf32>
    %78 = vector.shape_cast %77 : vector<8x8xf32> to vector<8x8x1xf32>
    %79 = tpu.reciprocal %78 {approx = true} : vector<8x8x1xf32> -> vector<8x8x1xf32>
    %80 = vector.broadcast %79 : vector<8x8x1xf32> to vector<8x8x8xf32>
    %81 = arith.mulf %76, %80 : vector<8x8x8xf32>
    %82 = arith.truncf %81 : vector<8x8x8xf32> to vector<8x8x8xbf16>
    "tpu.trace_start"() <{level = 10 : i32, message = "bqk,bkd->bqd"}> : () -> ()
    %cst_18 = arith.constant dense<0.000000e+00> : vector<8x8x64xf32>
    %83 = tpu.matmul %82, %55, %cst_18 {dimension_numbers = #tpu.dot_dimension_numbers<[2], [1], [1], [2], [0, 0, 0, 1, 1, 2], [0], [0]>} : vector<8x8x8xbf16>, vector<8x8x64xbf16>, vector<8x8x64xf32> -> vector<8x8x64xf32>
    "tpu.trace_stop"() : () -> ()
    %84 = vector.extract_strided_slice %83 {offsets = [0, 0, 0], sizes = [2, 8, 64], strides = [1, 1, 1]} : vector<8x8x64xf32> to vector<2x8x64xf32>
    %85 = vector.shape_cast %84 : vector<2x8x64xf32> to vector<16x64xf32>
    %86 = vector.extract_strided_slice %83 {offsets = [2, 0, 0], sizes = [2, 8, 64], strides = [1, 1, 1]} : vector<8x8x64xf32> to vector<2x8x64xf32>
    %87 = vector.shape_cast %86 : vector<2x8x64xf32> to vector<16x64xf32>
    %88 = vector.extract_strided_slice %83 {offsets = [4, 0, 0], sizes = [2, 8, 64], strides = [1, 1, 1]} : vector<8x8x64xf32> to vector<2x8x64xf32>
    %89 = vector.shape_cast %88 : vector<2x8x64xf32> to vector<16x64xf32>
    %90 = vector.extract_strided_slice %83 {offsets = [6, 0, 0], sizes = [2, 8, 64], strides = [1, 1, 1]} : vector<8x8x64xf32> to vector<2x8x64xf32>
    %91 = vector.shape_cast %90 : vector<2x8x64xf32> to vector<16x64xf32>
    %92 = tpu.concatenate %85, %87, %89, %91 in 1 : vector<16x64xf32>, vector<16x64xf32>, vector<16x64xf32>, vector<16x64xf32> -> vector<16x256xf32>
    %93 = arith.truncf %92 : vector<16x256xf32> to vector<16x256xbf16>
    %c0_19 = arith.constant 0 : index
    %c0_20 = arith.constant 0 : index
    %c0_21 = arith.constant 0 : index
    %94 = vector.load %arg7[%c0_19, %c0_20, %c0_21] : memref<1x256x256xbf16, #tpu.memory_space<vmem>>, vector<1x256x256xbf16>
    %95 = vector.shape_cast %94 : vector<1x256x256xbf16> to vector<256x256xbf16>
    %cst_22 = arith.constant dense<0.000000e+00> : vector<16x256xf32>
    %96 = tpu.matmul %93, %95, %cst_22 {dimension_numbers = #tpu.dot_dimension_numbers<[1], [0], [0], [1], [0, 0, 1, 1], [], []>} : vector<16x256xbf16>, vector<256x256xbf16>, vector<16x256xf32> -> vector<16x256xf32>
    %c0_23 = arith.constant 0 : index
    %c0_24 = arith.constant 0 : index
    %c0_25 = arith.constant 0 : index
    %97 = vector.load %arg8[%c0_23, %c0_24, %c0_25] : memref<1x1x256xf32, #tpu.memory_space<vmem>>, vector<1x1x256xf32>
    %98 = vector.shape_cast %97 : vector<1x1x256xf32> to vector<1x256xf32>
    %99 = vector.broadcast %98 : vector<1x256xf32> to vector<16x256xf32>
    %100 = arith.addf %96, %99 : vector<16x256xf32>
    %101 = arith.addf %3, %100 : vector<16x256xf32>
    %c0_26 = arith.constant 0 : index
    %c0_27 = arith.constant 0 : index
    %c0_28 = arith.constant 0 : index
    %102 = vector.load %arg9[%c0_26, %c0_27, %c0_28] : memref<1x1x256xf32, #tpu.memory_space<vmem>>, vector<1x1x256xf32>
    %103 = vector.shape_cast %102 : vector<1x1x256xf32> to vector<1x256xf32>
    %c0_29 = arith.constant 0 : index
    %c0_30 = arith.constant 0 : index
    %c0_31 = arith.constant 0 : index
    %104 = vector.load %arg10[%c0_29, %c0_30, %c0_31] : memref<1x1x256xf32, #tpu.memory_space<vmem>>, vector<1x1x256xf32>
    %105 = vector.shape_cast %104 : vector<1x1x256xf32> to vector<1x256xf32>
    %cst_32 = arith.constant dense<0.000000e+00> : vector<16xf32>
    %106 = vector.multi_reduction <add>, %101, %cst_32 [1] : vector<16x256xf32> to vector<16xf32>
    %107 = vector.shape_cast %106 : vector<16xf32> to vector<16x1xf32>
    %cst_33 = arith.constant 2.560000e+02 : f32
    %108 = vector.broadcast %cst_33 : f32 to vector<16x1xf32>
    %109 = arith.divf %107, %108 : vector<16x1xf32>
    %110 = vector.broadcast %109 : vector<16x1xf32> to vector<16x256xf32>
    %111 = arith.subf %101, %110 : vector<16x256xf32>
    %112 = arith.mulf %111, %111 : vector<16x256xf32>
    %cst_34 = arith.constant dense<0.000000e+00> : vector<16xf32>
    %113 = vector.multi_reduction <add>, %112, %cst_34 [1] : vector<16x256xf32> to vector<16xf32>
    %114 = vector.shape_cast %113 : vector<16xf32> to vector<16x1xf32>
    %cst_35 = arith.constant 2.560000e+02 : f32
    %115 = vector.broadcast %cst_35 : f32 to vector<16x1xf32>
    %116 = arith.divf %114, %115 : vector<16x1xf32>
    %117 = vector.broadcast %109 : vector<16x1xf32> to vector<16x256xf32>
    %118 = arith.subf %101, %117 : vector<16x256xf32>
    %cst_36 = arith.constant 9.99999974E-6 : f32
    %119 = vector.broadcast %cst_36 : f32 to vector<16x1xf32>
    %120 = arith.addf %116, %119 : vector<16x1xf32>
    %121 = math.rsqrt %120 : vector<16x1xf32>
    %122 = vector.broadcast %121 : vector<16x1xf32> to vector<16x256xf32>
    %123 = arith.mulf %118, %122 : vector<16x256xf32>
    %124 = vector.broadcast %103 : vector<1x256xf32> to vector<16x256xf32>
    %125 = arith.mulf %123, %124 : vector<16x256xf32>
    %126 = vector.broadcast %105 : vector<1x256xf32> to vector<16x256xf32>
    %127 = arith.addf %125, %126 : vector<16x256xf32>
    %128 = arith.truncf %127 : vector<16x256xf32> to vector<16x256xbf16>
    %c0_37 = arith.constant 0 : index
    %c0_38 = arith.constant 0 : index
    %c0_39 = arith.constant 0 : index
    %129 = vector.load %arg11[%c0_37, %c0_38, %c0_39] : memref<1x256x256xbf16, #tpu.memory_space<vmem>>, vector<1x256x256xbf16>
    %130 = vector.shape_cast %129 : vector<1x256x256xbf16> to vector<256x256xbf16>
    %cst_40 = arith.constant dense<0.000000e+00> : vector<16x256xf32>
    %131 = tpu.matmul %128, %130, %cst_40 {dimension_numbers = #tpu.dot_dimension_numbers<[1], [0], [0], [1], [0, 0, 1, 1], [], []>} : vector<16x256xbf16>, vector<256x256xbf16>, vector<16x256xf32> -> vector<16x256xf32>
    %c0_41 = arith.constant 0 : index
    %c0_42 = arith.constant 0 : index
    %c0_43 = arith.constant 0 : index
    %132 = vector.load %arg12[%c0_41, %c0_42, %c0_43] : memref<1x1x256xf32, #tpu.memory_space<vmem>>, vector<1x1x256xf32>
    %133 = vector.shape_cast %132 : vector<1x1x256xf32> to vector<1x256xf32>
    %134 = vector.broadcast %133 : vector<1x256xf32> to vector<16x256xf32>
    %135 = arith.addf %131, %134 : vector<16x256xf32>
    %c0_44 = arith.constant 0 : index
    %c0_45 = arith.constant 0 : index
    %136 = vector.load %arg2[%c0_44, %c0_45] : memref<16x256xbf16, #tpu.memory_space<vmem>>, vector<16x256xbf16>
    %c0_46 = arith.constant 0 : index
    %c0_47 = arith.constant 0 : index
    %c0_48 = arith.constant 0 : index
    %137 = vector.load %arg13[%c0_46, %c0_47, %c0_48] : memref<1x256x512xbf16, #tpu.memory_space<vmem>>, vector<1x256x512xbf16>
    %138 = vector.shape_cast %137 : vector<1x256x512xbf16> to vector<256x512xbf16>
    %cst_49 = arith.constant dense<0.000000e+00> : vector<16x512xf32>
    %139 = tpu.matmul %136, %138, %cst_49 {dimension_numbers = #tpu.dot_dimension_numbers<[1], [0], [0], [1], [0, 0, 1, 1], [], []>} : vector<16x256xbf16>, vector<256x512xbf16>, vector<16x512xf32> -> vector<16x512xf32>
    %c0_50 = arith.constant 0 : index
    %c0_51 = arith.constant 0 : index
    %c0_52 = arith.constant 0 : index
    %140 = vector.load %arg14[%c0_50, %c0_51, %c0_52] : memref<1x1x512xf32, #tpu.memory_space<vmem>>, vector<1x1x512xf32>
    %141 = vector.shape_cast %140 : vector<1x1x512xf32> to vector<1x512xf32>
    %142 = vector.broadcast %141 : vector<1x512xf32> to vector<16x512xf32>
    %143 = arith.addf %139, %142 : vector<16x512xf32>
    %144 = vector.extract_strided_slice %143 {offsets = [0, 0], sizes = [16, 256], strides = [1, 1]} : vector<16x512xf32> to vector<16x256xf32>
    %145 = vector.extract_strided_slice %143 {offsets = [0, 256], sizes = [16, 256], strides = [1, 1]} : vector<16x512xf32> to vector<16x256xf32>
    %146 = vector.extract_strided_slice %135 {offsets = [0, 0], sizes = [16, 64], strides = [1, 1]} : vector<16x256xf32> to vector<16x64xf32>
    %147 = vector.shape_cast %146 : vector<16x64xf32> to vector<2x8x64xf32>
    %148 = arith.truncf %147 : vector<2x8x64xf32> to vector<2x8x64xbf16>
    %149 = vector.extract_strided_slice %135 {offsets = [0, 64], sizes = [16, 64], strides = [1, 1]} : vector<16x256xf32> to vector<16x64xf32>
    %150 = vector.shape_cast %149 : vector<16x64xf32> to vector<2x8x64xf32>
    %151 = arith.truncf %150 : vector<2x8x64xf32> to vector<2x8x64xbf16>
    %152 = vector.extract_strided_slice %135 {offsets = [0, 128], sizes = [16, 64], strides = [1, 1]} : vector<16x256xf32> to vector<16x64xf32>
    %153 = vector.shape_cast %152 : vector<16x64xf32> to vector<2x8x64xf32>
    %154 = arith.truncf %153 : vector<2x8x64xf32> to vector<2x8x64xbf16>
    %155 = vector.extract_strided_slice %135 {offsets = [0, 192], sizes = [16, 64], strides = [1, 1]} : vector<16x256xf32> to vector<16x64xf32>
    %156 = vector.shape_cast %155 : vector<16x64xf32> to vector<2x8x64xf32>
    %157 = arith.truncf %156 : vector<2x8x64xf32> to vector<2x8x64xbf16>
    %158 = tpu.concatenate %148, %151, %154, %157 in 0 : vector<2x8x64xbf16>, vector<2x8x64xbf16>, vector<2x8x64xbf16>, vector<2x8x64xbf16> -> vector<8x8x64xbf16>
    %159 = vector.extract_strided_slice %144 {offsets = [0, 0], sizes = [16, 64], strides = [1, 1]} : vector<16x256xf32> to vector<16x64xf32>
    %160 = vector.shape_cast %159 : vector<16x64xf32> to vector<2x8x64xf32>
    %161 = arith.truncf %160 : vector<2x8x64xf32> to vector<2x8x64xbf16>
    %162 = vector.extract_strided_slice %144 {offsets = [0, 64], sizes = [16, 64], strides = [1, 1]} : vector<16x256xf32> to vector<16x64xf32>
    %163 = vector.shape_cast %162 : vector<16x64xf32> to vector<2x8x64xf32>
    %164 = arith.truncf %163 : vector<2x8x64xf32> to vector<2x8x64xbf16>
    %165 = vector.extract_strided_slice %144 {offsets = [0, 128], sizes = [16, 64], strides = [1, 1]} : vector<16x256xf32> to vector<16x64xf32>
    %166 = vector.shape_cast %165 : vector<16x64xf32> to vector<2x8x64xf32>
    %167 = arith.truncf %166 : vector<2x8x64xf32> to vector<2x8x64xbf16>
    %168 = vector.extract_strided_slice %144 {offsets = [0, 192], sizes = [16, 64], strides = [1, 1]} : vector<16x256xf32> to vector<16x64xf32>
    %169 = vector.shape_cast %168 : vector<16x64xf32> to vector<2x8x64xf32>
    %170 = arith.truncf %169 : vector<2x8x64xf32> to vector<2x8x64xbf16>
    %171 = tpu.concatenate %161, %164, %167, %170 in 0 : vector<2x8x64xbf16>, vector<2x8x64xbf16>, vector<2x8x64xbf16>, vector<2x8x64xbf16> -> vector<8x8x64xbf16>
    %172 = vector.extract_strided_slice %145 {offsets = [0, 0], sizes = [16, 64], strides = [1, 1]} : vector<16x256xf32> to vector<16x64xf32>
    %173 = vector.shape_cast %172 : vector<16x64xf32> to vector<2x8x64xf32>
    %174 = arith.truncf %173 : vector<2x8x64xf32> to vector<2x8x64xbf16>
    %175 = vector.extract_strided_slice %145 {offsets = [0, 64], sizes = [16, 64], strides = [1, 1]} : vector<16x256xf32> to vector<16x64xf32>
    %176 = vector.shape_cast %175 : vector<16x64xf32> to vector<2x8x64xf32>
    %177 = arith.truncf %176 : vector<2x8x64xf32> to vector<2x8x64xbf16>
    %178 = vector.extract_strided_slice %145 {offsets = [0, 128], sizes = [16, 64], strides = [1, 1]} : vector<16x256xf32> to vector<16x64xf32>
    %179 = vector.shape_cast %178 : vector<16x64xf32> to vector<2x8x64xf32>
    %180 = arith.truncf %179 : vector<2x8x64xf32> to vector<2x8x64xbf16>
    %181 = vector.extract_strided_slice %145 {offsets = [0, 192], sizes = [16, 64], strides = [1, 1]} : vector<16x256xf32> to vector<16x64xf32>
    %182 = vector.shape_cast %181 : vector<16x64xf32> to vector<2x8x64xf32>
    %183 = arith.truncf %182 : vector<2x8x64xf32> to vector<2x8x64xbf16>
    %184 = tpu.concatenate %174, %177, %180, %183 in 0 : vector<2x8x64xbf16>, vector<2x8x64xbf16>, vector<2x8x64xbf16>, vector<2x8x64xbf16> -> vector<8x8x64xbf16>
    %cst_53 = arith.constant 0.000000e+00 : f32
    %185 = vector.broadcast %cst_53 : f32 to vector<2x8xf32>
    %186 = arith.cmpf ogt, %6, %185 : vector<2x8xf32>
    %187 = vector.shape_cast %186 : vector<2x8xi1> to vector<2x1x8xi1>
    %cst_54 = arith.constant 0.000000e+00 : f32
    %cst_55 = arith.constant -1.000000e+09 : f32
    %188 = vector.broadcast %cst_54 : f32 to vector<2x1x8xf32>
    %189 = vector.broadcast %cst_55 : f32 to vector<2x1x8xf32>
    %190 = arith.select %187, %188, %189 : vector<2x1x8xi1>, vector<2x1x8xf32>
    %191 = tpu.concatenate %190, %190, %190, %190 in 0 : vector<2x1x8xf32>, vector<2x1x8xf32>, vector<2x1x8xf32>, vector<2x1x8xf32> -> vector<8x1x8xf32>
    "tpu.trace_start"() <{level = 10 : i32, message = "bqd,bkd->bqk"}> : () -> ()
    %cst_56 = arith.constant dense<0.000000e+00> : vector<8x8x8xf32>
    %192 = tpu.matmul %158, %171, %cst_56 {dimension_numbers = #tpu.dot_dimension_numbers<[2], [2], [1], [1], [0, 0, 0, 1, 1, 1], [0], [0]>} : vector<8x8x64xbf16>, vector<8x8x64xbf16>, vector<8x8x8xf32> -> vector<8x8x8xf32>
    "tpu.trace_stop"() : () -> ()
    %193 = vector.broadcast %191 : vector<8x1x8xf32> to vector<8x8x8xf32>
    %194 = arith.addf %192, %193 : vector<8x8x8xf32>
    %cst_57 = arith.constant dense<0xFF800000> : vector<8x8xf32>
    %195 = vector.multi_reduction <maximumf>, %194, %cst_57 [2] : vector<8x8x8xf32> to vector<8x8xf32>
    %196 = vector.shape_cast %195 : vector<8x8xf32> to vector<8x8x1xf32>
    %197 = vector.broadcast %196 : vector<8x8x1xf32> to vector<8x8x8xf32>
    %198 = arith.subf %194, %197 : vector<8x8x8xf32>
    %199 = math.exp %198 : vector<8x8x8xf32>
    %cst_58 = arith.constant dense<0.000000e+00> : vector<8x8xf32>
    %200 = vector.multi_reduction <add>, %199, %cst_58 [2] : vector<8x8x8xf32> to vector<8x8xf32>
    %201 = vector.shape_cast %200 : vector<8x8xf32> to vector<8x8x1xf32>
    %202 = tpu.reciprocal %201 {approx = true} : vector<8x8x1xf32> -> vector<8x8x1xf32>
    %203 = vector.broadcast %202 : vector<8x8x1xf32> to vector<8x8x8xf32>
    %204 = arith.mulf %199, %203 : vector<8x8x8xf32>
    %205 = arith.truncf %204 : vector<8x8x8xf32> to vector<8x8x8xbf16>
    "tpu.trace_start"() <{level = 10 : i32, message = "bqk,bkd->bqd"}> : () -> ()
    %cst_59 = arith.constant dense<0.000000e+00> : vector<8x8x64xf32>
    %206 = tpu.matmul %205, %184, %cst_59 {dimension_numbers = #tpu.dot_dimension_numbers<[2], [1], [1], [2], [0, 0, 0, 1, 1, 2], [0], [0]>} : vector<8x8x8xbf16>, vector<8x8x64xbf16>, vector<8x8x64xf32> -> vector<8x8x64xf32>
    "tpu.trace_stop"() : () -> ()
    %207 = vector.extract_strided_slice %206 {offsets = [0, 0, 0], sizes = [2, 8, 64], strides = [1, 1, 1]} : vector<8x8x64xf32> to vector<2x8x64xf32>
    %208 = vector.shape_cast %207 : vector<2x8x64xf32> to vector<16x64xf32>
    %209 = vector.extract_strided_slice %206 {offsets = [2, 0, 0], sizes = [2, 8, 64], strides = [1, 1, 1]} : vector<8x8x64xf32> to vector<2x8x64xf32>
    %210 = vector.shape_cast %209 : vector<2x8x64xf32> to vector<16x64xf32>
    %211 = vector.extract_strided_slice %206 {offsets = [4, 0, 0], sizes = [2, 8, 64], strides = [1, 1, 1]} : vector<8x8x64xf32> to vector<2x8x64xf32>
    %212 = vector.shape_cast %211 : vector<2x8x64xf32> to vector<16x64xf32>
    %213 = vector.extract_strided_slice %206 {offsets = [6, 0, 0], sizes = [2, 8, 64], strides = [1, 1, 1]} : vector<8x8x64xf32> to vector<2x8x64xf32>
    %214 = vector.shape_cast %213 : vector<2x8x64xf32> to vector<16x64xf32>
    %215 = tpu.concatenate %208, %210, %212, %214 in 1 : vector<16x64xf32>, vector<16x64xf32>, vector<16x64xf32>, vector<16x64xf32> -> vector<16x256xf32>
    %216 = arith.truncf %215 : vector<16x256xf32> to vector<16x256xbf16>
    %c0_60 = arith.constant 0 : index
    %c0_61 = arith.constant 0 : index
    %c0_62 = arith.constant 0 : index
    %217 = vector.load %arg15[%c0_60, %c0_61, %c0_62] : memref<1x256x256xbf16, #tpu.memory_space<vmem>>, vector<1x256x256xbf16>
    %218 = vector.shape_cast %217 : vector<1x256x256xbf16> to vector<256x256xbf16>
    %cst_63 = arith.constant dense<0.000000e+00> : vector<16x256xf32>
    %219 = tpu.matmul %216, %218, %cst_63 {dimension_numbers = #tpu.dot_dimension_numbers<[1], [0], [0], [1], [0, 0, 1, 1], [], []>} : vector<16x256xbf16>, vector<256x256xbf16>, vector<16x256xf32> -> vector<16x256xf32>
    %c0_64 = arith.constant 0 : index
    %c0_65 = arith.constant 0 : index
    %c0_66 = arith.constant 0 : index
    %220 = vector.load %arg16[%c0_64, %c0_65, %c0_66] : memref<1x1x256xf32, #tpu.memory_space<vmem>>, vector<1x1x256xf32>
    %221 = vector.shape_cast %220 : vector<1x1x256xf32> to vector<1x256xf32>
    %222 = vector.broadcast %221 : vector<1x256xf32> to vector<16x256xf32>
    %223 = arith.addf %219, %222 : vector<16x256xf32>
    %224 = arith.addf %127, %223 : vector<16x256xf32>
    %c0_67 = arith.constant 0 : index
    %c0_68 = arith.constant 0 : index
    %c0_69 = arith.constant 0 : index
    %225 = vector.load %arg17[%c0_67, %c0_68, %c0_69] : memref<1x1x256xf32, #tpu.memory_space<vmem>>, vector<1x1x256xf32>
    %226 = vector.shape_cast %225 : vector<1x1x256xf32> to vector<1x256xf32>
    %c0_70 = arith.constant 0 : index
    %c0_71 = arith.constant 0 : index
    %c0_72 = arith.constant 0 : index
    %227 = vector.load %arg18[%c0_70, %c0_71, %c0_72] : memref<1x1x256xf32, #tpu.memory_space<vmem>>, vector<1x1x256xf32>
    %228 = vector.shape_cast %227 : vector<1x1x256xf32> to vector<1x256xf32>
    %cst_73 = arith.constant dense<0.000000e+00> : vector<16xf32>
    %229 = vector.multi_reduction <add>, %224, %cst_73 [1] : vector<16x256xf32> to vector<16xf32>
    %230 = vector.shape_cast %229 : vector<16xf32> to vector<16x1xf32>
    %cst_74 = arith.constant 2.560000e+02 : f32
    %231 = vector.broadcast %cst_74 : f32 to vector<16x1xf32>
    %232 = arith.divf %230, %231 : vector<16x1xf32>
    %233 = vector.broadcast %232 : vector<16x1xf32> to vector<16x256xf32>
    %234 = arith.subf %224, %233 : vector<16x256xf32>
    %235 = arith.mulf %234, %234 : vector<16x256xf32>
    %cst_75 = arith.constant dense<0.000000e+00> : vector<16xf32>
    %236 = vector.multi_reduction <add>, %235, %cst_75 [1] : vector<16x256xf32> to vector<16xf32>
    %237 = vector.shape_cast %236 : vector<16xf32> to vector<16x1xf32>
    %cst_76 = arith.constant 2.560000e+02 : f32
    %238 = vector.broadcast %cst_76 : f32 to vector<16x1xf32>
    %239 = arith.divf %237, %238 : vector<16x1xf32>
    %240 = vector.broadcast %232 : vector<16x1xf32> to vector<16x256xf32>
    %241 = arith.subf %224, %240 : vector<16x256xf32>
    %cst_77 = arith.constant 9.99999974E-6 : f32
    %242 = vector.broadcast %cst_77 : f32 to vector<16x1xf32>
    %243 = arith.addf %239, %242 : vector<16x1xf32>
    %244 = math.rsqrt %243 : vector<16x1xf32>
    %245 = vector.broadcast %244 : vector<16x1xf32> to vector<16x256xf32>
    %246 = arith.mulf %241, %245 : vector<16x256xf32>
    %247 = vector.broadcast %226 : vector<1x256xf32> to vector<16x256xf32>
    %248 = arith.mulf %246, %247 : vector<16x256xf32>
    %249 = vector.broadcast %228 : vector<1x256xf32> to vector<16x256xf32>
    %250 = arith.addf %248, %249 : vector<16x256xf32>
    %251 = arith.truncf %250 : vector<16x256xf32> to vector<16x256xbf16>
    %c0_78 = arith.constant 0 : index
    %c0_79 = arith.constant 0 : index
    %c0_80 = arith.constant 0 : index
    %252 = vector.load %arg19[%c0_78, %c0_79, %c0_80] : memref<1x256x1024xbf16, #tpu.memory_space<vmem>>, vector<1x256x1024xbf16>
    %253 = vector.shape_cast %252 : vector<1x256x1024xbf16> to vector<256x1024xbf16>
    %cst_81 = arith.constant dense<0.000000e+00> : vector<16x1024xf32>
    %254 = tpu.matmul %251, %253, %cst_81 {dimension_numbers = #tpu.dot_dimension_numbers<[1], [0], [0], [1], [0, 0, 1, 1], [], []>} : vector<16x256xbf16>, vector<256x1024xbf16>, vector<16x1024xf32> -> vector<16x1024xf32>
    %c0_82 = arith.constant 0 : index
    %c0_83 = arith.constant 0 : index
    %c0_84 = arith.constant 0 : index
    %255 = vector.load %arg20[%c0_82, %c0_83, %c0_84] : memref<1x1x1024xf32, #tpu.memory_space<vmem>>, vector<1x1x1024xf32>
    %256 = vector.shape_cast %255 : vector<1x1x1024xf32> to vector<1x1024xf32>
    %257 = vector.broadcast %256 : vector<1x1024xf32> to vector<16x1024xf32>
    %258 = arith.addf %254, %257 : vector<16x1024xf32>
    %cst_85 = arith.constant 0.000000e+00 : f32
    %259 = vector.broadcast %cst_85 : f32 to vector<16x1024xf32>
    %260 = arith.maximumf %258, %259 : vector<16x1024xf32>
    %261 = arith.truncf %260 : vector<16x1024xf32> to vector<16x1024xbf16>
    %c0_86 = arith.constant 0 : index
    %c0_87 = arith.constant 0 : index
    %c0_88 = arith.constant 0 : index
    %262 = vector.load %arg21[%c0_86, %c0_87, %c0_88] : memref<1x1024x256xbf16, #tpu.memory_space<vmem>>, vector<1x1024x256xbf16>
    %263 = vector.shape_cast %262 : vector<1x1024x256xbf16> to vector<1024x256xbf16>
    %cst_89 = arith.constant dense<0.000000e+00> : vector<16x256xf32>
    %264 = tpu.matmul %261, %263, %cst_89 {dimension_numbers = #tpu.dot_dimension_numbers<[1], [0], [0], [1], [0, 0, 1, 1], [], []>} : vector<16x1024xbf16>, vector<1024x256xbf16>, vector<16x256xf32> -> vector<16x256xf32>
    %c0_90 = arith.constant 0 : index
    %c0_91 = arith.constant 0 : index
    %c0_92 = arith.constant 0 : index
    %265 = vector.load %arg22[%c0_90, %c0_91, %c0_92] : memref<1x1x256xf32, #tpu.memory_space<vmem>>, vector<1x1x256xf32>
    %266 = vector.shape_cast %265 : vector<1x1x256xf32> to vector<1x256xf32>
    %267 = vector.broadcast %266 : vector<1x256xf32> to vector<16x256xf32>
    %268 = arith.addf %264, %267 : vector<16x256xf32>
    %269 = arith.addf %250, %268 : vector<16x256xf32>
    %c0_93 = arith.constant 0 : index
    %c0_94 = arith.constant 0 : index
    %c0_95 = arith.constant 0 : index
    %270 = vector.load %arg23[%c0_93, %c0_94, %c0_95] : memref<1x1x256xf32, #tpu.memory_space<vmem>>, vector<1x1x256xf32>
    %271 = vector.shape_cast %270 : vector<1x1x256xf32> to vector<1x256xf32>
    %c0_96 = arith.constant 0 : index
    %c0_97 = arith.constant 0 : index
    %c0_98 = arith.constant 0 : index
    %272 = vector.load %arg24[%c0_96, %c0_97, %c0_98] : memref<1x1x256xf32, #tpu.memory_space<vmem>>, vector<1x1x256xf32>
    %273 = vector.shape_cast %272 : vector<1x1x256xf32> to vector<1x256xf32>
    %cst_99 = arith.constant dense<0.000000e+00> : vector<16xf32>
    %274 = vector.multi_reduction <add>, %269, %cst_99 [1] : vector<16x256xf32> to vector<16xf32>
    %275 = vector.shape_cast %274 : vector<16xf32> to vector<16x1xf32>
    %cst_100 = arith.constant 2.560000e+02 : f32
    %276 = vector.broadcast %cst_100 : f32 to vector<16x1xf32>
    %277 = arith.divf %275, %276 : vector<16x1xf32>
    %278 = vector.broadcast %277 : vector<16x1xf32> to vector<16x256xf32>
    %279 = arith.subf %269, %278 : vector<16x256xf32>
    %280 = arith.mulf %279, %279 : vector<16x256xf32>
    %cst_101 = arith.constant dense<0.000000e+00> : vector<16xf32>
    %281 = vector.multi_reduction <add>, %280, %cst_101 [1] : vector<16x256xf32> to vector<16xf32>
    %282 = vector.shape_cast %281 : vector<16xf32> to vector<16x1xf32>
    %cst_102 = arith.constant 2.560000e+02 : f32
    %283 = vector.broadcast %cst_102 : f32 to vector<16x1xf32>
    %284 = arith.divf %282, %283 : vector<16x1xf32>
    %285 = vector.broadcast %277 : vector<16x1xf32> to vector<16x256xf32>
    %286 = arith.subf %269, %285 : vector<16x256xf32>
    %cst_103 = arith.constant 9.99999974E-6 : f32
    %287 = vector.broadcast %cst_103 : f32 to vector<16x1xf32>
    %288 = arith.addf %284, %287 : vector<16x1xf32>
    %289 = math.rsqrt %288 : vector<16x1xf32>
    %290 = vector.broadcast %289 : vector<16x1xf32> to vector<16x256xf32>
    %291 = arith.mulf %286, %290 : vector<16x256xf32>
    %292 = vector.broadcast %271 : vector<1x256xf32> to vector<16x256xf32>
    %293 = arith.mulf %291, %292 : vector<16x256xf32>
    %294 = vector.broadcast %273 : vector<1x256xf32> to vector<16x256xf32>
    %295 = arith.addf %293, %294 : vector<16x256xf32>
    %c0_104 = arith.constant 0 : index
    %c0_105 = arith.constant 0 : index
    %296 = vector.load %arg27[%c0_104, %c0_105] : memref<16x256xf32, #tpu.memory_space<vmem>>, vector<16x256xf32>
    tpu.vector_store %arg27[%c0_104, %c0_105], %295 {strides = array<i32>} : memref<16x256xf32, #tpu.memory_space<vmem>>, vector<16x256xf32>,
    %c3_i32 = arith.constant 3 : i32
    %297 = arith.cmpi eq, %arg0, %c3_i32 : i32
    %298 = arith.extui %297 : i1 to i32
    %c0_i32_106 = arith.constant 0 : i32
    %299 = arith.cmpi ne, %298, %c0_i32_106 : i32
    scf.if %299 {
      %300 = arith.truncf %295 : vector<16x256xf32> to vector<16x256xbf16>
      %c0_107 = arith.constant 0 : index
      %c0_108 = arith.constant 0 : index
      %301 = vector.load %arg25[%c0_107, %c0_108] : memref<256x1024xbf16, #tpu.memory_space<vmem>>, vector<256x1024xbf16>
      %cst_109 = arith.constant dense<0.000000e+00> : vector<16x1024xf32>
      %302 = tpu.matmul %300, %301, %cst_109 {dimension_numbers = #tpu.dot_dimension_numbers<[1], [0], [0], [1], [0, 0, 1, 1], [], []>} : vector<16x256xbf16>, vector<256x1024xbf16>, vector<16x1024xf32> -> vector<16x1024xf32>
      %c0_110 = arith.constant 0 : index
      %c0_111 = arith.constant 0 : index
      %303 = vector.load %arg26[%c0_110, %c0_111] : memref<16x1024xf32, #tpu.memory_space<vmem>>, vector<16x1024xf32>
      tpu.vector_store %arg26[%c0_110, %c0_111], %302 {strides = array<i32>} : memref<16x1024xf32, #tpu.memory_space<vmem>>, vector<16x1024xf32>,
    } else {
    }
    return
  }
  func.func @transform_0(%arg0: i32) -> (i32, i32) {
    %c0_i32 = arith.constant 0 : i32
    %c0_i32_0 = arith.constant 0 : i32
    %c0_i32_1 = arith.constant 0 : i32
    return %c0_i32, %c0_i32_0 : i32, i32
  }
  func.func @transform_1(%arg0: i32) -> (i32, i32) {
    %c0_i32 = arith.constant 0 : i32
    %c0_i32_0 = arith.constant 0 : i32
    %c0_i32_1 = arith.constant 0 : i32
    return %c0_i32, %c0_i32_0 : i32, i32
  }
  func.func @transform_2(%arg0: i32) -> (i32, i32) {
    %c0_i32 = arith.constant 0 : i32
    %c0_i32_0 = arith.constant 0 : i32
    %c0_i32_1 = arith.constant 0 : i32
    return %c0_i32, %c0_i32_0 : i32, i32
  }
  func.func @transform_3(%arg0: i32) -> (i32, i32) {
    %c0_i32 = arith.constant 0 : i32
    %c0_i32_0 = arith.constant 0 : i32
    %c0_i32_1 = arith.constant 0 : i32
    return %c0_i32, %c0_i32_0 : i32, i32
  }
  func.func @transform_4(%arg0: i32) -> (i32, i32, i32) {
    %c0_i32 = arith.constant 0 : i32
    %c0_i32_0 = arith.constant 0 : i32
    %c0_i32_1 = arith.constant 0 : i32
    return %arg0, %c0_i32, %c0_i32_0 : i32, i32, i32
  }
  func.func @transform_5(%arg0: i32) -> (i32, i32, i32) {
    %c0_i32 = arith.constant 0 : i32
    %c0_i32_0 = arith.constant 0 : i32
    %c0_i32_1 = arith.constant 0 : i32
    return %arg0, %c0_i32, %c0_i32_0 : i32, i32, i32
  }
  func.func @transform_6(%arg0: i32) -> (i32, i32, i32) {
    %c0_i32 = arith.constant 0 : i32
    %c0_i32_0 = arith.constant 0 : i32
    %c0_i32_1 = arith.constant 0 : i32
    return %arg0, %c0_i32, %c0_i32_0 : i32, i32, i32
  }
  func.func @transform_7(%arg0: i32) -> (i32, i32, i32) {
    %c0_i32 = arith.constant 0 : i32
    %c0_i32_0 = arith.constant 0 : i32
    %c0_i32_1 = arith.constant 0 : i32
    return %arg0, %c0_i32, %c0_i32_0 : i32, i32, i32
  }
  func.func @transform_8(%arg0: i32) -> (i32, i32, i32) {
    %c0_i32 = arith.constant 0 : i32
    %c0_i32_0 = arith.constant 0 : i32
    %c0_i32_1 = arith.constant 0 : i32
    return %arg0, %c0_i32, %c0_i32_0 : i32, i32, i32
  }
  func.func @transform_9(%arg0: i32) -> (i32, i32, i32) {
    %c0_i32 = arith.constant 0 : i32
    %c0_i32_0 = arith.constant 0 : i32
    %c0_i32_1 = arith.constant 0 : i32
    return %arg0, %c0_i32, %c0_i32_0 : i32, i32, i32
  }
  func.func @transform_10(%arg0: i32) -> (i32, i32, i32) {
    %c0_i32 = arith.constant 0 : i32
    %c0_i32_0 = arith.constant 0 : i32
    %c0_i32_1 = arith.constant 0 : i32
    return %arg0, %c0_i32, %c0_i32_0 : i32, i32, i32
  }
  func.func @transform_11(%arg0: i32) -> (i32, i32, i32) {
    %c0_i32 = arith.constant 0 : i32
    %c0_i32_0 = arith.constant 0 : i32
    %c0_i32_1 = arith.constant 0 : i32
    return %arg0, %c0_i32, %c0_i32_0 : i32, i32, i32
  }
  func.func @transform_12(%arg0: i32) -> (i32, i32, i32) {
    %c0_i32 = arith.constant 0 : i32
    %c0_i32_0 = arith.constant 0 : i32
    %c0_i32_1 = arith.constant 0 : i32
    return %arg0, %c0_i32, %c0_i32_0 : i32, i32, i32
  }
  func.func @transform_13(%arg0: i32) -> (i32, i32, i32) {
    %c0_i32 = arith.constant 0 : i32
    %c0_i32_0 = arith.constant 0 : i32
    %c0_i32_1 = arith.constant 0 : i32
    return %arg0, %c0_i32, %c0_i32_0 : i32, i32, i32
  }
  func.func @transform_14(%arg0: i32) -> (i32, i32, i32) {
    %c0_i32 = arith.constant 0 : i32
    %c0_i32_0 = arith.constant 0 : i32
    %c0_i32_1 = arith.constant 0 : i32
    return %arg0, %c0_i32, %c0_i32_0 : i32, i32, i32
  }
  func.func @transform_15(%arg0: i32) -> (i32, i32, i32) {
    %c0_i32 = arith.constant 0 : i32
    %c0_i32_0 = arith.constant 0 : i32
    %c0_i32_1 = arith.constant 0 : i32
    return %arg0, %c0_i32, %c0_i32_0 : i32, i32, i32
  }
  func.func @transform_16(%arg0: i32) -> (i32, i32, i32) {
    %c0_i32 = arith.constant 0 : i32
    %c0_i32_0 = arith.constant 0 : i32
    %c0_i32_1 = arith.constant 0 : i32
    return %arg0, %c0_i32, %c0_i32_0 : i32, i32, i32
  }
  func.func @transform_17(%arg0: i32) -> (i32, i32, i32) {
    %c0_i32 = arith.constant 0 : i32
    %c0_i32_0 = arith.constant 0 : i32
    %c0_i32_1 = arith.constant 0 : i32
    return %arg0, %c0_i32, %c0_i32_0 : i32, i32, i32
  }
  func.func @transform_18(%arg0: i32) -> (i32, i32, i32) {
    %c0_i32 = arith.constant 0 : i32
    %c0_i32_0 = arith.constant 0 : i32
    %c0_i32_1 = arith.constant 0 : i32
    return %arg0, %c0_i32, %c0_i32_0 : i32, i32, i32
  }
  func.func @transform_19(%arg0: i32) -> (i32, i32, i32) {
    %c0_i32 = arith.constant 0 : i32
    %c0_i32_0 = arith.constant 0 : i32
    %c0_i32_1 = arith.constant 0 : i32
    return %arg0, %c0_i32, %c0_i32_0 : i32, i32, i32
  }
  func.func @transform_20(%arg0: i32) -> (i32, i32, i32) {
    %c0_i32 = arith.constant 0 : i32
    %c0_i32_0 = arith.constant 0 : i32
    %c0_i32_1 = arith.constant 0 : i32
    return %arg0, %c0_i32, %c0_i32_0 : i32, i32, i32
  }
  func.func @transform_21(%arg0: i32) -> (i32, i32, i32) {
    %c0_i32 = arith.constant 0 : i32
    %c0_i32_0 = arith.constant 0 : i32
    %c0_i32_1 = arith.constant 0 : i32
    return %arg0, %c0_i32, %c0_i32_0 : i32, i32, i32
  }
  func.func @transform_22(%arg0: i32) -> (i32, i32, i32) {
    %c0_i32 = arith.constant 0 : i32
    %c0_i32_0 = arith.constant 0 : i32
    %c0_i32_1 = arith.constant 0 : i32
    return %arg0, %c0_i32, %c0_i32_0 : i32, i32, i32
  }
  func.func @transform_23(%arg0: i32) -> (i32, i32, i32) {
    %c0_i32 = arith.constant 0 : i32
    %c0_i32_0 = arith.constant 0 : i32
    %c0_i32_1 = arith.constant 0 : i32
    return %arg0, %c0_i32, %c0_i32_0 : i32, i32, i32
  }
  func.func @transform_24(%arg0: i32) -> (i32, i32) {
    %c0_i32 = arith.constant 0 : i32
    %c0_i32_0 = arith.constant 0 : i32
    %c0_i32_1 = arith.constant 0 : i32
    return %c0_i32, %c0_i32_0 : i32, i32
  }
  func.func @transform_25(%arg0: i32) -> (i32, i32) {
    %c0_i32 = arith.constant 0 : i32
    %c0_i32_0 = arith.constant 0 : i32
    %c0_i32_1 = arith.constant 0 : i32
    return %c0_i32, %c0_i32_0 : i32, i32
  }
}

</mosaic_0001>

<bundles_post_ra>
// kernel: decoder_forward.1
= control target key start
LH: loop header
LB: loop body
LE: loop exit
PB: predicated region body
PF: predicated region fallthrough
CT: control target
= control target key end

     0   :  { %s13645_s0 = inlined_call_operand.vmem [shape: f32[16,256], index: 0, kind: input, shape index: {}]   ;;  %s13646_s1 = inlined_call_operand.vmem [shape: bf16[16,256], index: 1, kind: input, shape index: {}]   ;;  %s13647_s2 = inlined_call_operand.hbm [shape: f32[2,8], index: 2, kind: input, shape index: {}]   ;;  %s13648_s3 = inlined_call_operand.hbm [shape: f32[2,8], index: 3, kind: input, shape index: {}]   ;;  %s13649_s4 = inlined_call_operand.hbm [shape: bf16[4,256,768], index: 4, kind: input, shape index: {}]   ;;  %s13650_s5 = inlined_call_operand.hbm [shape: f32[4,1,768], index: 5, kind: input, shape index: {}]   ;;  %s13651_s6 = inlined_call_operand.hbm [shape: bf16[4,256,256], index: 6, kind: input, shape index: {}]   ;;  %s13652_s7 = inlined_call_operand.hbm [shape: f32[4,1,256], index: 7, kind: input, shape index: {}]   ;;  %s13653_s8 = inlined_call_operand.hbm [shape: f32[4,1,256], index: 8, kind: input, shape index: {}]   ;;  %s13654_s9 = inlined_call_operand.hbm [shape: f32[4,1,256], index: 9, kind: input, shape index: {}]   ;;  %s13655_s10 = inlined_call_operand.hbm [shape: bf16[4,256,256], index: 10, kind: input, shape index: {}]   ;;  %s13656_s11 = inlined_call_operand.hbm [shape: f32[4,1,256], index: 11, kind: input, shape index: {}]   ;;  %s13657_s12 = inlined_call_operand.hbm [shape: bf16[4,256,512], index: 12, kind: input, shape index: {}]   ;;  %s13658_s13 = inlined_call_operand.hbm [shape: f32[4,1,512], index: 13, kind: input, shape index: {}]   ;;  %s13659_s14 = inlined_call_operand.hbm [shape: bf16[4,256,256], index: 14, kind: input, shape index: {}]   ;;  %s13660_s15 = inlined_call_operand.hbm [shape: f32[4,1,256], index: 15, kind: input, shape index: {}]   ;;  %s13661_s16 = inlined_call_operand.hbm [shape: f32[4,1,256], index: 16, kind: input, shape index: {}]   ;;  %s13662_s17 = inlined_call_operand.hbm [shape: f32[4,1,256], index: 17, kind: input, shape index: {}]   ;;  %s13663_s18 = inlined_call_operand.hbm [shape: bf16[4,256,1024], index: 18, kind: input, shape index: {}]   ;;  %s13664_s19 = inlined_call_operand.hbm [shape: f32[4,1,1024], index: 19, kind: input, shape index: {}]   ;;  %s13665_s20 = inlined_call_operand.hbm [shape: bf16[4,1024,256], index: 20, kind: input, shape index: {}]   ;;  %s13666_s21 = inlined_call_operand.hbm [shape: f32[4,1,256], index: 21, kind: input, shape index: {}]   ;;  %s13667_s22 = inlined_call_operand.hbm [shape: f32[4,1,256], index: 22, kind: input, shape index: {}]   ;;  %s13668_s23 = inlined_call_operand.hbm [shape: f32[4,1,256], index: 23, kind: input, shape index: {}]   ;;  %s13669_s24 = inlined_call_operand.hbm [shape: bf16[256,1024], index: 24, kind: input, shape index: {}]   ;;  %s13670_s25 = inlined_call_operand.vmem [shape: f32[16,1024], index: 25, kind: output, shape index: {}]  }
   0x1   :  { %13712 = sst [smem:[#allocation39_spill]] %s13645_s0 }
   0x2   :  { %13713 = sst [smem:[#allocation40_spill]] %s13646_s1 }
   0x3   :  { %13714 = sst [smem:[#allocation41_spill]] %s13647_s2 }
   0x4   :  { %13715 = sst [smem:[#allocation42_spill]] %s13648_s3 }
   0x5   :  { %13716 = sst [smem:[#allocation43_spill]] %s13649_s4 }
   0x6   :  { %13717 = sst [smem:[#allocation44_spill]] %s13650_s5 }
   0x7   :  { %13718 = sst [smem:[#allocation45_spill]] %s13651_s6 }
   0x8   :  { %13719 = sst [smem:[#allocation46_spill]] %s13652_s7 }
   0x9   :  { %13720 = sst [smem:[#allocation47_spill]] %s13653_s8 }
   0xa   :  { %13721 = sst [smem:[#allocation48_spill]] %s13654_s9 }
   0xb   :  { %13722 = sst [smem:[#allocation49_spill]] %s13655_s10 }
   0xc   :  { %13723 = sst [smem:[#allocation50_spill]] %s13656_s11 }
   0xd   :  { %13724 = sst [smem:[#allocation51_spill]] %s13657_s12 }
   0xe   :  { %13725 = sst [smem:[#allocation52_spill]] %s13658_s13 }
   0xf   :  { %13726 = sst [smem:[#allocation53_spill]] %s13659_s14 }
  0x10   :  { %13727 = sst [smem:[#allocation54_spill]] %s13666_s21 }
  0x11   :  { %13728 = sst [smem:[#allocation55_spill]] %s13667_s22 }
  0x12   :  { %13729 = sst [smem:[#allocation56_spill]] %s13668_s23 }
  0x13   :  { %13730 = sst [smem:[#allocation57_spill]] %s13669_s24 }
  0x14   :  { %13731 = sst [smem:[#allocation58_spill]] %s13670_s25 }
  0x15   :  { %30 = vsyncpa [#allocation4], 0 }
  0x16   :  { %31 = vsyncpa [#allocation6], 0  ;;  %s11680_s29 = smov 0   ;;  %s11682_s2 = smov 0  }
  0x17   :  { %s11684_s6 = smov 0   ;;  %s11686_s30 = smov 0  }
  0x18 LB: > { %13732 = sst [smem:[#allocation32_spill]] %s11501_s2  ;;  %s11699_s7 = sadd.s32 4294967295, %s11509_s30   ;;  %s11509_s30 = sphi %s11686_s30, %s13789_s30   ;;  %s11505_s6 = sphi %s11684_s6, %s13792_s6   ;;  %s11501_s2 = sphi %s11682_s2, %s13791_s2   ;;  %s11497_s29 = sphi %s11680_s29, %s13790_s29  }
  0x19   : > { %13733 = sst [smem:[#allocation33_spill]] %s11505_s6  ;;  %s11702_s3 = sadd.s32 1, %s11509_s30  }
  0x1a   : > { %13734 = sst [smem:[#allocation34_spill]] %s11699_s7  ;;  %s125_s26 = ssub.s32 %s11509_s30, %s11702_s3 }
  0x1b   : > { %13735 = sst [smem:[#allocation35_spill]] %s11702_s3  ;;  %s128_s1 = sadd.s32 1, %s11505_s6 }
  0x1c   : > { %p126_p0 = scmp.eq.s32.totalorder %s125_s26, 0  ;;  %p135_p1 = scmp.ne.s32.totalorder %s11505_s6, %s11501_s2 }
  0x1d   : > { %p136_p2 = scmp.eq.s32.totalorder %s11509_s30, 0  ;;  %p141_p3 = scmp.ne.s32.totalorder %s11501_s2, %s11497_s29 }
  0x1e   : > { %s11712_s8 = scalar_select %p126_p0, %s11505_s6, %s128_s1  }
  0x1f   : > { %p11714_p4 = por %p136_p2, %p135_p1  ;;  %p13690_p5 = scmp.eq.s32.totalorder %s11699_s7, 0 }
  0x20   : > { %13736 = sst [smem:[#allocation36_spill]] %s11712_s8  ;;  %p8964_p6 = scmp.ge.s32.totalorder %s11509_s30, 1 }
  0x21   : > { %s13737_s27 = scalar_select %p11714_p4, 1, 0 }
  0x22   : > { %p688_p7 = scmp.lt.s32.totalorder %s11509_s30, 5  ;;  %p11723_p8 = por %p13690_p5, %p141_p3 }
  0x23   : > { %s11511_s9 = smov [#allocation5]   ;;  %s11512_s0 = smov [#allocation3]  }
  0x24   : > { %s13738_s4 = scalar_select %p11723_p8, 1, 0 }
  0x25   : > { %p11728_p10 = pnand %p8964_p6, %p688_p7  ;;  %s718_s5 = sshll.u32 %s11511_s9, 4  ;;  %s719_s5 = int_to_ptr.vmem [resolvable:$true] %s718_s5 }
  0x26   : > { %13739 = sst [smem:[#allocation37_spill]] %s13738_s4  ;;  %s707_s29 = sshll.u32 %s11512_s0, 4  ;;  %s11740_s29 = int_to_ptr.vmem [resolvable:$true] %s707_s29 }
  0x27   : > { %s13740_s28 = scalar_select %p11728_p10, 1, 0 }
  0x28   : > { %p10073_p11 = pneg %p11728_p10  ;;  %s11513_s1 = smov [#allocation27]  }
  0x29   : > { %13741 = sst [smem:[#allocation38_spill]] %s13740_s28  ;;  %s728_s8 = sshll.u32 %s11513_s1, 4  ;;  %s11742_s8 = int_to_ptr.vmem [resolvable:$true] %s728_s8 }
  0x2a   : > { %p11736_p12 = pnand %p10073_p11, %p13690_p5  ;;  %s13743_s9 = sld [smem:[#allocation42_spill]] }
  0x2c   : > { %p11752_p0 = pneg %p11736_p12 }
  0x30   : > { %s10819_s4 = scalar_lea.hbm %s13743_s9, 32 }
  0x31   : > { %p10820_p13 = scmp.ne.s32.totalorder %s13743_s9, %s10819_s4  ;;  %p10826_p3 = scmp.lt.u32.totalorder %s10819_s4, %s13743_s9 }
  0x33   : > { %p10822_p1 = pnand %p11752_p0, %p10820_p13 }
  0x35   : > { %p10823_p2 = pneg %p10822_p1 }
  0x37   : > { %p10828_p6 = pnand %p10826_p3, %p10823_p2 }
  0x39   : > { %10831 = shalt.err (!%p10828_p6)
}
  0x3a   : > { %s10832_s25 = scalar_lea.vmem %s719_s5, 32  ;;  %p10840_p5 = scmp.lt.s32.totalorder %s719_s5, %s719_s5 }
  0x3b   : > { %p10833_p7 = scmp.ne.s32.totalorder %s719_s5, %s10832_s25  ;;  %p10841_p8 = scmp.lt.s32.totalorder %s10832_s25, %s10832_s25 }
  0x3d   : > { %p10835_p11 = pnand %p10833_p7, %p11752_p0  ;;  %p10842_p10 = por %p10841_p8, %p10840_p5 }
  0x3f   : > { %p10836_p9 = pneg %p10835_p11 }
  0x41   : > { %p10843_p4 = pnand %p10842_p10, %p10836_p9 }
  0x43   : > { %10846 = shalt.err (!%p10843_p4)
}
  0x44   : > { %10079 = dma.hbm_to_vmem [thread:$0]  (!%p11736_p12), %s13743_s9, 32, %s719_s5, [#allocation6]  }
  0x45   : > { %s13745_s28 = sld [smem:[#allocation41_spill]] }
  0x4b   : > { %s10847_s1 = scalar_lea.hbm %s13745_s28, 32 }
  0x4c   : > { %p10848_p13 = scmp.ne.s32.totalorder %s13745_s28, %s10847_s1  ;;  %p10854_p4 = scmp.lt.u32.totalorder %s10847_s1, %s13745_s28 }
  0x4e   : > { %p10850_p1 = pnand %p10848_p13, %p11752_p0 }
  0x50   : > { %p10851_p5 = pneg %p10850_p1 }
  0x52   : > { %p10856_p8 = pnand %p10854_p4, %p10851_p5 }
  0x54   : > { %10859 = shalt.err (!%p10856_p8)
}
  0x55   : > { %s10860_s5 = scalar_lea.vmem %s11740_s29, 32  ;;  %p10868_p3 = scmp.lt.s32.totalorder %s11740_s29, %s11740_s29 }
  0x56   : > { %p10861_p9 = scmp.ne.s32.totalorder %s11740_s29, %s10860_s5  ;;  %p10869_p6 = scmp.lt.s32.totalorder %s10860_s5, %s10860_s5 }
  0x58   : > { %p10863_p10 = pnand %p10861_p9, %p11752_p0  ;;  %p10870_p7 = por %p10869_p6, %p10868_p3 }
  0x5a   : > { %p10864_p2 = pneg %p10863_p10 }
  0x5c   : > { %p10871_p11 = pnand %p10870_p7, %p10864_p2 }
  0x5e   : > { %10874 = shalt.err (!%p10871_p11)
}
  0x5f   : > { %10076 = dma.hbm_to_vmem [thread:$0]  (!%p11736_p12), %s13745_s28, 32, %s11740_s29, [#allocation4]  }
  0x60   : > { %s13746_s24 = sld [smem:[#allocation57_spill]] }
  0x66   : > { %s10875_s3 = scalar_lea.hbm %s13746_s24, 16384 }
  0x67   : > { %p10876_p13 = scmp.ne.s32.totalorder %s13746_s24, %s10875_s3  ;;  %p10882_p4 = scmp.lt.u32.totalorder %s10875_s3, %s13746_s24 }
  0x69   : > { %p10878_p1 = pnand %p10876_p13, %p11752_p0 }
  0x6b   : > { %p10879_p5 = pneg %p10878_p1 }
  0x6d   : > { %p10884_p8 = pnand %p10882_p4, %p10879_p5 }
  0x6f   : > { %10887 = shalt.err (!%p10884_p8)
}
  0x70   : > { %s10888_s29 = scalar_lea.vmem %s11742_s8, 16384  ;;  %p10896_p3 = scmp.lt.s32.totalorder %s11742_s8, %s11742_s8 }
  0x71   : > { %p10889_p9 = scmp.ne.s32.totalorder %s11742_s8, %s10888_s29  ;;  %p10897_p6 = scmp.lt.s32.totalorder %s10888_s29, %s10888_s29 }
  0x73   : > { %p10891_p10 = pnand %p10889_p9, %p11752_p0  ;;  %p10898_p7 = por %p10897_p6, %p10896_p3 }
  0x75   : > { %p10892_p2 = pneg %p10891_p10 }
  0x77   : > { %p10899_p11 = pnand %p10898_p7, %p10892_p2 }
  0x79   : > { %10902 = shalt.err (!%p10899_p11)
}
  0x7a   : > { %s11514_s5 = smov 512   ;;  %s11515_s21 = smov 32  }
  0x7b   : > { %10082 = dma.hbm_to_vmem [thread:$0]  (!%p11736_p12), %s13746_s24, 16384, %s11742_s8, [#allocation6], %s11514_s5, %s11514_s5, %s11515_s21  }
  0x7c   : > { %p8968_p13 = scmp.ge.s32.totalorder %s11509_s30, 4 }
  0x7d   : > { %s742_s0 = sand.u32 (!%p8968_p13), 1, %s11509_s30   ;;  %s11817_s2 = sand.u32 (!%p8968_p13), 1, %s11505_s6  }
  0x7e   : > { %738 = sbr.rel (%p8968_p13) target bundleno = 666 (0x29a), region = 36  ;;  %s13747_s1 = sld [smem:[#allocation43_spill]] (!%p8968_p13) }
  0x7f   : > { %s10015_s3 = smul.u32 (!%p8968_p13), 768, %s11817_s2  ;;  %s11829_s21 = scalar_lea.sflag (!%p8968_p13), [#allocation4], %s742_s0 }
  0x80   : > { %s10016_s7 = smul.u32 (!%p8968_p13), 12288, %s11509_s30  ;;  %p13748_p0 = scmp.ne.s32.totalorder (!%p8968_p13), %s13737_s27, 0 }
  0x81   : > { %s746_s8 = scalar_lea.vmem (!%p8968_p13), [#allocation7], %s10015_s3  ;;  %s10017_s5 = smul.u32 (!%p8968_p13), 6, %s11817_s2 }
  0x82   : > { %s753_s29 = sshll.u32 (!%p8968_p13), %s746_s8, 4  ;;  %s11826_s29 = int_to_ptr.vmem [resolvable:$true] %s753_s29 }
  0x84   : > { %s11824_s25 = scalar_lea.hbm (!%p8968_p13), %s13747_s1, %s10016_s7  ;;  %s10907_s7 = scalar_lea.hbm (!%p8968_p13), %s13747_s1, 49152 }
  0x85   : > { %s10903_s22 = scalar_lea.hbm %s11824_s25, 12288  ;;  %p10908_p4 = scmp.lt.u32.totalorder %s11824_s25, %s13747_s1 }
  0x86   : > { %p10904_p12 = scmp.ne.s32.totalorder %s11824_s25, %s10903_s22  ;;  %p10909_p8 = scmp.lt.u32.totalorder %s10907_s7, %s10903_s22 }
  0x87   : > { %p10911_p10 = scmp.lt.u32.totalorder %s10903_s22, %s11824_s25 }
  0x88   : > { %p10905_p1 = pnand %p10904_p12, %p13748_p0  ;;  %p10910_p9 = por %p10909_p8, %p10908_p4 }
  0x8a   : > { %p10906_p5 = pneg %p10905_p1  ;;  %p10912_p2 = por %p10911_p10, %p10910_p9 }
  0x8c   : > { %p10913_p3 = pnand %p10912_p2, %p10906_p5 }
  0x8e   : > { %10916 = shalt.err (!%p10913_p3)
}
  0x8f   : > { %s10917_s0 = scalar_lea.vmem %s11826_s29, 12288  ;;  %s11516_s3 = smov [#allocation7]  }
  0x90   : > { %p10918_p6 = scmp.ne.s32.totalorder %s11826_s29, %s10917_s0  ;;  %s10921_s8 = sshll.u32 %s11516_s3, 4  ;;  %s10922_s8 = int_to_ptr.vmem [resolvable:$false] %s10921_s8 }
  0x91   : > { %s10923_s9 = scalar_lea.vmem %s10922_s8, 24576  ;;  %p10924_p13 = scmp.lt.s32.totalorder %s11826_s29, %s10922_s8 }
  0x92   : > { %p10919_p7 = pnand %p10918_p6, %p13748_p0  ;;  %p10925_p12 = scmp.lt.s32.totalorder %s10923_s9, %s10917_s0 }
  0x94   : > { %p10920_p11 = pneg %p10919_p7  ;;  %p10926_p1 = por %p10925_p12, %p10924_p13 }
  0x96   : > { %p10927_p4 = pnand %p10926_p1, %p10920_p11 }
  0x98   : > { %10930 = shalt.err (!%p10927_p4)
}
  0x99   : > { %s11517_s22 = smov 384   ;;  %s11518_s23 = smov 24  }
  0x9a   : > { %10027 = dma.hbm_to_vmem [thread:$0]  (%p13748_p0), %s11824_s25, 12288, %s11826_s29, %s11829_s21, %s11517_s22, %s11517_s22, %s11518_s23  }
  0x9b   : > { %s10018_s4 = smul.u32 96, %s11509_s30  ;;  %s767_s7 = scalar_lea.vmem [#allocation8], %s10017_s5 }
  0x9c   : > { %s775_s26 = sshll.u32 %s767_s7, 4  ;;  %s11857_s0 = sshll.u32 %s11817_s2, 8  ;;  %s776_s26 = int_to_ptr.vmem [resolvable:$true] %s775_s26 }
  0x9d   : > { %s13749_s9 = sld [smem:[#allocation44_spill]] }
  0xa3   : > { %s773_s1 = scalar_lea.hbm %s13749_s9, %s10018_s4  ;;  %s10935_s25 = scalar_lea.hbm %s13749_s9, 384 }
  0xa4   : > { %s10931_s24 = scalar_lea.hbm %s773_s1, 96  ;;  %p10936_p10 = scmp.lt.u32.totalorder %s773_s1, %s13749_s9 }
  0xa5   : > { %p10932_p5 = scmp.ne.s32.totalorder %s773_s1, %s10931_s24  ;;  %p10937_p2 = scmp.lt.u32.totalorder %s10935_s25, %s10931_s24 }
  0xa6   : > { %p10939_p6 = scmp.lt.u32.totalorder %s10931_s24, %s773_s1 }
  0xa7   : > { %p10933_p8 = pnand %p10932_p5, %p13748_p0  ;;  %p10938_p3 = por %p10937_p2, %p10936_p10 }
  0xa9   : > { %p10934_p9 = pneg %p10933_p8  ;;  %p10940_p7 = por %p10939_p6, %p10938_p3 }
  0xab   : > { %p10941_p11 = pnand %p10940_p7, %p10934_p9 }
  0xad   : > { %10944 = shalt.err (!%p10941_p11)
}
  0xae   : > { %s10945_s5 = scalar_lea.vmem %s776_s26, 96  ;;  %s11519_s23 = smov [#allocation8]  }
  0xaf   : > { %p10946_p13 = scmp.ne.s32.totalorder %s776_s26, %s10945_s5  ;;  %s10949_s4 = sshll.u32 %s11519_s23, 4  ;;  %s10950_s4 = int_to_ptr.vmem [resolvable:$false] %s10949_s4 }
  0xb0   : > { %s10951_s6 = scalar_lea.vmem %s10950_s4, 192  ;;  %p10952_p4 = scmp.lt.s32.totalorder %s776_s26, %s10950_s4 }
  0xb1   : > { %p10947_p12 = pnand %p10946_p13, %p13748_p0  ;;  %p10953_p5 = scmp.lt.s32.totalorder %s10951_s6, %s10945_s5 }
  0xb3   : > { %p10948_p1 = pneg %p10947_p12  ;;  %p10954_p8 = por %p10953_p5, %p10952_p4 }
  0xb5   : > { %p10955_p2 = pnand %p10954_p8, %p10948_p1 }
  0xb7   : > { %10958 = shalt.err (!%p10955_p2)
}
  0xb8   : > { %10028 = dma.hbm_to_vmem [thread:$0]  (%p13748_p0), %s773_s1, 96, %s776_s26, %s11829_s21  }
  0xb9   : > { %s11876_s24 = sshll.u32 %s11509_s30, 12  ;;  %s13750_s3 = sld [smem:[#allocation45_spill]] }
  0xba   : > { %s786_s25 = scalar_lea.vmem [#allocation9], %s11857_s0  ;;  %s11888_s22 = sshll.u32 %s11817_s2, 1 }
  0xbb   : > { %s793_s29 = sshll.u32 %s786_s25, 4  ;;  %s11885_s29 = int_to_ptr.vmem [resolvable:$true] %s793_s29 }
  0xbf   : > { %s11882_s8 = scalar_lea.hbm %s13750_s3, %s11876_s24  ;;  %s10963_s23 = scalar_lea.hbm %s13750_s3, 16384 }
  0xc0   : > { %s10959_s5 = scalar_lea.hbm %s11882_s8, 4096  ;;  %p10964_p6 = scmp.lt.u32.totalorder %s11882_s8, %s13750_s3 }
  0xc1   : > { %p10960_p9 = scmp.ne.s32.totalorder %s11882_s8, %s10959_s5  ;;  %p10965_p7 = scmp.lt.u32.totalorder %s10963_s23, %s10959_s5 }
  0xc2   : > { %p10967_p13 = scmp.lt.u32.totalorder %s10959_s5, %s11882_s8 }
  0xc3   : > { %p10961_p10 = pnand %p10960_p9, %p13748_p0  ;;  %p10966_p11 = por %p10965_p7, %p10964_p6 }
  0xc5   : > { %p10962_p3 = pneg %p10961_p10  ;;  %p10968_p12 = por %p10967_p13, %p10966_p11 }
  0xc7   : > { %p10969_p1 = pnand %p10968_p12, %p10962_p3 }
  0xc9   : > { %10972 = shalt.err (!%p10969_p1)
}
  0xca   : > { %s10973_s28 = scalar_lea.vmem %s11885_s29, 4096  ;;  %s11520_s7 = smov [#allocation9]  }
  0xcb   : > { %p10974_p4 = scmp.ne.s32.totalorder %s11885_s29, %s10973_s28  ;;  %s10977_s25 = sshll.u32 %s11520_s7, 4  ;;  %s10978_s25 = int_to_ptr.vmem [resolvable:$false] %s10977_s25 }
  0xcc   : > { %s10979_s1 = scalar_lea.vmem %s10978_s25, 8192  ;;  %p10980_p2 = scmp.lt.s32.totalorder %s11885_s29, %s10978_s25 }
  0xcd   : > { %p10975_p5 = pnand %p10974_p4, %p13748_p0  ;;  %p10981_p9 = scmp.lt.s32.totalorder %s10979_s1, %s10973_s28 }
  0xcf   : > { %p10976_p8 = pneg %p10975_p5  ;;  %p10982_p10 = por %p10981_p9, %p10980_p2 }
  0xd1   : > { %p10983_p6 = pnand %p10982_p10, %p10976_p8 }
  0xd3   : > { %10986 = shalt.err (!%p10983_p6)
}
  0xd4   : > { %s13702_s5 = smov 128   ;;  %s13704_s26 = smov 8  }
  0xd5   : > { %10029 = dma.hbm_to_vmem [thread:$0]  (%p13748_p0), %s11882_s8, 4096, %s11885_s29, %s11829_s21, %s13702_s5, %s13702_s5, %s13704_s26  }
  0xd6   : > { %s11916_s23 = sshll.u32 %s11509_s30, 5  ;;  %s13751_s28 = sld [smem:[#allocation46_spill]] }
  0xd7   : > { %s807_s25 = scalar_lea.vmem [#allocation10], %s11888_s22 }
  0xd8   : > { %s815_s1 = sshll.u32 %s807_s25, 4  ;;  %s816_s1 = int_to_ptr.vmem [resolvable:$true] %s815_s1 }
  0xdc   : > { %s11922_s7 = scalar_lea.hbm %s13751_s28, %s11916_s23  ;;  %s10991_s5 = scalar_lea.hbm %s13751_s28, 128 }
  0xdd   : > { %s10987_s3 = scalar_lea.hbm %s11922_s7, 32  ;;  %p10992_p13 = scmp.lt.u32.totalorder %s11922_s7, %s13751_s28 }
  0xde   : > { %p10988_p3 = scmp.ne.s32.totalorder %s11922_s7, %s10987_s3  ;;  %p10993_p12 = scmp.lt.u32.totalorder %s10991_s5, %s10987_s3 }
  0xdf   : > { %p10995_p4 = scmp.lt.u32.totalorder %s10987_s3, %s11922_s7 }
  0xe0   : > { %p10989_p7 = pnand %p10988_p3, %p13748_p0  ;;  %p10994_p1 = por %p10993_p12, %p10992_p13 }
  0xe2   : > { %p10990_p11 = pneg %p10989_p7  ;;  %p10996_p5 = por %p10995_p4, %p10994_p1 }
  0xe4   : > { %p10997_p8 = pnand %p10996_p5, %p10990_p11 }
  0xe6   : > { %11000 = shalt.err (!%p10997_p8)
}
  0xe7   : > { %s11001_s6 = scalar_lea.vmem %s816_s1, 32  ;;  %s11523_s25 = smov [#allocation10]  }
  0xe8   : > { %p11002_p2 = scmp.ne.s32.totalorder %s816_s1, %s11001_s6  ;;  %s11005_s9 = sshll.u32 %s11523_s25, 4  ;;  %s11006_s9 = int_to_ptr.vmem [resolvable:$false] %s11005_s9 }
  0xe9   : > { %s11007_s8 = scalar_lea.vmem %s11006_s9, 64  ;;  %p11008_p6 = scmp.lt.s32.totalorder %s816_s1, %s11006_s9 }
  0xea   : > { %p11003_p9 = pnand %p11002_p2, %p13748_p0  ;;  %p11009_p3 = scmp.lt.s32.totalorder %s11007_s8, %s11001_s6 }
  0xec   : > { %p11004_p10 = pneg %p11003_p9  ;;  %p11010_p7 = por %p11009_p3, %p11008_p6 }
  0xee   : > { %p11011_p12 = pnand %p11010_p7, %p11004_p10 }
  0xf0   : > { %11014 = shalt.err (!%p11011_p12)
}
  0xf1   : > { %10030 = dma.hbm_to_vmem [thread:$0]  (%p13748_p0), %s11922_s7, 32, %s816_s1, %s11829_s21  }
  0xf2   : > { %s13752_s26 = sld [smem:[#allocation47_spill]]  ;;  %s826_s9 = scalar_lea.vmem [#allocation11], %s11888_s22 }
  0xf3   : > { %s834_s4 = sshll.u32 %s826_s9, 4  ;;  %s835_s4 = int_to_ptr.vmem [resolvable:$true] %s834_s4 }
  0xf8   : > { %s11947_s29 = scalar_lea.hbm %s13752_s26, %s11916_s23  ;;  %s11019_s7 = scalar_lea.hbm %s13752_s26, 128 }
  0xf9   : > { %s11015_s6 = scalar_lea.hbm %s11947_s29, 32  ;;  %p11020_p4 = scmp.lt.u32.totalorder %s11947_s29, %s13752_s26 }
  0xfa   : > { %p11016_p11 = scmp.ne.s32.totalorder %s11947_s29, %s11015_s6  ;;  %p11021_p5 = scmp.lt.u32.totalorder %s11019_s7, %s11015_s6 }
  0xfb   : > { %p11023_p2 = scmp.lt.u32.totalorder %s11015_s6, %s11947_s29 }
  0xfc   : > { %p11017_p13 = pnand %p11016_p11, %p13748_p0  ;;  %p11022_p8 = por %p11021_p5, %p11020_p4 }
  0xfe   : > { %p11018_p1 = pneg %p11017_p13  ;;  %p11024_p9 = por %p11023_p2, %p11022_p8 }
 0x100   : > { %p11025_p10 = pnand %p11024_p9, %p11018_p1 }
 0x102   : > { %11028 = shalt.err (!%p11025_p10)
}
 0x103   : > { %s11029_s5 = scalar_lea.vmem %s835_s4, 32  ;;  %s11524_s9 = smov [#allocation11]  }
 0x104   : > { %p11030_p6 = scmp.ne.s32.totalorder %s835_s4, %s11029_s5  ;;  %s11033_s28 = sshll.u32 %s11524_s9, 4  ;;  %s11034_s28 = int_to_ptr.vmem [resolvable:$false] %s11033_s28 }
 0x105   : > { %s11035_s25 = scalar_lea.vmem %s11034_s28, 64  ;;  %p11036_p12 = scmp.lt.s32.totalorder %s835_s4, %s11034_s28 }
 0x106   : > { %p11031_p3 = pnand %p11030_p6, %p13748_p0  ;;  %p11037_p11 = scmp.lt.s32.totalorder %s11035_s25, %s11029_s5 }
 0x108   : > { %p11032_p7 = pneg %p11031_p3  ;;  %p11038_p13 = por %p11037_p11, %p11036_p12 }
 0x10a   : > { %p11039_p4 = pnand %p11038_p13, %p11032_p7 }
 0x10c   : > { %11042 = shalt.err (!%p11039_p4)
}
 0x10d   : > { %10031 = dma.hbm_to_vmem [thread:$0]  (%p13748_p0), %s11947_s29, 32, %s835_s4, %s11829_s21  }
 0x10e   : > { %s13753_s7 = sld [smem:[#allocation48_spill]]  ;;  %s845_s28 = scalar_lea.vmem [#allocation12], %s11888_s22 }
 0x10f   : > { %s853_s3 = sshll.u32 %s845_s28, 4  ;;  %s854_s3 = int_to_ptr.vmem [resolvable:$true] %s853_s3 }
 0x114   : > { %s11972_s1 = scalar_lea.hbm %s13753_s7, %s11916_s23  ;;  %s11047_s29 = scalar_lea.hbm %s13753_s7, 128 }
 0x115   : > { %s11043_s5 = scalar_lea.hbm %s11972_s1, 32  ;;  %p11048_p2 = scmp.lt.u32.totalorder %s11972_s1, %s13753_s7 }
 0x116   : > { %p11044_p1 = scmp.ne.s32.totalorder %s11972_s1, %s11043_s5  ;;  %p11049_p9 = scmp.lt.u32.totalorder %s11047_s29, %s11043_s5 }
 0x117   : > { %p11051_p6 = scmp.lt.u32.totalorder %s11043_s5, %s11972_s1 }
 0x118   : > { %p11045_p5 = pnand %p11044_p1, %p13748_p0  ;;  %p11050_p10 = por %p11049_p9, %p11048_p2 }
 0x11a   : > { %p11046_p8 = pneg %p11045_p5  ;;  %p11052_p3 = por %p11051_p6, %p11050_p10 }
 0x11c   : > { %p11053_p7 = pnand %p11052_p3, %p11046_p8 }
 0x11e   : > { %11056 = shalt.err (!%p11053_p7)
}
 0x11f   : > { %s11057_s8 = scalar_lea.vmem %s854_s3, 32  ;;  %s11525_s28 = smov [#allocation12]  }
 0x120   : > { %p11058_p12 = scmp.ne.s32.totalorder %s854_s3, %s11057_s8  ;;  %s11061_s26 = sshll.u32 %s11525_s28, 4  ;;  %s11062_s26 = int_to_ptr.vmem [resolvable:$false] %s11061_s26 }
 0x121   : > { %s11063_s9 = scalar_lea.vmem %s11062_s26, 64  ;;  %p11064_p4 = scmp.lt.s32.totalorder %s854_s3, %s11062_s26 }
 0x122   : > { %p11059_p11 = pnand %p11058_p12, %p13748_p0  ;;  %p11065_p1 = scmp.lt.s32.totalorder %s11063_s9, %s11057_s8 }
 0x124   : > { %p11060_p13 = pneg %p11059_p11  ;;  %p11066_p5 = por %p11065_p1, %p11064_p4 }
 0x126   : > { %p11067_p2 = pnand %p11066_p5, %p11060_p13 }
 0x128   : > { %11070 = shalt.err (!%p11067_p2)
}
 0x129   : > { %10032 = dma.hbm_to_vmem [thread:$0]  (%p13748_p0), %s11972_s1, 32, %s854_s3, %s11829_s21  }
 0x12a   : > { %s13754_s10 = sld [smem:[#allocation49_spill]]  ;;  %s864_s26 = scalar_lea.vmem [#allocation13], %s11857_s0 }
 0x12b   : > { %s871_s4 = sshll.u32 %s864_s26, 4  ;;  %s12000_s4 = int_to_ptr.vmem [resolvable:$true] %s871_s4 }
 0x130   : > { %s11997_s29 = scalar_lea.hbm %s13754_s10, %s11876_s24  ;;  %s11075_s3 = scalar_lea.hbm %s13754_s10, 16384 }
 0x131   : > { %s11071_s6 = scalar_lea.hbm %s11997_s29, 4096  ;;  %p11076_p6 = scmp.lt.u32.totalorder %s11997_s29, %s13754_s10 }
 0x132   : > { %p11072_p8 = scmp.ne.s32.totalorder %s11997_s29, %s11071_s6  ;;  %p11077_p3 = scmp.lt.u32.totalorder %s11075_s3, %s11071_s6 }
 0x133   : > { %p11079_p12 = scmp.lt.u32.totalorder %s11071_s6, %s11997_s29 }
 0x134   : > { %p11073_p9 = pnand %p11072_p8, %p13748_p0  ;;  %p11078_p7 = por %p11077_p3, %p11076_p6 }
 0x136   : > { %p11074_p10 = pneg %p11073_p9  ;;  %p11080_p11 = por %p11079_p12, %p11078_p7 }
 0x138   : > { %p11081_p13 = pnand %p11080_p11, %p11074_p10 }
 0x13a   : > { %11084 = shalt.err (!%p11081_p13)
}
 0x13b   : > { %s11085_s5 = scalar_lea.vmem %s12000_s4, 4096  ;;  %s11526_s25 = smov [#allocation13]  }
 0x13c   : > { %p11086_p4 = scmp.ne.s32.totalorder %s12000_s4, %s11085_s5  ;;  %s11089_s26 = sshll.u32 %s11526_s25, 4  ;;  %s11090_s26 = int_to_ptr.vmem [resolvable:$false] %s11089_s26 }
 0x13d   : > { %s11091_s8 = scalar_lea.vmem %s11090_s26, 8192  ;;  %p11092_p2 = scmp.lt.s32.totalorder %s12000_s4, %s11090_s26 }
 0x13e   : > { %p11087_p1 = pnand %p11086_p4, %p13748_p0  ;;  %p11093_p8 = scmp.lt.s32.totalorder %s11091_s8, %s11085_s5 }
 0x140   : > { %p11088_p5 = pneg %p11087_p1  ;;  %p11094_p9 = por %p11093_p8, %p11092_p2 }
 0x142   : > { %p11095_p6 = pnand %p11094_p9, %p11088_p5 }
 0x144   : > { %11098 = shalt.err (!%p11095_p6)
}
 0x145   : > { %s13755_s6 = smov 8   ;;  %s13756_s1 = smov 128  }
 0x146   : > { %10033 = dma.hbm_to_vmem [thread:$0]  (%p13748_p0), %s11997_s29, 4096, %s12000_s4, %s11829_s21, %s13756_s1, %s13756_s1, %s13755_s6  }
 0x147   : > { %s13757_s11 = sld [smem:[#allocation50_spill]]  ;;  %s885_s5 = scalar_lea.vmem [#allocation14], %s11888_s22 }
 0x148   : > { %s893_s25 = sshll.u32 %s885_s5, 4  ;;  %s894_s25 = int_to_ptr.vmem [resolvable:$true] %s893_s25 }
 0x14d   : > { %s12031_s9 = scalar_lea.hbm %s13757_s11, %s11916_s23  ;;  %s11103_s4 = scalar_lea.hbm %s13757_s11, 128 }
 0x14e   : > { %s11099_s8 = scalar_lea.hbm %s12031_s9, 32  ;;  %p11104_p12 = scmp.lt.u32.totalorder %s12031_s9, %s13757_s11 }
 0x14f   : > { %p11100_p10 = scmp.ne.s32.totalorder %s12031_s9, %s11099_s8  ;;  %p11105_p11 = scmp.lt.u32.totalorder %s11103_s4, %s11099_s8 }
 0x150   : > { %p11107_p4 = scmp.lt.u32.totalorder %s11099_s8, %s12031_s9 }
 0x151   : > { %p11101_p3 = pnand %p11100_p10, %p13748_p0  ;;  %p11106_p13 = por %p11105_p11, %p11104_p12 }
 0x153   : > { %p11102_p7 = pneg %p11101_p3  ;;  %p11108_p1 = por %p11107_p4, %p11106_p13 }
 0x155   : > { %p11109_p5 = pnand %p11108_p1, %p11102_p7 }
 0x157   : > { %11112 = shalt.err (!%p11109_p5)
}
 0x158   : > { %s11113_s5 = scalar_lea.vmem %s894_s25, 32  ;;  %s11527_s26 = smov [#allocation14]  }
 0x159   : > { %p11114_p2 = scmp.ne.s32.totalorder %s894_s25, %s11113_s5  ;;  %s11117_s10 = sshll.u32 %s11527_s26, 4  ;;  %s11118_s10 = int_to_ptr.vmem [resolvable:$false] %s11117_s10 }
 0x15a   : > { %s11119_s7 = scalar_lea.vmem %s11118_s10, 64  ;;  %p11120_p6 = scmp.lt.s32.totalorder %s894_s25, %s11118_s10 }
 0x15b   : > { %p11115_p8 = pnand %p11114_p2, %p13748_p0  ;;  %p11121_p10 = scmp.lt.s32.totalorder %s11119_s7, %s11113_s5 }
 0x15d   : > { %p11116_p9 = pneg %p11115_p8  ;;  %p11122_p3 = por %p11121_p10, %p11120_p6 }
 0x15f   : > { %p11123_p11 = pnand %p11122_p3, %p11116_p9 }
 0x161   : > { %11126 = shalt.err (!%p11123_p11)
}
 0x162   : > { %10034 = dma.hbm_to_vmem [thread:$0]  (%p13748_p0), %s12031_s9, 32, %s894_s25, %s11829_s21  }
 0x163   : > { %s9731_s8 = sshll.u32 %s11509_s30, 13  ;;  %s13758_s12 = sld [smem:[#allocation51_spill]] }
 0x164   : > { %s13759_s10 = sshll.u32 %s11817_s2, 9  ;;  %s8992_s5 = sshll.u32 %s11817_s2, 2 }
 0x165   : > { %s904_s3 = scalar_lea.vmem [#allocation15], %s13759_s10 }
 0x166   : > { %s911_s28 = sshll.u32 %s904_s3, 4  ;;  %s12061_s28 = int_to_ptr.vmem [resolvable:$true] %s911_s28 }
 0x169   : > { %s12057_s26 = scalar_lea.hbm %s13758_s12, %s9731_s8  ;;  %s11131_s8 = scalar_lea.hbm %s13758_s12, 32768 }
 0x16a   : > { %s11127_s7 = scalar_lea.hbm %s12057_s26, 8192  ;;  %p11132_p4 = scmp.lt.u32.totalorder %s12057_s26, %s13758_s12 }
 0x16b   : > { %p11128_p7 = scmp.ne.s32.totalorder %s12057_s26, %s11127_s7  ;;  %p11133_p1 = scmp.lt.u32.totalorder %s11131_s8, %s11127_s7 }
 0x16c   : > { %p11135_p2 = scmp.lt.u32.totalorder %s11127_s7, %s12057_s26 }
 0x16d   : > { %p11129_p12 = pnand %p11128_p7, %p13748_p0  ;;  %p11134_p5 = por %p11133_p1, %p11132_p4 }
 0x16f   : > { %p11130_p13 = pneg %p11129_p12  ;;  %p11136_p8 = por %p11135_p2, %p11134_p5 }
 0x171   : > { %p11137_p9 = pnand %p11136_p8, %p11130_p13 }
 0x173   : > { %11140 = shalt.err (!%p11137_p9)
}
 0x174   : > { %s11141_s10 = scalar_lea.vmem %s12061_s28, 8192  ;;  %s11528_s3 = smov [#allocation15]  }
 0x175   : > { %p11142_p6 = scmp.ne.s32.totalorder %s12061_s28, %s11141_s10  ;;  %s11145_s9 = sshll.u32 %s11528_s3, 4  ;;  %s11146_s9 = int_to_ptr.vmem [resolvable:$false] %s11145_s9 }
 0x176   : > { %s11147_s25 = scalar_lea.vmem %s11146_s9, 16384  ;;  %p11148_p11 = scmp.lt.s32.totalorder %s12061_s28, %s11146_s9 }
 0x177   : > { %p11143_p10 = pnand %p11142_p6, %p13748_p0  ;;  %p11149_p7 = scmp.lt.s32.totalorder %s11147_s25, %s11141_s10 }
 0x179   : > { %p11144_p3 = pneg %p11143_p10  ;;  %p11150_p12 = por %p11149_p7, %p11148_p11 }
 0x17b   : > { %p11151_p4 = pnand %p11150_p12, %p11144_p3 }
 0x17d   : > { %11154 = shalt.err (!%p11151_p4)
}
 0x17e   : > { %s11529_s7 = smov 256   ;;  %s11530_s8 = smov 16  }
 0x17f   : > { %10035 = dma.hbm_to_vmem [thread:$0]  (%p13748_p0), %s12057_s26, 8192, %s12061_s28, %s11829_s21, %s11529_s7, %s11529_s7, %s11530_s8  }
 0x180   : > { %s9732_s29 = sshll.u32 %s11509_s30, 6  ;;  %s13760_s13 = sld [smem:[#allocation52_spill]] }
 0x181   : > { %s925_s10 = scalar_lea.vmem [#allocation16], %s8992_s5 }
 0x182   : > { %s933_s25 = sshll.u32 %s925_s10, 4  ;;  %s934_s25 = int_to_ptr.vmem [resolvable:$true] %s933_s25 }
 0x186   : > { %s12090_s9 = scalar_lea.hbm %s13760_s13, %s9732_s29  ;;  %s11159_s7 = scalar_lea.hbm %s13760_s13, 256 }
 0x187   : > { %s11155_s11 = scalar_lea.hbm %s12090_s9, 64  ;;  %p11160_p2 = scmp.lt.u32.totalorder %s12090_s9, %s13760_s13 }
 0x188   : > { %p11156_p13 = scmp.ne.s32.totalorder %s12090_s9, %s11155_s11  ;;  %p11161_p8 = scmp.lt.u32.totalorder %s11159_s7, %s11155_s11 }
 0x189   : > { %p11163_p6 = scmp.lt.u32.totalorder %s11155_s11, %s12090_s9 }
 0x18a   : > { %p11157_p1 = pnand %p11156_p13, %p13748_p0  ;;  %p11162_p9 = por %p11161_p8, %p11160_p2 }
 0x18c   : > { %p11158_p5 = pneg %p11157_p1  ;;  %p11164_p10 = por %p11163_p6, %p11162_p9 }
 0x18e   : > { %p11165_p3 = pnand %p11164_p10, %p11158_p5 }
 0x190   : > { %11168 = shalt.err (!%p11165_p3)
}
 0x191   : > { %s11169_s5 = scalar_lea.vmem %s934_s25, 64  ;;  %s11531_s4 = smov [#allocation16]  }
 0x192   : > { %p11170_p11 = scmp.ne.s32.totalorder %s934_s25, %s11169_s5  ;;  %s11173_s3 = sshll.u32 %s11531_s4, 4  ;;  %s11174_s3 = int_to_ptr.vmem [resolvable:$false] %s11173_s3 }
 0x193   : > { %s11175_s10 = scalar_lea.vmem %s11174_s3, 128  ;;  %p11176_p4 = scmp.lt.s32.totalorder %s934_s25, %s11174_s3 }
 0x194   : > { %p11171_p7 = pnand %p11170_p11, %p13748_p0  ;;  %p11177_p13 = scmp.lt.s32.totalorder %s11175_s10, %s11169_s5 }
 0x196   : > { %p11172_p12 = pneg %p11171_p7  ;;  %p11178_p1 = por %p11177_p13, %p11176_p4 }
 0x198   : > { %p11179_p2 = pnand %p11178_p1, %p11172_p12 }
 0x19a   : > { %11182 = shalt.err (!%p11179_p2)
}
 0x19b   : > { %10036 = dma.hbm_to_vmem [thread:$0]  (%p13748_p0), %s12090_s9, 64, %s934_s25, %s11829_s21  }
 0x19c   : > { %s13761_s14 = sld [smem:[#allocation53_spill]]  ;;  %s944_s7 = scalar_lea.vmem [#allocation17], %s11857_s0 }
 0x19d   : > { %s951_s8 = sshll.u32 %s944_s7, 4  ;;  %s12119_s8 = int_to_ptr.vmem [resolvable:$true] %s951_s8 }
 0x1a2   : > { %s12116_s28 = scalar_lea.hbm %s13761_s14, %s11876_s24  ;;  %s11187_s25 = scalar_lea.hbm %s13761_s14, 16384 }
 0x1a3   : > { %s11183_s29 = scalar_lea.hbm %s12116_s28, 4096  ;;  %p11188_p6 = scmp.lt.u32.totalorder %s12116_s28, %s13761_s14 }
 0x1a4   : > { %p11184_p5 = scmp.ne.s32.totalorder %s12116_s28, %s11183_s29  ;;  %p11189_p10 = scmp.lt.u32.totalorder %s11187_s25, %s11183_s29 }
 0x1a5   : > { %p11191_p11 = scmp.lt.u32.totalorder %s11183_s29, %s12116_s28 }
 0x1a6   : > { %p11185_p8 = pnand %p11184_p5, %p13748_p0  ;;  %p11190_p3 = por %p11189_p10, %p11188_p6 }
 0x1a8   : > { %p11186_p9 = pneg %p11185_p8  ;;  %p11192_p7 = por %p11191_p11, %p11190_p3 }
 0x1aa   : > { %p11193_p12 = pnand %p11192_p7, %p11186_p9 }
 0x1ac   : > { %11196 = shalt.err (!%p11193_p12)
}
 0x1ad   : > { %s11197_s0 = scalar_lea.vmem %s12119_s8, 4096  ;;  %s11532_s3 = smov [#allocation17]  }
 0x1ae   : > { %p11198_p4 = scmp.ne.s32.totalorder %s12119_s8, %s11197_s0  ;;  %s11201_s10 = sshll.u32 %s11532_s3, 4  ;;  %s11202_s10 = int_to_ptr.vmem [resolvable:$false] %s11201_s10 }
 0x1af   : > { %s11203_s11 = scalar_lea.vmem %s11202_s10, 8192  ;;  %p11204_p2 = scmp.lt.s32.totalorder %s12119_s8, %s11202_s10 }
 0x1b0   : > { %p11199_p13 = pnand %p11198_p4, %p13748_p0  ;;  %p11205_p5 = scmp.lt.s32.totalorder %s11203_s11, %s11197_s0 }
 0x1b2   : > { %p11200_p1 = pneg %p11199_p13  ;;  %p11206_p8 = por %p11205_p5, %p11204_p2 }
 0x1b4   : > { %p11207_p6 = pnand %p11206_p8, %p11200_p1 }
 0x1b6   : > { %11210 = shalt.err (!%p11207_p6)
}
 0x1b7   : > { %10037 = dma.hbm_to_vmem [thread:$0]  (%p13748_p0), %s12116_s28, 4096, %s12119_s8, %s11829_s21, %s13756_s1, %s13756_s1, %s13755_s6  }
 0x1b8   : > { %s12150_s29 = scalar_lea.hbm %s13660_s15, %s11916_s23  ;;  %s965_s5 = scalar_lea.vmem [#allocation18], %s11888_s22 }
 0x1b9   : > { %s973_s9 = sshll.u32 %s965_s5, 4  ;;  %s11211_s25 = scalar_lea.hbm %s12150_s29, 32  ;;  %s974_s9 = int_to_ptr.vmem [resolvable:$true] %s973_s9 }
 0x1ba   : > { %p11212_p9 = scmp.ne.s32.totalorder %s12150_s29, %s11211_s25  ;;  %s11215_s28 = scalar_lea.hbm %s13660_s15, 128 }
 0x1bb   : > { %p11216_p11 = scmp.lt.u32.totalorder %s12150_s29, %s13660_s15  ;;  %p11217_p7 = scmp.lt.u32.totalorder %s11215_s28, %s11211_s25 }
 0x1bc   : > { %p11213_p10 = pnand %p11212_p9, %p13748_p0  ;;  %p11219_p4 = scmp.lt.u32.totalorder %s11211_s25, %s12150_s29 }
 0x1bd   : > { %p11218_p12 = por %p11217_p7, %p11216_p11 }
 0x1be   : > { %p11214_p3 = pneg %p11213_p10 }
 0x1bf   : > { %p11220_p13 = por %p11219_p4, %p11218_p12 }
 0x1c1   : > { %p11221_p1 = pnand %p11220_p13, %p11214_p3 }
 0x1c3   : > { %11224 = shalt.err (!%p11221_p1)
}
 0x1c4   : > { %s11225_s3 = scalar_lea.vmem %s974_s9, 32  ;;  %s11533_s10 = smov [#allocation18]  }
 0x1c5   : > { %p11226_p2 = scmp.ne.s32.totalorder %s974_s9, %s11225_s3  ;;  %s11229_s11 = sshll.u32 %s11533_s10, 4  ;;  %s11230_s11 = int_to_ptr.vmem [resolvable:$false] %s11229_s11 }
 0x1c6   : > { %s11231_s26 = scalar_lea.vmem %s11230_s11, 64  ;;  %p11232_p6 = scmp.lt.s32.totalorder %s974_s9, %s11230_s11 }
 0x1c7   : > { %p11227_p5 = pnand %p11226_p2, %p13748_p0  ;;  %p11233_p9 = scmp.lt.s32.totalorder %s11231_s26, %s11225_s3 }
 0x1c9   : > { %p11228_p8 = pneg %p11227_p5  ;;  %p11234_p10 = por %p11233_p9, %p11232_p6 }
 0x1cb   : > { %p11235_p7 = pnand %p11234_p10, %p11228_p8 }
 0x1cd   : > { %11238 = shalt.err (!%p11235_p7)
}
 0x1ce   : > { %10038 = dma.hbm_to_vmem [thread:$0]  (%p13748_p0), %s12150_s29, 32, %s974_s9, %s11829_s21  }
 0x1cf   : > { %s12175_s25 = scalar_lea.hbm %s13661_s16, %s11916_s23  ;;  %s984_s4 = scalar_lea.vmem [#allocation19], %s11888_s22 }
 0x1d0   : > { %s992_s24 = sshll.u32 %s984_s4, 4  ;;  %s11239_s28 = scalar_lea.hbm %s12175_s25, 32  ;;  %s993_s24 = int_to_ptr.vmem [resolvable:$true] %s992_s24 }
 0x1d1   : > { %p11240_p3 = scmp.ne.s32.totalorder %s12175_s25, %s11239_s28  ;;  %s11243_s29 = scalar_lea.hbm %s13661_s16, 128 }
 0x1d2   : > { %p11244_p4 = scmp.lt.u32.totalorder %s12175_s25, %s13661_s16  ;;  %p11245_p13 = scmp.lt.u32.totalorder %s11243_s29, %s11239_s28 }
 0x1d3   : > { %p11241_p11 = pnand %p11240_p3, %p13748_p0  ;;  %p11247_p2 = scmp.lt.u32.totalorder %s11239_s28, %s12175_s25 }
 0x1d4   : > { %p11246_p1 = por %p11245_p13, %p11244_p4 }
 0x1d5   : > { %p11242_p12 = pneg %p11241_p11 }
 0x1d6   : > { %p11248_p5 = por %p11247_p2, %p11246_p1 }
 0x1d8   : > { %p11249_p8 = pnand %p11248_p5, %p11242_p12 }
 0x1da   : > { %11252 = shalt.err (!%p11249_p8)
}
 0x1db   : > { %s11253_s10 = scalar_lea.vmem %s993_s24, 32  ;;  %s11534_s11 = smov [#allocation19]  }
 0x1dc   : > { %p11254_p6 = scmp.ne.s32.totalorder %s993_s24, %s11253_s10  ;;  %s11257_s26 = sshll.u32 %s11534_s11, 4  ;;  %s11258_s26 = int_to_ptr.vmem [resolvable:$false] %s11257_s26 }
 0x1dd   : > { %s11259_s7 = scalar_lea.vmem %s11258_s26, 64  ;;  %p11260_p7 = scmp.lt.s32.totalorder %s993_s24, %s11258_s26 }
 0x1de   : > { %p11255_p9 = pnand %p11254_p6, %p13748_p0  ;;  %p11261_p3 = scmp.lt.s32.totalorder %s11259_s7, %s11253_s10 }
 0x1e0   : > { %p11256_p10 = pneg %p11255_p9  ;;  %p11262_p11 = por %p11261_p3, %p11260_p7 }
 0x1e2   : > { %p11263_p4 = pnand %p11262_p11, %p11256_p10 }
 0x1e4   : > { %11266 = shalt.err (!%p11263_p4)
}
 0x1e5   : > { %10039 = dma.hbm_to_vmem [thread:$0]  (%p13748_p0), %s12175_s25, 32, %s993_s24, %s11829_s21  }
 0x1e6   : > { %s12200_s28 = scalar_lea.hbm %s13662_s17, %s11916_s23  ;;  %s1003_s8 = scalar_lea.vmem [#allocation20], %s11888_s22 }
 0x1e7   : > { %s1011_s0 = sshll.u32 %s1003_s8, 4  ;;  %s9007_s29 = sshll.u32 %s11817_s2, 10  ;;  %s1012_s0 = int_to_ptr.vmem [resolvable:$true] %s1011_s0 }
 0x1e8   : > { %s11267_s9 = scalar_lea.hbm %s12200_s28, 32  ;;  %s11271_s24 = scalar_lea.hbm %s13662_s17, 128 }
 0x1e9   : > { %p11268_p12 = scmp.ne.s32.totalorder %s12200_s28, %s11267_s9  ;;  %p11272_p2 = scmp.lt.u32.totalorder %s12200_s28, %s13662_s17 }
 0x1ea   : > { %p11273_p5 = scmp.lt.u32.totalorder %s11271_s24, %s11267_s9  ;;  %p11275_p6 = scmp.lt.u32.totalorder %s11267_s9, %s12200_s28 }
 0x1eb   : > { %p11269_p13 = pnand %p11268_p12, %p13748_p0 }
 0x1ec   : > { %p11274_p8 = por %p11273_p5, %p11272_p2 }
 0x1ed   : > { %p11270_p1 = pneg %p11269_p13 }
 0x1ee   : > { %p11276_p9 = por %p11275_p6, %p11274_p8 }
 0x1f0   : > { %p11277_p10 = pnand %p11276_p9, %p11270_p1 }
 0x1f2   : > { %11280 = shalt.err (!%p11277_p10)
}
 0x1f3   : > { %s11281_s26 = scalar_lea.vmem %s1012_s0, 32  ;;  %s11535_s7 = smov [#allocation20]  }
 0x1f4   : > { %p11282_p7 = scmp.ne.s32.totalorder %s1012_s0, %s11281_s26  ;;  %s11285_s5 = sshll.u32 %s11535_s7, 4  ;;  %s11286_s5 = int_to_ptr.vmem [resolvable:$false] %s11285_s5 }
 0x1f5   : > { %s11287_s4 = scalar_lea.vmem %s11286_s5, 64  ;;  %p11288_p4 = scmp.lt.s32.totalorder %s1012_s0, %s11286_s5 }
 0x1f6   : > { %p11283_p3 = pnand %p11282_p7, %p13748_p0  ;;  %p11289_p12 = scmp.lt.s32.totalorder %s11287_s4, %s11281_s26 }
 0x1f8   : > { %p11284_p11 = pneg %p11283_p3  ;;  %p11290_p13 = por %p11289_p12, %p11288_p4 }
 0x1fa   : > { %p11291_p2 = pnand %p11290_p13, %p11284_p11 }
 0x1fc   : > { %11294 = shalt.err (!%p11291_p2)
}
 0x1fd   : > { %10040 = dma.hbm_to_vmem [thread:$0]  (%p13748_p0), %s12200_s28, 32, %s1012_s0, %s11829_s21  }
 0x1fe   : > { %s9737_s8 = sshll.u32 %s11509_s30, 14  ;;  %s1022_s24 = scalar_lea.vmem [#allocation21], %s9007_s29 }
 0x1ff   : > { %s12228_s25 = scalar_lea.hbm %s13663_s18, %s9737_s8  ;;  %s1029_s10 = sshll.u32 %s1022_s24, 4  ;;  %s12232_s10 = int_to_ptr.vmem [resolvable:$true] %s1029_s10 }
 0x200   : > { %s9010_s11 = sshll.u32 %s11817_s2, 3  ;;  %s11295_s26 = scalar_lea.hbm %s12228_s25, 16384 }
 0x201   : > { %p11296_p1 = scmp.ne.s32.totalorder %s12228_s25, %s11295_s26  ;;  %s11299_s7 = scalar_lea.hbm %s13663_s18, 65536 }
 0x202   : > { %p11300_p6 = scmp.lt.u32.totalorder %s12228_s25, %s13663_s18  ;;  %p11301_p9 = scmp.lt.u32.totalorder %s11299_s7, %s11295_s26 }
 0x203   : > { %p11297_p5 = pnand %p11296_p1, %p13748_p0  ;;  %p11303_p7 = scmp.lt.u32.totalorder %s11295_s26, %s12228_s25 }
 0x204   : > { %p11302_p10 = por %p11301_p9, %p11300_p6 }
 0x205   : > { %p11298_p8 = pneg %p11297_p5 }
 0x206   : > { %p11304_p3 = por %p11303_p7, %p11302_p10 }
 0x208   : > { %p11305_p11 = pnand %p11304_p3, %p11298_p8 }
 0x20a   : > { %11308 = shalt.err (!%p11305_p11)
}
 0x20b   : > { %s11309_s9 = scalar_lea.vmem %s12232_s10, 16384  ;;  %s11536_s3 = smov [#allocation21]  }
 0x20c   : > { %p11310_p4 = scmp.ne.s32.totalorder %s12232_s10, %s11309_s9  ;;  %s11313_s24 = sshll.u32 %s11536_s3, 4  ;;  %s11314_s24 = int_to_ptr.vmem [resolvable:$false] %s11313_s24 }
 0x20d   : > { %s11315_s28 = scalar_lea.vmem %s11314_s24, 32768  ;;  %p11316_p2 = scmp.lt.s32.totalorder %s12232_s10, %s11314_s24 }
 0x20e   : > { %p11311_p12 = pnand %p11310_p4, %p13748_p0  ;;  %p11317_p1 = scmp.lt.s32.totalorder %s11315_s28, %s11309_s9 }
 0x210   : > { %p11312_p13 = pneg %p11311_p12  ;;  %p11318_p5 = por %p11317_p1, %p11316_p2 }
 0x212   : > { %p11319_p6 = pnand %p11318_p5, %p11312_p13 }
 0x214   : > { %11322 = shalt.err (!%p11319_p6)
}
 0x215   : > { %s11537_s26 = smov 512   ;;  %s11538_s0 = smov 32  }
 0x216   : > { %10041 = dma.hbm_to_vmem [thread:$0]  (%p13748_p0), %s12228_s25, 16384, %s12232_s10, %s11829_s21, %s11537_s26, %s11537_s26, %s11538_s0  }
 0x217   : > { %s9738_s7 = sshll.u32 %s11509_s30, 7  ;;  %s1043_s9 = scalar_lea.vmem [#allocation22], %s9010_s11 }
 0x218   : > { %s12261_s3 = scalar_lea.hbm %s13664_s19, %s9738_s7  ;;  %s1051_s24 = sshll.u32 %s1043_s9, 4  ;;  %s1052_s24 = int_to_ptr.vmem [resolvable:$true] %s1051_s24 }
 0x219   : > { %s11323_s28 = scalar_lea.hbm %s12261_s3, 128  ;;  %s11327_s26 = scalar_lea.hbm %s13664_s19, 512 }
 0x21a   : > { %p11324_p8 = scmp.ne.s32.totalorder %s12261_s3, %s11323_s28  ;;  %p11328_p7 = scmp.lt.u32.totalorder %s12261_s3, %s13664_s19 }
 0x21b   : > { %p11329_p3 = scmp.lt.u32.totalorder %s11327_s26, %s11323_s28  ;;  %p11331_p4 = scmp.lt.u32.totalorder %s11323_s28, %s12261_s3 }
 0x21c   : > { %p11325_p9 = pnand %p11324_p8, %p13748_p0 }
 0x21d   : > { %p11330_p11 = por %p11329_p3, %p11328_p7 }
 0x21e   : > { %p11326_p10 = pneg %p11325_p9 }
 0x21f   : > { %p11332_p12 = por %p11331_p4, %p11330_p11 }
 0x221   : > { %p11333_p13 = pnand %p11332_p12, %p11326_p10 }
 0x223   : > { %11336 = shalt.err (!%p11333_p13)
}
 0x224   : > { %s11337_s11 = scalar_lea.vmem %s1052_s24, 128  ;;  %s11539_s5 = smov [#allocation22]  }
 0x225   : > { %p11338_p2 = scmp.ne.s32.totalorder %s1052_s24, %s11337_s11  ;;  %s11341_s4 = sshll.u32 %s11539_s5, 4  ;;  %s11342_s4 = int_to_ptr.vmem [resolvable:$false] %s11341_s4 }
 0x226   : > { %s11343_s9 = scalar_lea.vmem %s11342_s4, 256  ;;  %p11344_p6 = scmp.lt.s32.totalorder %s1052_s24, %s11342_s4 }
 0x227   : > { %p11339_p1 = pnand %p11338_p2, %p13748_p0  ;;  %p11345_p8 = scmp.lt.s32.totalorder %s11343_s9, %s11337_s11 }
 0x229   : > { %p11340_p5 = pneg %p11339_p1  ;;  %p11346_p9 = por %p11345_p8, %p11344_p6 }
 0x22b   : > { %p11347_p3 = pnand %p11346_p9, %p11340_p5 }
 0x22d   : > { %11350 = shalt.err (!%p11347_p3)
}
 0x22e   : > { %10042 = dma.hbm_to_vmem [thread:$0]  (%p13748_p0), %s12261_s3, 128, %s1052_s24, %s11829_s21  }
 0x22f   : > { %s12288_s10 = scalar_lea.hbm %s13665_s20, %s9737_s8  ;;  %s1062_s26 = scalar_lea.vmem [#allocation23], %s9007_s29 }
 0x230   : > { %s1069_s0 = sshll.u32 %s1062_s26, 4  ;;  %s11351_s7 = scalar_lea.hbm %s12288_s10, 16384  ;;  %s12292_s0 = int_to_ptr.vmem [resolvable:$true] %s1069_s0 }
 0x231   : > { %p11352_p10 = scmp.ne.s32.totalorder %s12288_s10, %s11351_s7  ;;  %s11355_s24 = scalar_lea.hbm %s13665_s20, 65536 }
 0x232   : > { %p11356_p4 = scmp.lt.u32.totalorder %s12288_s10, %s13665_s20  ;;  %p11357_p12 = scmp.lt.u32.totalorder %s11355_s24, %s11351_s7 }
 0x233   : > { %p11353_p7 = pnand %p11352_p10, %p13748_p0  ;;  %p11359_p2 = scmp.lt.u32.totalorder %s11351_s7, %s12288_s10 }
 0x234   : > { %p11358_p13 = por %p11357_p12, %p11356_p4 }
 0x235   : > { %p11354_p11 = pneg %p11353_p7 }
 0x236   : > { %p11360_p1 = por %p11359_p2, %p11358_p13 }
 0x238   : > { %p11361_p5 = pnand %p11360_p1, %p11354_p11 }
 0x23a   : > { %11364 = shalt.err (!%p11361_p5)
}
 0x23b   : > { %s11365_s2 = scalar_lea.vmem %s12292_s0, 16384  ;;  %s11540_s29 = smov [#allocation23]  }
 0x23c   : > { %p11366_p6 = scmp.ne.s32.totalorder %s12292_s0, %s11365_s2  ;;  %s11369_s5 = sshll.u32 %s11540_s29, 4  ;;  %s11370_s5 = int_to_ptr.vmem [resolvable:$false] %s11369_s5 }
 0x23d   : > { %s11371_s4 = scalar_lea.vmem %s11370_s5, 32768  ;;  %p11372_p3 = scmp.lt.s32.totalorder %s12292_s0, %s11370_s5 }
 0x23e   : > { %p11367_p8 = pnand %p11366_p6, %p13748_p0  ;;  %p11373_p10 = scmp.lt.s32.totalorder %s11371_s4, %s11365_s2 }
 0x240   : > { %p11368_p9 = pneg %p11367_p8  ;;  %p11374_p7 = por %p11373_p10, %p11372_p3 }
 0x242   : > { %p11375_p4 = pnand %p11374_p7, %p11368_p9 }
 0x244   : > { %11378 = shalt.err (!%p11375_p4)
}
 0x245   : > { %10043 = dma.hbm_to_vmem [thread:$0]  (%p13748_p0), %s12288_s10, 16384, %s12292_s0, %s11829_s21, %s13756_s1, %s13756_s1, %s13755_s6  }
 0x246   : > { %s13762_s25 = sld [smem:[#allocation54_spill]]  ;;  %s1083_s7 = scalar_lea.vmem [#allocation24], %s11888_s22 }
 0x247   : > { %s1091_s30 = sshll.u32 %s1083_s7, 4  ;;  %s1092_s30 = int_to_ptr.vmem [resolvable:$true] %s1091_s30 }
 0x24c   : > { %s12323_s26 = scalar_lea.hbm %s13762_s25, %s11916_s23  ;;  %s11383_s6 = scalar_lea.hbm %s13762_s25, 128 }
 0x24d   : > { %s11379_s3 = scalar_lea.hbm %s12323_s26, 32  ;;  %p11384_p2 = scmp.lt.u32.totalorder %s12323_s26, %s13762_s25 }
 0x24e   : > { %p11380_p11 = scmp.ne.s32.totalorder %s12323_s26, %s11379_s3  ;;  %p11385_p1 = scmp.lt.u32.totalorder %s11383_s6, %s11379_s3 }
 0x24f   : > { %p11387_p6 = scmp.lt.u32.totalorder %s11379_s3, %s12323_s26 }
 0x250   : > { %p11381_p12 = pnand %p11380_p11, %p13748_p0  ;;  %p11386_p5 = por %p11385_p1, %p11384_p2 }
 0x252   : > { %p11382_p13 = pneg %p11381_p12  ;;  %p11388_p8 = por %p11387_p6, %p11386_p5 }
 0x254   : > { %p11389_p9 = pnand %p11388_p8, %p11382_p13 }
 0x256   : > { %11392 = shalt.err (!%p11389_p9)
}
 0x257   : > { %s11393_s0 = scalar_lea.vmem %s1092_s30, 32  ;;  %s11541_s11 = smov [#allocation24]  }
 0x258   : > { %p11394_p3 = scmp.ne.s32.totalorder %s1092_s30, %s11393_s0  ;;  %s11397_s2 = sshll.u32 %s11541_s11, 4  ;;  %s11398_s2 = int_to_ptr.vmem [resolvable:$false] %s11397_s2 }
 0x259   : > { %s11399_s29 = scalar_lea.vmem %s11398_s2, 64  ;;  %p11400_p4 = scmp.lt.s32.totalorder %s1092_s30, %s11398_s2 }
 0x25a   : > { %p11395_p10 = pnand %p11394_p3, %p13748_p0  ;;  %p11401_p11 = scmp.lt.s32.totalorder %s11399_s29, %s11393_s0 }
 0x25c   : > { %p11396_p7 = pneg %p11395_p10  ;;  %p11402_p12 = por %p11401_p11, %p11400_p4 }
 0x25e   : > { %p11403_p1 = pnand %p11402_p12, %p11396_p7 }
 0x260   : > { %11406 = shalt.err (!%p11403_p1)
}
 0x261   : > { %10044 = dma.hbm_to_vmem [thread:$0]  (%p13748_p0), %s12323_s26, 32, %s1092_s30, %s11829_s21  }
 0x262   : > { %s13763_s9 = sld [smem:[#allocation55_spill]]  ;;  %s1102_s7 = scalar_lea.vmem [#allocation25], %s11888_s22 }
 0x263   : > { %s1110_s3 = sshll.u32 %s1102_s7, 4  ;;  %s1111_s3 = int_to_ptr.vmem [resolvable:$true] %s1110_s3 }
 0x268   : > { %s12348_s28 = scalar_lea.hbm %s13763_s9, %s11916_s23  ;;  %s11411_s26 = scalar_lea.hbm %s13763_s9, 128 }
 0x269   : > { %s11407_s24 = scalar_lea.hbm %s12348_s28, 32  ;;  %p11412_p6 = scmp.lt.u32.totalorder %s12348_s28, %s13763_s9 }
 0x26a   : > { %p11408_p13 = scmp.ne.s32.totalorder %s12348_s28, %s11407_s24  ;;  %p11413_p8 = scmp.lt.u32.totalorder %s11411_s26, %s11407_s24 }
 0x26b   : > { %p11415_p3 = scmp.lt.u32.totalorder %s11407_s24, %s12348_s28 }
 0x26c   : > { %p11409_p2 = pnand %p11408_p13, %p13748_p0  ;;  %p11414_p9 = por %p11413_p8, %p11412_p6 }
 0x26e   : > { %p11410_p5 = pneg %p11409_p2  ;;  %p11416_p10 = por %p11415_p3, %p11414_p9 }
 0x270   : > { %p11417_p7 = pnand %p11416_p10, %p11410_p5 }
 0x272   : > { %11420 = shalt.err (!%p11417_p7)
}
 0x273   : > { %s11421_s10 = scalar_lea.vmem %s1111_s3, 32  ;;  %s11542_s0 = smov [#allocation25]  }
 0x274   : > { %p11422_p4 = scmp.ne.s32.totalorder %s1111_s3, %s11421_s10  ;;  %s11425_s11 = sshll.u32 %s11542_s0, 4  ;;  %s11426_s11 = int_to_ptr.vmem [resolvable:$false] %s11425_s11 }
 0x275   : > { %s11427_s2 = scalar_lea.vmem %s11426_s11, 64  ;;  %p11428_p1 = scmp.lt.s32.totalorder %s1111_s3, %s11426_s11 }
 0x276   : > { %p11423_p11 = pnand %p11422_p4, %p13748_p0  ;;  %p11429_p13 = scmp.lt.s32.totalorder %s11427_s2, %s11421_s10 }
 0x278   : > { %p11424_p12 = pneg %p11423_p11  ;;  %p11430_p2 = por %p11429_p13, %p11428_p1 }
 0x27a   : > { %p11431_p6 = pnand %p11430_p2, %p11424_p12 }
 0x27c   : > { %11434 = shalt.err (!%p11431_p6)
}
 0x27d   : > { %10045 = dma.hbm_to_vmem [thread:$0]  (%p13748_p0), %s12348_s28, 32, %s1111_s3, %s11829_s21  }
 0x27e   : > { %s13764_s4 = sld [smem:[#allocation56_spill]]  ;;  %s1121_s24 = scalar_lea.vmem [#allocation26], %s11888_s22 }
 0x27f   : > { %s1129_s8 = sshll.u32 %s1121_s24, 4  ;;  %s1130_s8 = int_to_ptr.vmem [resolvable:$true] %s1129_s8 }
 0x284   : > { %s12373_s7 = scalar_lea.hbm %s13764_s4, %s11916_s23  ;;  %s11439_s28 = scalar_lea.hbm %s13764_s4, 128 }
 0x285   : > { %s11435_s6 = scalar_lea.hbm %s12373_s7, 32  ;;  %p11440_p3 = scmp.lt.u32.totalorder %s12373_s7, %s13764_s4 }
 0x286   : > { %p11436_p5 = scmp.ne.s32.totalorder %s12373_s7, %s11435_s6  ;;  %p11441_p10 = scmp.lt.u32.totalorder %s11439_s28, %s11435_s6 }
 0x287   : > { %p11443_p4 = scmp.lt.u32.totalorder %s11435_s6, %s12373_s7 }
 0x288   : > { %p11437_p8 = pnand %p11436_p5, %p13748_p0  ;;  %p11442_p7 = por %p11441_p10, %p11440_p3 }
 0x28a   : > { %p11438_p9 = pneg %p11437_p8  ;;  %p11444_p11 = por %p11443_p4, %p11442_p7 }
 0x28c   : > { %p11445_p12 = pnand %p11444_p11, %p11438_p9 }
 0x28e   : > { %11448 = shalt.err (!%p11445_p12)
}
 0x28f   : > { %s11449_s22 = scalar_lea.vmem %s1130_s8, 32  ;;  %s11543_s23 = smov [#allocation26]  }
 0x290   : > { %p11450_p1 = scmp.ne.s32.totalorder %s1130_s8, %s11449_s22  ;;  %s11453_s10 = sshll.u32 %s11543_s23, 4  ;;  %s11454_s10 = int_to_ptr.vmem [resolvable:$false] %s11453_s10 }
 0x291   : > { %s11455_s0 = scalar_lea.vmem %s11454_s10, 64  ;;  %p11456_p6 = scmp.lt.s32.totalorder %s1130_s8, %s11454_s10 }
 0x292   : > { %p11451_p13 = pnand %p11450_p1, %p13748_p0  ;;  %p11457_p5 = scmp.lt.s32.totalorder %s11455_s0, %s11449_s22 }
 0x294   : > { %p11452_p2 = pneg %p11451_p13  ;;  %p11458_p8 = por %p11457_p5, %p11456_p6 }
 0x296   : > { %p11459_p3 = pnand %p11458_p8, %p11452_p2 }
 0x298   : > { %11462 = shalt.err (!%p11459_p3)
}
 0x299   : > { %10046 = dma.hbm_to_vmem [thread:$0]  (%p13748_p0), %s12373_s7, 32, %s1130_s8, %s11829_s21  }
 0x29a PF: > { %s13765_s11 = sld [smem:[#allocation38_spill]] }
 0x2a0   : > { %p13766_p9 = scmp.ne.s32.totalorder %s13765_s11, 0 }
 0x2a1   : > { %s13767_s2 = sld [smem:[#allocation34_spill]] (!%p13766_p9) }
 0x2a2   : > { %1138 = sbr.rel (%p13766_p9) target bundleno = 5665 (0x1621), region = 120 }
 0x2a7   : > { %p13768_p10 = scmp.eq.s32.totalorder (!%p13766_p9), %s13767_s2, 0 }
 0x2a9   : > { %11480 = dma.done.wait (%p13768_p10), [#allocation4], 32   ;;  %p13769_p7 = pmov %p13768_p10 }
 0x2ab   : > { %11482 = vsyncadd (%p13769_p7), [#allocation4], 4294967264  ;;  %p13770_p4 = pmov %p13769_p7 }
 0x2ad   : > { %11484 = dma.done.wait (%p13770_p4), [#allocation6], 32   ;;  %p13771_p11 = pmov %p13770_p4 }
 0x2ae   : > { %s13772_s27 = sld [smem:[#allocation32_spill]]  ;;  %s13773_s29 = sld [smem:[#allocation37_spill]] }
 0x2af   : > { %11486 = vsyncadd (%p13771_p11), [#allocation6], 4294967264  ;;  %s1148_s21 = sand.u32 1, %s13767_s2  }
 0x2b0   : > { %s1149_s24 = scalar_lea.sflag [#allocation4], %s1148_s21 }
 0x2b4   : > { %s1150_s5 = sand.u32 1, %s13772_s27   ;;  %p13774_p0 = scmp.ne.s32.totalorder %s13773_s29, 0 }
 0x2b5   : > { %s10019_s7 = smul.u32 768, %s1150_s5 }
 0x2b7   : > { %s12406_s8 = scalar_lea.vmem [#allocation7], %s10019_s7 }
 0x2b8   : > { %11488 = dma.done.wait (%p13774_p0), %s1149_s24, 66144  }
 0x2b9   : > { %11490 = vsyncadd (%p13774_p0), %s1149_s24, 4294901152  ;;  %s10020_s6 = smul.u32 6, %s1150_s5  ;;  %s9028_s26 = sshll.u32 %s1150_s5, 8 }
 0x2ba   : > { %s12412_s30 = sshll.u32 %s1150_s5, 1  ;;  %s9034_s28 = sshll.u32 %s1150_s5, 9 }
 0x2bb   : > { %s9035_s3 = sshll.u32 %s1150_s5, 2  ;;  %s9040_s1 = sshll.u32 %s1150_s5, 10 }
 0x2bc   : > { %s9041_s22 = sshll.u32 %s1150_s5, 3  ;;  %s12414_s23 = scalar_lea.vmem [#allocation8], %s10020_s6 }
 0x2bd   : > { %s12416_s10 = scalar_lea.vmem [#allocation9], %s9028_s26  ;;  %s12421_s29 = scalar_lea.vmem [#allocation13], %s9028_s26 }
 0x2be   : > { %s1215_s21 = scalar_lea.vmem [#allocation14], %s12412_s30  ;;  %s12424_s7 = scalar_lea.vmem [#allocation15], %s9034_s28 }
 0x2bf   : > { %s12426_s24 = scalar_lea.vmem [#allocation16], %s9035_s3  ;;  %s12428_s4 = scalar_lea.vmem [#allocation17], %s9028_s26 }
 0x2c0   : > { %s1251_s5 = scalar_lea.vmem [#allocation18], %s12412_s30  ;;  %s1260_s6 = scalar_lea.vmem [#allocation19], %s12412_s30 }
 0x2c1   : > { %s12433_s12 = scalar_lea.vmem [#allocation21], %s9040_s1  ;;  %s12435_s13 = scalar_lea.vmem [#allocation22], %s9041_s22 }
 0x2c2   : > { %s12437_s0 = scalar_lea.vmem [#allocation23], %s9040_s1  ;;  %p13775_p12 = pmov %p13770_p4 }
 0x2c3   : > { %p13776_p1 = pmov %p13770_p4 }
 0x2c4   : > { %11492 = dma.done.wait (%p13775_p12), [#allocation6], 16384  }
 0x2c5   : > { %11494 = vsyncadd (%p13776_p1), [#allocation6], 4294950912  ;;  %p13777_p13 = scmp.ne.s32.totalorder %s13767_s2, 0 }
 0x2c6   : > { %s13778_s3 = sld [smem:[#allocation39_spill]] (!%p13777_p13) }
 0x2c7   : > { %1488 = sbr.rel (%p13777_p13) target bundleno = 719 (0x2cf), region = 216 }
 0x2cc   : > { %v1489_v0 = vld [vmem:[%s13778_s3] sm:$0xff] (!%p13777_p13)  ;;  %v1490_v1 = vld [vmem:[%s13778_s3 + $0x8] sm:$0xff] (!%p13777_p13)  ;;  %v1491_v2 = vld [vmem:[%s13778_s3 + $0x10] sm:$0xff] (!%p13777_p13) }
 0x2cd   : > { %1493 = vst [vmem:[#allocation2] sm:$0xff] (!%p13777_p13), %v1489_v0  ;;  %1494 = vst [vmem:[#allocation2 + $0x8] sm:$0xff] (!%p13777_p13), %v1490_v1  ;;  %v1492_v3 = vld [vmem:[%s13778_s3 + $0x18] sm:$0xff] (!%p13777_p13) }
 0x2ce   : > { %1495 = vst [vmem:[#allocation2 + $0x10] sm:$0xff] %v1491_v2  ;;  %1496 = vst [vmem:[#allocation2 + $0x18] sm:$0xff] %v1492_v3 }
 0x2cf PF: > { %v10160_v4 = vld [vmem:[%s12406_s8 + $0x4] ss:$24 sps:$4 sm:$0xff]   ;;  %v10162_v5 = vld [vmem:[%s12406_s8] ss:$24 sps:$4 sm:$0xff]   ;;  %v10163_v6 = vld [vmem:[%s12406_s8 + $0x34] ss:$24 sps:$4 sm:$0xff]  }
 0x2d0   : > { %2113 = vmatprep.subr.bf16.mxu0 %v10160_v4  ;;  %v10165_v7 = vld [vmem:[%s12406_s8 + $0x30] ss:$24 sps:$4 sm:$0xff]   ;;  %v10166_v8 = vld [vmem:[%s12406_s8 + $0x64] ss:$24 sps:$4 sm:$0xff]   ;;  %v10168_v9 = vld [vmem:[%s12406_s8 + $0x60] ss:$24 sps:$4 sm:$0xff]  }
 0x2d1   : > { %2114 = vmatpush1.bf16.msra.mxu0 %v10162_v5  ;;  %v10169_v10 = vld [vmem:[%s12406_s8 + $0x94] ss:$24 sps:$4 sm:$0xff]   ;;  %v10171_v11 = vld [vmem:[%s12406_s8 + $0x90] ss:$24 sps:$4 sm:$0xff]   ;;  %v10172_v12 = vld [vmem:[%s12406_s8 + $0xc4] ss:$24 sps:$4 sm:$0xff]  }
 0x2d2   : > { %2115 = vmatprep.subr.bf16.mxu0 %v10163_v6  ;;  %v10174_v13 = vld [vmem:[%s12406_s8 + $0xc0] ss:$24 sps:$4 sm:$0xff]   ;;  %v10175_v14 = vld [vmem:[%s12406_s8 + $0xf4] ss:$24 sps:$4 sm:$0xff]   ;;  %v10177_v15 = vld [vmem:[%s12406_s8 + $0xf0] ss:$24 sps:$4 sm:$0xff]  }
 0x2d3   : > { %v10178_v16 = vld [vmem:[%s12406_s8 + $0x124] ss:$24 sps:$4 sm:$0xff]   ;;  %v10180_v20 = vld [vmem:[%s12406_s8 + $0x120] ss:$24 sps:$4 sm:$0xff]   ;;  %v10181_v21 = vld [vmem:[%s12406_s8 + $0x154] ss:$24 sps:$4 sm:$0xff]  }
 0x2d4   : > { %v10183_v22 = vld [vmem:[%s12406_s8 + $0x150] ss:$24 sps:$4 sm:$0xff]   ;;  %v10184_v23 = vld [vmem:[%s12406_s8 + $0x184] ss:$24 sps:$4 sm:$0xff]   ;;  %v10186_v24 = vld [vmem:[%s12406_s8 + $0x180] ss:$24 sps:$4 sm:$0xff]  }
 0x2d5   : > { %2116 = vmatpush1.bf16.msra.mxu0 %v10165_v7  ;;  %v1498_v17 = vld [vmem:[#allocation2 + $0x8] sm:$0xff]  ;;  %v1500_v18 = vld [vmem:[#allocation2 + $0x18] sm:$0xff]  ;;  %v1497_v39 = vld [vmem:[#allocation2] sm:$0xff]  ;;  %vm11545_vm0 = vmmov 0   ;;  %vm2339_vm1 = vcmask 523264   ;;  %s11546_s14 = smov 64  }
 0x2d6   : > { %2117 = vmatprep.subr.bf16.mxu0 %v10166_v8  ;;  %v12473_v19 = vpack.c.bf16 %v1500_v18, %v1498_v17  ;;  %v10187_v25 = vld [vmem:[%s12406_s8 + $0x1b4] ss:$24 sps:$4 sm:$0xff]   ;;  %v10189_v26 = vld [vmem:[%s12406_s8 + $0x1b0] ss:$24 sps:$4 sm:$0xff]   ;;  %v10190_v27 = vld [vmem:[%s12406_s8 + $0x1e4] ss:$24 sps:$4 sm:$0xff]  }
 0x2d7   : > { %v10192_v28 = vld [vmem:[%s12406_s8 + $0x1e0] ss:$24 sps:$4 sm:$0xff]   ;;  %v10193_v29 = vld [vmem:[%s12406_s8 + $0x214] ss:$24 sps:$4 sm:$0xff]   ;;  %v10195_v30 = vld [vmem:[%s12406_s8 + $0x210] ss:$24 sps:$4 sm:$0xff]  }
 0x2d8   : > { %2145 = vmatprep.mubr.bf16.mxu0 %v12473_v19  ;;  %v10196_v31 = vld [vmem:[%s12406_s8 + $0x244] ss:$24 sps:$4 sm:$0xff]   ;;  %v10198_v32 = vld [vmem:[%s12406_s8 + $0x240] ss:$24 sps:$4 sm:$0xff]   ;;  %v10199_v33 = vld [vmem:[%s12406_s8 + $0x274] ss:$24 sps:$4 sm:$0xff]  }
 0x2d9   : > { %2118 = vmatpush1.bf16.msra.mxu0 %v10168_v9  ;;  %v10201_v34 = vld [vmem:[%s12406_s8 + $0x270] ss:$24 sps:$4 sm:$0xff]   ;;  %v10202_v35 = vld [vmem:[%s12406_s8 + $0x2a4] ss:$24 sps:$4 sm:$0xff]   ;;  %v10204_v36 = vld [vmem:[%s12406_s8 + $0x2a0] ss:$24 sps:$4 sm:$0xff]  }
 0x2da   : > { %2119 = vmatprep.subr.bf16.mxu0 %v10169_v10  ;;  %v10205_v37 = vld [vmem:[%s12406_s8 + $0x2d4] ss:$24 sps:$4 sm:$0xff]   ;;  %v10207_v38 = vld [vmem:[%s12406_s8 + $0x2d0] ss:$24 sps:$4 sm:$0xff]   ;;  %v10265_v17 = vld [vmem:[%s12406_s8 + $0xa0] ss:$24 sps:$4 sm:$0xff]  }
 0x2db   : > { %v1499_v40 = vld [vmem:[#allocation2 + $0x10] sm:$0xff]  ;;  %v10208_v42 = vld [vmem:[%s12406_s8 + $0x8] ss:$24 sps:$4 sm:$0xff]   ;;  %v10213_v44 = vld [vmem:[%s12406_s8 + $0x3c] ss:$24 sps:$4 sm:$0xff]   ;;  %vm2808_vm2 = vcmask 1043456  }
 0x2dc   : > { %v10210_v41 = vld [vmem:[%s12406_s8 + $0xc] ss:$24 sps:$4 sm:$0xff]   ;;  %v12497_v43 = vpack.c.bf16 %v1499_v40, %v1497_v39  ;;  %v10211_v45 = vld [vmem:[%s12406_s8 + $0x38] ss:$24 sps:$4 sm:$0xff]   ;;  %v10214_v47 = vld [vmem:[%s12406_s8 + $0x68] ss:$24 sps:$4 sm:$0xff]  }
 0x2dd   : > { %2120 = vmatpush1.bf16.msra.mxu0 %v10171_v11  ;;  %v10216_v46 = vld [vmem:[%s12406_s8 + $0x6c] ss:$24 sps:$4 sm:$0xff]   ;;  %v10219_v48 = vld [vmem:[%s12406_s8 + $0x9c] ss:$24 sps:$4 sm:$0xff]   ;;  %v10217_v49 = vld [vmem:[%s12406_s8 + $0x98] ss:$24 sps:$4 sm:$0xff]  }
 0x2de   : > { %2121 = vmatprep.subr.bf16.mxu0 %v10172_v12  ;;  %v10222_v50 = vld [vmem:[%s12406_s8 + $0xcc] ss:$24 sps:$4 sm:$0xff]   ;;  %v10220_v51 = vld [vmem:[%s12406_s8 + $0xc8] ss:$24 sps:$4 sm:$0xff]   ;;  %v10225_v52 = vld [vmem:[%s12406_s8 + $0xfc] ss:$24 sps:$4 sm:$0xff]  }
 0x2df   : > { %v10223_v53 = vld [vmem:[%s12406_s8 + $0xf8] ss:$24 sps:$4 sm:$0xff]   ;;  %v10228_v54 = vld [vmem:[%s12406_s8 + $0x12c] ss:$24 sps:$4 sm:$0xff]   ;;  %v10226_v55 = vld [vmem:[%s12406_s8 + $0x128] ss:$24 sps:$4 sm:$0xff]  }
 0x2e0   : > { %v10231_v56 = vld [vmem:[%s12406_s8 + $0x15c] ss:$24 sps:$4 sm:$0xff]   ;;  %v10229_v57 = vld [vmem:[%s12406_s8 + $0x158] ss:$24 sps:$4 sm:$0xff]   ;;  %v10234_v58 = vld [vmem:[%s12406_s8 + $0x18c] ss:$24 sps:$4 sm:$0xff]  }
 0x2e1   : > { %2122 = vmatpush1.bf16.msra.mxu0 %v10174_v13  ;;  %v10232_v59 = vld [vmem:[%s12406_s8 + $0x188] ss:$24 sps:$4 sm:$0xff]   ;;  %v10237_v60 = vld [vmem:[%s12406_s8 + $0x1bc] ss:$24 sps:$4 sm:$0xff]   ;;  %v10235_v61 = vld [vmem:[%s12406_s8 + $0x1b8] ss:$24 sps:$4 sm:$0xff]  }
 0x2e2   : > { %2123 = vmatprep.subr.bf16.mxu0 %v10175_v14  ;;  %v10240_v62 = vld [vmem:[%s12406_s8 + $0x1ec] ss:$24 sps:$4 sm:$0xff]   ;;  %v10238_v63 = vld [vmem:[%s12406_s8 + $0x1e8] ss:$24 sps:$4 sm:$0xff]   ;;  %v10243_v0 = vld [vmem:[%s12406_s8 + $0x21c] ss:$24 sps:$4 sm:$0xff]  }
 0x2e3   : > { %v10241_v1 = vld [vmem:[%s12406_s8 + $0x218] ss:$24 sps:$4 sm:$0xff]   ;;  %v10246_v2 = vld [vmem:[%s12406_s8 + $0x24c] ss:$24 sps:$4 sm:$0xff]   ;;  %v10244_v3 = vld [vmem:[%s12406_s8 + $0x248] ss:$24 sps:$4 sm:$0xff]  }
 0x2e4   : > { %v10249_v4 = vld [vmem:[%s12406_s8 + $0x27c] ss:$24 sps:$4 sm:$0xff]   ;;  %v10247_v5 = vld [vmem:[%s12406_s8 + $0x278] ss:$24 sps:$4 sm:$0xff]   ;;  %v10252_v6 = vld [vmem:[%s12406_s8 + $0x2ac] ss:$24 sps:$4 sm:$0xff]  }
 0x2e5   : > { %2124 = vmatpush1.bf16.msra.mxu0 %v10177_v15  ;;  %v10250_v7 = vld [vmem:[%s12406_s8 + $0x2a8] ss:$24 sps:$4 sm:$0xff]   ;;  %v10255_v8 = vld [vmem:[%s12406_s8 + $0x2dc] ss:$24 sps:$4 sm:$0xff]   ;;  %v10253_v9 = vld [vmem:[%s12406_s8 + $0x2d8] ss:$24 sps:$4 sm:$0xff]  }
 0x2e6   : > { %2125 = vmatprep.subr.bf16.mxu0 %v10178_v16  ;;  %v10258_v10 = vld [vmem:[%s12406_s8 + $0x14] ss:$24 sps:$4 sm:$0xff]   ;;  %v10256_v11 = vld [vmem:[%s12406_s8 + $0x10] ss:$24 sps:$4 sm:$0xff]   ;;  %v10261_v12 = vld [vmem:[%s12406_s8 + $0x44] ss:$24 sps:$4 sm:$0xff]  }
 0x2e7   : > { %v10259_v13 = vld [vmem:[%s12406_s8 + $0x40] ss:$24 sps:$4 sm:$0xff]   ;;  %v10262_v14 = vld [vmem:[%s12406_s8 + $0x70] ss:$24 sps:$4 sm:$0xff]   ;;  %v10264_v15 = vld [vmem:[%s12406_s8 + $0x74] ss:$24 sps:$4 sm:$0xff]  }
 0x2e8   : > { %v10267_v16 = vld [vmem:[%s12406_s8 + $0xa4] ss:$24 sps:$4 sm:$0xff]   ;;  %v10270_v18 = vld [vmem:[%s12406_s8 + $0xd4] ss:$24 sps:$4 sm:$0xff]   ;;  %v10298_v39 = vld [vmem:[%s12406_s8 + $0x2b0] ss:$24 sps:$4 sm:$0xff]  }
 0x2e9   : > { %2126 = vmatpush1.bf16.msra.mxu0 %v10180_v20  ;;  %v10273_v20 = vld [vmem:[%s12406_s8 + $0x104] ss:$24 sps:$4 sm:$0xff]   ;;  %vm2708_vm9 = vcmask 64512   ;;  %s13779_s9 = scalar_lea.vmem [#allocation10], %s12412_s30  ;;  %s13781_s27 = scalar_lea.vmem [#allocation11], %s12412_s30 }
 0x2ea   : > { %2127 = vmatprep.subr.bf16.mxu0 %v10181_v21  ;;  %v10271_v21 = vld [vmem:[%s12406_s8 + $0x100] ss:$24 sps:$4 sm:$0xff]   ;;  %v10303_v40 = vld [vmem:[%s12406_s8 + $0x2e4] ss:$24 sps:$4 sm:$0xff]   ;;  %s13782_s26 = scalar_lea.vmem [#allocation12], %s12412_s30 }
 0x2ed   : > { %2128 = vmatpush1.bf16.msra.mxu0 %v10183_v22  ;;  %v10276_v22 = vld [vmem:[%s12406_s8 + $0x134] ss:$24 sps:$4 sm:$0xff]  }
 0x2ee   : > { %2129 = vmatprep.subr.bf16.mxu0 %v10184_v23  ;;  %v10274_v23 = vld [vmem:[%s12406_s8 + $0x130] ss:$24 sps:$4 sm:$0xff]  }
 0x2f1   : > { %2130 = vmatpush1.bf16.msra.mxu0 %v10186_v24  ;;  %v10279_v24 = vld [vmem:[%s12406_s8 + $0x164] ss:$24 sps:$4 sm:$0xff]  }
 0x2f2   : > { %2131 = vmatprep.subr.bf16.mxu0 %v10187_v25  ;;  %v10277_v25 = vld [vmem:[%s12406_s8 + $0x160] ss:$24 sps:$4 sm:$0xff]  }
 0x2f5   : > { %2132 = vmatpush1.bf16.msra.mxu0 %v10189_v26  ;;  %v10282_v26 = vld [vmem:[%s12406_s8 + $0x194] ss:$24 sps:$4 sm:$0xff]  }
 0x2f6   : > { %2133 = vmatprep.subr.bf16.mxu0 %v10190_v27  ;;  %v10280_v27 = vld [vmem:[%s12406_s8 + $0x190] ss:$24 sps:$4 sm:$0xff]  }
 0x2f9   : > { %2134 = vmatpush1.bf16.msra.mxu0 %v10192_v28  ;;  %v10285_v28 = vld [vmem:[%s12406_s8 + $0x1c4] ss:$24 sps:$4 sm:$0xff]  }
 0x2fa   : > { %2135 = vmatprep.subr.bf16.mxu0 %v10193_v29  ;;  %v10283_v29 = vld [vmem:[%s12406_s8 + $0x1c0] ss:$24 sps:$4 sm:$0xff]  }
 0x2fd   : > { %2136 = vmatpush1.bf16.msra.mxu0 %v10195_v30  ;;  %v10288_v30 = vld [vmem:[%s12406_s8 + $0x1f4] ss:$24 sps:$4 sm:$0xff]  }
 0x2fe   : > { %2137 = vmatprep.subr.bf16.mxu0 %v10196_v31  ;;  %v10286_v31 = vld [vmem:[%s12406_s8 + $0x1f0] ss:$24 sps:$4 sm:$0xff]  }
 0x301   : > { %2138 = vmatpush1.bf16.msra.mxu0 %v10198_v32  ;;  %v10291_v32 = vld [vmem:[%s12406_s8 + $0x224] ss:$24 sps:$4 sm:$0xff]  }
 0x302   : > { %2139 = vmatprep.subr.bf16.mxu0 %v10199_v33  ;;  %v10289_v33 = vld [vmem:[%s12406_s8 + $0x220] ss:$24 sps:$4 sm:$0xff]  }
 0x305   : > { %2140 = vmatpush1.bf16.msra.mxu0 %v10201_v34  ;;  %v10294_v34 = vld [vmem:[%s12406_s8 + $0x254] ss:$24 sps:$4 sm:$0xff]  }
 0x306   : > { %2141 = vmatprep.subr.bf16.mxu0 %v10202_v35  ;;  %v10292_v35 = vld [vmem:[%s12406_s8 + $0x250] ss:$24 sps:$4 sm:$0xff]  }
 0x309   : > { %2142 = vmatpush1.bf16.msra.mxu0 %v10204_v36  ;;  %v10297_v36 = vld [vmem:[%s12406_s8 + $0x284] ss:$24 sps:$4 sm:$0xff]  }
 0x30a   : > { %2143 = vmatprep.subr.bf16.mxu0 %v10205_v37  ;;  %v10295_v37 = vld [vmem:[%s12406_s8 + $0x280] ss:$24 sps:$4 sm:$0xff]  }
 0x30d   : > { %2144 = vmatpush1.bf16.msra.mxu0 %v10207_v38  ;;  %v10300_v38 = vld [vmem:[%s12406_s8 + $0x2b4] ss:$24 sps:$4 sm:$0xff]  }
 0x30e   : > { %2156 = vmatprep.subr.bf16.mxu0 %v10210_v41  ;;  %v10301_v41 = vld [vmem:[%s12406_s8 + $0x2e0] ss:$24 sps:$4 sm:$0xff]  }
 0x310   : > { %2146 = vmatmul.mubr.bf16.vlgmr.msra.gmra.mrb[0].mxu0 %v12497_v43 }
 0x311   : > { %2157 = vmatpush1.bf16.msra.mxu0 %v10208_v42  ;;  %2188 = vmatprep.mubr.bf16.mxu0 %v12473_v19  ;;  %v11544_v42 = vmov 0.0  }
 0x312   : > { %2158 = vmatprep.subr.bf16.mxu0 %v10213_v44  ;;  %9831 = vmatprep.subr.bf16.mxu1 %v11544_v42 }
 0x313   : > { %9833 = vmatprep.mubr.msk.bf16.mxu1 %vm11545_vm0, %v11544_v42 }
 0x315   : > { %2159 = vmatpush1.bf16.msra.mxu0 %v10211_v45 }
 0x316   : > { %2160 = vmatprep.subr.bf16.mxu0 %v10216_v46 }
 0x319   : > { %2161 = vmatpush1.bf16.msra.mxu0 %v10214_v47 }
 0x31a   : > { %2162 = vmatprep.subr.bf16.mxu0 %v10219_v48  ;;  %v1603_v48 = vlaneseq }
 0x31d   : > { %2163 = vmatpush1.bf16.msra.mxu0 %v10217_v49 }
 0x31e   : > { %2164 = vmatprep.subr.bf16.mxu0 %v10222_v50 }
 0x321   : > { %2165 = vmatpush1.bf16.msra.mxu0 %v10220_v51 }
 0x322   : > { %2166 = vmatprep.subr.bf16.mxu0 %v10225_v52  ;;  %v12585_v52 = vld [vmem:[%s12414_s23] sm:$0x3f]  ;;  %s13780_s23 = sld [smem:[#allocation40_spill]] }
 0x325   : > { %2167 = vmatpush1.bf16.msra.mxu0 %v10223_v53 }
 0x326   : > { %2168 = vmatprep.subr.bf16.mxu0 %v10228_v54 }
 0x329   : > { %2169 = vmatpush1.bf16.msra.mxu0 %v10226_v55 }
 0x32a   : > { %2170 = vmatprep.subr.bf16.mxu0 %v10231_v56 }
 0x32d   : > { %2171 = vmatpush1.bf16.msra.mxu0 %v10229_v57 }
 0x32e   : > { %2172 = vmatprep.subr.bf16.mxu0 %v10234_v58 }
 0x331   : > { %2173 = vmatpush1.bf16.msra.mxu0 %v10232_v59 }
 0x332   : > { %2174 = vmatprep.subr.bf16.mxu0 %v10237_v60 }
 0x335   : > { %2175 = vmatpush1.bf16.msra.mxu0 %v10235_v61 }
 0x336   : > { %2176 = vmatprep.subr.bf16.mxu0 %v10240_v62 }
 0x339   : > { %2177 = vmatpush1.bf16.msra.mxu0 %v10238_v63 }
 0x33a   : > { %2178 = vmatprep.subr.bf16.mxu0 %v10243_v0 }
 0x33d   : > { %2179 = vmatpush1.bf16.msra.mxu0 %v10241_v1 }
 0x33e   : > { %2180 = vmatprep.subr.bf16.mxu0 %v10246_v2 }
 0x341   : > { %2181 = vmatpush1.bf16.msra.mxu0 %v10244_v3 }
 0x342   : > { %2182 = vmatprep.subr.bf16.mxu0 %v10249_v4 }
 0x345   : > { %2183 = vmatpush1.bf16.msra.mxu0 %v10247_v5 }
 0x346   : > { %2184 = vmatprep.subr.bf16.mxu0 %v10252_v6 }
 0x349   : > { %2185 = vmatpush1.bf16.msra.mxu0 %v10250_v7 }
 0x34a   : > { %2186 = vmatprep.subr.bf16.mxu0 %v10255_v8 }
 0x34d   : > { %2187 = vmatpush1.bf16.msra.mxu0 %v10253_v9 }
 0x34e   : > { %2199 = vmatprep.subr.bf16.mxu0 %v10258_v10 }
 0x350   : > { %2189 = vmatmul.mubr.bf16.vlgmr.msra.gmra.mrb[4].mxu0 %v12497_v43 }
 0x351   : > { %2231 = vmatprep.mubr.bf16.mxu0 %v12473_v19  ;;  %2200 = vmatpush1.bf16.msra.mxu0 %v10256_v11  ;;  %v10268_v19 = vld [vmem:[%s12406_s8 + $0xd0] ss:$24 sps:$4 sm:$0xff]  }
 0x352   : > { %2201 = vmatprep.subr.bf16.mxu0 %v10261_v12 }
 0x355   : > { %2202 = vmatpush1.bf16.msra.mxu0 %v10259_v13 }
 0x356   : > { %2203 = vmatprep.subr.bf16.mxu0 %v10264_v15 }
 0x359   : > { %2204 = vmatpush1.bf16.msra.mxu0 %v10262_v14 }
 0x35a   : > { %2205 = vmatprep.subr.bf16.mxu0 %v10267_v16 }
 0x35d   : > { %2206 = vmatpush1.bf16.msra.mxu0 %v10265_v17 }
 0x35e   : > { %2207 = vmatprep.subr.bf16.mxu0 %v10270_v18 }
 0x361   : > { %2208 = vmatpush1.bf16.msra.mxu0 %v10268_v19 }
 0x362   : > { %2209 = vmatprep.subr.bf16.mxu0 %v10273_v20 }
 0x365   : > { %2210 = vmatpush1.bf16.msra.mxu0 %v10271_v21 }
 0x366   : > { %2211 = vmatprep.subr.bf16.mxu0 %v10276_v22 }
 0x369   : > { %2212 = vmatpush1.bf16.msra.mxu0 %v10274_v23 }
 0x36a   : > { %2213 = vmatprep.subr.bf16.mxu0 %v10279_v24 }
 0x36d   : > { %2214 = vmatpush1.bf16.msra.mxu0 %v10277_v25 }
 0x36e   : > { %2215 = vmatprep.subr.bf16.mxu0 %v10282_v26 }
 0x371   : > { %2216 = vmatpush1.bf16.msra.mxu0 %v10280_v27 }
 0x372   : > { %2217 = vmatprep.subr.bf16.mxu0 %v10285_v28 }
 0x375   : > { %2218 = vmatpush1.bf16.msra.mxu0 %v10283_v29 }
 0x376   : > { %2219 = vmatprep.subr.bf16.mxu0 %v10288_v30 }
 0x379   : > { %2220 = vmatpush1.bf16.msra.mxu0 %v10286_v31 }
 0x37a   : > { %2221 = vmatprep.subr.bf16.mxu0 %v10291_v32 }
 0x37d   : > { %2222 = vmatpush1.bf16.msra.mxu0 %v10289_v33 }
 0x37e   : > { %2223 = vmatprep.subr.bf16.mxu0 %v10294_v34 }
 0x381   : > { %2224 = vmatpush1.bf16.msra.mxu0 %v10292_v35 }
 0x382   : > { %2225 = vmatprep.subr.bf16.mxu0 %v10297_v36 }
 0x385   : > { %2226 = vmatpush1.bf16.msra.mxu0 %v10295_v37 }
 0x386   : > { %2227 = vmatprep.subr.bf16.mxu0 %v10300_v38 }
 0x389   : > { %2228 = vmatpush1.bf16.msra.mxu0 %v10298_v39 }
 0x38a   : > { %2229 = vmatprep.subr.bf16.mxu0 %v10303_v40 }
 0x38d   : > { %2230 = vmatpush1.bf16.msra.mxu0 %v10301_v41 }
 0x38e   : > { %9807 = vmatprep.subr.bf16.mxu0 %v11544_v42 }
 0x390   : > { %2232 = vmatmul.mubr.bf16.vlgmr.msra.gmra.mrb[8].mxu0 %v12497_v43  ;;  %v12573_v43 = vshrl.u32 %v1603_v48, 7 }
 0x391   : > { %9809 = vmatprep.mubr.msk.bf16.mxu0 %vm11545_vm0, %v11544_v42 }
 0x392   : > { %v12576_v49 = vsub.s32 2, %v12573_v43  ;;  %v12579_v50 = vsub.s32 3, %v12573_v43  ;;  %v12582_v51 = vsub.s32 0, %v12573_v43  ;;  %v12594_v56 = vsub.s32 1, %v12573_v43 }
 0x393   : > { %v1621_v23 = vsub.s32 4, %v12573_v43 }
 0x394   : > { %v1614_v53 = vrot.slane %v12585_v52, %v12576_v49  ;;  %v1618_v54 = vrot.slane %v12585_v52, %v12579_v50  ;;  %v1606_v55 = vrot.slane %v12585_v52, %v12582_v51  ;;  %v1610_v2 = vrot.slane %v12585_v52, %v12594_v56 }
 0x395   : > { %v1622_v27 = vrot.slane %v12585_v52, %v1621_v23 }
 0x3e3   : > { %v2147_v44 = vpop.f32.mrb[0].mxu0 }
 0x3e4   : > { %v2149_v45 = vpop.f32.mrb[1].mxu0  ;;  %v2148_v62 = vadd.f32 %v2147_v44, %v1606_v55  ;;  %v11547_v44 = vmov 1966171168  }
 0x3e5   : > { %v2151_v46 = vpop.f32.mrb[2].mxu0  ;;  %v2150_v10 = vadd.f32 %v2149_v45, %v1610_v2  ;;  %v2293_v45 = vunpack.c.l.s4 %v11547_v44 }
 0x3e6   : > { %v2153_v47 = vpop.f32.mrb[3].mxu0  ;;  %v2152_v4 = vadd.f32 %v2151_v46, %v1606_v55  ;;  %v2242_v9 = vpack.c.bf16 %v2148_v62, %v2148_v62  ;;  %v1503_v46 = vld [vmem:[#allocation3] sm:$0x3]  ;;  %v2319_v62 = vand.u32 127, %v1603_v48 }
 0x3e7   : > { %v2244_v13 = vpack.c.bf16 %v2150_v10, %v2150_v10  ;;  %v2154_v14 = vadd.f32 %v2153_v47, %v1610_v2  ;;  %v2294_v47 = vunpack.c.0.s8 %v2293_v45  ;;  %vm2290_vm3 = vcmp.gt.f32.partialorder %v1503_v46, 0.0 }
 0x3e8   : > { %v2243_v11 = vpack.c.bf16 %v2152_v4, %v2152_v4  ;;  %vm2320_vm6 = vcmp.le.s32.totalorder %v2319_v62, %v12573_v43  ;;  %v11549_v2 = vmov -1e+09  }
 0x3e9   : > { %v2245_v17 = vpack.c.bf16 %v2154_v14, %v2154_v14 }
 0x423   : > { %v2190_v57 = vpop.f32.mrb[4].mxu0 }
 0x424   : > { %v2191_v58 = vadd.f32 %v2190_v57, %v1614_v53  ;;  %v2192_v59 = vpop.f32.mrb[5].mxu0 }
 0x425   : > { %v2193_v60 = vadd.f32 %v2192_v59, %v1618_v54  ;;  %v2194_v61 = vpop.f32.mrb[6].mxu0 }
 0x426   : > { %v2258_v63 = vpack.c.bf16 %v2191_v58, %v2191_v58  ;;  %v2195_v0 = vadd.f32 %v2194_v61, %v1614_v53  ;;  %v2196_v1 = vpop.f32.mrb[7].mxu0  ;;  %v12665_v53 = vsub.s32 %v2294_v47, %v12573_v43 }
 0x427   : > { %v2260_v3 = vpack.c.bf16 %v2193_v60, %v2193_v60  ;;  %v2197_v7 = vadd.f32 %v2196_v1, %v1618_v54  ;;  %v11548_v54 = vmov 0  }
 0x428   : > { %v2344_v5 = vsel %vm2339_vm1, %v2258_v63, 0  ;;  %v2259_v6 = vpack.c.bf16 %v2195_v0, %v2195_v0  ;;  %2264 = vrot.lane.b32.xlu0 %v2258_v63, %s11546_s14  ;;  %v2291_v55 = vsel %vm2290_vm3, 1, %v11548_v54 }
 0x429   : > { %9808 = vmatpush3.bf16.xpose.msra.mxu0 %v2344_v5  ;;  %v2528_v8 = vsel %vm2339_vm1, %v2260_v3, 0  ;;  %v2261_v12 = vpack.c.bf16 %v2197_v7, %v2197_v7  ;;  %v2298_v57 = vrot.slane %v2291_v55, %v12665_v53 }
 0x42a   : > { %2266 = vrot.lane.b32.xlu1 %v2259_v6, %s11546_s14  ;;  %9832 = vmatpush3.bf16.xpose.msra.mxu1 %v2528_v8  ;;  %v2390_v15 = vsel %vm2339_vm1, %v2259_v6, 0 }
 0x42b   : > { %9813 = vmatprep.subr.bf16.mxu0 %v11544_v42  ;;  %9837 = vmatprep.subr.bf16.mxu1 %v11544_v42  ;;  %v2574_v16 = vsel %vm2339_vm1, %v2261_v12, 0  ;;  %v2306_v58 = vrot.slane %v2298_v57, %v12665_v53  ;;  %v2299_v59 = vcombine.high %v2298_v57, %v2298_v57 }
 0x42c   : > { %2248 = vrot.lane.b32.xlu0 %v2242_v9, %s11546_s14 }
 0x42d   : > { %vm2314_vm4 = vcmp.ne.s32.totalorder %v2306_v58, 0  ;;  %v2313_v61 = vrot.slane %v2299_v59, %v12665_v53 }
 0x42e   : > { %2250 = vrot.lane.b32.xlu1 %v2243_v11, %s11546_s14  ;;  %v2321_v60 = vsel %vm2314_vm4, 1, %v11548_v54 }
 0x42f   : > { %v2326_v63 = vrot.slane %v2321_v60, %v12582_v51  ;;  %vm2315_vm5 = vcmp.ne.s32.totalorder %v2313_v61, 0 }
 0x430   : > { %2270 = vrot.lane.b32.xlu0 %v2260_v3, %s11546_s14  ;;  %9810 = vmatmul.mubr.msk.bf16.vlgmr.msra.gmra.mrb[12].mxu0 %vm2339_vm1, %v2242_v9  ;;  %v2322_v0 = vsel %vm2315_vm5, 1, %v11548_v54 }
 0x431   : > { %9814 = vmatpush3.bf16.xpose.msra.mxu0 %v2390_v15  ;;  %9834 = vmatmul.mubr.msk.bf16.vlgmr.msra.gmra.mrb[0].mxu1 %vm2339_vm1, %v2244_v13  ;;  %vm2331_vm7 = vcmp.eq.s32.totalorder %v2326_v63, 1  ;;  %v2330_v1 = vrot.slane %v2322_v0, %v12582_v51 }
 0x432   : > { %2254 = vrot.lane.b32.xlu1 %v2244_v13, %s11546_s14  ;;  %9838 = vmatpush3.bf16.xpose.msra.mxu1 %v2574_v16  ;;  %vm2335_vm8 = vmand %vm2331_vm7, %vm2320_vm6 }
 0x433   : > { %9815 = vmatprep.mubr.msk.bf16.mxu0 %vm11545_vm0, %v11544_v42  ;;  %9839 = vmatprep.mubr.msk.bf16.mxu1 %vm11545_vm0, %v11544_v42  ;;  %v2337_v3 = vsel %vm2335_vm8, 0.0, %v11549_v2  ;;  %vm2332_vm10 = vcmp.eq.s32.totalorder %v2330_v1, 1 }
 0x434   : > { %2272 = vrot.lane.b32.xlu0 %v2261_v12, %s11546_s14  ;;  %9819 = vmatprep.subr.bf16.mxu0 %v11544_v42  ;;  %vm2336_vm11 = vmand %vm2332_vm10, %vm2320_vm6 }
 0x435   : > { %9843 = vmatprep.subr.bf16.mxu1 %v11544_v42  ;;  %v2338_v13 = vsel %vm2336_vm11, 0.0, %v11549_v2 }
 0x436   : > { %2256 = vrot.lane.b32.xlu1 %v2245_v17, %s11546_s14 }
 0x438   : > { %9816 = vmatmul.mubr.msk.bf16.vlgmr.msra.gmra.mrb[16].mxu0 %vm2339_vm1, %v2243_v11 }
 0x439   : > { %9840 = vmatmul.mubr.msk.bf16.vlgmr.msra.gmra.mrb[4].mxu1 %vm2339_vm1, %v2245_v17  ;;  %9821 = vmatprep.mubr.msk.bf16.mxu0 %vm11545_vm0, %v11544_v42 }
 0x43a   : > { %9845 = vmatprep.mubr.msk.bf16.mxu1 %vm11545_vm0, %v11544_v42 }
 0x463   : > { %v2233_v18 = vpop.f32.mrb[8].mxu0 }
 0x464   : > { %v12626_v19 = vpop.f32.mrb[9].mxu0  ;;  %v2234_v29 = vadd.f32 %v2233_v18, %v1622_v27 }
 0x465   : > { %v2237_v20 = vpop.f32.mrb[10].mxu0 }
 0x466   : > { %v12628_v21 = vpop.f32.mrb[11].mxu0  ;;  %v12642_v33 = vpack.c.bf16 %v2234_v29, %v2234_v29  ;;  %v2238_v35 = vadd.f32 %v2237_v20, %v1622_v27 }
 0x468   : > { %v2810_v37 = vsel %vm2808_vm2, %v12642_v33, 0  ;;  %v12652_v39 = vpack.c.bf16 %v2238_v35, %v2238_v35 }
 0x46a   : > { %v2856_v40 = vsel %vm2808_vm2, %v12652_v39, 0 }
 0x49a   : > { %v2265_v22 = vpop.permute.xlu0 %2264 }
 0x49b   : > { %v2436_v24 = vsel %vm2339_vm1, %v2265_v22, 0 }
 0x49c   : > { %9820 = vmatpush3.bf16.xpose.msra.mxu0 %v2436_v24  ;;  %v2267_v25 = vpop.permute.xlu1 %2266 }
 0x49d   : > { %9825 = vmatprep.subr.bf16.mxu0 %v11544_v42  ;;  %v2482_v30 = vsel %vm2339_vm1, %v2267_v25, 0 }
 0x49e   : > { %v2249_v26 = vpop.permute.xlu0 %2248 }
 0x4a0   : > { %v2251_v32 = vpop.permute.xlu1 %2250 }
 0x4a2   : > { %v2271_v28 = vpop.permute.xlu0 %2270 }
 0x4a3   : > { %v2620_v31 = vsel %vm2339_vm1, %v2271_v28, 0  ;;  %9822 = vmatmul.mubr.msk.bf16.vlgmr.msra.gmra.mrb[20].mxu0 %vm2339_vm1, %v2249_v26 }
 0x4a4   : > { %9826 = vmatpush3.bf16.xpose.msra.mxu0 %v2482_v30  ;;  %9844 = vmatpush3.bf16.xpose.msra.mxu1 %v2620_v31  ;;  %v2255_v36 = vpop.permute.xlu1 %2254 }
 0x4a5   : > { %9827 = vmatprep.mubr.msk.bf16.mxu0 %vm11545_vm0, %v11544_v42  ;;  %9849 = vmatprep.subr.bf16.mxu1 %v11544_v42 }
 0x4a6   : > { %9855 = vmatprep.subr.bf16.mxu0 %v11544_v42  ;;  %v2273_v34 = vpop.permute.xlu0 %2272 }
 0x4a7   : > { %v2666_v38 = vsel %vm2339_vm1, %v2273_v34, 0 }
 0x4a8   : > { %v2257_v41 = vpop.permute.xlu1 %2256 }
 0x4ab   : > { %9828 = vmatmul.mubr.msk.bf16.vlgmr.msra.gmra.mrb[24].mxu0 %vm2339_vm1, %v2251_v32  ;;  %9846 = vmatmul.mubr.msk.bf16.vlgmr.msra.gmra.mrb[8].mxu1 %vm2339_vm1, %v2255_v36 }
 0x4ac   : > { %9850 = vmatpush3.bf16.xpose.msra.mxu1 %v2666_v38  ;;  %9851 = vmatprep.mubr.msk.bf16.mxu1 %vm11545_vm0, %v11544_v42 }
 0x4ad   : > { %9861 = vmatprep.subr.bf16.mxu1 %v11544_v42  ;;  %9856 = vmatpush3.bf16.msra.mxu0 %v2810_v37 }
 0x4ae   : > { %9857 = vmatprep.mubr.msk.bf16.mxu0 %vm11545_vm0, %v11544_v42  ;;  %9867 = vmatprep.subr.bf16.mxu0 %v11544_v42 }
 0x4b3   : > { %9852 = vmatmul.mubr.msk.bf16.vlgmr.msra.gmra.mrb[12].mxu1 %vm2339_vm1, %v2257_v41 }
 0x4b4   : > { %9862 = vmatpush3.bf16.msra.mxu1 %v2856_v40  ;;  %9863 = vmatprep.mubr.msk.bf16.mxu1 %vm11545_vm0, %v11544_v42 }
 0x4b5   : > { %9873 = vmatprep.subr.bf16.mxu1 %v11544_v42 }
 0x503   : > { %v2380_v4 = vpop.f32.mrb[12].mxu0 }
 0x504   : > { %v12680_v48 = vadd.f32 %v2380_v4, %v2337_v3  ;;  %v9811_v5 = vpop.f32.mrb[13].mxu0  ;;  %v2564_v6 = vpop.f32.mrb[0].mxu1 }
 0x505   : > { %v2383_v7 = vpop.f32.mrb[14].mxu0  ;;  %v9835_v8 = vpop.f32.mrb[1].mxu1  ;;  %v2565_v22 = vadd.f32 %v2564_v6, %v2337_v3 }
 0x506   : > { %v9812_v9 = vpop.f32.mrb[15].mxu0  ;;  %v2567_v10 = vpop.f32.mrb[2].mxu1  ;;  %v2709_v11 = vsel %vm2708_vm9, %v12680_v48, -inf }
 0x507   : > { %v9836_v12 = vpop.f32.mrb[3].mxu1  ;;  %2710 = vmax.xlane.f32.xlu0 %v2709_v11  ;;  %v2721_v28 = vsel %vm2708_vm9, %v2565_v22, -inf }
 0x50b   : > { %v2426_v14 = vpop.f32.mrb[16].mxu0 }
 0x50c   : > { %v2427_v15 = vadd.f32 %v2426_v14, %v2338_v13  ;;  %v9817_v16 = vpop.f32.mrb[17].mxu0  ;;  %v2610_v17 = vpop.f32.mrb[4].mxu1 }
 0x50d   : > { %v2429_v18 = vpop.f32.mrb[18].mxu0  ;;  %v9841_v20 = vpop.f32.mrb[5].mxu1  ;;  %v2611_v47 = vadd.f32 %v2610_v17, %v2338_v13 }
 0x50e   : > { %v9818_v24 = vpop.f32.mrb[19].mxu0  ;;  %v2613_v25 = vpop.f32.mrb[6].mxu1  ;;  %v2712_v26 = vsel %vm2708_vm9, %v2427_v15, -inf }
 0x50f   : > { %v9842_v27 = vpop.f32.mrb[7].mxu1  ;;  %2713 = vmax.xlane.f32.xlu1 %v2712_v26  ;;  %v2724_v60 = vsel %vm2708_vm9, %v2611_v47, -inf }
 0x513   : > { %2722 = vmax.xlane.f32.xlu1 %v2721_v28 }
 0x576   : > { %v2472_v29 = vpop.f32.mrb[20].mxu0 }
 0x577   : > { %v2473_v30 = vadd.f32 %v2472_v29, %v2337_v3  ;;  %v9823_v31 = vpop.f32.mrb[21].mxu0 }
 0x578   : > { %v2475_v32 = vpop.f32.mrb[22].mxu0 }
 0x579   : > { %v9824_v34 = vpop.f32.mrb[23].mxu0  ;;  %v2715_v35 = vsel %vm2708_vm9, %v2473_v30, -inf }
 0x57a   : > { %2716 = vmax.xlane.f32.xlu0 %v2715_v35 }
 0x57e   : > { %v2518_v36 = vpop.f32.mrb[24].mxu0  ;;  %v2656_v37 = vpop.f32.mrb[8].mxu1 }
 0x57f   : > { %v2519_v38 = vadd.f32 %v2518_v36, %v2338_v13  ;;  %v2657_v40 = vadd.f32 %v2656_v37, %v2337_v3  ;;  %v9829_v41 = vpop.f32.mrb[25].mxu0  ;;  %v9847_v44 = vpop.f32.mrb[9].mxu1 }
 0x580   : > { %v2521_v45 = vpop.f32.mrb[26].mxu0  ;;  %v2659_v46 = vpop.f32.mrb[10].mxu1  ;;  %v1625_v44 = vsub.s32 5, %v12573_v43 }
 0x581   : > { %v9830_v55 = vpop.f32.mrb[27].mxu0  ;;  %v9848_v57 = vpop.f32.mrb[11].mxu1  ;;  %v2727_v58 = vsel %vm2708_vm9, %v2657_v40, -inf  ;;  %v2718_v59 = vsel %vm2708_vm9, %v2519_v38, -inf }
 0x582   : > { %2728 = vmax.xlane.f32.xlu1 %v2727_v58  ;;  %2719 = vmax.xlane.f32.xlu0 %v2718_v59 }
 0x586   : > { %v2702_v61 = vpop.f32.mrb[12].mxu1  ;;  %2725 = vmax.xlane.f32.xlu0 %v2724_v60 }
 0x587   : > { %v2703_v62 = vadd.f32 %v2702_v61, %v2338_v13  ;;  %v9853_v63 = vpop.f32.mrb[13].mxu1 }
 0x588   : > { %v2705_v0 = vpop.f32.mrb[14].mxu1 }
 0x589   : > { %v9854_v1 = vpop.f32.mrb[15].mxu1  ;;  %v2730_v3 = vsel %vm2708_vm9, %v2703_v62, -inf }
 0x58a   : > { %2731 = vmax.xlane.f32.xlu0 %v2730_v3 }
 0x593   : > { %2280 = vrot.lane.b32.xlu1 %v12642_v33, %s11546_s14 }
 0x594   : > { %v2711_v6 = vpop.xlane.xlu0 %2710 }
 0x595   : > { %v2733_v8 = vsub.f32 %v12680_v48, %v2711_v6 }
 0x597   : > { %v2741_v10 = vmul.f32 1.442695, %v2733_v8 }
 0x59c   : > { %v2714_v4 = vpop.xlane.xlu1 %2713 }
 0x59d   : > { %v2734_v5 = vsub.f32 %v2427_v15, %v2714_v4 }
 0x59f   : > { %v2743_v7 = vmul.f32 1.442695, %v2734_v5 }
 0x5a0   : > { %v2723_v9 = vpop.xlane.xlu1 %2722 }
 0x5a1   : > { %10739 = vpow2.f32 %v2743_v7  ;;  %v2737_v11 = vsub.f32 %v2565_v22, %v2723_v9 }
 0x5a2   : > { %10741 = vpow2.f32 %v2741_v10 }
 0x5a3   : > { %v2749_v12 = vmul.f32 1.442695, %v2737_v11 }
 0x5a5   : > { %10743 = vpow2.f32 %v2749_v12 }
 0x5ab   : > { %v10740_v13 = vpop.eup %10739 }
 0x5ac   : > { %v2760_v14 = vsel %vm2708_vm9, %v10740_v13, 0.0  ;;  %v10742_v16 = vpop.eup %10741 }
 0x5ad   : > { %2761 = vadd.xlane.f32.xlu0 %v2760_v14  ;;  %v2757_v33 = vsel %vm2708_vm9, %v10742_v16, 0.0 }
 0x5af   : > { %v12699_v17 = vpop.eup %10743 }
 0x5b0   : > { %v2769_v48 = vsel %vm2708_vm9, %v12699_v17, 0.0 }
 0x5b7   : > { %2758 = vadd.xlane.f32.xlu1 %v2757_v33 }
 0x5bb   : > { %2770 = vadd.xlane.f32.xlu1 %v2769_v48 }
 0x607   : > { %v2717_v15 = vpop.xlane.xlu0 %2716 }
 0x608   : > { %v2735_v18 = vsub.f32 %v2473_v30, %v2717_v15 }
 0x60a   : > { %v2745_v20 = vmul.f32 1.442695, %v2735_v18 }
 0x60c   : > { %10745 = vpow2.f32 %v2745_v20 }
 0x60f   : > { %v2729_v22 = vpop.xlane.xlu1 %2728  ;;  %v2720_v24 = vpop.xlane.xlu0 %2719 }
 0x610   : > { %v2739_v25 = vsub.f32 %v2657_v40, %v2729_v22  ;;  %v2736_v27 = vsub.f32 %v2519_v38, %v2720_v24 }
 0x612   : > { %v2753_v26 = vmul.f32 1.442695, %v2739_v25  ;;  %v2747_v32 = vmul.f32 1.442695, %v2736_v27 }
 0x613   : > { %v2726_v28 = vpop.xlane.xlu0 %2725  ;;  %v2281_v63 = vpop.permute.xlu1 %2280 }
 0x614   : > { %10747 = vpow2.f32 %v2753_v26  ;;  %v2738_v29 = vsub.f32 %v2611_v47, %v2726_v28  ;;  %v1626_v47 = vrot.slane %v12585_v52, %v1625_v44  ;;  %v2902_v6 = vsel %vm2808_vm2, %v2281_v63, 0  ;;  %v10312_v63 = vld [vmem:[%s12416_s10 + $0x24] ss:$8 sps:$4 sm:$0xff]  }
 0x616   : > { %v10746_v31 = vpop.eup %10745  ;;  %v2751_v34 = vmul.f32 1.442695, %v2738_v29  ;;  %v2236_v58 = vadd.f32 %v12626_v19, %v1626_v47  ;;  %v2240_v61 = vadd.f32 %v12628_v21, %v1626_v47 }
 0x617   : > { %v2732_v35 = vpop.xlane.xlu0 %2731  ;;  %v2763_v36 = vsel %vm2708_vm9, %v10746_v31, 0.0 }
 0x618   : > { %10749 = vpow2.f32 %v2751_v34  ;;  %v2740_v37 = vsub.f32 %v2703_v62, %v2732_v35  ;;  %2764 = vadd.xlane.f32.xlu1 %v2763_v36  ;;  %v2276_v60 = vpack.c.bf16 %v2236_v58, %v2236_v58  ;;  %v2277_v62 = vpack.c.bf16 %v2240_v61, %v2240_v61  ;;  %v10306_v61 = vld [vmem:[%s12416_s10 + $0x4] ss:$8 sps:$4 sm:$0xff]  }
 0x619   : > { %10751 = vpow2.f32 %v2747_v32 }
 0x61a   : > { %v2755_v30 = vmul.f32 1.442695, %v2740_v37  ;;  %v2994_v14 = vsel %vm2808_vm2, %v2276_v60, 0  ;;  %v3040_v32 = vsel %vm2808_vm2, %v2277_v62, 0 }
 0x61c   : > { %10753 = vpow2.f32 %v2755_v30 }
 0x61e   : > { %v12704_v41 = vpop.eup %10747 }
 0x61f   : > { %v2775_v38 = vsel %vm2708_vm9, %v12704_v41, 0.0 }
 0x620   : > { %2776 = vadd.xlane.f32.xlu1 %v2775_v38 }
 0x622   : > { %v12708_v40 = vpop.eup %10749 }
 0x623   : > { %v2772_v45 = vsel %vm2708_vm9, %v12708_v40, 0.0  ;;  %v12713_v46 = vpop.eup %10751 }
 0x624   : > { %2773 = vadd.xlane.f32.xlu0 %v2772_v45  ;;  %v2766_v55 = vsel %vm2708_vm9, %v12713_v46, 0.0 }
 0x626   : > { %v12720_v57 = vpop.eup %10753 }
 0x627   : > { %v2778_v59 = vsel %vm2708_vm9, %v12720_v57, 0.0 }
 0x628   : > { %2767 = vadd.xlane.f32.xlu0 %v2766_v55 }
 0x62c   : > { %2779 = vadd.xlane.f32.xlu0 %v2778_v59 }
 0x631   : > { %2286 = vrot.lane.b32.xlu1 %v2276_v60, %s11546_s14 }
 0x635   : > { %2288 = vrot.lane.b32.xlu1 %v2277_v62, %s11546_s14  ;;  %v10309_v62 = vld [vmem:[%s12416_s10 + $0x14] ss:$8 sps:$4 sm:$0xff]  }
 0x63a   : > { %v2762_v52 = vpop.xlane.xlu0 %2761 }
 0x63b   : > { %10755 = vrcp.f32 %v2762_v52  ;;  %v10307_v52 = vld [vmem:[%s12416_s10 + $0x10] ss:$8 sps:$4 sm:$0xff]  }
 0x642   : > { %2282 = vrot.lane.b32.xlu0 %v12652_v39, %s11546_s14 }
 0x644   : > { %v2759_v0 = vpop.xlane.xlu1 %2758 }
 0x645   : > { %v10756_v19 = vpop.eup %10755  ;;  %10757 = vrcp.f32 %v2759_v0  ;;  %v10310_v0 = vld [vmem:[%s12416_s10 + $0x20] ss:$8 sps:$4 sm:$0xff]  }
 0x646   : > { %v2790_v1 = vmul.f32 %v10756_v19, %v10740_v13  ;;  %v10315_v19 = vld [vmem:[%s12416_s10 + $0x34] ss:$8 sps:$4 sm:$0xff]  }
 0x648   : > { %v2798_v3 = vpack.c.bf16 %v2790_v1, %v2790_v1  ;;  %v2771_v39 = vpop.xlane.xlu1 %2770  ;;  %v10313_v1 = vld [vmem:[%s12416_s10 + $0x30] ss:$8 sps:$4 sm:$0xff]  }
 0x64a   : > { %9864 = vmatmul.mubr.msk.bf16.vlgmr.msra.gmra.mrb[16].mxu1 %vm2708_vm9, %v2798_v3  ;;  %v10318_v3 = vld [vmem:[%s12416_s10 + $0x44] ss:$8 sps:$4 sm:$0xff]  }
 0x64b   : > { %9875 = vmatprep.mubr.msk.bf16.mxu1 %vm11545_vm0, %v11544_v42 }
 0x64f   : > { %v10758_v21 = vpop.eup %10757 }
 0x650   : > { %v2789_v4 = vmul.f32 %v10758_v21, %v10742_v16  ;;  %v10316_v21 = vld [vmem:[%s12416_s10 + $0x40] ss:$8 sps:$4 sm:$0xff]  }
 0x652   : > { %v2797_v5 = vpack.c.bf16 %v2789_v4, %v2789_v4  ;;  %v10321_v4 = vld [vmem:[%s12416_s10 + $0x54] ss:$8 sps:$4 sm:$0xff]  }
 0x654   : > { %9858 = vmatmul.mubr.msk.bf16.vlgmr.msra.gmra.mrb[28].mxu0 %vm2708_vm9, %v2797_v5  ;;  %v10319_v5 = vld [vmem:[%s12416_s10 + $0x50] ss:$8 sps:$4 sm:$0xff]  }
 0x655   : > { %9868 = vmatpush3.bf16.msra.mxu0 %v2902_v6  ;;  %9869 = vmatprep.mubr.msk.bf16.mxu0 %vm11545_vm0, %v11544_v42  ;;  %v10324_v6 = vld [vmem:[%s12416_s10 + $0x64] ss:$8 sps:$4 sm:$0xff]  }
 0x656   : > { %9879 = vmatprep.subr.bf16.mxu0 %v11544_v42 }
 0x6a5   : > { %v2765_v7 = vpop.xlane.xlu1 %2764 }
 0x6a6   : > { %10759 = vrcp.f32 %v2765_v7  ;;  %v10327_v7 = vld [vmem:[%s12416_s10 + $0x74] ss:$8 sps:$4 sm:$0xff]  }
 0x6a7   : > { %10761 = vrcp.f32 %v2771_v39  ;;  %v10322_v39 = vld [vmem:[%s12416_s10 + $0x60] ss:$8 sps:$4 sm:$0xff]  }
 0x6ad   : > { %v2777_v8 = vpop.xlane.xlu1 %2776 }
 0x6ae   : > { %10763 = vrcp.f32 %v2777_v8  ;;  %v10325_v8 = vld [vmem:[%s12416_s10 + $0x70] ss:$8 sps:$4 sm:$0xff]  }
 0x6b0   : > { %v10760_v9 = vpop.eup %10759 }
 0x6b1   : > { %v2791_v10 = vmul.f32 %v10760_v9, %v10746_v31  ;;  %v2774_v11 = vpop.xlane.xlu0 %2773  ;;  %v10762_v13 = vpop.eup %10761  ;;  %v10330_v9 = vld [vmem:[%s12416_s10 + $0x84] ss:$8 sps:$4 sm:$0xff]  }
 0x6b2   : > { %v2793_v33 = vmul.f32 %v10762_v13, %v12699_v17  ;;  %v2287_v15 = vpop.permute.xlu1 %2286  ;;  %v10336_v13 = vld [vmem:[%s12416_s10 + $0xa4] ss:$8 sps:$4 sm:$0xff]  }
 0x6b3   : > { %v2799_v12 = vpack.c.bf16 %v2791_v10, %v2791_v10  ;;  %v3086_v22 = vsel %vm2808_vm2, %v2287_v15, 0  ;;  %v10328_v10 = vld [vmem:[%s12416_s10 + $0x80] ss:$8 sps:$4 sm:$0xff]  }
 0x6b4   : > { %v2801_v18 = vpack.c.bf16 %v2793_v33, %v2793_v33 }
 0x6b5   : > { %9870 = vmatmul.mubr.msk.bf16.vlgmr.msra.gmra.mrb[32].mxu0 %vm2708_vm9, %v2799_v12  ;;  %v2768_v16 = vpop.xlane.xlu0 %2767  ;;  %v10331_v12 = vld [vmem:[%s12416_s10 + $0x90] ss:$8 sps:$4 sm:$0xff]  }
 0x6b6   : > { %9880 = vmatpush3.bf16.msra.mxu0 %v2994_v14  ;;  %10765 = vrcp.f32 %v2768_v16  ;;  %9881 = vmatprep.mubr.msk.bf16.mxu0 %vm11545_vm0, %v11544_v42  ;;  %v2289_v35 = vpop.permute.xlu1 %2288  ;;  %v10334_v14 = vld [vmem:[%s12416_s10 + $0xa0] ss:$8 sps:$4 sm:$0xff]  }
 0x6b7   : > { %9891 = vmatprep.subr.bf16.mxu0 %v11544_v42  ;;  %10767 = vrcp.f32 %v2774_v11  ;;  %v3132_v30 = vsel %vm2808_vm2, %v2289_v35, 0  ;;  %v10333_v11 = vld [vmem:[%s12416_s10 + $0x94] ss:$8 sps:$4 sm:$0xff]  }
 0x6b8   : > { %v10764_v20 = vpop.eup %10763 }
 0x6b9   : > { %v2780_v48 = vpop.xlane.xlu0 %2779  ;;  %v2795_v17 = vmul.f32 %v10764_v20, %v12704_v41 }
 0x6ba   : > { %10769 = vrcp.f32 %v2780_v48 }
 0x6bb   : > { %v2803_v29 = vpack.c.bf16 %v2795_v17, %v2795_v17 }
 0x6bd   : > { %9882 = vmatmul.mubr.msk.bf16.vlgmr.msra.gmra.mrb[36].mxu0 %vm2708_vm9, %v2801_v18  ;;  %v2283_v24 = vpop.permute.xlu0 %2282  ;;  %v10339_v18 = vld [vmem:[%s12416_s10 + $0xb4] ss:$8 sps:$4 sm:$0xff]  }
 0x6be   : > { %9892 = vmatpush3.bf16.msra.mxu0 %v3086_v22  ;;  %v2948_v25 = vsel %vm2808_vm2, %v2283_v24, 0  ;;  %9893 = vmatprep.mubr.msk.bf16.mxu0 %vm11545_vm0, %v11544_v42  ;;  %v10337_v22 = vld [vmem:[%s12416_s10 + $0xb0] ss:$8 sps:$4 sm:$0xff]  }
 0x6bf   : > { %9874 = vmatpush3.bf16.msra.mxu1 %v2948_v25  ;;  %3400 = vmatprep.subr.bf16.mxu0 %v10306_v61  ;;  %v10342_v25 = vld [vmem:[%s12416_s10 + $0xc4] ss:$8 sps:$4 sm:$0xff]  }
 0x6c0   : > { %v10766_v26 = vpop.eup %10765  ;;  %9885 = vmatprep.subr.bf16.mxu1 %v11544_v42 }
 0x6c1   : > { %v2792_v27 = vmul.f32 %v10766_v26, %v12713_v46  ;;  %v10768_v31 = vpop.eup %10767  ;;  %v10340_v26 = vld [vmem:[%s12416_s10 + $0xc0] ss:$8 sps:$4 sm:$0xff]  }
 0x6c2   : > { %v2794_v34 = vmul.f32 %v10768_v31, %v12708_v40  ;;  %v10348_v31 = vld [vmem:[%s12416_s10 + $0xe4] ss:$8 sps:$4 sm:$0xff]  }
 0x6c3   : > { %v2800_v28 = vpack.c.bf16 %v2792_v27, %v2792_v27 }
 0x6c4   : > { %v2802_v36 = vpack.c.bf16 %v2794_v34, %v2794_v34  ;;  %v10770_v37 = vpop.eup %10769 }
 0x6c5   : > { %9876 = vmatmul.mubr.msk.bf16.vlgmr.msra.gmra.mrb[20].mxu1 %vm2708_vm9, %v2800_v28  ;;  %9894 = vmatmul.mubr.msk.bf16.vlgmr.msra.gmra.mrb[40].mxu0 %vm2708_vm9, %v2803_v29  ;;  %v2796_v41 = vmul.f32 %v10770_v37, %v12720_v57  ;;  %v10304_v57 = vld [vmem:[%s12416_s10] ss:$8 sps:$4 sm:$0xff]   ;;  %v10345_v28 = vld [vmem:[%s12416_s10 + $0xd4] ss:$8 sps:$4 sm:$0xff]   ;;  %v10343_v29 = vld [vmem:[%s12416_s10 + $0xd0] ss:$8 sps:$4 sm:$0xff]  }
 0x6c6   : > { %9886 = vmatpush3.bf16.msra.mxu1 %v3040_v32  ;;  %9887 = vmatprep.mubr.msk.bf16.mxu1 %vm11545_vm0, %v11544_v42 }
 0x6c7   : > { %9897 = vmatprep.subr.bf16.mxu1 %v11544_v42  ;;  %v2804_v38 = vpack.c.bf16 %v2796_v41, %v2796_v41  ;;  %3401 = vmatpush1.bf16.msra.mxu0 %v10304_v57 }
 0x6c8   : > { %3402 = vmatprep.subr.bf16.mxu0 %v10309_v62 }
 0x6cb   : > { %3403 = vmatpush1.bf16.msra.mxu0 %v10307_v52 }
 0x6cc   : > { %3404 = vmatprep.subr.bf16.mxu0 %v10312_v63 }
 0x6cd   : > { %9888 = vmatmul.mubr.msk.bf16.vlgmr.msra.gmra.mrb[24].mxu1 %vm2708_vm9, %v2802_v36 }
 0x6ce   : > { %9898 = vmatpush3.bf16.msra.mxu1 %v3132_v30  ;;  %9899 = vmatprep.mubr.msk.bf16.mxu1 %vm11545_vm0, %v11544_v42 }
 0x6cf   : > { %3405 = vmatpush1.bf16.msra.mxu0 %v10310_v0 }
 0x6d0   : > { %3406 = vmatprep.subr.bf16.mxu0 %v10315_v19 }
 0x6d3   : > { %3407 = vmatpush1.bf16.msra.mxu0 %v10313_v1 }
 0x6d4   : > { %3408 = vmatprep.subr.bf16.mxu0 %v10318_v3 }
 0x6d5   : > { %9900 = vmatmul.mubr.msk.bf16.vlgmr.msra.gmra.mrb[28].mxu1 %vm2708_vm9, %v2804_v38  ;;  %v10346_v38 = vld [vmem:[%s12416_s10 + $0xe0] ss:$8 sps:$4 sm:$0xff]  }
 0x6d7   : > { %3409 = vmatpush1.bf16.msra.mxu0 %v10316_v21 }
 0x6d8   : > { %3410 = vmatprep.subr.bf16.mxu0 %v10321_v4 }
 0x6db   : > { %3411 = vmatpush1.bf16.msra.mxu0 %v10319_v5 }
 0x6dc   : > { %3412 = vmatprep.subr.bf16.mxu0 %v10324_v6 }
 0x6df   : > { %3413 = vmatpush1.bf16.msra.mxu0 %v10322_v39 }
 0x6e0   : > { %3414 = vmatprep.subr.bf16.mxu0 %v10327_v7 }
 0x6e3   : > { %3415 = vmatpush1.bf16.msra.mxu0 %v10325_v8 }
 0x6e4   : > { %3416 = vmatprep.subr.bf16.mxu0 %v10330_v9 }
 0x6e7   : > { %3417 = vmatpush1.bf16.msra.mxu0 %v10328_v10 }
 0x6e8   : > { %3418 = vmatprep.subr.bf16.mxu0 %v10333_v11 }
 0x6eb   : > { %3419 = vmatpush1.bf16.msra.mxu0 %v10331_v12  ;;  %v3228_v12 = vld [vmem:[%s13779_s9] sm:$0x3] }
 0x6ec   : > { %3420 = vmatprep.subr.bf16.mxu0 %v10336_v13  ;;  %v3233_v13 = vrot.slane %v3228_v12, %v12582_v51 }
 0x6ef   : > { %3421 = vmatpush1.bf16.msra.mxu0 %v10334_v14 }
 0x6f0   : > { %3422 = vmatprep.subr.bf16.mxu0 %v10339_v18 }
 0x6f3   : > { %3423 = vmatpush1.bf16.msra.mxu0 %v10337_v22 }
 0x6f4   : > { %3424 = vmatprep.subr.bf16.mxu0 %v10342_v25 }
 0x6f7   : > { %3425 = vmatpush1.bf16.msra.mxu0 %v10340_v26  ;;  %v10817_v26 = vld [vmem:[#allocation2 + $0x10] sm:$0xff] }
 0x6f8   : > { %3426 = vmatprep.subr.bf16.mxu0 %v10345_v28  ;;  %v10818_v28 = vld [vmem:[#allocation2 + $0x18] sm:$0xff] }
 0x6fb   : > { %3427 = vmatpush1.bf16.msra.mxu0 %v10343_v29 }
 0x6fc   : > { %3428 = vmatprep.subr.bf16.mxu0 %v10348_v31 }
 0x6ff   : > { %3429 = vmatpush1.bf16.msra.mxu0 %v10346_v38  ;;  %v10369_v38 = vld [vmem:[%s12421_s29 + $0x14] ss:$8 sps:$4 sm:$0xff]  }
 0x71d   : > { %v12765_v40 = vpop.f32.mrb[16].mxu1 }
 0x71e   : > { %v9865_v45 = vpop.f32.mrb[17].mxu1 }
 0x71f   : > { %v2895_v46 = vpop.f32.mrb[18].mxu1 }
 0x720   : > { %v9866_v47 = vpop.f32.mrb[19].mxu1 }
 0x721   : > { %v10349_v47 = vld [vmem:[%s12416_s10 + $0xf0] ss:$8 sps:$4 sm:$0xff]  }
 0x727   : > { %v12767_v55 = vpop.f32.mrb[28].mxu0 }
 0x728   : > { %v9859_v58 = vpop.f32.mrb[29].mxu0 }
 0x729   : > { %v2849_v59 = vpop.f32.mrb[30].mxu0  ;;  %v10351_v58 = vld [vmem:[%s12416_s10 + $0xf4] ss:$8 sps:$4 sm:$0xff]  }
 0x72a   : > { %v9860_v60 = vpop.f32.mrb[31].mxu0  ;;  %3430 = vmatprep.subr.bf16.mxu0 %v10351_v58  ;;  %v10358_v58 = vld [vmem:[%s12424_s7 + $0x40] ss:$16 sps:$4 sm:$0xff]  }
 0x72b   : > { %3431 = vmatpush1.bf16.msra.mxu0 %v10349_v47  ;;  %v10375_v47 = vld [vmem:[%s12421_s29 + $0x24] ss:$8 sps:$4 sm:$0xff]  }
 0x788   : > { %v2938_v16 = vpop.f32.mrb[32].mxu0 }
 0x789   : > { %v9871_v33 = vpop.f32.mrb[33].mxu0 }
 0x78a   : > { %v2941_v48 = vpop.f32.mrb[34].mxu0 }
 0x78b   : > { %v9872_v15 = vpop.f32.mrb[35].mxu0 }
 0x78c   : > { %v10815_v15 = vld [vmem:[#allocation2] sm:$0xff] }
 0x790   : > { %v3030_v20 = vpop.f32.mrb[36].mxu0 }
 0x791   : > { %v9883_v24 = vpop.f32.mrb[37].mxu0 }
 0x792   : > { %v3033_v17 = vpop.f32.mrb[38].mxu0  ;;  %v10816_v24 = vld [vmem:[#allocation2 + $0x8] sm:$0xff] }
 0x793   : > { %v9884_v27 = vpop.f32.mrb[39].mxu0 }
 0x798   : > { %v2984_v32 = vpop.f32.mrb[20].mxu1  ;;  %v3122_v34 = vpop.f32.mrb[40].mxu0 }
 0x799   : > { %v10145_v35 = vpack.i.bf16 %v2984_v32, %v2938_v16  ;;  %v9877_v36 = vpop.f32.mrb[21].mxu1  ;;  %v9895_v37 = vpop.f32.mrb[41].mxu0 }
 0x79a   : > { %v2987_v30 = vpop.f32.mrb[22].mxu1  ;;  %v3125_v41 = vpop.f32.mrb[42].mxu0  ;;  %v10357_v36 = vld [vmem:[%s12424_s7 + $0x24] ss:$16 sps:$4 sm:$0xff]  }
 0x79b   : > { %v9878_v45 = vpop.f32.mrb[23].mxu1  ;;  %10146 = vrot.lane.b32.xlu1 %v10145_v35, %s11546_s14  ;;  %v9896_v46 = vpop.f32.mrb[43].mxu0  ;;  %v10354_v35 = vld [vmem:[%s12424_s7 + $0x4] ss:$16 sps:$4 sm:$0xff]   ;;  %v10363_v30 = vld [vmem:[%s12421_s29 + $0x4] ss:$8 sps:$4 sm:$0xff]  }
 0x79c   : > { %4179 = vmatprep.subr.bf16.mxu0 %v10354_v35  ;;  %v10361_v37 = vld [vmem:[%s12421_s29] ss:$8 sps:$4 sm:$0xff]   ;;  %v10355_v41 = vld [vmem:[%s12424_s7 + $0x20] ss:$16 sps:$4 sm:$0xff]   ;;  %3718 = vmatprep.subr.bf16.mxu1 %v10363_v30  ;;  %v10367_v46 = vld [vmem:[%s12421_s29 + $0x10] ss:$8 sps:$4 sm:$0xff]  }
 0x79d   : > { %v10360_v45 = vld [vmem:[%s12424_s7 + $0x44] ss:$16 sps:$4 sm:$0xff]   ;;  %3719 = vmatpush1.bf16.msra.mxu1 %v10361_v37  ;;  %v10417_v37 = vld [vmem:[%s12421_s29 + $0x94] ss:$8 sps:$4 sm:$0xff]  }
 0x79e   : > { %3720 = vmatprep.subr.bf16.mxu1 %v10369_v38  ;;  %v10420_v30 = vld [vmem:[%s12424_s7 + $0x184] ss:$16 sps:$4 sm:$0xff]   ;;  %v10418_v38 = vld [vmem:[%s12424_s7 + $0x180] ss:$16 sps:$4 sm:$0xff]  }
 0x7a0   : > { %v3076_v59 = vpop.f32.mrb[24].mxu1 }
 0x7a1   : > { %v9889_v60 = vpop.f32.mrb[25].mxu1  ;;  %3721 = vmatpush1.bf16.msra.mxu1 %v10367_v46  ;;  %v10426_v46 = vld [vmem:[%s12424_s7 + $0x1a4] ss:$16 sps:$4 sm:$0xff]  }
 0x7a2   : > { %v3079_v57 = vpop.f32.mrb[26].mxu1  ;;  %v10373_v60 = vld [vmem:[%s12421_s29 + $0x20] ss:$8 sps:$4 sm:$0xff]   ;;  %3722 = vmatprep.subr.bf16.mxu1 %v10375_v47 }
 0x7a3   : > { %v9890_v61 = vpop.f32.mrb[27].mxu1  ;;  %v10381_v57 = vld [vmem:[%s12421_s29 + $0x34] ss:$8 sps:$4 sm:$0xff]   ;;  %v10421_v47 = vld [vmem:[%s12421_s29 + $0xa0] ss:$8 sps:$4 sm:$0xff]  }
 0x7a4   : > { %v10364_v61 = vld [vmem:[%s12424_s7 + $0x60] ss:$16 sps:$4 sm:$0xff]  }
 0x7a5   : > { %3723 = vmatpush1.bf16.msra.mxu1 %v10373_v60  ;;  %v10432_v60 = vld [vmem:[%s12424_s7 + $0x1c4] ss:$16 sps:$4 sm:$0xff]  }
 0x7a6   : > { %3724 = vmatprep.subr.bf16.mxu1 %v10381_v57  ;;  %v10427_v57 = vld [vmem:[%s12421_s29 + $0xb0] ss:$8 sps:$4 sm:$0xff]  }
 0x7a8   : > { %v3168_v62 = vpop.f32.mrb[28].mxu1 }
 0x7a9   : > { %v10140_v52 = vpack.i.bf16 %v3168_v62, %v3122_v34  ;;  %v9901_v63 = vpop.f32.mrb[29].mxu1  ;;  %v10352_v34 = vld [vmem:[%s12424_s7] ss:$16 sps:$4 sm:$0xff]   ;;  %v10372_v62 = vld [vmem:[%s12424_s7 + $0x84] ss:$16 sps:$4 sm:$0xff]  }
 0x7aa   : > { %v3171_v0 = vpop.f32.mrb[30].mxu1  ;;  %v10387_v63 = vld [vmem:[%s12421_s29 + $0x44] ss:$8 sps:$4 sm:$0xff]  }
 0x7ab   : > { %v9902_v19 = vpop.f32.mrb[31].mxu1  ;;  %10141 = vrot.lane.b32.xlu0 %v10140_v52, %s11546_s14  ;;  %v10379_v52 = vld [vmem:[%s12421_s29 + $0x30] ss:$8 sps:$4 sm:$0xff]   ;;  %v10370_v0 = vld [vmem:[%s12424_s7 + $0x80] ss:$16 sps:$4 sm:$0xff]  }
 0x7ac   : > { %v10378_v19 = vld [vmem:[%s12424_s7 + $0xa4] ss:$16 sps:$4 sm:$0xff]   ;;  %3725 = vmatpush1.bf16.msra.mxu1 %v10379_v52 }
 0x7ad   : > { %3726 = vmatprep.subr.bf16.mxu1 %v10387_v63  ;;  %v10438_v52 = vld [vmem:[%s12424_s7 + $0x1e4] ss:$16 sps:$4 sm:$0xff]  }
 0x7ae   : > { %v10433_v63 = vld [vmem:[%s12421_s29 + $0xc0] ss:$8 sps:$4 sm:$0xff]  }
 0x80d   : > { %v10147_v1 = vpop.permute.xlu1 %10146 }
 0x80e   : > { %v10149_v3 = vunpack.i.h.bf16 %v10147_v1  ;;  %v10148_v21 = vunpack.i.l.bf16 %v10147_v1  ;;  %v10385_v1 = vld [vmem:[%s12421_s29 + $0x40] ss:$8 sps:$4 sm:$0xff]  }
 0x80f   : > { %3727 = vmatpush1.bf16.msra.mxu1 %v10385_v1  ;;  %v12909_v1 = vld [vmem:[%s13780_s23] ss:$8 sps:$4 sm:$0xff]  }
 0x810   : > { %v3191_v4 = vsel %vm2339_vm1, %v12765_v40, %v10149_v3  ;;  %v3190_v5 = vsel %vm2339_vm1, %v12767_v55, %v10148_v21  ;;  %v3237_v40 = vrot.slane %v3228_v12, %v12594_v56  ;;  %v10393_v3 = vld [vmem:[%s12421_s29 + $0x54] ss:$8 sps:$4 sm:$0xff]   ;;  %v10403_v12 = vld [vmem:[%s12421_s29 + $0x70] ss:$8 sps:$4 sm:$0xff]  }
 0x811   : > { %v3194_v6 = vpack.c.bf16 %v3191_v4, %v3190_v5  ;;  %v10376_v21 = vld [vmem:[%s12424_s7 + $0xa0] ss:$16 sps:$4 sm:$0xff]   ;;  %v10384_v4 = vld [vmem:[%s12424_s7 + $0xc4] ss:$16 sps:$4 sm:$0xff]   ;;  %3728 = vmatprep.subr.bf16.mxu1 %v10393_v3 }
 0x812   : > { %v10391_v5 = vld [vmem:[%s12421_s29 + $0x50] ss:$8 sps:$4 sm:$0xff]   ;;  %v10444_v3 = vld [vmem:[%s12421_s29 + $0xd4] ss:$8 sps:$4 sm:$0xff]  }
 0x813   : > { %3729 = vmatpush1.bf16.msra.mxu1 %v10391_v5  ;;  %v10447_v5 = vld [vmem:[%s12421_s29 + $0xe4] ss:$8 sps:$4 sm:$0xff]  }
 0x81d   : > { %v10142_v39 = vpop.permute.xlu0 %10141 }
 0x81e   : > { %v10144_v7 = vunpack.i.h.bf16 %v10142_v39  ;;  %v10143_v8 = vunpack.i.l.bf16 %v10142_v39  ;;  %v10382_v39 = vld [vmem:[%s12424_s7 + $0xc0] ss:$16 sps:$4 sm:$0xff]  }
 0x820   : > { %v3192_v9 = vsel %vm2339_vm1, %v3030_v20, %v10143_v8  ;;  %v3193_v10 = vsel %vm2339_vm1, %v3076_v59, %v10144_v7  ;;  %v10366_v59 = vld [vmem:[%s12424_s7 + $0x64] ss:$16 sps:$4 sm:$0xff]  }
 0x821   : > { %v3195_v11 = vpack.c.bf16 %v3193_v10, %v3192_v9  ;;  %v10390_v7 = vld [vmem:[%s12424_s7 + $0xe4] ss:$16 sps:$4 sm:$0xff]   ;;  %v10405_v9 = vld [vmem:[%s12421_s29 + $0x74] ss:$8 sps:$4 sm:$0xff]  }
 0x822   : > { %v10397_v8 = vld [vmem:[%s12421_s29 + $0x60] ss:$8 sps:$4 sm:$0xff]   ;;  %v10388_v10 = vld [vmem:[%s12424_s7 + $0xe0] ss:$16 sps:$4 sm:$0xff]  }
 0x823   : > { %3432 = vmatprep.mubr.bf16.mxu0 %v3195_v11  ;;  %v10396_v11 = vld [vmem:[%s12424_s7 + $0x104] ss:$16 sps:$4 sm:$0xff]  }
 0x824   : > { %3433 = vmatmul.mubr.bf16.vlgmr.msra.gmra.mrb[44].mxu0 %v3194_v6  ;;  %v10399_v6 = vld [vmem:[%s12421_s29 + $0x64] ss:$8 sps:$4 sm:$0xff]  }
 0x825   : > { %4180 = vmatpush1.bf16.msra.mxu0 %v10352_v34  ;;  %3730 = vmatprep.subr.bf16.mxu1 %v10399_v6  ;;  %v10450_v6 = vld [vmem:[%s12421_s29 + $0xf4] ss:$8 sps:$4 sm:$0xff]  }
 0x826   : > { %4181 = vmatprep.subr.bf16.mxu0 %v10357_v36  ;;  %3731 = vmatpush1.bf16.msra.mxu1 %v10397_v8 }
 0x827   : > { %3732 = vmatprep.subr.bf16.mxu1 %v10405_v9 }
 0x829   : > { %4182 = vmatpush1.bf16.msra.mxu0 %v10355_v41  ;;  %v10415_v41 = vld [vmem:[%s12421_s29 + $0x90] ss:$8 sps:$4 sm:$0xff]  }
 0x82a   : > { %4183 = vmatprep.subr.bf16.mxu0 %v10360_v45  ;;  %3733 = vmatpush1.bf16.msra.mxu1 %v10403_v12  ;;  %v10423_v45 = vld [vmem:[%s12421_s29 + $0xa4] ss:$8 sps:$4 sm:$0xff]  }
 0x82d   : > { %4184 = vmatpush1.bf16.msra.mxu0 %v10358_v58  ;;  %v10424_v58 = vld [vmem:[%s12424_s7 + $0x1a0] ss:$16 sps:$4 sm:$0xff]  }
 0x82e   : > { %4185 = vmatprep.subr.bf16.mxu0 %v10366_v59  ;;  %v10429_v59 = vld [vmem:[%s12421_s29 + $0xb4] ss:$8 sps:$4 sm:$0xff]  }
 0x831   : > { %4186 = vmatpush1.bf16.msra.mxu0 %v10364_v61  ;;  %v10430_v61 = vld [vmem:[%s12424_s7 + $0x1c0] ss:$16 sps:$4 sm:$0xff]  }
 0x832   : > { %4187 = vmatprep.subr.bf16.mxu0 %v10372_v62  ;;  %v10435_v62 = vld [vmem:[%s12421_s29 + $0xc4] ss:$8 sps:$4 sm:$0xff]  }
 0x835   : > { %4188 = vmatpush1.bf16.msra.mxu0 %v10370_v0  ;;  %v10436_v0 = vld [vmem:[%s12424_s7 + $0x1e0] ss:$16 sps:$4 sm:$0xff]  }
 0x836   : > { %4189 = vmatprep.subr.bf16.mxu0 %v10378_v19  ;;  %v10441_v19 = vld [vmem:[%s13780_s23 + $0x4] ss:$8 sps:$4 sm:$0xff]  }
 0x837   : > { %4211 = vmatprep.mubr.bf16.mxu0 %v10441_v19 }
 0x839   : > { %4190 = vmatpush1.bf16.msra.mxu0 %v10376_v21  ;;  %v10442_v21 = vld [vmem:[%s12421_s29 + $0xd0] ss:$8 sps:$4 sm:$0xff]  }
 0x83a   : > { %4191 = vmatprep.subr.bf16.mxu0 %v10384_v4  ;;  %v10445_v4 = vld [vmem:[%s12421_s29 + $0xe0] ss:$8 sps:$4 sm:$0xff]  }
 0x83d   : > { %4192 = vmatpush1.bf16.msra.mxu0 %v10382_v39  ;;  %v10448_v39 = vld [vmem:[%s12421_s29 + $0xf0] ss:$8 sps:$4 sm:$0xff]  }
 0x83e   : > { %4193 = vmatprep.subr.bf16.mxu0 %v10390_v7  ;;  %v10453_v7 = vld [vmem:[%s12424_s7 + $0xc] ss:$16 sps:$4 sm:$0xff]  }
 0x841   : > { %4194 = vmatpush1.bf16.msra.mxu0 %v10388_v10 }
 0x842   : > { %4195 = vmatprep.subr.bf16.mxu0 %v10396_v11 }
 0x8f7   : > { %v3434_v14 = vpop.f32.mrb[44].mxu0 }
 0x8f8   : > { %v3435_v16 = vadd.f32 %v3434_v14, %v3233_v13  ;;  %v3436_v55 = vpop.f32.mrb[45].mxu0  ;;  %v10402_v14 = vld [vmem:[%s12424_s7 + $0x124] ss:$16 sps:$4 sm:$0xff]  }
 0x8f9   : > { %v3437_v33 = vadd.f32 %v3436_v55, %v3237_v40  ;;  %v3438_v48 = vpop.f32.mrb[46].mxu0  ;;  %v10400_v55 = vld [vmem:[%s12424_s7 + $0x120] ss:$16 sps:$4 sm:$0xff]  }
 0x8fa   : > { %v12813_v18 = vadd.f32 %v10815_v15, %v3435_v16  ;;  %v3439_v20 = vadd.f32 %v3438_v48, %v3233_v13  ;;  %v3440_v22 = vpop.f32.mrb[47].mxu0  ;;  %v10411_v13 = vld [vmem:[%s12421_s29 + $0x84] ss:$8 sps:$4 sm:$0xff]   ;;  %v10409_v16 = vld [vmem:[%s12421_s29 + $0x80] ss:$8 sps:$4 sm:$0xff]  }
 0x8fb   : > { %v12815_v25 = vadd.f32 %v10816_v24, %v3437_v33  ;;  %v3441_v17 = vadd.f32 %v3440_v22, %v3237_v40  ;;  %v10394_v40 = vld [vmem:[%s12424_s7 + $0x100] ss:$16 sps:$4 sm:$0xff]   ;;  %3734 = vmatprep.subr.bf16.mxu1 %v10411_v13  ;;  %v10408_v33 = vld [vmem:[%s12424_s7 + $0x144] ss:$16 sps:$4 sm:$0xff]  }
 0x8fc   : > { %v12817_v27 = vadd.f32 %v10817_v26, %v3439_v20  ;;  %4196 = vmatpush1.bf16.msra.mxu0 %v10394_v40  ;;  %3735 = vmatpush1.bf16.msra.mxu1 %v10409_v16  ;;  %v10406_v48 = vld [vmem:[%s12424_s7 + $0x140] ss:$16 sps:$4 sm:$0xff]   ;;  %v10414_v15 = vld [vmem:[%s12424_s7 + $0x164] ss:$16 sps:$4 sm:$0xff]  }
 0x8fd   : > { %v12819_v29 = vadd.f32 %v10818_v28, %v3441_v17  ;;  %v3449_v31 = vadd.f32 %v12815_v25, %v12813_v18  ;;  %4197 = vmatprep.subr.bf16.mxu0 %v10402_v14  ;;  %v10412_v20 = vld [vmem:[%s12424_s7 + $0x160] ss:$16 sps:$4 sm:$0xff]   ;;  %3736 = vmatprep.subr.bf16.mxu1 %v10417_v37  ;;  %v3447_v40 = vld [vmem:[%s13781_s27] sm:$0x3]  ;;  %v10451_v37 = vld [vmem:[%s12424_s7 + $0x8] ss:$16 sps:$4 sm:$0xff]  }
 0x8ff   : > { %3450 = vadd.xlane.f32.xlu0 %v3449_v31  ;;  %v3452_v32 = vadd.f32 %v12819_v29, %v12817_v27 }
 0x900   : > { %4198 = vmatpush1.bf16.msra.mxu0 %v10400_v55  ;;  %3737 = vmatpush1.bf16.msra.mxu1 %v10415_v41  ;;  %v3448_v55 = vld [vmem:[%s13782_s26] sm:$0x3] }
 0x901   : > { %3453 = vadd.xlane.f32.xlu1 %v3452_v32  ;;  %4199 = vmatprep.subr.bf16.mxu0 %v10408_v33  ;;  %v10454_v41 = vld [vmem:[%s12424_s7 + $0x28] ss:$16 sps:$4 sm:$0xff]  }
 0x902   : > { %3738 = vmatprep.subr.bf16.mxu1 %v10423_v45  ;;  %v10457_v45 = vld [vmem:[%s12424_s7 + $0x48] ss:$16 sps:$4 sm:$0xff]  }
 0x904   : > { %4200 = vmatpush1.bf16.msra.mxu0 %v10406_v48  ;;  %3739 = vmatpush1.bf16.msra.mxu1 %v10421_v47  ;;  %v3486_v48 = vrot.slane %v3447_v40, %v12582_v51  ;;  %v10460_v47 = vld [vmem:[%s12424_s7 + $0x68] ss:$16 sps:$4 sm:$0xff]  }
 0x905   : > { %4201 = vmatprep.subr.bf16.mxu0 %v10414_v15  ;;  %3740 = vmatprep.subr.bf16.mxu1 %v10429_v59  ;;  %v3490_v15 = vrot.slane %v3447_v40, %v12594_v56  ;;  %v10463_v59 = vld [vmem:[%s12424_s7 + $0x88] ss:$16 sps:$4 sm:$0xff]  }
 0x906   : > { %v10496_v40 = vld [vmem:[%s12424_s7 + $0x1e8] ss:$16 sps:$4 sm:$0xff]  }
 0x908   : > { %4202 = vmatpush1.bf16.msra.mxu0 %v10412_v20  ;;  %3741 = vmatpush1.bf16.msra.mxu1 %v10427_v57  ;;  %v10466_v57 = vld [vmem:[%s12424_s7 + $0xa8] ss:$16 sps:$4 sm:$0xff]  }
 0x909   : > { %4203 = vmatprep.subr.bf16.mxu0 %v10420_v30  ;;  %3742 = vmatprep.subr.bf16.mxu1 %v10435_v62  ;;  %v10456_v30 = vld [vmem:[%s12424_s7 + $0x2c] ss:$16 sps:$4 sm:$0xff]   ;;  %v10469_v62 = vld [vmem:[%s12424_s7 + $0xc8] ss:$16 sps:$4 sm:$0xff]  }
 0x90c   : > { %4204 = vmatpush1.bf16.msra.mxu0 %v10418_v38  ;;  %3743 = vmatpush1.bf16.msra.mxu1 %v10433_v63  ;;  %v10459_v38 = vld [vmem:[%s12424_s7 + $0x4c] ss:$16 sps:$4 sm:$0xff]   ;;  %v10472_v63 = vld [vmem:[%s12424_s7 + $0xe8] ss:$16 sps:$4 sm:$0xff]  }
 0x90d   : > { %4205 = vmatprep.subr.bf16.mxu0 %v10426_v46  ;;  %3744 = vmatprep.subr.bf16.mxu1 %v10444_v3  ;;  %v10462_v46 = vld [vmem:[%s12424_s7 + $0x6c] ss:$16 sps:$4 sm:$0xff]  }
 0x90e   : > { %v10480_v3 = vld [vmem:[%s12424_s7 + $0x12c] ss:$16 sps:$4 sm:$0xff]  }
 0x910   : > { %4206 = vmatpush1.bf16.msra.mxu0 %v10424_v58  ;;  %3745 = vmatpush1.bf16.msra.mxu1 %v10442_v21  ;;  %v10465_v58 = vld [vmem:[%s12424_s7 + $0x8c] ss:$16 sps:$4 sm:$0xff]   ;;  %v10478_v21 = vld [vmem:[%s12424_s7 + $0x128] ss:$16 sps:$4 sm:$0xff]  }
 0x911   : > { %4207 = vmatprep.subr.bf16.mxu0 %v10432_v60  ;;  %3746 = vmatprep.subr.bf16.mxu1 %v10447_v5  ;;  %v10468_v60 = vld [vmem:[%s12424_s7 + $0xac] ss:$16 sps:$4 sm:$0xff]   ;;  %v10481_v5 = vld [vmem:[%s12424_s7 + $0x148] ss:$16 sps:$4 sm:$0xff]  }
 0x914   : > { %4208 = vmatpush1.bf16.msra.mxu0 %v10430_v61  ;;  %3747 = vmatpush1.bf16.msra.mxu1 %v10445_v4  ;;  %v10471_v61 = vld [vmem:[%s12424_s7 + $0xcc] ss:$16 sps:$4 sm:$0xff]  }
 0x915   : > { %4209 = vmatprep.subr.bf16.mxu0 %v10438_v52  ;;  %3748 = vmatprep.subr.bf16.mxu1 %v10450_v6  ;;  %v10474_v52 = vld [vmem:[%s12424_s7 + $0xec] ss:$16 sps:$4 sm:$0xff]  }
 0x916   : > { %v10483_v4 = vld [vmem:[%s12424_s7 + $0x14c] ss:$16 sps:$4 sm:$0xff]  }
 0x917   : > { %v10486_v6 = vld [vmem:[%s12424_s7 + $0x16c] ss:$16 sps:$4 sm:$0xff]  }
 0x918   : > { %4210 = vmatpush1.bf16.msra.mxu0 %v10436_v0  ;;  %3749 = vmatpush1.bf16.msra.mxu1 %v10448_v39  ;;  %v10477_v0 = vld [vmem:[%s12424_s7 + $0x10c] ss:$16 sps:$4 sm:$0xff]   ;;  %v10484_v39 = vld [vmem:[%s12424_s7 + $0x168] ss:$16 sps:$4 sm:$0xff]  }
 0x919   : > { %9903 = vmatprep.subr.bf16.mxu0 %v11544_v42  ;;  %4222 = vmatprep.subr.bf16.mxu1 %v10453_v7  ;;  %v10489_v7 = vld [vmem:[%s12424_s7 + $0x18c] ss:$16 sps:$4 sm:$0xff]  }
 0x91b   : > { %4212 = vmatmul.mubr.bf16.vlgmr.msra.gmra.mrb[48].mxu0 %v12909_v1 }
 0x91c   : > { %9905 = vmatprep.mubr.msk.bf16.mxu0 %vm11545_vm0, %v11544_v42 }
 0x98c   : > { %v3451_v22 = vpop.xlane.xlu0 %3450 }
 0x98d   : > { %v3456_v24 = vmul.f32 0.00390625, %v3451_v22  ;;  %v3501_v22 = vrot.slane %v3448_v55, %v12582_v51 }
 0x98e   : > { %v3454_v17 = vpop.xlane.xlu1 %3453 }
 0x98f   : > { %v12868_v26 = vsub.f32 %v12813_v18, %v3456_v24  ;;  %v12871_v28 = vsub.f32 %v12815_v25, %v3456_v24  ;;  %v3457_v31 = vmul.f32 0.00390625, %v3454_v17  ;;  %v3505_v24 = vrot.slane %v3448_v55, %v12594_v56 }
 0x991   : > { %v12874_v32 = vsub.f32 %v12817_v27, %v3457_v31  ;;  %v12877_v34 = vsub.f32 %v12819_v29, %v3457_v31  ;;  %v3462_v35 = vmul.f32 %v12868_v26, %v12868_v26  ;;  %v3463_v36 = vmul.f32 %v12871_v28, %v12871_v28 }
 0x993   : > { %v3466_v18 = vadd.f32 %v3463_v36, %v3462_v35  ;;  %v3464_v25 = vmul.f32 %v12874_v32, %v12874_v32  ;;  %v3465_v27 = vmul.f32 %v12877_v34, %v12877_v34 }
 0x995   : > { %3467 = vadd.xlane.f32.xlu0 %v3466_v18  ;;  %v3469_v29 = vadd.f32 %v3465_v27, %v3464_v25 }
 0x999   : > { %3470 = vadd.xlane.f32.xlu0 %v3469_v29 }
 0xa22   : > { %v3468_v8 = vpop.xlane.xlu0 %3467 }
 0xa23   : > { %v3472_v9 = vmul.f32 0.00390625, %v3468_v8  ;;  %v10487_v8 = vld [vmem:[%s12424_s7 + $0x188] ss:$16 sps:$4 sm:$0xff]  }
 0xa25   : > { %v3474_v10 = vadd.f32 1e-05, %v3472_v9  ;;  %v10492_v9 = vld [vmem:[%s12424_s7 + $0x1ac] ss:$16 sps:$4 sm:$0xff]  }
 0xa26   : > { %v3471_v11 = vpop.xlane.xlu0 %3470 }
 0xa27   : > { %10771 = vrsqrt.f32 %v3474_v10  ;;  %v3473_v12 = vmul.f32 0.00390625, %v3471_v11  ;;  %v10490_v10 = vld [vmem:[%s12424_s7 + $0x1a8] ss:$16 sps:$4 sm:$0xff]   ;;  %v10495_v11 = vld [vmem:[%s12424_s7 + $0x1cc] ss:$16 sps:$4 sm:$0xff]  }
 0xa29   : > { %v3475_v13 = vadd.f32 1e-05, %v3473_v12  ;;  %v10493_v12 = vld [vmem:[%s12424_s7 + $0x1c8] ss:$16 sps:$4 sm:$0xff]  }
 0xa2b   : > { %10773 = vrsqrt.f32 %v3475_v13  ;;  %v10498_v13 = vld [vmem:[%s12424_s7 + $0x1ec] ss:$16 sps:$4 sm:$0xff]  }
 0xa31   : > { %v10772_v14 = vpop.eup %10771 }
 0xa32   : > { %v3478_v16 = vmul.f32 %v10772_v14, %v12868_v26  ;;  %v3479_v33 = vmul.f32 %v10772_v14, %v12871_v28  ;;  %v12982_v14 = vld [vmem:[%s12426_s24] sm:$0xf] }
 0xa33   : > { %v3836_v55 = vrot.slane %v12982_v14, %v12594_v56 }
 0xa34   : > { %v3494_v26 = vmul.f32 %v3490_v15, %v3479_v33  ;;  %v3493_v35 = vmul.f32 %v3486_v48, %v3478_v16  ;;  %v3832_v16 = vrot.slane %v12982_v14, %v12582_v51  ;;  %v4213_v33 = vpop.f32.mrb[48].mxu0 }
 0xa35   : > { %v10774_v20 = vpop.eup %10773 }
 0xa36   : > { %v3480_v17 = vmul.f32 %v10774_v20, %v12874_v32  ;;  %v3481_v31 = vmul.f32 %v10774_v20, %v12877_v34  ;;  %v12934_v18 = vadd.f32 %v3505_v24, %v3494_v26  ;;  %v12938_v27 = vadd.f32 %v3501_v22, %v3493_v35 }
 0xa38   : > { %v3496_v36 = vmul.f32 %v3490_v15, %v3481_v31  ;;  %v3495_v28 = vmul.f32 %v3486_v48, %v3480_v17  ;;  %v4214_v48 = vadd.f32 %v4213_v33, %v3832_v16  ;;  %v4215_v15 = vpop.f32.mrb[49].mxu0 }
 0xa39   : > { %v4217_v20 = vpop.f32.mrb[50].mxu0 }
 0xa3a   : > { %v12936_v25 = vadd.f32 %v3505_v24, %v3496_v36  ;;  %v12940_v29 = vadd.f32 %v3501_v22, %v3495_v28  ;;  %v4281_v22 = vpack.c.bf16 %v4214_v48, %v4214_v48  ;;  %v4216_v24 = vadd.f32 %v4215_v15, %v3836_v55 }
 0xa3b   : > { %v4218_v17 = vadd.f32 %v4217_v20, %v3832_v16 }
 0xa3c   : > { %v3513_v32 = vpack.c.bf16 %v12936_v25, %v12934_v18  ;;  %v3512_v34 = vpack.c.bf16 %v12940_v29, %v12938_v27  ;;  %v4357_v26 = vsel %vm2339_vm1, %v4281_v22, 0  ;;  %4287 = vrot.lane.b32.xlu1 %v4281_v22, %s11546_s14  ;;  %v4283_v36 = vpack.c.bf16 %v4216_v24, %v4216_v24 }
 0xa3d   : > { %v4282_v35 = vpack.c.bf16 %v4218_v17, %v4218_v17  ;;  %9904 = vmatpush3.bf16.xpose.msra.mxu0 %v4357_v26  ;;  %v1504_v17 = vld [vmem:[#allocation5] sm:$0x3] }
 0xa3e   : > { %3750 = vmatprep.mubr.bf16.mxu1 %v3513_v32  ;;  %9915 = vmatprep.subr.bf16.mxu0 %v11544_v42  ;;  %v3546_v32 = vld [vmem:[%s1215_s21] sm:$0x3]  ;;  %vm4313_vm12 = vcmp.gt.f32.partialorder %v1504_v17, 0.0 }
 0xa3f   : > { %3751 = vmatmul.mubr.bf16.vlgmr.msra.gmra.mrb[32].mxu1 %v3512_v34  ;;  %v4403_v28 = vsel %vm2339_vm1, %v4282_v35, 0  ;;  %4289 = vrot.lane.b32.xlu0 %v4282_v35, %s11546_s14  ;;  %v3551_v34 = vrot.slane %v3546_v32, %v12582_v51 }
 0xa40   : > { %4223 = vmatpush1.bf16.msra.mxu1 %v10451_v37  ;;  %4254 = vmatprep.mubr.bf16.mxu1 %v10441_v19  ;;  %v10475_v19 = vld [vmem:[%s12424_s7 + $0x108] ss:$16 sps:$4 sm:$0xff]   ;;  %v3555_v37 = vrot.slane %v3546_v32, %v12594_v56 }
 0xa41   : > { %4224 = vmatprep.subr.bf16.mxu1 %v10456_v30 }
 0xa43   : > { %4293 = vrot.lane.b32.xlu0 %v4283_v36, %s11546_s14 }
 0xa44   : > { %4225 = vmatpush1.bf16.msra.mxu1 %v10454_v41 }
 0xa45   : > { %4226 = vmatprep.subr.bf16.mxu1 %v10459_v38 }
 0xa48   : > { %4227 = vmatpush1.bf16.msra.mxu1 %v10457_v45 }
 0xa49   : > { %4228 = vmatprep.subr.bf16.mxu1 %v10462_v46 }
 0xa4c   : > { %4229 = vmatpush1.bf16.msra.mxu1 %v10460_v47 }
 0xa4d   : > { %4230 = vmatprep.subr.bf16.mxu1 %v10465_v58 }
 0xa50   : > { %4231 = vmatpush1.bf16.msra.mxu1 %v10463_v59 }
 0xa51   : > { %4232 = vmatprep.subr.bf16.mxu1 %v10468_v60 }
 0xa54   : > { %4233 = vmatpush1.bf16.msra.mxu1 %v10466_v57 }
 0xa55   : > { %4234 = vmatprep.subr.bf16.mxu1 %v10471_v61 }
 0xa58   : > { %4235 = vmatpush1.bf16.msra.mxu1 %v10469_v62 }
 0xa59   : > { %4236 = vmatprep.subr.bf16.mxu1 %v10474_v52 }
 0xa5c   : > { %4237 = vmatpush1.bf16.msra.mxu1 %v10472_v63 }
 0xa5d   : > { %4238 = vmatprep.subr.bf16.mxu1 %v10477_v0 }
 0xa60   : > { %4239 = vmatpush1.bf16.msra.mxu1 %v10475_v19 }
 0xa61   : > { %4240 = vmatprep.subr.bf16.mxu1 %v10480_v3 }
 0xa64   : > { %4241 = vmatpush1.bf16.msra.mxu1 %v10478_v21 }
 0xa65   : > { %4242 = vmatprep.subr.bf16.mxu1 %v10483_v4 }
 0xa68   : > { %4243 = vmatpush1.bf16.msra.mxu1 %v10481_v5 }
 0xa69   : > { %4244 = vmatprep.subr.bf16.mxu1 %v10486_v6 }
 0xa6c   : > { %4245 = vmatpush1.bf16.msra.mxu1 %v10484_v39 }
 0xa6d   : > { %4246 = vmatprep.subr.bf16.mxu1 %v10489_v7  ;;  %v4541_v7 = vsel %vm2339_vm1, %v4283_v36, 0 }
 0xa70   : > { %4247 = vmatpush1.bf16.msra.mxu1 %v10487_v8  ;;  %v3840_v8 = vrot.slane %v12982_v14, %v12576_v49 }
 0xa71   : > { %4248 = vmatprep.subr.bf16.mxu1 %v10492_v9 }
 0xa74   : > { %4249 = vmatpush1.bf16.msra.mxu1 %v10490_v10 }
 0xa75   : > { %4250 = vmatprep.subr.bf16.mxu1 %v10495_v11 }
 0xa78   : > { %4251 = vmatpush1.bf16.msra.mxu1 %v10493_v12 }
 0xa79   : > { %4252 = vmatprep.subr.bf16.mxu1 %v10498_v13 }
 0xa7c   : > { %4253 = vmatpush1.bf16.msra.mxu1 %v10496_v40 }
 0xa7d   : > { %9909 = vmatprep.subr.bf16.mxu1 %v11544_v42 }
 0xa7f   : > { %4255 = vmatmul.mubr.bf16.vlgmr.msra.gmra.mrb[36].mxu1 %v12909_v1  ;;  %v4219_v1 = vpop.f32.mrb[51].mxu0 }
 0xa80   : > { %9911 = vmatprep.mubr.msk.bf16.mxu1 %vm11545_vm0, %v11544_v42  ;;  %v4220_v31 = vadd.f32 %v4219_v1, %v3836_v55  ;;  %v4314_v1 = vsel %vm4313_vm12, 1, %v11548_v54 }
 0xa82   : > { %v4284_v0 = vpack.c.bf16 %v4220_v31, %v4220_v31  ;;  %v4321_v31 = vrot.slane %v4314_v1, %v12665_v53 }
 0xa84   : > { %v4587_v10 = vsel %vm2339_vm1, %v4284_v0, 0  ;;  %v4322_v26 = vcombine.high %v4321_v31, %v4321_v31  ;;  %v4329_v35 = vrot.slane %v4321_v31, %v12665_v53 }
 0xa85   : > { %9910 = vmatpush3.bf16.xpose.msra.mxu1 %v4403_v28 }
 0xa86   : > { %9921 = vmatprep.subr.bf16.mxu1 %v11544_v42  ;;  %v4336_v36 = vrot.slane %v4322_v26, %v12665_v53  ;;  %vm4337_vm13 = vcmp.ne.s32.totalorder %v4329_v35, 0 }
 0xa87   : > { %v4339_v28 = vsel %vm4337_vm13, 0.0, %v11549_v2 }
 0xa88   : > { %vm4338_vm14 = vcmp.ne.s32.totalorder %v4336_v36, 0 }
 0xa89   : > { %v4340_v32 = vsel %vm4338_vm14, 0.0, %v11549_v2 }
 0xaae   : > { %v4288_v41 = vpop.permute.xlu1 %4287 }
 0xaaf   : > { %v4449_v57 = vsel %vm2339_vm1, %v4288_v41, 0 }
 0xab1   : > { %v4290_v62 = vpop.permute.xlu0 %4289 }
 0xab2   : > { %v4495_v63 = vsel %vm2339_vm1, %v4290_v62, 0 }
 0xab5   : > { %v4294_v11 = vpop.permute.xlu0 %4293 }
 0xab6   : > { %v4633_v13 = vsel %vm2339_vm1, %v4294_v11, 0 }
 0xb12   : > { %v3752_v30 = vpop.f32.mrb[32].mxu1 }
 0xb13   : > { %v3753_v38 = vadd.f32 %v3752_v30, %v3551_v34  ;;  %v3754_v45 = vpop.f32.mrb[33].mxu1 }
 0xb14   : > { %v3755_v46 = vadd.f32 %v3754_v45, %v3555_v37  ;;  %v3756_v47 = vpop.f32.mrb[34].mxu1 }
 0xb15   : > { %v4265_v58 = vpack.c.bf16 %v3753_v38, %v3753_v38  ;;  %v3757_v59 = vadd.f32 %v3756_v47, %v3551_v34  ;;  %v3758_v60 = vpop.f32.mrb[35].mxu1  ;;  %v4346_v34 = vrot.slane %v4339_v28, %v12582_v51 }
 0xb16   : > { %v4267_v61 = vpack.c.bf16 %v3755_v46, %v3755_v46  ;;  %v3759_v19 = vadd.f32 %v3758_v60, %v3555_v37  ;;  %v4350_v37 = vrot.slane %v4340_v32, %v12582_v51 }
 0xb17   : > { %v4266_v52 = vpack.c.bf16 %v3757_v59, %v3757_v59  ;;  %4271 = vrot.lane.b32.xlu1 %v4265_v58, %s11546_s14  ;;  %9906 = vmatmul.mubr.msk.bf16.vlgmr.msra.gmra.mrb[52].mxu0 %vm2339_vm1, %v4265_v58 }
 0xb18   : > { %4277 = vrot.lane.b32.xlu0 %v4267_v61, %s11546_s14  ;;  %9916 = vmatpush3.bf16.xpose.msra.mxu0 %v4449_v57  ;;  %v4268_v3 = vpack.c.bf16 %v3759_v19, %v3759_v19 }
 0xb19   : > { %9912 = vmatmul.mubr.msk.bf16.vlgmr.msra.gmra.mrb[40].mxu1 %vm2339_vm1, %v4266_v52  ;;  %9917 = vmatprep.mubr.msk.bf16.mxu0 %vm11545_vm0, %v11544_v42 }
 0xb1a   : > { %9922 = vmatpush3.bf16.xpose.msra.mxu1 %v4495_v63  ;;  %9927 = vmatprep.subr.bf16.mxu0 %v11544_v42 }
 0xb1b   : > { %4273 = vrot.lane.b32.xlu1 %v4266_v52, %s11546_s14  ;;  %9923 = vmatprep.mubr.msk.bf16.mxu1 %vm11545_vm0, %v11544_v42 }
 0xb1c   : > { %9933 = vmatprep.subr.bf16.mxu1 %v11544_v42 }
 0xb1f   : > { %4295 = vrot.lane.b32.xlu1 %v4284_v0, %s11546_s14 }
 0xb23   : > { %4279 = vrot.lane.b32.xlu1 %v4268_v3, %s11546_s14 }
 0xb52   : > { %v4256_v21 = vpop.f32.mrb[36].mxu1 }
 0xb53   : > { %v13014_v4 = vpop.f32.mrb[37].mxu1  ;;  %v4257_v12 = vadd.f32 %v4256_v21, %v3840_v8 }
 0xb54   : > { %v4260_v5 = vpop.f32.mrb[38].mxu1 }
 0xb55   : > { %v13016_v6 = vpop.f32.mrb[39].mxu1  ;;  %v13034_v16 = vpack.c.bf16 %v4257_v12, %v4257_v12  ;;  %v4261_v55 = vadd.f32 %v4260_v5, %v3840_v8 }
 0xb57   : > { %v4821_v48 = vsel %vm2808_vm2, %v13034_v16, 0  ;;  %v13043_v15 = vpack.c.bf16 %v4261_v55, %v4261_v55 }
 0xb59   : > { %v4867_v22 = vsel %vm2808_vm2, %v13043_v15, 0 }
 0xb89   : > { %v4272_v39 = vpop.permute.xlu1 %4271 }
 0xb8a   : > { %9918 = vmatmul.mubr.msk.bf16.vlgmr.msra.gmra.mrb[56].mxu0 %vm2339_vm1, %v4272_v39  ;;  %v4278_v20 = vpop.permute.xlu0 %4277 }
 0xb8b   : > { %9928 = vmatpush3.bf16.xpose.msra.mxu0 %v4541_v7  ;;  %9929 = vmatprep.mubr.msk.bf16.mxu0 %vm11545_vm0, %v11544_v42 }
 0xb8c   : > { %9939 = vmatprep.subr.bf16.mxu0 %v11544_v42 }
 0xb8d   : > { %v4274_v9 = vpop.permute.xlu1 %4273 }
 0xb8e   : > { %9924 = vmatmul.mubr.msk.bf16.vlgmr.msra.gmra.mrb[44].mxu1 %vm2339_vm1, %v4274_v9 }
 0xb8f   : > { %9934 = vmatpush3.bf16.xpose.msra.mxu1 %v4587_v10  ;;  %9935 = vmatprep.mubr.msk.bf16.mxu1 %vm11545_vm0, %v11544_v42 }
 0xb90   : > { %9945 = vmatprep.subr.bf16.mxu1 %v11544_v42 }
 0xb91   : > { %v4296_v40 = vpop.permute.xlu1 %4295 }
 0xb92   : > { %9930 = vmatmul.mubr.msk.bf16.vlgmr.msra.gmra.mrb[60].mxu0 %vm2339_vm1, %v4267_v61  ;;  %v4679_v33 = vsel %vm2339_vm1, %v4296_v40, 0 }
 0xb93   : > { %9940 = vmatpush3.bf16.xpose.msra.mxu0 %v4633_v13  ;;  %9941 = vmatprep.mubr.msk.bf16.mxu0 %vm11545_vm0, %v11544_v42 }
 0xb94   : > { %9951 = vmatprep.subr.bf16.mxu0 %v11544_v42 }
 0xb95   : > { %v4280_v24 = vpop.permute.xlu1 %4279 }
 0xb96   : > { %9936 = vmatmul.mubr.msk.bf16.vlgmr.msra.gmra.mrb[48].mxu1 %vm2339_vm1, %v4268_v3 }
 0xb97   : > { %9946 = vmatpush3.bf16.xpose.msra.mxu1 %v4679_v33  ;;  %9947 = vmatprep.mubr.msk.bf16.mxu1 %vm11545_vm0, %v11544_v42 }
 0xb98   : > { %9957 = vmatprep.subr.bf16.mxu1 %v11544_v42 }
 0xb9a   : > { %9942 = vmatmul.mubr.msk.bf16.vlgmr.msra.gmra.mrb[64].mxu0 %vm2339_vm1, %v4278_v20 }
 0xb9b   : > { %9952 = vmatpush3.bf16.msra.mxu0 %v4821_v48  ;;  %9953 = vmatprep.mubr.msk.bf16.mxu0 %vm11545_vm0, %v11544_v42 }
 0xb9c   : > { %9963 = vmatprep.subr.bf16.mxu0 %v11544_v42 }
 0xb9e   : > { %9948 = vmatmul.mubr.msk.bf16.vlgmr.msra.gmra.mrb[52].mxu1 %vm2339_vm1, %v4280_v24 }
 0xb9f   : > { %9958 = vmatpush3.bf16.msra.mxu1 %v4867_v22  ;;  %9959 = vmatprep.mubr.msk.bf16.mxu1 %vm11545_vm0, %v11544_v42 }
 0xba0   : > { %9969 = vmatprep.subr.bf16.mxu1 %v11544_v42 }
 0xbea   : > { %v4393_v30 = vpop.f32.mrb[52].mxu0 }
 0xbeb   : > { %v13064_v41 = vadd.f32 %v4393_v30, %v4346_v34  ;;  %v9907_v54 = vpop.f32.mrb[53].mxu0 }
 0xbec   : > { %v4396_v38 = vpop.f32.mrb[54].mxu0  ;;  %v4439_v45 = vpop.f32.mrb[40].mxu1 }
 0xbed   : > { %v4440_v46 = vadd.f32 %v4439_v45, %v4350_v37  ;;  %v9908_v47 = vpop.f32.mrb[55].mxu0  ;;  %v9913_v58 = vpop.f32.mrb[41].mxu1  ;;  %v4721_v53 = vsel %vm2708_vm9, %v13064_v41, -inf }
 0xbee   : > { %v4442_v59 = vpop.f32.mrb[42].mxu1  ;;  %4722 = vmax.xlane.f32.xlu0 %v4721_v53 }
 0xbef   : > { %v9914_v60 = vpop.f32.mrb[43].mxu1  ;;  %v4724_v2 = vsel %vm2708_vm9, %v4440_v46, -inf }
 0xbf0   : > { %4725 = vmax.xlane.f32.xlu1 %v4724_v2 }
 0xc5d   : > { %v4485_v57 = vpop.f32.mrb[56].mxu0 }
 0xc5e   : > { %v4486_v61 = vadd.f32 %v4485_v57, %v4346_v34  ;;  %v9919_v62 = vpop.f32.mrb[57].mxu0 }
 0xc5f   : > { %v4488_v52 = vpop.f32.mrb[58].mxu0 }
 0xc60   : > { %v9920_v63 = vpop.f32.mrb[59].mxu0  ;;  %v4727_v0 = vsel %vm2708_vm9, %v4486_v61, -inf }
 0xc61   : > { %4728 = vmax.xlane.f32.xlu0 %v4727_v0  ;;  %v4531_v19 = vpop.f32.mrb[44].mxu1 }
 0xc62   : > { %v4532_v3 = vadd.f32 %v4531_v19, %v4350_v37  ;;  %v9925_v21 = vpop.f32.mrb[45].mxu1 }
 0xc63   : > { %v4534_v5 = vpop.f32.mrb[46].mxu1 }
 0xc64   : > { %v9926_v39 = vpop.f32.mrb[47].mxu1  ;;  %v4730_v7 = vsel %vm2708_vm9, %v4532_v3, -inf }
 0xc65   : > { %v4577_v8 = vpop.f32.mrb[60].mxu0  ;;  %4731 = vmax.xlane.f32.xlu0 %v4730_v7 }
 0xc66   : > { %v4578_v9 = vadd.f32 %v4577_v8, %v4346_v34  ;;  %v9931_v10 = vpop.f32.mrb[61].mxu0 }
 0xc67   : > { %v4580_v11 = vpop.f32.mrb[62].mxu0 }
 0xc68   : > { %v9932_v12 = vpop.f32.mrb[63].mxu0  ;;  %v4733_v13 = vsel %vm2708_vm9, %v4578_v9, -inf }
 0xc69   : > { %4734 = vmax.xlane.f32.xlu1 %v4733_v13  ;;  %v4623_v40 = vpop.f32.mrb[48].mxu1 }
 0xc6a   : > { %v4624_v55 = vadd.f32 %v4623_v40, %v4350_v37  ;;  %v9937_v33 = vpop.f32.mrb[49].mxu1 }
 0xc6b   : > { %v4626_v48 = vpop.f32.mrb[50].mxu1 }
 0xc6c   : > { %v9938_v20 = vpop.f32.mrb[51].mxu1  ;;  %v4736_v22 = vsel %vm2708_vm9, %v4624_v55, -inf }
 0xc6d   : > { %4737 = vmax.xlane.f32.xlu0 %v4736_v22  ;;  %v4669_v24 = vpop.f32.mrb[64].mxu0 }
 0xc6e   : > { %v4670_v17 = vadd.f32 %v4669_v24, %v4346_v34  ;;  %v9943_v1 = vpop.f32.mrb[65].mxu0 }
 0xc6f   : > { %v4672_v31 = vpop.f32.mrb[66].mxu0 }
 0xc70   : > { %v9944_v26 = vpop.f32.mrb[67].mxu0  ;;  %v4739_v35 = vsel %vm2708_vm9, %v4670_v17, -inf }
 0xc71   : > { %v4715_v36 = vpop.f32.mrb[52].mxu1  ;;  %4740 = vmax.xlane.f32.xlu1 %v4739_v35  ;;  %v3844_v26 = vrot.slane %v12982_v14, %v12579_v50 }
 0xc72   : > { %v4716_v28 = vadd.f32 %v4715_v36, %v4350_v37  ;;  %v9949_v32 = vpop.f32.mrb[53].mxu1 }
 0xc73   : > { %v4718_v30 = vpop.f32.mrb[54].mxu1  ;;  %v4259_v35 = vadd.f32 %v13014_v4, %v3844_v26  ;;  %v4263_v32 = vadd.f32 %v13016_v6, %v3844_v26  ;;  %v10499_v26 = vld [vmem:[%s12428_s4] ss:$8 sps:$4 sm:$0xff]  }
 0xc74   : > { %v9950_v54 = vpop.f32.mrb[55].mxu1  ;;  %v4742_v38 = vsel %vm2708_vm9, %v4716_v28, -inf }
 0xc75   : > { %4743 = vmax.xlane.f32.xlu0 %v4742_v38  ;;  %v4300_v30 = vpack.c.bf16 %v4263_v32, %v4263_v32  ;;  %v10505_v32 = vld [vmem:[%s12428_s4 + $0x20] ss:$8 sps:$4 sm:$0xff]  }
 0xc7b   : > { %v4723_v53 = vpop.xlane.xlu0 %4722 }
 0xc7c   : > { %v4745_v37 = vsub.f32 %v13064_v41, %v4723_v53 }
 0xc7d   : > { %v4726_v45 = vpop.xlane.xlu1 %4725 }
 0xc7e   : > { %v4746_v47 = vsub.f32 %v4440_v46, %v4726_v45  ;;  %v4753_v60 = vmul.f32 1.442695, %v4745_v37 }
 0xc80   : > { %v4755_v58 = vmul.f32 1.442695, %v4746_v47 }
 0xc82   : > { %10775 = vpow2.f32 %v4755_v58  ;;  %4303 = vrot.lane.b32.xlu1 %v13034_v16, %s11546_s14 }
 0xc83   : > { %10777 = vpow2.f32 %v4753_v60 }
 0xc8c   : > { %v10776_v34 = vpop.eup %10775 }
 0xc8d   : > { %v4772_v59 = vsel %vm2708_vm9, %v10776_v34, 0.0  ;;  %v13079_v2 = vpop.eup %10777 }
 0xc8e   : > { %4773 = vadd.xlane.f32.xlu0 %v4772_v59  ;;  %v4769_v57 = vsel %vm2708_vm9, %v13079_v2, 0.0 }
 0xca6   : > { %4770 = vadd.xlane.f32.xlu1 %v4769_v57 }
 0xcee   : > { %v4729_v46 = vpop.xlane.xlu0 %4728 }
 0xcef   : > { %v4747_v62 = vsub.f32 %v4486_v61, %v4729_v46 }
 0xcf1   : > { %v4757_v52 = vmul.f32 1.442695, %v4747_v62 }
 0xcf2   : > { %v4732_v63 = vpop.xlane.xlu0 %4731 }
 0xcf3   : > { %10779 = vpow2.f32 %v4757_v52  ;;  %v4748_v16 = vsub.f32 %v4532_v3, %v4732_v63 }
 0xcf5   : > { %v4759_v0 = vmul.f32 1.442695, %v4748_v16 }
 0xcf6   : > { %v4735_v19 = vpop.xlane.xlu1 %4734 }
 0xcf7   : > { %10781 = vpow2.f32 %v4759_v0  ;;  %v4749_v21 = vsub.f32 %v4578_v9, %v4735_v19 }
 0xcf9   : > { %v4761_v5 = vmul.f32 1.442695, %v4749_v21 }
 0xcfa   : > { %v4738_v41 = vpop.xlane.xlu0 %4737 }
 0xcfb   : > { %10783 = vpow2.f32 %v4761_v5  ;;  %v4750_v39 = vsub.f32 %v4624_v55, %v4738_v41 }
 0xcfd   : > { %v10780_v7 = vpop.eup %10779  ;;  %v4763_v8 = vmul.f32 1.442695, %v4750_v39 }
 0xcfe   : > { %v4741_v10 = vpop.xlane.xlu1 %4740  ;;  %v4775_v11 = vsel %vm2708_vm9, %v10780_v7, 0.0 }
 0xcff   : > { %10785 = vpow2.f32 %v4763_v8  ;;  %v4751_v12 = vsub.f32 %v4670_v17, %v4741_v10  ;;  %4776 = vadd.xlane.f32.xlu1 %v4775_v11 }
 0xd01   : > { %v13084_v61 = vpop.eup %10781  ;;  %v4765_v13 = vmul.f32 1.442695, %v4751_v12 }
 0xd02   : > { %v4744_v3 = vpop.xlane.xlu0 %4743  ;;  %v4778_v40 = vsel %vm2708_vm9, %v13084_v61, 0.0  ;;  %v4304_v14 = vpop.permute.xlu1 %4303 }
 0xd03   : > { %10787 = vpow2.f32 %v4765_v13  ;;  %v4752_v9 = vsub.f32 %v4716_v28, %v4744_v3  ;;  %4779 = vadd.xlane.f32.xlu0 %v4778_v40  ;;  %v4299_v28 = vpack.c.bf16 %v4259_v35, %v4259_v35  ;;  %v4913_v53 = vsel %vm2808_vm2, %v4304_v14, 0  ;;  %v10501_v35 = vld [vmem:[%s12428_s4 + $0x4] ss:$8 sps:$4 sm:$0xff]   ;;  %v10508_v14 = vld [vmem:[%s12428_s4 + $0x30] ss:$8 sps:$4 sm:$0xff]  }
 0xd05   : > { %v10784_v33 = vpop.eup %10783  ;;  %v4767_v55 = vmul.f32 1.442695, %v4752_v9  ;;  %v5005_v46 = vsel %vm2808_vm2, %v4299_v28, 0 }
 0xd06   : > { %v4781_v48 = vsel %vm2708_vm9, %v10784_v33, 0.0 }
 0xd07   : > { %10789 = vpow2.f32 %v4767_v55  ;;  %4782 = vadd.xlane.f32.xlu1 %v4781_v48 }
 0xd09   : > { %v13089_v20 = vpop.eup %10785 }
 0xd0a   : > { %v4784_v22 = vsel %vm2708_vm9, %v13089_v20, 0.0 }
 0xd0b   : > { %4785 = vadd.xlane.f32.xlu0 %v4784_v22 }
 0xd0d   : > { %v13093_v24 = vpop.eup %10787 }
 0xd0e   : > { %v4787_v17 = vsel %vm2708_vm9, %v13093_v24, 0.0 }
 0xd0f   : > { %4788 = vadd.xlane.f32.xlu1 %v4787_v17 }
 0xd11   : > { %v13097_v1 = vpop.eup %10789 }
 0xd12   : > { %v4790_v31 = vsel %vm2708_vm9, %v13097_v1, 0.0 }
 0xd13   : > { %4791 = vadd.xlane.f32.xlu0 %v4790_v31 }
 0xd1b   : > { %v4774_v36 = vpop.xlane.xlu0 %4773 }
 0xd1c   : > { %10791 = vrcp.f32 %v4774_v36  ;;  %v10504_v36 = vld [vmem:[%s12428_s4 + $0x14] ss:$8 sps:$4 sm:$0xff]  }
 0xd20   : > { %4309 = vrot.lane.b32.xlu1 %v4299_v28, %s11546_s14 }
 0xd24   : > { %4311 = vrot.lane.b32.xlu1 %v4300_v30, %s11546_s14 }
 0xd26   : > { %v10792_v54 = vpop.eup %10791 }
 0xd27   : > { %v4802_v38 = vmul.f32 %v10792_v54, %v10776_v34  ;;  %v10510_v54 = vld [vmem:[%s12428_s4 + $0x34] ss:$8 sps:$4 sm:$0xff]  }
 0xd29   : > { %4305 = vrot.lane.b32.xlu0 %v13043_v15, %s11546_s14  ;;  %v4810_v45 = vpack.c.bf16 %v4802_v38, %v4802_v38 }
 0xd2b   : > { %9960 = vmatmul.mubr.msk.bf16.vlgmr.msra.gmra.mrb[56].mxu1 %vm2708_vm9, %v4810_v45 }
 0xd2c   : > { %9971 = vmatprep.mubr.msk.bf16.mxu1 %vm11545_vm0, %v11544_v42 }
 0xd33   : > { %v4771_v4 = vpop.xlane.xlu1 %4770 }
 0xd34   : > { %10793 = vrcp.f32 %v4771_v4  ;;  %v10513_v4 = vld [vmem:[%s12428_s4 + $0x44] ss:$8 sps:$4 sm:$0xff]  }
 0xd3e   : > { %v10794_v6 = vpop.eup %10793 }
 0xd3f   : > { %v4801_v47 = vmul.f32 %v10794_v6, %v13079_v2  ;;  %v10511_v6 = vld [vmem:[%s12428_s4 + $0x40] ss:$8 sps:$4 sm:$0xff]  }
 0xd41   : > { %v4809_v58 = vpack.c.bf16 %v4801_v47, %v4801_v47  ;;  %v10516_v47 = vld [vmem:[%s12428_s4 + $0x54] ss:$8 sps:$4 sm:$0xff]  }
 0xd43   : > { %9954 = vmatmul.mubr.msk.bf16.vlgmr.msra.gmra.mrb[68].mxu0 %vm2708_vm9, %v4809_v58  ;;  %v10514_v58 = vld [vmem:[%s12428_s4 + $0x50] ss:$8 sps:$4 sm:$0xff]  }
 0xd44   : > { %9964 = vmatpush3.bf16.msra.mxu0 %v4913_v53  ;;  %9965 = vmatprep.mubr.msk.bf16.mxu0 %vm11545_vm0, %v11544_v42  ;;  %v10519_v53 = vld [vmem:[%s12428_s4 + $0x64] ss:$8 sps:$4 sm:$0xff]  }
 0xd45   : > { %9975 = vmatprep.subr.bf16.mxu0 %v11544_v42 }
 0xd8c   : > { %v4777_v15 = vpop.xlane.xlu1 %4776 }
 0xd8d   : > { %10795 = vrcp.f32 %v4777_v15  ;;  %v10517_v15 = vld [vmem:[%s12428_s4 + $0x60] ss:$8 sps:$4 sm:$0xff]  }
 0xd90   : > { %v4780_v34 = vpop.xlane.xlu0 %4779 }
 0xd94   : > { %v4783_v59 = vpop.xlane.xlu1 %4782 }
 0xd95   : > { %10797 = vrcp.f32 %v4783_v59  ;;  %v10520_v59 = vld [vmem:[%s12428_s4 + $0x70] ss:$8 sps:$4 sm:$0xff]  }
 0xd96   : > { %10799 = vrcp.f32 %v4780_v34  ;;  %v10522_v34 = vld [vmem:[%s12428_s4 + $0x74] ss:$8 sps:$4 sm:$0xff]  }
 0xd97   : > { %v10796_v37 = vpop.eup %10795 }
 0xd98   : > { %v4803_v60 = vmul.f32 %v10796_v37, %v10780_v7  ;;  %v4786_v57 = vpop.xlane.xlu0 %4785  ;;  %v10525_v37 = vld [vmem:[%s12428_s4 + $0x84] ss:$8 sps:$4 sm:$0xff]  }
 0xd9a   : > { %v4811_v2 = vpack.c.bf16 %v4803_v60, %v4803_v60  ;;  %v10523_v60 = vld [vmem:[%s12428_s4 + $0x80] ss:$8 sps:$4 sm:$0xff]  }
 0xd9c   : > { %9966 = vmatmul.mubr.msk.bf16.vlgmr.msra.gmra.mrb[72].mxu0 %vm2708_vm9, %v4811_v2  ;;  %v4789_v62 = vpop.xlane.xlu1 %4788  ;;  %v10528_v2 = vld [vmem:[%s12428_s4 + $0x94] ss:$8 sps:$4 sm:$0xff]  }
 0xd9d   : > { %9976 = vmatpush3.bf16.msra.mxu0 %v5005_v46  ;;  %10801 = vrcp.f32 %v4789_v62  ;;  %9977 = vmatprep.mubr.msk.bf16.mxu0 %vm11545_vm0, %v11544_v42  ;;  %v10531_v46 = vld [vmem:[%s12428_s4 + $0xa4] ss:$8 sps:$4 sm:$0xff]   ;;  %v10529_v62 = vld [vmem:[%s12428_s4 + $0xa0] ss:$8 sps:$4 sm:$0xff]  }
 0xd9e   : > { %10803 = vrcp.f32 %v4786_v57  ;;  %9987 = vmatprep.subr.bf16.mxu0 %v11544_v42  ;;  %v10526_v57 = vld [vmem:[%s12428_s4 + $0x90] ss:$8 sps:$4 sm:$0xff]  }
 0xd9f   : > { %v10798_v52 = vpop.eup %10797 }
 0xda0   : > { %v10800_v63 = vpop.eup %10799  ;;  %v4805_v16 = vmul.f32 %v10798_v52, %v10784_v33  ;;  %v4792_v0 = vpop.xlane.xlu0 %4791 }
 0xda1   : > { %v4310_v19 = vpop.permute.xlu1 %4309  ;;  %v4804_v5 = vmul.f32 %v10800_v63, %v13084_v61  ;;  %10805 = vrcp.f32 %v4792_v0  ;;  %v5051_v61 = vsel %vm2808_vm2, %v4300_v30, 0 }
 0xda2   : > { %v4813_v21 = vpack.c.bf16 %v4805_v16, %v4805_v16  ;;  %v5097_v41 = vsel %vm2808_vm2, %v4310_v19, 0  ;;  %v10534_v19 = vld [vmem:[%s12428_s4 + $0xb4] ss:$8 sps:$4 sm:$0xff]  }
 0xda3   : > { %v4812_v10 = vpack.c.bf16 %v4804_v5, %v4804_v5  ;;  %v10537_v5 = vld [vmem:[%s12428_s4 + $0xc4] ss:$8 sps:$4 sm:$0xff]  }
 0xda4   : > { %9978 = vmatmul.mubr.msk.bf16.vlgmr.msra.gmra.mrb[76].mxu0 %vm2708_vm9, %v4813_v21  ;;  %v4306_v39 = vpop.permute.xlu0 %4305  ;;  %v10532_v21 = vld [vmem:[%s12428_s4 + $0xb0] ss:$8 sps:$4 sm:$0xff]  }
 0xda5   : > { %9988 = vmatpush3.bf16.msra.mxu0 %v5097_v41  ;;  %v4959_v7 = vsel %vm2808_vm2, %v4306_v39, 0  ;;  %9989 = vmatprep.mubr.msk.bf16.mxu0 %vm11545_vm0, %v11544_v42  ;;  %v4312_v40 = vpop.permute.xlu1 %4311  ;;  %v10535_v41 = vld [vmem:[%s12428_s4 + $0xc0] ss:$8 sps:$4 sm:$0xff]  }
 0xda6   : > { %9970 = vmatpush3.bf16.msra.mxu1 %v4959_v7  ;;  %v5143_v55 = vsel %vm2808_vm2, %v4312_v40, 0  ;;  %5411 = vmatprep.subr.bf16.mxu0 %v10501_v35  ;;  %v10540_v7 = vld [vmem:[%s12428_s4 + $0xd4] ss:$8 sps:$4 sm:$0xff]  }
 0xda7   : > { %v10802_v8 = vpop.eup %10801  ;;  %9981 = vmatprep.subr.bf16.mxu1 %v11544_v42 }
 0xda8   : > { %v10804_v11 = vpop.eup %10803  ;;  %v4807_v12 = vmul.f32 %v10802_v8, %v13093_v24 }
 0xda9   : > { %9972 = vmatmul.mubr.msk.bf16.vlgmr.msra.gmra.mrb[60].mxu1 %vm2708_vm9, %v4812_v10  ;;  %v4806_v3 = vmul.f32 %v10804_v11, %v13089_v20 }
 0xdaa   : > { %9982 = vmatpush3.bf16.msra.mxu1 %v5051_v61  ;;  %v4815_v13 = vpack.c.bf16 %v4807_v12, %v4807_v12  ;;  %9983 = vmatprep.mubr.msk.bf16.mxu1 %vm11545_vm0, %v11544_v42  ;;  %v10538_v12 = vld [vmem:[%s12428_s4 + $0xd0] ss:$8 sps:$4 sm:$0xff]   ;;  %v10543_v61 = vld [vmem:[%s12428_s4 + $0xe4] ss:$8 sps:$4 sm:$0xff]  }
 0xdab   : > { %9993 = vmatprep.subr.bf16.mxu1 %v11544_v42  ;;  %v4814_v9 = vpack.c.bf16 %v4806_v3, %v4806_v3  ;;  %v10806_v33 = vpop.eup %10805 }
 0xdac   : > { %9990 = vmatmul.mubr.msk.bf16.vlgmr.msra.gmra.mrb[80].mxu0 %vm2708_vm9, %v4815_v13  ;;  %v4808_v48 = vmul.f32 %v10806_v33, %v13097_v1  ;;  %v10507_v1 = vld [vmem:[%s12428_s4 + $0x24] ss:$8 sps:$4 sm:$0xff]   ;;  %v10541_v33 = vld [vmem:[%s12428_s4 + $0xe0] ss:$8 sps:$4 sm:$0xff]  }
 0xdad   : > { %5412 = vmatpush1.bf16.msra.mxu0 %v10499_v26  ;;  %v10546_v26 = vld [vmem:[%s12428_s4 + $0xf4] ss:$8 sps:$4 sm:$0xff]  }
 0xdae   : > { %v4816_v20 = vpack.c.bf16 %v4808_v48, %v4808_v48  ;;  %5413 = vmatprep.subr.bf16.mxu0 %v10504_v36 }
 0xdb1   : > { %9984 = vmatmul.mubr.msk.bf16.vlgmr.msra.gmra.mrb[64].mxu1 %vm2708_vm9, %v4814_v9 }
 0xdb2   : > { %9994 = vmatpush3.bf16.msra.mxu1 %v5143_v55  ;;  %9995 = vmatprep.mubr.msk.bf16.mxu1 %vm11545_vm0, %v11544_v42  ;;  %v10502_v42 = vld [vmem:[%s12428_s4 + $0x10] ss:$8 sps:$4 sm:$0xff]  }
 0xdb3   : > { %5414 = vmatpush1.bf16.msra.mxu0 %v10502_v42 }
 0xdb4   : > { %5415 = vmatprep.subr.bf16.mxu0 %v10507_v1 }
 0xdb7   : > { %5416 = vmatpush1.bf16.msra.mxu0 %v10505_v32 }
 0xdb8   : > { %5417 = vmatprep.subr.bf16.mxu0 %v10510_v54 }
 0xdb9   : > { %9996 = vmatmul.mubr.msk.bf16.vlgmr.msra.gmra.mrb[68].mxu1 %vm2708_vm9, %v4816_v20 }
 0xdbb   : > { %5418 = vmatpush1.bf16.msra.mxu0 %v10508_v14 }
 0xdbc   : > { %5419 = vmatprep.subr.bf16.mxu0 %v10513_v4 }
 0xdbf   : > { %5420 = vmatpush1.bf16.msra.mxu0 %v10511_v6 }
 0xdc0   : > { %5421 = vmatprep.subr.bf16.mxu0 %v10516_v47 }
 0xdc3   : > { %5422 = vmatpush1.bf16.msra.mxu0 %v10514_v58 }
 0xdc4   : > { %5423 = vmatprep.subr.bf16.mxu0 %v10519_v53 }
 0xdc7   : > { %5424 = vmatpush1.bf16.msra.mxu0 %v10517_v15 }
 0xdc8   : > { %5425 = vmatprep.subr.bf16.mxu0 %v10522_v34 }
 0xdcb   : > { %5426 = vmatpush1.bf16.msra.mxu0 %v10520_v59 }
 0xdcc   : > { %5427 = vmatprep.subr.bf16.mxu0 %v10525_v37 }
 0xdcf   : > { %5428 = vmatpush1.bf16.msra.mxu0 %v10523_v60 }
 0xdd0   : > { %5429 = vmatprep.subr.bf16.mxu0 %v10528_v2 }
 0xdd3   : > { %5430 = vmatpush1.bf16.msra.mxu0 %v10526_v57  ;;  %v5239_v57 = vld [vmem:[%s1251_s5] sm:$0x3] }
 0xdd4   : > { %5431 = vmatprep.subr.bf16.mxu0 %v10531_v46  ;;  %v5244_v46 = vrot.slane %v5239_v57, %v12582_v51 }
 0xdd7   : > { %5432 = vmatpush1.bf16.msra.mxu0 %v10529_v62 }
 0xdd8   : > { %5433 = vmatprep.subr.bf16.mxu0 %v10534_v19 }
 0xddb   : > { %5434 = vmatpush1.bf16.msra.mxu0 %v10532_v21 }
 0xddc   : > { %5435 = vmatprep.subr.bf16.mxu0 %v10537_v5 }
 0xddf   : > { %5436 = vmatpush1.bf16.msra.mxu0 %v10535_v41 }
 0xde0   : > { %5437 = vmatprep.subr.bf16.mxu0 %v10540_v7 }
 0xde3   : > { %5438 = vmatpush1.bf16.msra.mxu0 %v10538_v12  ;;  %v5529_v12 = vld [vmem:[%s12433_s12 + $0x28] sm:$0xff] }
 0xde4   : > { %5439 = vmatprep.subr.bf16.mxu0 %v10543_v61  ;;  %v5532_v61 = vld [vmem:[%s12433_s12 + $0x40] sm:$0xff] }
 0xde7   : > { %5440 = vmatpush1.bf16.msra.mxu0 %v10541_v33  ;;  %v5533_v33 = vld [vmem:[%s12433_s12 + $0x48] sm:$0xff] }
 0xde8   : > { %5441 = vmatprep.subr.bf16.mxu0 %v10546_v26 }
 0xdfe   : > { %v13144_v22 = vpop.f32.mrb[56].mxu1 }
 0xdff   : > { %v9961_v24 = vpop.f32.mrb[57].mxu1 }
 0xe00   : > { %v4906_v17 = vpop.f32.mrb[58].mxu1 }
 0xe01   : > { %v9962_v31 = vpop.f32.mrb[59].mxu1 }
 0xe02   : > { %v10544_v31 = vld [vmem:[%s12428_s4 + $0xf0] ss:$8 sps:$4 sm:$0xff]   ;;  %s13783_s4 = scalar_lea.vmem [#allocation20], %s12412_s30 }
 0xe03   : > { %5442 = vmatpush1.bf16.msra.mxu0 %v10544_v31  ;;  %v5545_v31 = vld [vmem:[%s12433_s12 + $0xa8] sm:$0xff] }
 0xe16   : > { %v13151_v28 = vpop.f32.mrb[68].mxu0 }
 0xe17   : > { %v9955_v30 = vpop.f32.mrb[69].mxu0 }
 0xe18   : > { %v4860_v38 = vpop.f32.mrb[70].mxu0 }
 0xe19   : > { %v9956_v45 = vpop.f32.mrb[71].mxu0 }
 0xe6f   : > { %v4949_v52 = vpop.f32.mrb[72].mxu0 }
 0xe70   : > { %v9967_v63 = vpop.f32.mrb[73].mxu0 }
 0xe71   : > { %v4952_v16 = vpop.f32.mrb[74].mxu0 }
 0xe72   : > { %v9968_v0 = vpop.f32.mrb[75].mxu0 }
 0xe77   : > { %v5041_v39 = vpop.f32.mrb[76].mxu0 }
 0xe78   : > { %v9979_v8 = vpop.f32.mrb[77].mxu0 }
 0xe79   : > { %v5044_v10 = vpop.f32.mrb[78].mxu0 }
 0xe7a   : > { %v9980_v11 = vpop.f32.mrb[79].mxu0  ;;  %v5528_v10 = vld [vmem:[%s12433_s12 + $0x20] sm:$0xff] }
 0xe7c   : > { %v4995_v13 = vpop.f32.mrb[60].mxu1 }
 0xe7d   : > { %v10155_v3 = vpack.i.bf16 %v4995_v13, %v4949_v52  ;;  %v9973_v40 = vpop.f32.mrb[61].mxu1  ;;  %v5536_v13 = vld [vmem:[%s12433_s12 + $0x60] sm:$0xff] }
 0xe7e   : > { %v4998_v9 = vpop.f32.mrb[62].mxu1  ;;  %v9346_v26 = vcombine.low %v5532_v61, %v5536_v13 }
 0xe7f   : > { %v5133_v55 = vpop.f32.mrb[80].mxu0  ;;  %10156 = vrot.lane.b32.xlu1 %v10155_v3, %s11546_s14  ;;  %v9974_v48 = vpop.f32.mrb[63].mxu1  ;;  %v9347_v9 = vcombine.high %v5532_v61, %v5536_v13 }
 0xe80   : > { %v9991_v20 = vpop.f32.mrb[81].mxu0  ;;  %v5540_v48 = vld [vmem:[%s12433_s12 + $0x80] sm:$0xff] }
 0xe81   : > { %v5136_v24 = vpop.f32.mrb[82].mxu0 }
 0xe82   : > { %v9992_v17 = vpop.f32.mrb[83].mxu0  ;;  %v5544_v24 = vld [vmem:[%s12433_s12 + $0xa0] sm:$0xff] }
 0xe83   : > { %v5541_v17 = vld [vmem:[%s12433_s12 + $0x88] sm:$0xff] }
 0xe84   : > { %v5087_v35 = vpop.f32.mrb[64].mxu1 }
 0xe85   : > { %v9985_v36 = vpop.f32.mrb[65].mxu1 }
 0xe86   : > { %v5090_v42 = vpop.f32.mrb[66].mxu1  ;;  %v9355_v36 = vcombine.high %v5540_v48, %v5544_v24 }
 0xe87   : > { %v9986_v1 = vpop.f32.mrb[67].mxu1  ;;  %v9357_v42 = vcombine.high %v5541_v17, %v5545_v31 }
 0xe88   : > { %v5548_v1 = vld [vmem:[%s12433_s12 + $0xc0] sm:$0xff] }
 0xe8c   : > { %v5179_v32 = vpop.f32.mrb[68].mxu1 }
 0xe8d   : > { %v10150_v30 = vpack.i.bf16 %v5179_v32, %v5133_v55  ;;  %v9997_v54 = vpop.f32.mrb[69].mxu1  ;;  %v5537_v55 = vld [vmem:[%s12433_s12 + $0x68] sm:$0xff]  ;;  %v5552_v32 = vld [vmem:[%s12433_s12 + $0xe0] sm:$0xff] }
 0xe8e   : > { %v5182_v38 = vpop.f32.mrb[70].mxu1  ;;  %v9349_v20 = vcombine.high %v5533_v33, %v5537_v55  ;;  %v5553_v54 = vld [vmem:[%s12433_s12 + $0xe8] sm:$0xff] }
 0xe8f   : > { %10151 = vrot.lane.b32.xlu0 %v10150_v30, %s11546_s14  ;;  %v9998_v45 = vpop.f32.mrb[71].mxu1  ;;  %v5549_v30 = vld [vmem:[%s12433_s12 + $0xc8] sm:$0xff]  ;;  %v9354_v38 = vcombine.low %v5540_v48, %v5544_v24 }
 0xe90   : > { %v9356_v45 = vcombine.low %v5541_v17, %v5545_v31  ;;  %v5596_v31 = vld [vmem:[%s12433_s12 + $0x240] sm:$0xff] }
 0xef1   : > { %v10157_v14 = vpop.permute.xlu1 %10156 }
 0xef2   : > { %v10159_v4 = vunpack.i.h.bf16 %v10157_v14  ;;  %v10158_v6 = vunpack.i.l.bf16 %v10157_v14  ;;  %v9363_v14 = vcombine.high %v5548_v1, %v5552_v32 }
 0xef4   : > { %v5202_v47 = vsel %vm2339_vm1, %v13144_v22, %v10159_v4  ;;  %v5201_v58 = vsel %vm2339_vm1, %v13151_v28, %v10158_v6  ;;  %v5248_v22 = vrot.slane %v5239_v57, %v12594_v56  ;;  %v9365_v4 = vcombine.high %v5549_v30, %v5553_v54  ;;  %v5556_v6 = vld [vmem:[%s12433_s12 + $0x100] sm:$0xff]  ;;  %v5565_v57 = vld [vmem:[%s12433_s12 + $0x148] sm:$0xff] }
 0xef5   : > { %v5205_v53 = vpack.c.bf16 %v5202_v47, %v5201_v58  ;;  %v5560_v47 = vld [vmem:[%s12433_s12 + $0x120] sm:$0xff]  ;;  %v5557_v58 = vld [vmem:[%s12433_s12 + $0x108] sm:$0xff] }
 0xf01   : > { %v10152_v15 = vpop.permute.xlu0 %10151 }
 0xf02   : > { %v10154_v34 = vunpack.i.h.bf16 %v10152_v15  ;;  %v10153_v59 = vunpack.i.l.bf16 %v10152_v15  ;;  %v9362_v15 = vcombine.low %v5548_v1, %v5552_v32 }
 0xf04   : > { %v5203_v37 = vsel %vm2339_vm1, %v5041_v39, %v10153_v59  ;;  %v5204_v60 = vsel %vm2339_vm1, %v5087_v35, %v10154_v34  ;;  %v9348_v35 = vcombine.low %v5533_v33, %v5537_v55  ;;  %v9364_v34 = vcombine.low %v5549_v30, %v5553_v54  ;;  %v5589_v33 = vld [vmem:[%s12433_s12 + $0x208] sm:$0xff] }
 0xf05   : > { %v5206_v2 = vpack.c.bf16 %v5204_v60, %v5203_v37  ;;  %v9371_v59 = vcombine.high %v5556_v6, %v5560_v47  ;;  %v5564_v60 = vld [vmem:[%s12433_s12 + $0x140] sm:$0xff]  ;;  %v5593_v55 = vld [vmem:[%s12433_s12 + $0x228] sm:$0xff] }
 0xf06   : > { %v9405_v17 = vcombine.high %v5589_v33, %v5593_v55  ;;  %v9404_v1 = vcombine.low %v5589_v33, %v5593_v55  ;;  %v5633_v55 = vld [vmem:[%s12433_s12 + $0x368] sm:$0xff] }
 0xf07   : > { %5443 = vmatprep.mubr.bf16.mxu0 %v5206_v2  ;;  %v5568_v2 = vld [vmem:[%s12433_s12 + $0x160] sm:$0xff] }
 0xf08   : > { %5444 = vmatmul.mubr.bf16.vlgmr.msra.gmra.mrb[84].mxu0 %v5205_v53  ;;  %v5561_v53 = vld [vmem:[%s12433_s12 + $0x128] sm:$0xff] }
 0xf09   : > { %v9373_v37 = vcombine.high %v5557_v58, %v5561_v53 }
 0xfdb   : > { %v5445_v62 = vpop.f32.mrb[84].mxu0 }
 0xfdc   : > { %v5446_v28 = vadd.f32 %v5445_v62, %v5244_v46  ;;  %v5447_v52 = vpop.f32.mrb[85].mxu0  ;;  %v9372_v62 = vcombine.low %v5557_v58, %v5561_v53 }
 0xfdd   : > { %v5448_v63 = vadd.f32 %v5447_v52, %v5248_v22  ;;  %v5449_v16 = vpop.f32.mrb[86].mxu0 }
 0xfde   : > { %v13193_v0 = vadd.f32 %v5446_v28, %v12938_v27  ;;  %v5450_v19 = vadd.f32 %v5449_v16, %v5244_v46  ;;  %v5451_v21 = vpop.f32.mrb[87].mxu0  ;;  %v5569_v46 = vld [vmem:[%s12433_s12 + $0x168] sm:$0xff]  ;;  %v9379_v28 = vcombine.high %v5564_v60, %v5568_v2  ;;  %v5576_v16 = vld [vmem:[%s12433_s12 + $0x1a0] sm:$0xff] }
 0xfdf   : > { %v13196_v5 = vadd.f32 %v5448_v63, %v12934_v18  ;;  %v5452_v41 = vadd.f32 %v5451_v21, %v5248_v22  ;;  %v5524_v18 = vld [vmem:[%s12433_s12] sm:$0xff]  ;;  %v9370_v22 = vcombine.low %v5556_v6, %v5560_v47  ;;  %v9381_v52 = vcombine.high %v5565_v57, %v5569_v46  ;;  %v5577_v21 = vld [vmem:[%s12433_s12 + $0x1a8] sm:$0xff] }
 0xfe0   : > { %v13199_v39 = vadd.f32 %v5450_v19, %v12940_v29  ;;  %v5525_v29 = vld [vmem:[%s12433_s12 + $0x8] sm:$0xff]  ;;  %v9338_v11 = vcombine.low %v5524_v18, %v5528_v10  ;;  %v5572_v63 = vld [vmem:[%s12433_s12 + $0x180] sm:$0xff] }
 0xfe1   : > { %v13202_v7 = vadd.f32 %v5452_v41, %v12936_v25  ;;  %v5460_v27 = vadd.f32 %v13196_v5, %v13193_v0  ;;  %v9339_v25 = vcombine.high %v5524_v18, %v5528_v10  ;;  %v9340_v3 = vcombine.low %v5525_v29, %v5529_v12  ;;  %v5573_v19 = vld [vmem:[%s12433_s12 + $0x188] sm:$0xff]  ;;  %v5580_v10 = vld [vmem:[%s12433_s12 + $0x1c0] sm:$0xff] }
 0xfe2   : > { %v9341_v40 = vcombine.high %v5525_v29, %v5529_v12  ;;  %v9378_v41 = vcombine.low %v5564_v60, %v5568_v2  ;;  %v9389_v18 = vcombine.high %v5573_v19, %v5577_v21  ;;  %v5584_v29 = vld [vmem:[%s12433_s12 + $0x1e0] sm:$0xff]  ;;  %v9386_v12 = vcombine.low %v5572_v63, %v5576_v16  ;;  %v5605_v2 = vld [vmem:[%s12433_s12 + $0x288] sm:$0xff] }
 0xfe3   : > { %5461 = vadd.xlane.f32.xlu0 %v5460_v27  ;;  %v5463_v8 = vadd.f32 %v13202_v7, %v13199_v39  ;;  %6334 = vmatprep.subr.bf16.mxu1 %v9339_v25  ;;  %v9380_v27 = vcombine.low %v5565_v57, %v5569_v46  ;;  %v5585_v25 = vld [vmem:[%s12433_s12 + $0x1e8] sm:$0xff]  ;;  %v9388_v61 = vcombine.low %v5573_v19, %v5577_v21  ;;  %v5608_v60 = vld [vmem:[%s12433_s12 + $0x2a0] sm:$0xff] }
 0xfe4   : > { %6377 = vmatprep.subr.bf16.mxu0 %v9341_v40  ;;  %6335 = vmatpush1.bf16.msra.mxu1 %v9338_v11  ;;  %v5581_v11 = vld [vmem:[%s12433_s12 + $0x1c8] sm:$0xff]  ;;  %v9395_v13 = vcombine.high %v5580_v10, %v5584_v29  ;;  %v5588_v40 = vld [vmem:[%s12433_s12 + $0x200] sm:$0xff]  ;;  %v9394_v48 = vcombine.low %v5580_v10, %v5584_v29 }
 0xfe5   : > { %5464 = vadd.xlane.f32.xlu1 %v5463_v8  ;;  %6378 = vmatpush1.bf16.msra.mxu0 %v9340_v3  ;;  %v9387_v8 = vcombine.high %v5572_v63, %v5576_v16  ;;  %v9397_v3 = vcombine.high %v5581_v11, %v5585_v25  ;;  %v5609_v46 = vld [vmem:[%s12433_s12 + $0x2a8] sm:$0xff]  ;;  %v5616_v63 = vld [vmem:[%s12433_s12 + $0x2e0] sm:$0xff] }
 0xfe6   : > { %6336 = vmatprep.subr.bf16.mxu1 %v9347_v9  ;;  %6379 = vmatprep.subr.bf16.mxu0 %v9349_v20  ;;  %v5592_v9 = vld [vmem:[%s12433_s12 + $0x220] sm:$0xff]  ;;  %v9396_v20 = vcombine.low %v5581_v11, %v5585_v25  ;;  %v5613_v16 = vld [vmem:[%s12433_s12 + $0x2c8] sm:$0xff] }
 0xfe7   : > { %v9403_v24 = vcombine.high %v5588_v40, %v5592_v9  ;;  %v5617_v21 = vld [vmem:[%s12433_s12 + $0x2e8] sm:$0xff]  ;;  %v5624_v10 = vld [vmem:[%s12433_s12 + $0x320] sm:$0xff] }
 0xfe8   : > { %6337 = vmatpush1.bf16.msra.mxu1 %v9346_v26  ;;  %v5600_v26 = vld [vmem:[%s12433_s12 + $0x260] sm:$0xff]  ;;  %v5621_v29 = vld [vmem:[%s12433_s12 + $0x308] sm:$0xff] }
 0xfe9   : > { %6380 = vmatpush1.bf16.msra.mxu0 %v9348_v35  ;;  %6338 = vmatprep.subr.bf16.mxu1 %v9355_v36  ;;  %v5597_v35 = vld [vmem:[%s12433_s12 + $0x248] sm:$0xff]  ;;  %v9411_v32 = vcombine.high %v5596_v31, %v5600_v26  ;;  %v9410_v54 = vcombine.low %v5596_v31, %v5600_v26  ;;  %v5640_v31 = vld [vmem:[%s12433_s12 + $0x3a0] sm:$0xff] }
 0xfea   : > { %6381 = vmatprep.subr.bf16.mxu0 %v9357_v42  ;;  %v5601_v36 = vld [vmem:[%s12433_s12 + $0x268] sm:$0xff]  ;;  %v9402_v42 = vcombine.low %v5588_v40, %v5592_v9  ;;  %v5632_v40 = vld [vmem:[%s12433_s12 + $0x360] sm:$0xff] }
 0xfeb   : > { %v9413_v30 = vcombine.high %v5597_v35, %v5601_v36  ;;  %v5625_v25 = vld [vmem:[%s12433_s12 + $0x328] sm:$0xff] }
 0xfec   : > { %6339 = vmatpush1.bf16.msra.mxu1 %v9354_v38  ;;  %v9412_v38 = vcombine.low %v5597_v35, %v5601_v36  ;;  %v5629_v9 = vld [vmem:[%s12433_s12 + $0x348] sm:$0xff] }
 0xfed   : > { %6382 = vmatpush1.bf16.msra.mxu0 %v9356_v45  ;;  %6340 = vmatprep.subr.bf16.mxu1 %v9363_v14  ;;  %v5637_v26 = vld [vmem:[%s12433_s12 + $0x388] sm:$0xff] }
 0xfee   : > { %6383 = vmatprep.subr.bf16.mxu0 %v9365_v4  ;;  %v5641_v36 = vld [vmem:[%s12433_s12 + $0x3a8] sm:$0xff] }
 0xff0   : > { %6341 = vmatpush1.bf16.msra.mxu1 %v9362_v15 }
 0xff1   : > { %6384 = vmatpush1.bf16.msra.mxu0 %v9364_v34  ;;  %6342 = vmatprep.subr.bf16.mxu1 %v9371_v59 }
 0xff2   : > { %6385 = vmatprep.subr.bf16.mxu0 %v9373_v37 }
 0xff4   : > { %6343 = vmatpush1.bf16.msra.mxu1 %v9370_v22 }
 0xff5   : > { %6386 = vmatpush1.bf16.msra.mxu0 %v9372_v62  ;;  %6344 = vmatprep.subr.bf16.mxu1 %v9379_v28  ;;  %v9420_v62 = vcombine.low %v5605_v2, %v5609_v46  ;;  %v9421_v28 = vcombine.high %v5605_v2, %v5609_v46 }
 0xff6   : > { %6387 = vmatprep.subr.bf16.mxu0 %v9381_v52  ;;  %v5612_v52 = vld [vmem:[%s12433_s12 + $0x2c0] sm:$0xff] }
 0xff7   : > { %v9427_v19 = vcombine.high %v5612_v52, %v5616_v63 }
 0xff8   : > { %6345 = vmatpush1.bf16.msra.mxu1 %v9378_v41  ;;  %v9426_v41 = vcombine.low %v5612_v52, %v5616_v63  ;;  %v5458_v63 = vld [vmem:[%s1260_s6] sm:$0x3] }
 0xff9   : > { %6388 = vmatpush1.bf16.msra.mxu0 %v9380_v27  ;;  %6346 = vmatprep.subr.bf16.mxu1 %v9387_v8  ;;  %v9428_v27 = vcombine.low %v5613_v16, %v5617_v21  ;;  %v9429_v8 = vcombine.high %v5613_v16, %v5617_v21 }
 0xffa   : > { %6389 = vmatprep.subr.bf16.mxu0 %v9389_v18  ;;  %v5620_v18 = vld [vmem:[%s12433_s12 + $0x300] sm:$0xff] }
 0xffb   : > { %v9435_v11 = vcombine.high %v5620_v18, %v5624_v10 }
 0xffc   : > { %6347 = vmatpush1.bf16.msra.mxu1 %v9386_v12  ;;  %v9434_v12 = vcombine.low %v5620_v18, %v5624_v10 }
 0xffd   : > { %6390 = vmatpush1.bf16.msra.mxu0 %v9388_v61  ;;  %6348 = vmatprep.subr.bf16.mxu1 %v9395_v13  ;;  %v9436_v61 = vcombine.low %v5621_v29, %v5625_v25  ;;  %v9437_v13 = vcombine.high %v5621_v29, %v5625_v25 }
 0xffe   : > { %6391 = vmatprep.subr.bf16.mxu0 %v9397_v3  ;;  %v5628_v3 = vld [vmem:[%s12433_s12 + $0x340] sm:$0xff] }
 0xfff   : > { %v9443_v33 = vcombine.high %v5628_v3, %v5632_v40 }
0x1000   : > { %6349 = vmatpush1.bf16.msra.mxu1 %v9394_v48  ;;  %v9442_v48 = vcombine.low %v5628_v3, %v5632_v40 }
0x1001   : > { %6392 = vmatpush1.bf16.msra.mxu0 %v9396_v20  ;;  %6350 = vmatprep.subr.bf16.mxu1 %v9403_v24  ;;  %v9444_v20 = vcombine.low %v5629_v9, %v5633_v55  ;;  %v9445_v24 = vcombine.high %v5629_v9, %v5633_v55  ;;  %v5535_v55 = vld [vmem:[%s12433_s12 + $0x58] sm:$0xff] }
0x1002   : > { %6393 = vmatprep.subr.bf16.mxu0 %v9405_v17  ;;  %v5636_v17 = vld [vmem:[%s12433_s12 + $0x380] sm:$0xff] }
0x1003   : > { %v9451_v35 = vcombine.high %v5636_v17, %v5640_v31 }
0x1004   : > { %6351 = vmatpush1.bf16.msra.mxu1 %v9402_v42  ;;  %v9450_v42 = vcombine.low %v5636_v17, %v5640_v31 }
0x1005   : > { %6394 = vmatpush1.bf16.msra.mxu0 %v9404_v1  ;;  %6352 = vmatprep.subr.bf16.mxu1 %v9411_v32  ;;  %v9452_v1 = vcombine.low %v5637_v26, %v5641_v36  ;;  %v9453_v32 = vcombine.high %v5637_v26, %v5641_v36  ;;  %v5546_v26 = vld [vmem:[%s12433_s12 + $0xb0] sm:$0xff]  ;;  %v5547_v36 = vld [vmem:[%s12433_s12 + $0xb8] sm:$0xff] }
0x1006   : > { %6395 = vmatprep.subr.bf16.mxu0 %v9413_v30  ;;  %v5644_v30 = vld [vmem:[%s12433_s12 + $0x3c0] sm:$0xff] }
0x1008   : > { %6353 = vmatpush1.bf16.msra.mxu1 %v9410_v54  ;;  %v5648_v54 = vld [vmem:[%s12433_s12 + $0x3e0] sm:$0xff] }
0x1009   : > { %6396 = vmatpush1.bf16.msra.mxu0 %v9412_v38  ;;  %v5645_v38 = vld [vmem:[%s12433_s12 + $0x3c8] sm:$0xff] }
0x100a   : > { %6397 = vmatprep.subr.bf16.mxu0 %v9421_v28 }
0x100d   : > { %6398 = vmatpush1.bf16.msra.mxu0 %v9420_v62 }
0x100e   : > { %6399 = vmatprep.subr.bf16.mxu0 %v9429_v8  ;;  %v5496_v8 = vrot.slane %v5458_v63, %v12582_v51 }
0x1011   : > { %6400 = vmatpush1.bf16.msra.mxu0 %v9428_v27  ;;  %v5500_v27 = vrot.slane %v5458_v63, %v12594_v56 }
0x1012   : > { %6401 = vmatprep.subr.bf16.mxu0 %v9437_v13 }
0x1015   : > { %6402 = vmatpush1.bf16.msra.mxu0 %v9436_v61 }
0x1016   : > { %6403 = vmatprep.subr.bf16.mxu0 %v9445_v24  ;;  %v5542_v24 = vld [vmem:[%s12433_s12 + $0x90] sm:$0xff] }
0x1019   : > { %6404 = vmatpush1.bf16.msra.mxu0 %v9444_v20 }
0x101a   : > { %6405 = vmatprep.subr.bf16.mxu0 %v9453_v32  ;;  %v9359_v32 = vcombine.high %v5542_v24, %v5546_v26 }
0x101d   : > { %6406 = vmatpush1.bf16.msra.mxu0 %v9452_v1 }
0x1070   : > { %v5462_v45 = vpop.xlane.xlu0 %5461 }
0x1071   : > { %v5466_v14 = vmul.f32 0.00390625, %v5462_v45  ;;  %v9459_v45 = vcombine.high %v5644_v30, %v5648_v54 }
0x1072   : > { %v5465_v4 = vpop.xlane.xlu1 %5464 }
0x1073   : > { %v13249_v6 = vsub.f32 %v13193_v0, %v5466_v14  ;;  %v13252_v47 = vsub.f32 %v13196_v5, %v5466_v14  ;;  %v5467_v58 = vmul.f32 0.00390625, %v5465_v4  ;;  %v5649_v14 = vld [vmem:[%s12433_s12 + $0x3e8] sm:$0xff]  ;;  %v9458_v4 = vcombine.low %v5644_v30, %v5648_v54  ;;  %v5550_v54 = vld [vmem:[%s12433_s12 + $0xd0] sm:$0xff] }
0x1075   : > { %v13255_v53 = vsub.f32 %v13199_v39, %v5467_v58  ;;  %v13258_v15 = vsub.f32 %v13202_v7, %v5467_v58  ;;  %v5472_v34 = vmul.f32 %v13249_v6, %v13249_v6  ;;  %v5473_v59 = vmul.f32 %v13252_v47, %v13252_v47  ;;  %v5604_v7 = vld [vmem:[%s12433_s12 + $0x280] sm:$0xff] }
0x1076   : > { %v9419_v57 = vcombine.high %v5604_v7, %v5608_v60  ;;  %v9418_v22 = vcombine.low %v5604_v7, %v5608_v60  ;;  %v9461_v58 = vcombine.high %v5645_v38, %v5649_v14 }
0x1077   : > { %v5476_v37 = vadd.f32 %v5473_v59, %v5472_v34  ;;  %v5474_v0 = vmul.f32 %v13255_v53, %v13255_v53  ;;  %v5475_v5 = vmul.f32 %v13258_v15, %v13258_v15  ;;  %v9460_v34 = vcombine.low %v5645_v38, %v5649_v14  ;;  %v5526_v59 = vld [vmem:[%s12433_s12 + $0x10] sm:$0xff]  ;;  %v5555_v14 = vld [vmem:[%s12433_s12 + $0xf8] sm:$0xff] }
0x1078   : > { %6354 = vmatprep.subr.bf16.mxu1 %v9419_v57  ;;  %6407 = vmatprep.subr.bf16.mxu0 %v9461_v58  ;;  %v5554_v38 = vld [vmem:[%s12433_s12 + $0xf0] sm:$0xff] }
0x1079   : > { %5477 = vadd.xlane.f32.xlu0 %v5476_v37  ;;  %v5479_v39 = vadd.f32 %v5475_v5, %v5474_v0  ;;  %6355 = vmatpush1.bf16.msra.mxu1 %v9418_v22  ;;  %v5530_v37 = vld [vmem:[%s12433_s12 + $0x30] sm:$0xff]  ;;  %v5527_v0 = vld [vmem:[%s12433_s12 + $0x18] sm:$0xff] }
0x107a   : > { %6356 = vmatprep.subr.bf16.mxu1 %v9427_v19  ;;  %6408 = vmatpush1.bf16.msra.mxu0 %v9460_v34  ;;  %v9343_v5 = vcombine.high %v5526_v59, %v5530_v37  ;;  %v9342_v7 = vcombine.low %v5526_v59, %v5530_v37  ;;  %v9367_v34 = vcombine.high %v5550_v54, %v5554_v38  ;;  %v5558_v37 = vld [vmem:[%s12433_s12 + $0x110] sm:$0xff] }
0x107d   : > { %5480 = vadd.xlane.f32.xlu0 %v5479_v39  ;;  %6357 = vmatpush1.bf16.msra.mxu1 %v9426_v41  ;;  %v5531_v39 = vld [vmem:[%s12433_s12 + $0x38] sm:$0xff] }
0x107e   : > { %6358 = vmatprep.subr.bf16.mxu1 %v9435_v11  ;;  %v9344_v60 = vcombine.low %v5527_v0, %v5531_v39  ;;  %v9345_v2 = vcombine.high %v5527_v0, %v5531_v39  ;;  %v5459_v41 = vld [vmem:[%s13783_s4] sm:$0x3]  ;;  %v5562_v0 = vld [vmem:[%s12433_s12 + $0x130] sm:$0xff] }
0x107f   : > { %v5515_v10 = vrot.slane %v5459_v41, %v12594_v56  ;;  %v5511_v29 = vrot.slane %v5459_v41, %v12582_v51  ;;  %v5563_v39 = vld [vmem:[%s12433_s12 + $0x138] sm:$0xff]  ;;  %v5578_v41 = vld [vmem:[%s12433_s12 + $0x1b0] sm:$0xff] }
0x1080   : > { %6463 = vmatprep.subr.bf16.mxu0 %v9345_v2  ;;  %v9375_v2 = vcombine.high %v5558_v37, %v5562_v0 }
0x1081   : > { %6359 = vmatpush1.bf16.msra.mxu1 %v9434_v12 }
0x1082   : > { %6360 = vmatprep.subr.bf16.mxu1 %v9443_v33  ;;  %v5534_v33 = vld [vmem:[%s12433_s12 + $0x50] sm:$0xff] }
0x1085   : > { %6361 = vmatpush1.bf16.msra.mxu1 %v9442_v48  ;;  %v5539_v48 = vld [vmem:[%s12433_s12 + $0x78] sm:$0xff] }
0x1086   : > { %6362 = vmatprep.subr.bf16.mxu1 %v9451_v35  ;;  %v9353_v31 = vcombine.high %v5535_v55, %v5539_v48  ;;  %v5543_v35 = vld [vmem:[%s12433_s12 + $0x98] sm:$0xff]  ;;  %v9352_v1 = vcombine.low %v5535_v55, %v5539_v48  ;;  %v5590_v48 = vld [vmem:[%s12433_s12 + $0x210] sm:$0xff] }
0x1087   : > { %v9361_v30 = vcombine.high %v5543_v35, %v5547_v36  ;;  %v9360_v58 = vcombine.low %v5543_v35, %v5547_v36 }
0x1089   : > { %6363 = vmatpush1.bf16.msra.mxu1 %v9450_v42 }
0x108a   : > { %6364 = vmatprep.subr.bf16.mxu1 %v9459_v45  ;;  %v5551_v45 = vld [vmem:[%s12433_s12 + $0xd8] sm:$0xff] }
0x108b   : > { %v9369_v59 = vcombine.high %v5551_v45, %v5555_v14 }
0x108d   : > { %6365 = vmatpush1.bf16.msra.mxu1 %v9458_v4  ;;  %v9358_v4 = vcombine.low %v5542_v24, %v5546_v26  ;;  %v5591_v24 = vld [vmem:[%s12433_s12 + $0x218] sm:$0xff] }
0x108e   : > { %6420 = vmatprep.subr.bf16.mxu1 %v9343_v5  ;;  %v5559_v5 = vld [vmem:[%s12433_s12 + $0x118] sm:$0xff] }
0x108f   : > { %v9376_v63 = vcombine.low %v5559_v5, %v5563_v39 }
0x1106   : > { %v5478_v57 = vpop.xlane.xlu0 %5477 }
0x1107   : > { %v5482_v46 = vmul.f32 0.00390625, %v5478_v57  ;;  %v9377_v57 = vcombine.high %v5559_v5, %v5563_v39 }
0x1109   : > { %v5484_v22 = vadd.f32 1e-05, %v5482_v46  ;;  %v5566_v46 = vld [vmem:[%s12433_s12 + $0x150] sm:$0xff] }
0x110a   : > { %v5481_v62 = vpop.xlane.xlu0 %5480 }
0x110b   : > { %10807 = vrsqrt.f32 %v5484_v22  ;;  %v5483_v28 = vmul.f32 0.00390625, %v5481_v62  ;;  %v5570_v22 = vld [vmem:[%s12433_s12 + $0x170] sm:$0xff]  ;;  %v5567_v62 = vld [vmem:[%s12433_s12 + $0x158] sm:$0xff] }
0x110d   : > { %v5485_v52 = vadd.f32 1e-05, %v5483_v28  ;;  %v5571_v28 = vld [vmem:[%s12433_s12 + $0x178] sm:$0xff] }
0x110f   : > { %10809 = vrsqrt.f32 %v5485_v52  ;;  %v9374_v52 = vcombine.low %v5558_v37, %v5562_v0 }
0x1115   : > { %v10808_v16 = vpop.eup %10807 }
0x1116   : > { %v5488_v19 = vmul.f32 %v10808_v16, %v13249_v6  ;;  %v5489_v21 = vmul.f32 %v10808_v16, %v13252_v47  ;;  %v9383_v16 = vcombine.high %v5566_v46, %v5570_v22 }
0x1118   : > { %v5504_v47 = vmul.f32 %v5500_v27, %v5489_v21  ;;  %v5503_v25 = vmul.f32 %v5496_v8, %v5488_v19  ;;  %v9385_v19 = vcombine.high %v5567_v62, %v5571_v28  ;;  %v5574_v21 = vld [vmem:[%s12433_s12 + $0x190] sm:$0xff] }
0x1119   : > { %v10810_v18 = vpop.eup %10809 }
0x111a   : > { %v5490_v11 = vmul.f32 %v10810_v18, %v13255_v53  ;;  %v5491_v6 = vmul.f32 %v10810_v18, %v13258_v15  ;;  %v13308_v13 = vadd.f32 %v5515_v10, %v5504_v47  ;;  %v13312_v40 = vadd.f32 %v5511_v29, %v5503_v25  ;;  %v5538_v53 = vld [vmem:[%s12433_s12 + $0x70] sm:$0xff]  ;;  %v5583_v25 = vld [vmem:[%s12433_s12 + $0x1d8] sm:$0xff] }
0x111b   : > { %v9351_v17 = vcombine.high %v5534_v33, %v5538_v53  ;;  %v9350_v42 = vcombine.low %v5534_v33, %v5538_v53  ;;  %v9382_v18 = vcombine.low %v5566_v46, %v5570_v22  ;;  %v5586_v47 = vld [vmem:[%s12433_s12 + $0x1f0] sm:$0xff] }
0x111c   : > { %v5506_v12 = vmul.f32 %v5500_v27, %v5491_v6  ;;  %v5505_v61 = vmul.f32 %v5496_v8, %v5490_v11  ;;  %v5575_v27 = vld [vmem:[%s12433_s12 + $0x198] sm:$0xff]  ;;  %v5582_v6 = vld [vmem:[%s12433_s12 + $0x1d0] sm:$0xff] }
0x111d   : > { %v5579_v8 = vld [vmem:[%s12433_s12 + $0x1b8] sm:$0xff]  ;;  %v9399_v53 = vcombine.high %v5582_v6, %v5586_v47 }
0x111e   : > { %v13310_v3 = vadd.f32 %v5515_v10, %v5506_v12  ;;  %v13314_v9 = vadd.f32 %v5511_v29, %v5505_v61  ;;  %v9384_v10 = vcombine.low %v5567_v62, %v5571_v28  ;;  %v9391_v29 = vcombine.high %v5574_v21, %v5578_v41  ;;  %v5587_v12 = vld [vmem:[%s12433_s12 + $0x1f8] sm:$0xff] }
0x111f   : > { %v9393_v11 = vcombine.high %v5575_v27, %v5579_v8  ;;  %v9390_v61 = vcombine.low %v5574_v21, %v5578_v41  ;;  %v9392_v33 = vcombine.low %v5575_v27, %v5579_v8  ;;  %v9401_v55 = vcombine.high %v5583_v25, %v5587_v12 }
0x1120   : > { %v5523_v15 = vpack.c.bf16 %v13310_v3, %v13308_v13  ;;  %v13324_v20 = vpack.c.bf16 %v13314_v9, %v13312_v40  ;;  %v9400_v26 = vcombine.low %v5583_v25, %v5587_v12 }
0x1122   : > { %6366 = vmatprep.mubr.bf16.mxu1 %v5523_v15  ;;  %6409 = vmatprep.mubr.bf16.mxu0 %v5523_v15 }
0x1123   : > { %6367 = vmatmul.mubr.bf16.vlgmr.msra.gmra.mrb[72].mxu1 %v13324_v20  ;;  %6410 = vmatmul.mubr.bf16.vlgmr.msra.gmra.mrb[88].mxu0 %v13324_v20 }
0x1124   : > { %6421 = vmatpush1.bf16.msra.mxu1 %v9342_v7  ;;  %6464 = vmatpush1.bf16.msra.mxu0 %v9344_v60  ;;  %v9366_v7 = vcombine.low %v5550_v54, %v5554_v38  ;;  %v9368_v60 = vcombine.low %v5551_v45, %v5555_v14 }
0x1125   : > { %6452 = vmatprep.mubr.bf16.mxu1 %v5523_v15  ;;  %6495 = vmatprep.mubr.bf16.mxu0 %v5523_v15  ;;  %v5594_v15 = vld [vmem:[%s12433_s12 + $0x230] sm:$0xff] }
0x1126   : > { %6422 = vmatprep.subr.bf16.mxu1 %v9351_v17  ;;  %6465 = vmatprep.subr.bf16.mxu0 %v9353_v31  ;;  %v5595_v17 = vld [vmem:[%s12433_s12 + $0x238] sm:$0xff]  ;;  %v9398_v31 = vcombine.low %v5582_v6, %v5586_v47  ;;  %v9407_v35 = vcombine.high %v5590_v48, %v5594_v15  ;;  %v9406_v54 = vcombine.low %v5590_v48, %v5594_v15 }
0x1127   : > { %v9409_v36 = vcombine.high %v5591_v24, %v5595_v17  ;;  %v9408_v38 = vcombine.low %v5591_v24, %v5595_v17 }
0x1128   : > { %6423 = vmatpush1.bf16.msra.mxu1 %v9350_v42  ;;  %6466 = vmatpush1.bf16.msra.mxu0 %v9352_v1  ;;  %v5598_v42 = vld [vmem:[%s12433_s12 + $0x250] sm:$0xff] }
0x1129   : > { %6424 = vmatprep.subr.bf16.mxu1 %v9359_v32  ;;  %6467 = vmatprep.subr.bf16.mxu0 %v9361_v30  ;;  %v5602_v1 = vld [vmem:[%s12433_s12 + $0x270] sm:$0xff]  ;;  %v5599_v32 = vld [vmem:[%s12433_s12 + $0x258] sm:$0xff] }
0x112a   : > { %v5603_v30 = vld [vmem:[%s12433_s12 + $0x278] sm:$0xff]  ;;  %v9415_v45 = vcombine.high %v5598_v42, %v5602_v1  ;;  %v9414_v37 = vcombine.low %v5598_v42, %v5602_v1 }
0x112b   : > { %v9417_v14 = vcombine.high %v5599_v32, %v5603_v30  ;;  %v9416_v0 = vcombine.low %v5599_v32, %v5603_v30 }
0x112c   : > { %6425 = vmatpush1.bf16.msra.mxu1 %v9358_v4  ;;  %6468 = vmatpush1.bf16.msra.mxu0 %v9360_v58  ;;  %v5606_v4 = vld [vmem:[%s12433_s12 + $0x290] sm:$0xff] }
0x112d   : > { %6426 = vmatprep.subr.bf16.mxu1 %v9367_v34  ;;  %6469 = vmatprep.subr.bf16.mxu0 %v9369_v59  ;;  %v5610_v58 = vld [vmem:[%s12433_s12 + $0x2b0] sm:$0xff]  ;;  %v5607_v34 = vld [vmem:[%s12433_s12 + $0x298] sm:$0xff] }
0x112e   : > { %v5611_v59 = vld [vmem:[%s12433_s12 + $0x2b8] sm:$0xff]  ;;  %v9423_v5 = vcombine.high %v5606_v4, %v5610_v58  ;;  %v9422_v46 = vcombine.low %v5606_v4, %v5610_v58  ;;  %v10552_v4 = vld [vmem:[%s12437_s0 + $0x14] ss:$8 sps:$4 sm:$0xff]   ;;  %v10550_v58 = vld [vmem:[%s12437_s0 + $0x10] ss:$8 sps:$4 sm:$0xff]  }
0x112f   : > { %v9425_v39 = vcombine.high %v5607_v34, %v5611_v59  ;;  %v9424_v22 = vcombine.low %v5607_v34, %v5611_v59  ;;  %v10555_v34 = vld [vmem:[%s12437_s0 + $0x24] ss:$8 sps:$4 sm:$0xff]   ;;  %v10553_v59 = vld [vmem:[%s12437_s0 + $0x20] ss:$8 sps:$4 sm:$0xff]  }
0x1130   : > { %6427 = vmatpush1.bf16.msra.mxu1 %v9366_v7  ;;  %6470 = vmatpush1.bf16.msra.mxu0 %v9368_v60  ;;  %v5614_v7 = vld [vmem:[%s12433_s12 + $0x2d0] sm:$0xff] }
0x1131   : > { %6428 = vmatprep.subr.bf16.mxu1 %v9375_v2  ;;  %6471 = vmatprep.subr.bf16.mxu0 %v9377_v57  ;;  %v5618_v60 = vld [vmem:[%s12433_s12 + $0x2f0] sm:$0xff]  ;;  %v5615_v2 = vld [vmem:[%s12433_s12 + $0x2d8] sm:$0xff] }
0x1132   : > { %v5619_v57 = vld [vmem:[%s12433_s12 + $0x2f8] sm:$0xff]  ;;  %v9431_v62 = vcombine.high %v5614_v7, %v5618_v60  ;;  %v9430_v21 = vcombine.low %v5614_v7, %v5618_v60  ;;  %v10562_v7 = vld [vmem:[%s12437_s0 + $0x50] ss:$8 sps:$4 sm:$0xff]  }
0x1133   : > { %v9433_v28 = vcombine.high %v5615_v2, %v5619_v57  ;;  %v9432_v41 = vcombine.low %v5615_v2, %v5619_v57  ;;  %v10567_v60 = vld [vmem:[%s12437_s0 + $0x64] ss:$8 sps:$4 sm:$0xff]   ;;  %v10565_v2 = vld [vmem:[%s12437_s0 + $0x60] ss:$8 sps:$4 sm:$0xff]   ;;  %v10570_v57 = vld [vmem:[%s12437_s0 + $0x74] ss:$8 sps:$4 sm:$0xff]  }
0x1134   : > { %6429 = vmatpush1.bf16.msra.mxu1 %v9374_v52  ;;  %6472 = vmatpush1.bf16.msra.mxu0 %v9376_v63  ;;  %v5622_v52 = vld [vmem:[%s12433_s12 + $0x310] sm:$0xff] }
0x1135   : > { %6430 = vmatprep.subr.bf16.mxu1 %v9383_v16  ;;  %6473 = vmatprep.subr.bf16.mxu0 %v9385_v19  ;;  %v5626_v63 = vld [vmem:[%s12433_s12 + $0x330] sm:$0xff]  ;;  %v5623_v16 = vld [vmem:[%s12433_s12 + $0x318] sm:$0xff] }
0x1136   : > { %v5627_v19 = vld [vmem:[%s12433_s12 + $0x338] sm:$0xff]  ;;  %v9439_v27 = vcombine.high %v5622_v52, %v5626_v63  ;;  %v9438_v6 = vcombine.low %v5622_v52, %v5626_v63  ;;  %v10574_v52 = vld [vmem:[%s12437_s0 + $0x90] ss:$8 sps:$4 sm:$0xff]  }
0x1137   : > { %v9441_v8 = vcombine.high %v5623_v16, %v5627_v19  ;;  %v9440_v47 = vcombine.low %v5623_v16, %v5627_v19  ;;  %v10579_v63 = vld [vmem:[%s12437_s0 + $0xa4] ss:$8 sps:$4 sm:$0xff]   ;;  %v10577_v16 = vld [vmem:[%s12437_s0 + $0xa0] ss:$8 sps:$4 sm:$0xff]   ;;  %v10582_v19 = vld [vmem:[%s12437_s0 + $0xb4] ss:$8 sps:$4 sm:$0xff]  }
0x1138   : > { %6431 = vmatpush1.bf16.msra.mxu1 %v9382_v18  ;;  %6474 = vmatpush1.bf16.msra.mxu0 %v9384_v10  ;;  %v5630_v18 = vld [vmem:[%s12433_s12 + $0x350] sm:$0xff] }
0x1139   : > { %6432 = vmatprep.subr.bf16.mxu1 %v9391_v29  ;;  %6475 = vmatprep.subr.bf16.mxu0 %v9393_v11  ;;  %v5634_v10 = vld [vmem:[%s12433_s12 + $0x370] sm:$0xff]  ;;  %v5631_v29 = vld [vmem:[%s12433_s12 + $0x358] sm:$0xff] }
0x113a   : > { %v5635_v11 = vld [vmem:[%s12433_s12 + $0x378] sm:$0xff]  ;;  %v9447_v25 = vcombine.high %v5630_v18, %v5634_v10  ;;  %v9446_v48 = vcombine.low %v5630_v18, %v5634_v10  ;;  %v10586_v18 = vld [vmem:[%s12437_s0 + $0xd0] ss:$8 sps:$4 sm:$0xff]  }
0x113b   : > { %v9449_v12 = vcombine.high %v5631_v29, %v5635_v11  ;;  %v9448_v15 = vcombine.low %v5631_v29, %v5635_v11  ;;  %v10591_v10 = vld [vmem:[%s12437_s0 + $0xe4] ss:$8 sps:$4 sm:$0xff]   ;;  %v10589_v29 = vld [vmem:[%s12437_s0 + $0xe0] ss:$8 sps:$4 sm:$0xff]   ;;  %v10594_v11 = vld [vmem:[%s12437_s0 + $0xf4] ss:$8 sps:$4 sm:$0xff]  }
0x113c   : > { %6433 = vmatpush1.bf16.msra.mxu1 %v9390_v61  ;;  %6476 = vmatpush1.bf16.msra.mxu0 %v9392_v33  ;;  %v5638_v61 = vld [vmem:[%s12433_s12 + $0x390] sm:$0xff] }
0x113d   : > { %6434 = vmatprep.subr.bf16.mxu1 %v9399_v53  ;;  %6477 = vmatprep.subr.bf16.mxu0 %v9401_v55  ;;  %v5642_v33 = vld [vmem:[%s12433_s12 + $0x3b0] sm:$0xff]  ;;  %v5639_v53 = vld [vmem:[%s12433_s12 + $0x398] sm:$0xff] }
0x113e   : > { %v5643_v55 = vld [vmem:[%s12433_s12 + $0x3b8] sm:$0xff]  ;;  %v9455_v24 = vcombine.high %v5638_v61, %v5642_v33  ;;  %v9454_v42 = vcombine.low %v5638_v61, %v5642_v33 }
0x113f   : > { %v9457_v17 = vcombine.high %v5639_v53, %v5643_v55  ;;  %v9456_v1 = vcombine.low %v5639_v53, %v5643_v55 }
0x1140   : > { %6435 = vmatpush1.bf16.msra.mxu1 %v9398_v31  ;;  %6478 = vmatpush1.bf16.msra.mxu0 %v9400_v26  ;;  %v5646_v31 = vld [vmem:[%s12433_s12 + $0x3d0] sm:$0xff] }
0x1141   : > { %6436 = vmatprep.subr.bf16.mxu1 %v9407_v35  ;;  %6479 = vmatprep.subr.bf16.mxu0 %v9409_v36  ;;  %v5650_v26 = vld [vmem:[%s12433_s12 + $0x3f0] sm:$0xff]  ;;  %v5647_v35 = vld [vmem:[%s12433_s12 + $0x3d8] sm:$0xff] }
0x1142   : > { %v5651_v36 = vld [vmem:[%s12433_s12 + $0x3f8] sm:$0xff]  ;;  %v9463_v32 = vcombine.high %v5646_v31, %v5650_v26  ;;  %s13784_s12 = scalar_lea.vmem [#allocation24], %s12412_s30 }
0x1143   : > { %v9465_v30 = vcombine.high %v5647_v35, %v5651_v36 }
0x1144   : > { %6437 = vmatpush1.bf16.msra.mxu1 %v9406_v54  ;;  %6480 = vmatpush1.bf16.msra.mxu0 %v9408_v38  ;;  %v9462_v54 = vcombine.low %v5646_v31, %v5650_v26  ;;  %v9464_v38 = vcombine.low %v5647_v35, %v5651_v36 }
0x1145   : > { %6438 = vmatprep.subr.bf16.mxu1 %v9415_v45  ;;  %6481 = vmatprep.subr.bf16.mxu0 %v9417_v14  ;;  %v10549_v45 = vld [vmem:[%s12437_s0 + $0x4] ss:$8 sps:$4 sm:$0xff]   ;;  %v10547_v14 = vld [vmem:[%s12437_s0] ss:$8 sps:$4 sm:$0xff]  }
0x1148   : > { %6439 = vmatpush1.bf16.msra.mxu1 %v9414_v37  ;;  %6482 = vmatpush1.bf16.msra.mxu0 %v9416_v0  ;;  %v10558_v37 = vld [vmem:[%s12437_s0 + $0x34] ss:$8 sps:$4 sm:$0xff]   ;;  %v10556_v0 = vld [vmem:[%s12437_s0 + $0x30] ss:$8 sps:$4 sm:$0xff]  }
0x1149   : > { %6440 = vmatprep.subr.bf16.mxu1 %v9423_v5  ;;  %6483 = vmatprep.subr.bf16.mxu0 %v9425_v39  ;;  %v10561_v5 = vld [vmem:[%s12437_s0 + $0x44] ss:$8 sps:$4 sm:$0xff]   ;;  %v10564_v39 = vld [vmem:[%s12437_s0 + $0x54] ss:$8 sps:$4 sm:$0xff]  }
0x114c   : > { %6441 = vmatpush1.bf16.msra.mxu1 %v9422_v46  ;;  %6484 = vmatpush1.bf16.msra.mxu0 %v9424_v22  ;;  %v10568_v46 = vld [vmem:[%s12437_s0 + $0x70] ss:$8 sps:$4 sm:$0xff]   ;;  %v10573_v22 = vld [vmem:[%s12437_s0 + $0x84] ss:$8 sps:$4 sm:$0xff]  }
0x114d   : > { %6442 = vmatprep.subr.bf16.mxu1 %v9431_v62  ;;  %6485 = vmatprep.subr.bf16.mxu0 %v9433_v28  ;;  %v10571_v62 = vld [vmem:[%s12437_s0 + $0x80] ss:$8 sps:$4 sm:$0xff]   ;;  %v10576_v28 = vld [vmem:[%s12437_s0 + $0x94] ss:$8 sps:$4 sm:$0xff]  }
0x1150   : > { %6443 = vmatpush1.bf16.msra.mxu1 %v9430_v21  ;;  %6486 = vmatpush1.bf16.msra.mxu0 %v9432_v41  ;;  %v10580_v21 = vld [vmem:[%s12437_s0 + $0xb0] ss:$8 sps:$4 sm:$0xff]   ;;  %v10585_v41 = vld [vmem:[%s12437_s0 + $0xc4] ss:$8 sps:$4 sm:$0xff]  }
0x1151   : > { %6444 = vmatprep.subr.bf16.mxu1 %v9439_v27  ;;  %6487 = vmatprep.subr.bf16.mxu0 %v9441_v8  ;;  %v10583_v27 = vld [vmem:[%s12437_s0 + $0xc0] ss:$8 sps:$4 sm:$0xff]   ;;  %v10588_v8 = vld [vmem:[%s12437_s0 + $0xd4] ss:$8 sps:$4 sm:$0xff]  }
0x1154   : > { %6445 = vmatpush1.bf16.msra.mxu1 %v9438_v6  ;;  %6488 = vmatpush1.bf16.msra.mxu0 %v9440_v47  ;;  %v10592_v6 = vld [vmem:[%s12437_s0 + $0xf0] ss:$8 sps:$4 sm:$0xff]   ;;  %v10597_v47 = vld [vmem:[%s12437_s0 + $0x104] ss:$8 sps:$4 sm:$0xff]  }
0x1155   : > { %6446 = vmatprep.subr.bf16.mxu1 %v9447_v25  ;;  %6489 = vmatprep.subr.bf16.mxu0 %v9449_v12  ;;  %v13420_v25 = vld [vmem:[%s12435_s13] sm:$0xff]  ;;  %s13785_s13 = scalar_lea.vmem [#allocation25], %s12412_s30 }
0x1156   : > { %v5657_v12 = vrot.slane %v13420_v25, %v12582_v51  ;;  %v5665_v61 = vrot.slane %v13420_v25, %v12576_v49  ;;  %v5661_v33 = vrot.slane %v13420_v25, %v12594_v56  ;;  %v5669_v53 = vrot.slane %v13420_v25, %v12579_v50 }
0x1158   : > { %6447 = vmatpush1.bf16.msra.mxu1 %v9446_v48  ;;  %6490 = vmatpush1.bf16.msra.mxu0 %v9448_v15 }
0x1159   : > { %6448 = vmatprep.subr.bf16.mxu1 %v9455_v24  ;;  %6491 = vmatprep.subr.bf16.mxu0 %v9457_v17 }
0x115c   : > { %6449 = vmatpush1.bf16.msra.mxu1 %v9454_v42  ;;  %6492 = vmatpush1.bf16.msra.mxu0 %v9456_v1 }
0x115d   : > { %6450 = vmatprep.subr.bf16.mxu1 %v9463_v32  ;;  %6493 = vmatprep.subr.bf16.mxu0 %v9465_v30 }
0x1160   : > { %6451 = vmatpush1.bf16.msra.mxu1 %v9462_v54  ;;  %6494 = vmatpush1.bf16.msra.mxu0 %v9464_v38 }
0x1161   : > { %7310 = vmatprep.subr.bf16.mxu1 %v10549_v45 }
0x1163   : > { %6453 = vmatmul.mubr.bf16.vlgmr.msra.gmra.mrb[76].mxu1 %v13324_v20  ;;  %6496 = vmatmul.mubr.bf16.vlgmr.msra.gmra.mrb[92].mxu0 %v13324_v20  ;;  %v10559_v20 = vld [vmem:[%s12437_s0 + $0x40] ss:$8 sps:$4 sm:$0xff]  }
0x1164   : > { %7311 = vmatpush1.bf16.msra.mxu1 %v10547_v14 }
0x1165   : > { %7312 = vmatprep.subr.bf16.mxu1 %v10552_v4 }
0x1168   : > { %7313 = vmatpush1.bf16.msra.mxu1 %v10550_v58 }
0x1169   : > { %7314 = vmatprep.subr.bf16.mxu1 %v10555_v34 }
0x116c   : > { %7315 = vmatpush1.bf16.msra.mxu1 %v10553_v59 }
0x116d   : > { %7316 = vmatprep.subr.bf16.mxu1 %v10558_v37 }
0x1170   : > { %7317 = vmatpush1.bf16.msra.mxu1 %v10556_v0 }
0x1171   : > { %7318 = vmatprep.subr.bf16.mxu1 %v10561_v5 }
0x1174   : > { %7319 = vmatpush1.bf16.msra.mxu1 %v10559_v20 }
0x1175   : > { %7320 = vmatprep.subr.bf16.mxu1 %v10564_v39 }
0x1178   : > { %7321 = vmatpush1.bf16.msra.mxu1 %v10562_v7  ;;  %v10595_v7 = vld [vmem:[%s12437_s0 + $0x100] ss:$8 sps:$4 sm:$0xff]  }
0x1179   : > { %7322 = vmatprep.subr.bf16.mxu1 %v10567_v60  ;;  %v10600_v60 = vld [vmem:[%s12437_s0 + $0x114] ss:$8 sps:$4 sm:$0xff]  }
0x117c   : > { %7323 = vmatpush1.bf16.msra.mxu1 %v10565_v2  ;;  %v10598_v2 = vld [vmem:[%s12437_s0 + $0x110] ss:$8 sps:$4 sm:$0xff]  }
0x117d   : > { %7324 = vmatprep.subr.bf16.mxu1 %v10570_v57  ;;  %v10603_v57 = vld [vmem:[%s12437_s0 + $0x124] ss:$8 sps:$4 sm:$0xff]  }
0x1180   : > { %7325 = vmatpush1.bf16.msra.mxu1 %v10568_v46  ;;  %v10601_v46 = vld [vmem:[%s12437_s0 + $0x120] ss:$8 sps:$4 sm:$0xff]  }
0x1181   : > { %7326 = vmatprep.subr.bf16.mxu1 %v10573_v22  ;;  %v10606_v22 = vld [vmem:[%s12437_s0 + $0x134] ss:$8 sps:$4 sm:$0xff]  }
0x1184   : > { %7327 = vmatpush1.bf16.msra.mxu1 %v10571_v62  ;;  %v10604_v62 = vld [vmem:[%s12437_s0 + $0x130] ss:$8 sps:$4 sm:$0xff]  }
0x1185   : > { %7328 = vmatprep.subr.bf16.mxu1 %v10576_v28  ;;  %v10609_v28 = vld [vmem:[%s12437_s0 + $0x144] ss:$8 sps:$4 sm:$0xff]  }
0x1188   : > { %7329 = vmatpush1.bf16.msra.mxu1 %v10574_v52  ;;  %v10607_v52 = vld [vmem:[%s12437_s0 + $0x140] ss:$8 sps:$4 sm:$0xff]  }
0x1189   : > { %7330 = vmatprep.subr.bf16.mxu1 %v10579_v63  ;;  %v10612_v63 = vld [vmem:[%s12437_s0 + $0x154] ss:$8 sps:$4 sm:$0xff]  }
0x118c   : > { %7331 = vmatpush1.bf16.msra.mxu1 %v10577_v16  ;;  %v10610_v16 = vld [vmem:[%s12437_s0 + $0x150] ss:$8 sps:$4 sm:$0xff]  }
0x118d   : > { %7332 = vmatprep.subr.bf16.mxu1 %v10582_v19  ;;  %v10615_v19 = vld [vmem:[%s12437_s0 + $0x164] ss:$8 sps:$4 sm:$0xff]  }
0x1190   : > { %7333 = vmatpush1.bf16.msra.mxu1 %v10580_v21  ;;  %v10613_v21 = vld [vmem:[%s12437_s0 + $0x160] ss:$8 sps:$4 sm:$0xff]  }
0x1191   : > { %7334 = vmatprep.subr.bf16.mxu1 %v10585_v41  ;;  %v10618_v41 = vld [vmem:[%s12437_s0 + $0x174] ss:$8 sps:$4 sm:$0xff]  }
0x1194   : > { %7335 = vmatpush1.bf16.msra.mxu1 %v10583_v27  ;;  %v10616_v27 = vld [vmem:[%s12437_s0 + $0x170] ss:$8 sps:$4 sm:$0xff]  }
0x1195   : > { %7336 = vmatprep.subr.bf16.mxu1 %v10588_v8  ;;  %v10621_v8 = vld [vmem:[%s12437_s0 + $0x184] ss:$8 sps:$4 sm:$0xff]  }
0x1198   : > { %7337 = vmatpush1.bf16.msra.mxu1 %v10586_v18  ;;  %v10619_v18 = vld [vmem:[%s12437_s0 + $0x180] ss:$8 sps:$4 sm:$0xff]  }
0x1199   : > { %7338 = vmatprep.subr.bf16.mxu1 %v10591_v10  ;;  %v10624_v10 = vld [vmem:[%s12437_s0 + $0x194] ss:$8 sps:$4 sm:$0xff]  }
0x119c   : > { %7339 = vmatpush1.bf16.msra.mxu1 %v10589_v29  ;;  %v10622_v29 = vld [vmem:[%s12437_s0 + $0x190] ss:$8 sps:$4 sm:$0xff]  }
0x119d   : > { %7340 = vmatprep.subr.bf16.mxu1 %v10594_v11  ;;  %v10627_v11 = vld [vmem:[%s12437_s0 + $0x1a4] ss:$8 sps:$4 sm:$0xff]  }
0x11a0   : > { %7341 = vmatpush1.bf16.msra.mxu1 %v10592_v6  ;;  %v10625_v6 = vld [vmem:[%s12437_s0 + $0x1a0] ss:$8 sps:$4 sm:$0xff]  }
0x11a1   : > { %7353 = vmatprep.subr.bf16.mxu1 %v10597_v47  ;;  %v10630_v47 = vld [vmem:[%s12437_s0 + $0x1b4] ss:$8 sps:$4 sm:$0xff]  }
0x11f6   : > { %v6368_v55 = vpop.f32.mrb[72].mxu1  ;;  %v6411_v48 = vpop.f32.mrb[88].mxu0 }
0x11f7   : > { %v6369_v15 = vadd.f32 %v6368_v55, %v5657_v12  ;;  %v6412_v24 = vadd.f32 %v6411_v48, %v5665_v61  ;;  %v6370_v17 = vpop.f32.mrb[73].mxu1  ;;  %v6413_v31 = vpop.f32.mrb[89].mxu0  ;;  %v5680_v55 = vsub.s32 6, %v12573_v43  ;;  %v5684_v48 = vsub.s32 7, %v12573_v43 }
0x11f8   : > { %v6371_v26 = vadd.f32 %v6370_v17, %v5661_v33  ;;  %v6414_v35 = vadd.f32 %v6413_v31, %v5669_v53  ;;  %v6372_v36 = vpop.f32.mrb[74].mxu1  ;;  %v6415_v42 = vpop.f32.mrb[90].mxu0  ;;  %v10639_v31 = vld [vmem:[%s12437_s0 + $0x1e4] ss:$8 sps:$4 sm:$0xff]  }
0x11f9   : > { %v6373_v1 = vadd.f32 %v6372_v36, %v5657_v12  ;;  %v6416_v32 = vadd.f32 %v6415_v42, %v5665_v61  ;;  %v6374_v30 = vpop.f32.mrb[75].mxu1  ;;  %v6417_v49 = vpop.f32.mrb[91].mxu0  ;;  %v6506_v45 = vmax.f32 %v6369_v15, 0.0  ;;  %v6508_v50 = vmax.f32 %v6412_v24, 0.0  ;;  %v10628_v12 = vld [vmem:[%s12437_s0 + $0x1b0] ss:$8 sps:$4 sm:$0xff]  }
0x11fa   : > { %v6375_v54 = vadd.f32 %v6374_v30, %v5661_v33  ;;  %v6418_v38 = vadd.f32 %v6417_v49, %v5669_v53  ;;  %v6507_v58 = vmax.f32 %v6371_v26, 0.0  ;;  %v6509_v34 = vmax.f32 %v6414_v35, 0.0  ;;  %v10633_v61 = vld [vmem:[%s12437_s0 + $0x1c4] ss:$8 sps:$4 sm:$0xff]   ;;  %v10631_v33 = vld [vmem:[%s12437_s0 + $0x1c0] ss:$8 sps:$4 sm:$0xff]  }
0x11fb   : > { %v6514_v14 = vmax.f32 %v6373_v1, 0.0  ;;  %v6516_v4 = vmax.f32 %v6416_v32, 0.0  ;;  %v10636_v53 = vld [vmem:[%s12437_s0 + $0x1d4] ss:$8 sps:$4 sm:$0xff]   ;;  %v10634_v15 = vld [vmem:[%s12437_s0 + $0x1d0] ss:$8 sps:$4 sm:$0xff]   ;;  %v5673_v24 = vrot.slane %v13420_v25, %v1621_v23  ;;  %v5681_v17 = vrot.slane %v13420_v25, %v5680_v55 }
0x11fc   : > { %v6515_v59 = vmax.f32 %v6375_v54, 0.0  ;;  %v6517_v37 = vmax.f32 %v6418_v38, 0.0  ;;  %v5677_v26 = vrot.slane %v13420_v25, %v1625_v44  ;;  %v5685_v35 = vrot.slane %v13420_v25, %v5684_v48  ;;  %v10637_v1 = vld [vmem:[%s12437_s0 + $0x1e0] ss:$8 sps:$4 sm:$0xff]   ;;  %v10642_v23 = vld [vmem:[%s12437_s0 + $0x1f4] ss:$8 sps:$4 sm:$0xff]  }
0x11fd   : > { %v6522_v0 = vpack.c.bf16 %v6514_v14, %v6506_v45  ;;  %v13430_v5 = vpack.c.bf16 %v6516_v4, %v6508_v50  ;;  %v10670_v55 = vld [vmem:[%s12437_s0 + $0x290] ss:$8 sps:$4 sm:$0xff]   ;;  %v10675_v48 = vld [vmem:[%s12437_s0 + $0x2a4] ss:$8 sps:$4 sm:$0xff]  }
0x11fe   : > { %v6523_v20 = vpack.c.bf16 %v6515_v59, %v6507_v58  ;;  %v6525_v39 = vpack.c.bf16 %v6517_v37, %v6509_v34  ;;  %v10640_v59 = vld [vmem:[%s12437_s0 + $0x1f0] ss:$8 sps:$4 sm:$0xff]  }
0x1200   : > { %7342 = vmatprep.mubr.bf16.mxu1 %v6523_v20 }
0x1201   : > { %7343 = vmatmul.mubr.bf16.vlgmr.msra.gmra.mrb[80].mxu1 %v6522_v0 }
0x1202   : > { %7354 = vmatpush1.bf16.msra.mxu1 %v10595_v7  ;;  %7385 = vmatprep.mubr.bf16.mxu1 %v6525_v39  ;;  %v10645_v7 = vld [vmem:[%s12437_s0 + $0x204] ss:$8 sps:$4 sm:$0xff]  }
0x1203   : > { %7355 = vmatprep.subr.bf16.mxu1 %v10600_v60 }
0x1206   : > { %7356 = vmatpush1.bf16.msra.mxu1 %v10598_v2 }
0x1207   : > { %7357 = vmatprep.subr.bf16.mxu1 %v10603_v57 }
0x120a   : > { %7358 = vmatpush1.bf16.msra.mxu1 %v10601_v46 }
0x120b   : > { %7359 = vmatprep.subr.bf16.mxu1 %v10606_v22 }
0x120e   : > { %7360 = vmatpush1.bf16.msra.mxu1 %v10604_v62 }
0x120f   : > { %7361 = vmatprep.subr.bf16.mxu1 %v10609_v28 }
0x1212   : > { %7362 = vmatpush1.bf16.msra.mxu1 %v10607_v52 }
0x1213   : > { %7363 = vmatprep.subr.bf16.mxu1 %v10612_v63  ;;  %v10643_v63 = vld [vmem:[%s12437_s0 + $0x200] ss:$8 sps:$4 sm:$0xff]  }
0x1216   : > { %7364 = vmatpush1.bf16.msra.mxu1 %v10610_v16  ;;  %v10648_v16 = vld [vmem:[%s12437_s0 + $0x214] ss:$8 sps:$4 sm:$0xff]  }
0x1217   : > { %7365 = vmatprep.subr.bf16.mxu1 %v10615_v19  ;;  %v10646_v19 = vld [vmem:[%s12437_s0 + $0x210] ss:$8 sps:$4 sm:$0xff]  }
0x121a   : > { %7366 = vmatpush1.bf16.msra.mxu1 %v10613_v21  ;;  %v10651_v21 = vld [vmem:[%s12437_s0 + $0x224] ss:$8 sps:$4 sm:$0xff]  }
0x121b   : > { %7367 = vmatprep.subr.bf16.mxu1 %v10618_v41  ;;  %v10649_v41 = vld [vmem:[%s12437_s0 + $0x220] ss:$8 sps:$4 sm:$0xff]  }
0x121e   : > { %7368 = vmatpush1.bf16.msra.mxu1 %v10616_v27  ;;  %v10654_v27 = vld [vmem:[%s12437_s0 + $0x234] ss:$8 sps:$4 sm:$0xff]  }
0x121f   : > { %7369 = vmatprep.subr.bf16.mxu1 %v10621_v8  ;;  %v10652_v8 = vld [vmem:[%s12437_s0 + $0x230] ss:$8 sps:$4 sm:$0xff]  }
0x1222   : > { %7370 = vmatpush1.bf16.msra.mxu1 %v10619_v18  ;;  %v10657_v18 = vld [vmem:[%s12437_s0 + $0x244] ss:$8 sps:$4 sm:$0xff]  }
0x1223   : > { %7371 = vmatprep.subr.bf16.mxu1 %v10624_v10  ;;  %v10660_v10 = vld [vmem:[%s12437_s0 + $0x254] ss:$8 sps:$4 sm:$0xff]  }
0x1226   : > { %7372 = vmatpush1.bf16.msra.mxu1 %v10622_v29  ;;  %v10658_v29 = vld [vmem:[%s12437_s0 + $0x250] ss:$8 sps:$4 sm:$0xff]  }
0x1227   : > { %7373 = vmatprep.subr.bf16.mxu1 %v10627_v11  ;;  %v10663_v11 = vld [vmem:[%s12437_s0 + $0x264] ss:$8 sps:$4 sm:$0xff]  }
0x122a   : > { %7374 = vmatpush1.bf16.msra.mxu1 %v10625_v6  ;;  %v10661_v6 = vld [vmem:[%s12437_s0 + $0x260] ss:$8 sps:$4 sm:$0xff]  }
0x122b   : > { %7375 = vmatprep.subr.bf16.mxu1 %v10630_v47  ;;  %v10666_v47 = vld [vmem:[%s12437_s0 + $0x274] ss:$8 sps:$4 sm:$0xff]  }
0x122e   : > { %7376 = vmatpush1.bf16.msra.mxu1 %v10628_v12  ;;  %v10664_v12 = vld [vmem:[%s12437_s0 + $0x270] ss:$8 sps:$4 sm:$0xff]  }
0x122f   : > { %7377 = vmatprep.subr.bf16.mxu1 %v10633_v61  ;;  %v10669_v61 = vld [vmem:[%s12437_s0 + $0x284] ss:$8 sps:$4 sm:$0xff]  }
0x1232   : > { %7378 = vmatpush1.bf16.msra.mxu1 %v10631_v33  ;;  %v10667_v33 = vld [vmem:[%s12437_s0 + $0x280] ss:$8 sps:$4 sm:$0xff]  }
0x1233   : > { %7379 = vmatprep.subr.bf16.mxu1 %v10636_v53  ;;  %v10672_v53 = vld [vmem:[%s12437_s0 + $0x294] ss:$8 sps:$4 sm:$0xff]  }
0x1236   : > { %v6454_v36 = vpop.f32.mrb[76].mxu1  ;;  %v6497_v42 = vpop.f32.mrb[92].mxu0  ;;  %7380 = vmatpush1.bf16.msra.mxu1 %v10634_v15  ;;  %v10673_v15 = vld [vmem:[%s12437_s0 + $0x2a0] ss:$8 sps:$4 sm:$0xff]  }
0x1237   : > { %v6455_v32 = vadd.f32 %v6454_v36, %v5673_v24  ;;  %v6498_v30 = vadd.f32 %v6497_v42, %v5681_v17  ;;  %v6456_v49 = vpop.f32.mrb[77].mxu1  ;;  %v6499_v54 = vpop.f32.mrb[93].mxu0  ;;  %7381 = vmatprep.subr.bf16.mxu1 %v10639_v31  ;;  %v10681_v31 = vld [vmem:[%s12437_s0 + $0x2c4] ss:$8 sps:$4 sm:$0xff]   ;;  %v10682_v36 = vld [vmem:[%s12437_s0 + $0x2d0] ss:$8 sps:$4 sm:$0xff]  }
0x1238   : > { %v6457_v38 = vadd.f32 %v6456_v49, %v5677_v26  ;;  %v6500_v45 = vadd.f32 %v6499_v54, %v5685_v35  ;;  %v6458_v50 = vpop.f32.mrb[78].mxu1  ;;  %v6501_v43 = vpop.f32.mrb[94].mxu0  ;;  %v10687_v42 = vld [vmem:[%s12437_s0 + $0x2e4] ss:$8 sps:$4 sm:$0xff]   ;;  %v10691_v54 = vld [vmem:[%s12437_s0 + $0x300] ss:$8 sps:$4 sm:$0xff]  }
0x1239   : > { %v6459_v14 = vadd.f32 %v6458_v50, %v5673_v24  ;;  %v6502_v44 = vadd.f32 %v6501_v43, %v5681_v17  ;;  %v6460_v4 = vpop.f32.mrb[79].mxu1  ;;  %v6503_v25 = vpop.f32.mrb[95].mxu0  ;;  %v6510_v37 = vmax.f32 %v6455_v32, 0.0  ;;  %v6512_v0 = vmax.f32 %v6498_v30, 0.0  ;;  %v10678_v24 = vld [vmem:[%s12437_s0 + $0x2b4] ss:$8 sps:$4 sm:$0xff]  }
0x123a   : > { %v6461_v58 = vadd.f32 %v6460_v4, %v5677_v26  ;;  %v6504_v34 = vadd.f32 %v6503_v25, %v5685_v35  ;;  %7382 = vmatpush1.bf16.msra.mxu1 %v10637_v1  ;;  %v6511_v60 = vmax.f32 %v6457_v38, 0.0  ;;  %v6513_v2 = vmax.f32 %v6500_v45, 0.0  ;;  %v10676_v17 = vld [vmem:[%s12437_s0 + $0x2b0] ss:$8 sps:$4 sm:$0xff]   ;;  %v10679_v26 = vld [vmem:[%s12437_s0 + $0x2c0] ss:$8 sps:$4 sm:$0xff]  }
0x123b   : > { %v6518_v20 = vmax.f32 %v6459_v14, 0.0  ;;  %v6520_v39 = vmax.f32 %v6502_v44, 0.0  ;;  %7383 = vmatprep.subr.bf16.mxu1 %v10642_v23  ;;  %v10684_v35 = vld [vmem:[%s12437_s0 + $0x2d4] ss:$8 sps:$4 sm:$0xff]   ;;  %v10685_v1 = vld [vmem:[%s12437_s0 + $0x2e0] ss:$8 sps:$4 sm:$0xff]  }
0x123c   : > { %v6519_v57 = vmax.f32 %v6461_v58, 0.0  ;;  %v6521_v46 = vmax.f32 %v6504_v34, 0.0  ;;  %v10690_v32 = vld [vmem:[%s12437_s0 + $0x2f4] ss:$8 sps:$4 sm:$0xff]   ;;  %v10688_v30 = vld [vmem:[%s12437_s0 + $0x2f0] ss:$8 sps:$4 sm:$0xff]  }
0x123d   : > { %v13474_v22 = vpack.c.bf16 %v6518_v20, %v6510_v37  ;;  %v13476_v62 = vpack.c.bf16 %v6520_v39, %v6512_v0  ;;  %v10693_v49 = vld [vmem:[%s12437_s0 + $0x304] ss:$8 sps:$4 sm:$0xff]   ;;  %v10696_v23 = vld [vmem:[%s12437_s0 + $0x314] ss:$8 sps:$4 sm:$0xff]   ;;  %v10694_v38 = vld [vmem:[%s12437_s0 + $0x310] ss:$8 sps:$4 sm:$0xff]  }
0x123e   : > { %v6527_v28 = vpack.c.bf16 %v6519_v57, %v6511_v60  ;;  %v13478_v52 = vpack.c.bf16 %v6521_v46, %v6513_v2  ;;  %7384 = vmatpush1.bf16.msra.mxu1 %v10640_v59  ;;  %v10699_v45 = vld [vmem:[%s12437_s0 + $0x324] ss:$8 sps:$4 sm:$0xff]   ;;  %v10697_v50 = vld [vmem:[%s12437_s0 + $0x320] ss:$8 sps:$4 sm:$0xff]   ;;  %v10702_v43 = vld [vmem:[%s12437_s0 + $0x334] ss:$8 sps:$4 sm:$0xff]  }
0x123f   : > { %7396 = vmatprep.subr.bf16.mxu1 %v10645_v7  ;;  %v10700_v14 = vld [vmem:[%s12437_s0 + $0x330] ss:$8 sps:$4 sm:$0xff]   ;;  %v10705_v44 = vld [vmem:[%s12437_s0 + $0x344] ss:$8 sps:$4 sm:$0xff]   ;;  %v10703_v4 = vld [vmem:[%s12437_s0 + $0x340] ss:$8 sps:$4 sm:$0xff]  }
0x1240   : > { %v10708_v25 = vld [vmem:[%s12437_s0 + $0x354] ss:$8 sps:$4 sm:$0xff]   ;;  %v10706_v58 = vld [vmem:[%s12437_s0 + $0x350] ss:$8 sps:$4 sm:$0xff]   ;;  %v10711_v34 = vld [vmem:[%s12437_s0 + $0x364] ss:$8 sps:$4 sm:$0xff]  }
0x1241   : > { %7386 = vmatmul.mubr.bf16.vlgmr.msra.gmra.mrb[80].mxu1 %v13430_v5  ;;  %v10655_v5 = vld [vmem:[%s12437_s0 + $0x240] ss:$8 sps:$4 sm:$0xff]   ;;  %v10714_v37 = vld [vmem:[%s12437_s0 + $0x374] ss:$8 sps:$4 sm:$0xff]   ;;  %v10712_v0 = vld [vmem:[%s12437_s0 + $0x370] ss:$8 sps:$4 sm:$0xff]  }
0x1242   : > { %7397 = vmatpush1.bf16.msra.mxu1 %v10643_v63  ;;  %7428 = vmatprep.mubr.bf16.mxu1 %v6527_v28  ;;  %v10709_v59 = vld [vmem:[%s12437_s0 + $0x360] ss:$8 sps:$4 sm:$0xff]   ;;  %v10717_v20 = vld [vmem:[%s12437_s0 + $0x384] ss:$8 sps:$4 sm:$0xff]   ;;  %v10720_v7 = vld [vmem:[%s12437_s0 + $0x394] ss:$8 sps:$4 sm:$0xff]  }
0x1243   : > { %7398 = vmatprep.subr.bf16.mxu1 %v10648_v16  ;;  %v10715_v39 = vld [vmem:[%s12437_s0 + $0x380] ss:$8 sps:$4 sm:$0xff]   ;;  %v10718_v60 = vld [vmem:[%s12437_s0 + $0x390] ss:$8 sps:$4 sm:$0xff]   ;;  %v10723_v2 = vld [vmem:[%s12437_s0 + $0x3a4] ss:$8 sps:$4 sm:$0xff]  }
0x1244   : > { %v10721_v57 = vld [vmem:[%s12437_s0 + $0x3a0] ss:$8 sps:$4 sm:$0xff]   ;;  %v10726_v46 = vld [vmem:[%s12437_s0 + $0x3b4] ss:$8 sps:$4 sm:$0xff]   ;;  %v10729_v28 = vld [vmem:[%s12437_s0 + $0x3c4] ss:$8 sps:$4 sm:$0xff]  }
0x1245   : > { %v10732_v63 = vld [vmem:[%s12437_s0 + $0x3d4] ss:$8 sps:$4 sm:$0xff]   ;;  %v10730_v16 = vld [vmem:[%s12437_s0 + $0x3d0] ss:$8 sps:$4 sm:$0xff]  }
0x1246   : > { %7399 = vmatpush1.bf16.msra.mxu1 %v10646_v19  ;;  %v10735_v19 = vld [vmem:[%s12437_s0 + $0x3e4] ss:$8 sps:$4 sm:$0xff]  }
0x1247   : > { %7400 = vmatprep.subr.bf16.mxu1 %v10651_v21  ;;  %v10733_v21 = vld [vmem:[%s12437_s0 + $0x3e0] ss:$8 sps:$4 sm:$0xff]  }
0x124a   : > { %7401 = vmatpush1.bf16.msra.mxu1 %v10649_v41  ;;  %v10738_v41 = vld [vmem:[%s12437_s0 + $0x3f4] ss:$8 sps:$4 sm:$0xff]  }
0x124b   : > { %7402 = vmatprep.subr.bf16.mxu1 %v10654_v27  ;;  %v10736_v27 = vld [vmem:[%s12437_s0 + $0x3f0] ss:$8 sps:$4 sm:$0xff]  }
0x124e   : > { %7403 = vmatpush1.bf16.msra.mxu1 %v10652_v8  ;;  %v6658_v8 = vld [vmem:[%s13784_s12] sm:$0x3] }
0x124f   : > { %7404 = vmatprep.subr.bf16.mxu1 %v10657_v18  ;;  %v6663_v18 = vrot.slane %v6658_v8, %v12582_v51 }
0x1252   : > { %7405 = vmatpush1.bf16.msra.mxu1 %v10655_v5  ;;  %v6667_v5 = vrot.slane %v6658_v8, %v12594_v56 }
0x1253   : > { %7406 = vmatprep.subr.bf16.mxu1 %v10660_v10 }
0x1256   : > { %7407 = vmatpush1.bf16.msra.mxu1 %v10658_v29 }
0x1257   : > { %7408 = vmatprep.subr.bf16.mxu1 %v10663_v11 }
0x125a   : > { %7409 = vmatpush1.bf16.msra.mxu1 %v10661_v6 }
0x125b   : > { %7410 = vmatprep.subr.bf16.mxu1 %v10666_v47 }
0x125e   : > { %7411 = vmatpush1.bf16.msra.mxu1 %v10664_v12 }
0x125f   : > { %7412 = vmatprep.subr.bf16.mxu1 %v10669_v61 }
0x1262   : > { %7413 = vmatpush1.bf16.msra.mxu1 %v10667_v33 }
0x1263   : > { %7414 = vmatprep.subr.bf16.mxu1 %v10672_v53 }
0x1266   : > { %7415 = vmatpush1.bf16.msra.mxu1 %v10670_v55 }
0x1267   : > { %7416 = vmatprep.subr.bf16.mxu1 %v10675_v48 }
0x126a   : > { %7417 = vmatpush1.bf16.msra.mxu1 %v10673_v15 }
0x126b   : > { %7418 = vmatprep.subr.bf16.mxu1 %v10678_v24 }
0x126e   : > { %7419 = vmatpush1.bf16.msra.mxu1 %v10676_v17 }
0x126f   : > { %7420 = vmatprep.subr.bf16.mxu1 %v10681_v31 }
0x1272   : > { %7421 = vmatpush1.bf16.msra.mxu1 %v10679_v26 }
0x1273   : > { %7422 = vmatprep.subr.bf16.mxu1 %v10684_v35 }
0x1276   : > { %7423 = vmatpush1.bf16.msra.mxu1 %v10682_v36 }
0x1277   : > { %7424 = vmatprep.subr.bf16.mxu1 %v10687_v42 }
0x127a   : > { %7425 = vmatpush1.bf16.msra.mxu1 %v10685_v1 }
0x127b   : > { %7426 = vmatprep.subr.bf16.mxu1 %v10690_v32 }
0x127e   : > { %7427 = vmatpush1.bf16.msra.mxu1 %v10688_v30 }
0x127f   : > { %7439 = vmatprep.subr.bf16.mxu1 %v10693_v49 }
0x1281   : > { %7429 = vmatmul.mubr.bf16.vlgmr.msra.gmra.mrb[80].mxu1 %v13474_v22  ;;  %v10724_v22 = vld [vmem:[%s12437_s0 + $0x3b0] ss:$8 sps:$4 sm:$0xff]  }
0x1282   : > { %7440 = vmatpush1.bf16.msra.mxu1 %v10691_v54  ;;  %7471 = vmatprep.mubr.bf16.mxu1 %v13478_v52  ;;  %v10727_v52 = vld [vmem:[%s12437_s0 + $0x3c0] ss:$8 sps:$4 sm:$0xff]   ;;  %s13786_s0 = scalar_lea.vmem [#allocation26], %s12412_s30  ;;  %s13787_s30 = sld [smem:[#allocation34_spill]] }
0x1283   : > { %7441 = vmatprep.subr.bf16.mxu1 %v10696_v23 }
0x1286   : > { %7442 = vmatpush1.bf16.msra.mxu1 %v10694_v38 }
0x1287   : > { %7443 = vmatprep.subr.bf16.mxu1 %v10699_v45 }
0x1288   : > { %p9594_p2 = scmp.ne.s32.totalorder %s13787_s30, 3 }
0x1289   : > { %v7568_v8 = vld [vmem:[#allocation27 + $0x40] sm:$0xff] (!%p9594_p2)  ;;  %s13788_s7 = sld [smem:[#allocation58_spill]] (!%p9594_p2) }
0x128a   : > { %7444 = vmatpush1.bf16.msra.mxu1 %v10697_v50 }
0x128b   : > { %7445 = vmatprep.subr.bf16.mxu1 %v10702_v43 }
0x128e   : > { %7446 = vmatpush1.bf16.msra.mxu1 %v10700_v14  ;;  %v7486_v14 = vld [vmem:[%s13785_s13] sm:$0x3] }
0x128f   : > { %7447 = vmatprep.subr.bf16.mxu1 %v10705_v44  ;;  %v7487_v44 = vld [vmem:[%s13786_s0] sm:$0x3] }
0x1292   : > { %7448 = vmatpush1.bf16.msra.mxu1 %v10703_v4  ;;  %v7524_v4 = vrot.slane %v7486_v14, %v12582_v51 }
0x1293   : > { %7449 = vmatprep.subr.bf16.mxu1 %v10708_v25  ;;  %v7528_v25 = vrot.slane %v7486_v14, %v12594_v56 }
0x1296   : > { %7450 = vmatpush1.bf16.msra.mxu1 %v10706_v58 }
0x1297   : > { %7451 = vmatprep.subr.bf16.mxu1 %v10711_v34  ;;  %v7539_v34 = vrot.slane %v7487_v44, %v12582_v51 }
0x129a   : > { %7452 = vmatpush1.bf16.msra.mxu1 %v10709_v59  ;;  %v7543_v59 = vrot.slane %v7487_v44, %v12594_v56  ;;  %v7560_v56 = vld [vmem:[#allocation27] sm:$0xff] (!%p9594_p2) }
0x129b   : > { %7453 = vmatprep.subr.bf16.mxu1 %v10714_v37 }
0x129e   : > { %7454 = vmatpush1.bf16.msra.mxu1 %v10712_v0 }
0x129f   : > { %7455 = vmatprep.subr.bf16.mxu1 %v10717_v20 }
0x12a2   : > { %7456 = vmatpush1.bf16.msra.mxu1 %v10715_v39 }
0x12a3   : > { %7457 = vmatprep.subr.bf16.mxu1 %v10720_v7 }
0x12a6   : > { %7458 = vmatpush1.bf16.msra.mxu1 %v10718_v60 }
0x12a7   : > { %7459 = vmatprep.subr.bf16.mxu1 %v10723_v2 }
0x12aa   : > { %7460 = vmatpush1.bf16.msra.mxu1 %v10721_v57 }
0x12ab   : > { %7461 = vmatprep.subr.bf16.mxu1 %v10726_v46 }
0x12ae   : > { %7462 = vmatpush1.bf16.msra.mxu1 %v10724_v22 }
0x12af   : > { %7463 = vmatprep.subr.bf16.mxu1 %v10729_v28 }
0x12b2   : > { %7464 = vmatpush1.bf16.msra.mxu1 %v10727_v52 }
0x12b3   : > { %7465 = vmatprep.subr.bf16.mxu1 %v10732_v63  ;;  %v7564_v63 = vld [vmem:[#allocation27 + $0x20] sm:$0xff] (!%p9594_p2) }
0x12b6   : > { %7466 = vmatpush1.bf16.msra.mxu1 %v10730_v16  ;;  %v7561_v16 = vld [vmem:[#allocation27 + $0x8] sm:$0xff] (!%p9594_p2) }
0x12b7   : > { %7467 = vmatprep.subr.bf16.mxu1 %v10735_v19 }
0x12ba   : > { %7468 = vmatpush1.bf16.msra.mxu1 %v10733_v21  ;;  %v9596_v21 = vcombine.high (!%p9594_p2), %v7560_v56, %v7564_v63 }
0x12bb   : > { %7469 = vmatprep.subr.bf16.mxu1 %v10738_v41  ;;  %v7565_v41 = vld [vmem:[#allocation27 + $0x28] sm:$0xff] (!%p9594_p2) }
0x12bc   : > { %8328 = vmatprep.subr.bf16.mxu0 (!%p9594_p2), %v9596_v21  ;;  %v7625_v21 = vld [vmem:[#allocation27 + $0x208] sm:$0xff] (!%p9594_p2) }
0x12be   : > { %7470 = vmatpush1.bf16.msra.mxu1 %v10736_v27  ;;  %v9595_v27 = vcombine.low (!%p9594_p2), %v7560_v56, %v7564_v63  ;;  %v7624_v63 = vld [vmem:[#allocation27 + $0x200] sm:$0xff] (!%p9594_p2) }
0x12c0   : > { %8329 = vmatpush1.bf16.msra.mxu0 (!%p9594_p2), %v9595_v27 }
0x12c1   : > { %7472 = vmatmul.mubr.bf16.vlgmr.msra.gmra.mrb[80].mxu1 %v13476_v62 }
0x1394   : > { %v7473_v10 = vpop.f32.mrb[80].mxu1 }
0x1395   : > { %v9999_v29 = vadd.f32 %v7473_v10, %v6663_v18  ;;  %v7475_v11 = vpop.f32.mrb[81].mxu1  ;;  %v9597_v10 = vcombine.low (!%p9594_p2), %v7561_v16, %v7565_v41 }
0x1396   : > { %v10000_v6 = vadd.f32 %v7475_v11, %v6667_v5  ;;  %v7477_v47 = vpop.f32.mrb[82].mxu1  ;;  %v7569_v11 = vld [vmem:[#allocation27 + $0x48] sm:$0xff] (!%p9594_p2) }
0x1397   : > { %v7482_v12 = vadd.f32 %v9999_v29, %v13312_v40  ;;  %v10001_v61 = vadd.f32 %v7477_v47, %v6663_v18  ;;  %v7479_v33 = vpop.f32.mrb[83].mxu1  ;;  %v7572_v18 = vld [vmem:[#allocation27 + $0x60] sm:$0xff] (!%p9594_p2) }
0x1398   : > { %v7483_v53 = vadd.f32 %v10000_v6, %v13308_v13  ;;  %v10002_v55 = vadd.f32 %v7479_v33, %v6667_v5  ;;  %v9598_v5 = vcombine.high (!%p9594_p2), %v7561_v16, %v7565_v41  ;;  %v9604_v29 = vcombine.high (!%p9594_p2), %v7568_v8, %v7572_v18  ;;  %v7573_v6 = vld [vmem:[#allocation27 + $0x68] sm:$0xff] (!%p9594_p2)  ;;  %v7576_v47 = vld [vmem:[#allocation27 + $0x80] sm:$0xff] (!%p9594_p2) }
0x1399   : > { %v7484_v62 = vadd.f32 %v10001_v61, %v13314_v9  ;;  %v7580_v61 = vld [vmem:[#allocation27 + $0xa0] sm:$0xff] (!%p9594_p2)  ;;  %v7577_v33 = vld [vmem:[#allocation27 + $0x88] sm:$0xff] (!%p9594_p2) }
0x139a   : > { %v7485_v48 = vadd.f32 %v10002_v55, %v13310_v3  ;;  %v7488_v15 = vadd.f32 %v7483_v53, %v7482_v12  ;;  %8371 = vmatprep.subr.bf16.mxu1 (!%p9594_p2), %v9598_v5  ;;  %v9603_v55 = vcombine.low (!%p9594_p2), %v7568_v8, %v7572_v18  ;;  %8330 = vmatprep.subr.bf16.mxu0 (!%p9594_p2), %v9604_v29  ;;  %v7628_v16 = vld [vmem:[#allocation27 + $0x220] sm:$0xff] (!%p9594_p2)  ;;  %v7629_v41 = vld [vmem:[#allocation27 + $0x228] sm:$0xff] (!%p9594_p2) }
0x139b   : > { %8372 = vmatpush1.bf16.msra.mxu1 (!%p9594_p2), %v9597_v10  ;;  %v9660_v18 = vcombine.high (!%p9594_p2), %v7624_v63, %v7628_v16  ;;  %v9662_v5 = vcombine.high (!%p9594_p2), %v7625_v21, %v7629_v41  ;;  %v7632_v10 = vld [vmem:[#allocation27 + $0x240] sm:$0xff] (!%p9594_p2) }
0x139c   : > { %7489 = vadd.xlane.f32.xlu1 %v7488_v15  ;;  %v7491_v24 = vadd.f32 %v7485_v48, %v7484_v62  ;;  %8331 = vmatpush1.bf16.msra.mxu0 (!%p9594_p2), %v9603_v55  ;;  %v7636_v29 = vld [vmem:[#allocation27 + $0x260] sm:$0xff] (!%p9594_p2) }
0x139d   : > { %v7644_v55 = vld [vmem:[#allocation27 + $0x2a0] sm:$0xff] (!%p9594_p2) }
0x139e   : > { %7492 = vadd.xlane.f32.xlu0 %v7491_v24  ;;  %v7584_v24 = vld [vmem:[#allocation27 + $0xc0] sm:$0xff] (!%p9594_p2) }
0x1429   : > { %v7490_v17 = vpop.xlane.xlu1 %7489 }
0x142a   : > { %v7494_v31 = vmul.f32 0.00390625, %v7490_v17  ;;  %v7588_v17 = vld [vmem:[#allocation27 + $0xe0] sm:$0xff] (!%p9594_p2) }
0x142b   : > { %v7493_v26 = vpop.xlane.xlu0 %7492 }
0x142c   : > { %v7496_v35 = vsub.f32 %v7482_v12, %v7494_v31  ;;  %v7497_v36 = vsub.f32 %v7483_v53, %v7494_v31  ;;  %v7495_v42 = vmul.f32 0.00390625, %v7493_v26  ;;  %v9606_v12 = vcombine.high (!%p9594_p2), %v7569_v11, %v7573_v6  ;;  %v7581_v53 = vld [vmem:[#allocation27 + $0xa8] sm:$0xff] (!%p9594_p2) }
0x142d   : > { %v9614_v15 = vcombine.high (!%p9594_p2), %v7577_v33, %v7581_v53  ;;  %v7585_v31 = vld [vmem:[#allocation27 + $0xc8] sm:$0xff] (!%p9594_p2) }
0x142e   : > { %v7498_v40 = vsub.f32 %v7484_v62, %v7495_v42  ;;  %v7499_v1 = vsub.f32 %v7485_v48, %v7495_v42  ;;  %v7500_v32 = vmul.f32 %v7496_v35, %v7496_v35  ;;  %v7501_v13 = vmul.f32 %v7497_v36, %v7497_v36  ;;  %8373 = vmatprep.subr.bf16.mxu1 (!%p9594_p2), %v9606_v12  ;;  %v7589_v26 = vld [vmem:[#allocation27 + $0xe8] sm:$0xff] (!%p9594_p2) }
0x142f   : > { %v9605_v62 = vcombine.low (!%p9594_p2), %v7569_v11, %v7573_v6  ;;  %v9612_v48 = vcombine.high (!%p9594_p2), %v7576_v47, %v7580_v61  ;;  %v9620_v42 = vcombine.high (!%p9594_p2), %v7584_v24, %v7588_v17  ;;  %v7633_v11 = vld [vmem:[#allocation27 + $0x248] sm:$0xff] (!%p9594_p2)  ;;  %v9661_v12 = vcombine.low (!%p9594_p2), %v7625_v21, %v7629_v41  ;;  %v7562_v41 = vld [vmem:[#allocation27 + $0x10] sm:$0xff] (!%p9594_p2) }
0x1430   : > { %v7504_v30 = vadd.f32 %v7501_v13, %v7500_v32  ;;  %v7502_v9 = vmul.f32 %v7498_v40, %v7498_v40  ;;  %v7503_v49 = vmul.f32 %v7499_v1, %v7499_v1  ;;  %v7596_v32 = vld [vmem:[#allocation27 + $0x120] sm:$0xff] (!%p9594_p2)  ;;  %v7593_v13 = vld [vmem:[#allocation27 + $0x108] sm:$0xff] (!%p9594_p2) }
0x1431   : > { %8374 = vmatpush1.bf16.msra.mxu1 (!%p9594_p2), %v9605_v62  ;;  %8332 = vmatprep.subr.bf16.mxu0 (!%p9594_p2), %v9612_v48  ;;  %v7637_v6 = vld [vmem:[#allocation27 + $0x268] sm:$0xff] (!%p9594_p2) }
0x1432   : > { %7505 = vadd.xlane.f32.xlu1 %v7504_v30  ;;  %v7507_v3 = vadd.f32 %v7503_v49, %v7502_v9  ;;  %8375 = vmatprep.subr.bf16.mxu1 (!%p9594_p2), %v9614_v15  ;;  %v7597_v30 = vld [vmem:[#allocation27 + $0x128] sm:$0xff] (!%p9594_p2)  ;;  %v9619_v9 = vcombine.low (!%p9594_p2), %v7584_v24, %v7588_v17  ;;  %v9621_v49 = vcombine.low (!%p9594_p2), %v7585_v31, %v7589_v26 }
0x1433   : > { %v9629_v14 = vcombine.low (!%p9594_p2), %v7593_v13, %v7597_v30  ;;  %v7641_v62 = vld [vmem:[#allocation27 + $0x288] sm:$0xff] (!%p9594_p2)  ;;  %v9667_v15 = vcombine.low (!%p9594_p2), %v7632_v10, %v7636_v29  ;;  %v9669_v24 = vcombine.low (!%p9594_p2), %v7633_v11, %v7637_v6 }
0x1434   : > { %7508 = vadd.xlane.f32.xlu0 %v7507_v3  ;;  %v7645_v48 = vld [vmem:[#allocation27 + $0x2a8] sm:$0xff] (!%p9594_p2) }
0x14bf   : > { %v7506_v54 = vpop.xlane.xlu1 %7505 }
0x14c0   : > { %v7510_v23 = vmul.f32 0.00390625, %v7506_v54  ;;  %v9630_v54 = vcombine.high (!%p9594_p2), %v7593_v13, %v7597_v30  ;;  %v7656_v30 = vld [vmem:[#allocation27 + $0x300] sm:$0xff] (!%p9594_p2) }
0x14c1   : > { %v7509_v38 = vpop.xlane.xlu0 %7508 }
0x14c2   : > { %v7512_v45 = vadd.f32 1e-05, %v7510_v23  ;;  %v7511_v50 = vmul.f32 0.00390625, %v7509_v38  ;;  %v7600_v23 = vld [vmem:[#allocation27 + $0x140] sm:$0xff] (!%p9594_p2) }
0x14c3   : > { %v7604_v38 = vld [vmem:[#allocation27 + $0x160] sm:$0xff] (!%p9594_p2) }
0x14c4   : > { %10811 = vrsqrt.f32 %v7512_v45  ;;  %v7513_v43 = vadd.f32 1e-05, %v7511_v50  ;;  %v7601_v45 = vld [vmem:[#allocation27 + $0x148] sm:$0xff] (!%p9594_p2)  ;;  %v9636_v44 = vcombine.high (!%p9594_p2), %v7600_v23, %v7604_v38 }
0x14c5   : > { %v7605_v50 = vld [vmem:[#allocation27 + $0x168] sm:$0xff] (!%p9594_p2) }
0x14c6   : > { %10813 = vrsqrt.f32 %v7513_v43 }
0x14ce   : > { %v10812_v58 = vpop.eup %10811 }
0x14cf   : > { %v7516_v37 = vmul.f32 %v10812_v58, %v7496_v35  ;;  %v7517_v0 = vmul.f32 %v10812_v58, %v7497_v36  ;;  %v9611_v35 = vcombine.low (!%p9594_p2), %v7576_v47, %v7580_v61  ;;  %v9613_v36 = vcombine.low (!%p9594_p2), %v7577_v33, %v7581_v53  ;;  %v7612_v58 = vld [vmem:[#allocation27 + $0x1a0] sm:$0xff] (!%p9594_p2) }
0x14d0   : > { %v10814_v20 = vpop.eup %10813  ;;  %v9659_v47 = vcombine.low (!%p9594_p2), %v7624_v63, %v7628_v16  ;;  %v9668_v61 = vcombine.high (!%p9594_p2), %v7632_v10, %v7636_v29  ;;  %v9670_v33 = vcombine.high (!%p9594_p2), %v7633_v11, %v7637_v6  ;;  %v7640_v53 = vld [vmem:[#allocation27 + $0x280] sm:$0xff] (!%p9594_p2)  ;;  %v7570_v6 = vld [vmem:[#allocation27 + $0x50] sm:$0xff] (!%p9594_p2) }
0x14d1   : > { %v7531_v39 = vmul.f32 %v7524_v4, %v7516_v37  ;;  %v7532_v7 = vmul.f32 %v7528_v25, %v7517_v0  ;;  %v7518_v60 = vmul.f32 %v10814_v20, %v7498_v40  ;;  %v7519_v2 = vmul.f32 %v10814_v20, %v7499_v1  ;;  %7557 = sbr.rel (%p9594_p2) target bundleno = 5665 (0x1621), region = 220  ;;  %v7592_v1 = vld [vmem:[#allocation27 + $0x100] sm:$0xff] (!%p9594_p2)  ;;  %8333 = vmatpush1.bf16.msra.mxu0 (!%p9594_p2), %v9611_v35 }
0x14d2   : > { %v9622_v40 = vcombine.high (!%p9594_p2), %v7585_v31, %v7589_v26  ;;  %8376 = vmatpush1.bf16.msra.mxu1 (!%p9594_p2), %v9613_v36  ;;  %8334 = vmatprep.subr.bf16.mxu0 (!%p9594_p2), %v9620_v42  ;;  %v9628_v3 = vcombine.high (!%p9594_p2), %v7592_v1, %v7596_v32  ;;  %v9627_v43 = vcombine.low (!%p9594_p2), %v7592_v1, %v7596_v32  ;;  %v7648_v26 = vld [vmem:[#allocation27 + $0x2c0] sm:$0xff] (!%p9594_p2)  ;;  %v7649_v36 = vld [vmem:[#allocation27 + $0x2c8] sm:$0xff] (!%p9594_p2) }
0x14d3   : > { %v13563_v57 = vadd.f32 %v7539_v34, %v7531_v39  ;;  %v7547_v46 = vadd.f32 %v7543_v59, %v7532_v7  ;;  %v7533_v22 = vmul.f32 %v7524_v4, %v7518_v60  ;;  %v7534_v28 = vmul.f32 %v7528_v25, %v7519_v2  ;;  %v7608_v25 = vld [vmem:[#allocation27 + $0x180] sm:$0xff] (!%p9594_p2)  ;;  %v7617_v2 = vld [vmem:[#allocation27 + $0x1c8] sm:$0xff] (!%p9594_p2) }
0x14d4   : > { %8377 = vmatprep.subr.bf16.mxu1 (!%p9594_p2), %v9622_v40  ;;  %v9638_v4 = vcombine.high (!%p9594_p2), %v7601_v45, %v7605_v50  ;;  %v9635_v37 = vcombine.low (!%p9594_p2), %v7600_v23, %v7604_v38  ;;  %v9637_v0 = vcombine.low (!%p9594_p2), %v7601_v45, %v7605_v50  ;;  %v9644_v20 = vcombine.high (!%p9594_p2), %v7608_v25, %v7612_v58  ;;  %v7616_v7 = vld [vmem:[#allocation27 + $0x1c0] sm:$0xff] (!%p9594_p2)  ;;  %v7653_v42 = vld [vmem:[#allocation27 + $0x2e8] sm:$0xff] (!%p9594_p2) }
0x14d5   : > { %7550 = vst [vmem:[#allocation2] sm:$0xff] %v13563_v57  ;;  %7551 = vst [vmem:[#allocation2 + $0x8] sm:$0xff] %v7547_v46  ;;  %v13566_v52 = vadd.f32 %v7539_v34, %v7533_v22  ;;  %v7549_v51 = vadd.f32 %v7543_v59, %v7534_v28  ;;  %8335 = vmatpush1.bf16.msra.mxu0 (!%p9594_p2), %v9619_v9  ;;  %v7609_v34 = vld [vmem:[#allocation27 + $0x188] sm:$0xff] (!%p9594_p2)  ;;  %v7620_v60 = vld [vmem:[#allocation27 + $0x1e0] sm:$0xff] (!%p9594_p2)  ;;  %v9643_v22 = vcombine.low (!%p9594_p2), %v7608_v25, %v7612_v58 }
0x14d6   : > { %8378 = vmatpush1.bf16.msra.mxu1 (!%p9594_p2), %v9621_v49  ;;  %8336 = vmatprep.subr.bf16.mxu0 (!%p9594_p2), %v9628_v3  ;;  %v7613_v59 = vld [vmem:[#allocation27 + $0x1a8] sm:$0xff] (!%p9594_p2)  ;;  %v9651_v27 = vcombine.low (!%p9594_p2), %v7616_v7, %v7620_v60  ;;  %v9676_v17 = vcombine.high (!%p9594_p2), %v7640_v53, %v7644_v55  ;;  %v9678_v31 = vcombine.high (!%p9594_p2), %v7641_v62, %v7645_v48  ;;  %v7652_v35 = vld [vmem:[#allocation27 + $0x2e0] sm:$0xff] (!%p9594_p2) }
0x14d7   : > { %7552 = vst [vmem:[#allocation2 + $0x10] sm:$0xff] %v13566_v52  ;;  %7553 = vst [vmem:[#allocation2 + $0x18] sm:$0xff] %v7549_v51  ;;  %v13570_v19 = vpack.c.bf16 (!%p9594_p2), %v7549_v51, %v7547_v46  ;;  %8379 = vmatprep.subr.bf16.mxu1 (!%p9594_p2), %v9630_v54  ;;  %v9646_v39 = vcombine.high (!%p9594_p2), %v7609_v34, %v7613_v59  ;;  %v7621_v46 = vld [vmem:[#allocation27 + $0x1e8] sm:$0xff] (!%p9594_p2)  ;;  %v9645_v28 = vcombine.low (!%p9594_p2), %v7609_v34, %v7613_v59  ;;  %v7660_v9 = vld [vmem:[#allocation27 + $0x320] sm:$0xff] (!%p9594_p2) }
0x14d8   : > { %v9652_v51 = vcombine.high %v7616_v7, %v7620_v60  ;;  %v9654_v56 = vcombine.high %v7617_v2, %v7621_v46  ;;  %v9653_v8 = vcombine.low %v7617_v2, %v7621_v46  ;;  %v9675_v40 = vcombine.low %v7640_v53, %v7644_v55  ;;  %v7657_v49 = vld [vmem:[#allocation27 + $0x308] sm:$0xff]  ;;  %v7664_v50 = vld [vmem:[#allocation27 + $0x340] sm:$0xff] }
0x14d9   : > { %8360 = vmatprep.mubr.bf16.mxu0 %v13570_v19  ;;  %8403 = vmatprep.mubr.bf16.mxu1 %v13570_v19  ;;  %v9677_v1 = vcombine.low %v7641_v62, %v7645_v48  ;;  %v9684_v32 = vcombine.high %v7648_v26, %v7652_v35  ;;  %v9686_v13 = vcombine.high %v7649_v36, %v7653_v42  ;;  %v7661_v3 = vld [vmem:[#allocation27 + $0x328] sm:$0xff]  ;;  %v7672_v59 = vld [vmem:[#allocation27 + $0x380] sm:$0xff] }
0x14da   : > { %8337 = vmatpush1.bf16.msra.mxu0 %v9627_v43  ;;  %8380 = vmatpush1.bf16.msra.mxu1 %v9629_v14  ;;  %v9683_v54 = vcombine.low %v7648_v26, %v7652_v35  ;;  %v9685_v23 = vcombine.low %v7649_v36, %v7653_v42  ;;  %v9692_v38 = vcombine.high %v7656_v30, %v7660_v9  ;;  %v7668_v43 = vld [vmem:[#allocation27 + $0x360] sm:$0xff]  ;;  %v7665_v14 = vld [vmem:[#allocation27 + $0x348] sm:$0xff]  ;;  %v7586_v36 = vld [vmem:[#allocation27 + $0xd0] sm:$0xff] }
0x14db   : > { %8338 = vmatprep.subr.bf16.mxu0 %v9636_v44  ;;  %8381 = vmatprep.subr.bf16.mxu1 %v9638_v4  ;;  %v9694_v45 = vcombine.high %v7657_v49, %v7661_v3  ;;  %v7669_v44 = vld [vmem:[#allocation27 + $0x368] sm:$0xff]  ;;  %v9691_v4 = vcombine.low %v7656_v30, %v7660_v9  ;;  %v9693_v25 = vcombine.low %v7657_v49, %v7661_v3  ;;  %v7680_v46 = vld [vmem:[#allocation27 + $0x3c0] sm:$0xff]  ;;  %v7590_v42 = vld [vmem:[#allocation27 + $0xf0] sm:$0xff] }
0x14dc   : > { %v9700_v58 = vcombine.high %v7664_v50, %v7668_v43  ;;  %v9702_v34 = vcombine.high %v7665_v14, %v7669_v44  ;;  %v9701_v7 = vcombine.low %v7665_v14, %v7669_v44  ;;  %v9624_v30 = vcombine.high %v7586_v36, %v7590_v42  ;;  %v7594_v49 = vld [vmem:[#allocation27 + $0x110] sm:$0xff]  ;;  %v7603_v44 = vld [vmem:[#allocation27 + $0x158] sm:$0xff] }
0x14dd   : > { %v7598_v3 = vld [vmem:[#allocation27 + $0x130] sm:$0xff] }
0x14de   : > { %8339 = vmatpush1.bf16.msra.mxu0 %v9635_v37  ;;  %8382 = vmatpush1.bf16.msra.mxu1 %v9637_v0  ;;  %v7676_v37 = vld [vmem:[#allocation27 + $0x3a0] sm:$0xff]  ;;  %v7673_v0 = vld [vmem:[#allocation27 + $0x388] sm:$0xff]  ;;  %v7606_v14 = vld [vmem:[#allocation27 + $0x170] sm:$0xff] }
0x14df   : > { %8340 = vmatprep.subr.bf16.mxu0 %v9644_v20  ;;  %8383 = vmatprep.subr.bf16.mxu1 %v9646_v39  ;;  %v7677_v20 = vld [vmem:[#allocation27 + $0x3a8] sm:$0xff]  ;;  %v9699_v39 = vcombine.low %v7664_v50, %v7668_v43  ;;  %v9708_v60 = vcombine.high %v7672_v59, %v7676_v37  ;;  %v9632_v50 = vcombine.high %v7594_v49, %v7598_v3  ;;  %v7602_v43 = vld [vmem:[#allocation27 + $0x150] sm:$0xff] }
0x14e0   : > { %v9710_v2 = vcombine.high %v7673_v0, %v7677_v20  ;;  %v9709_v63 = vcombine.low %v7673_v0, %v7677_v20  ;;  %v7614_v0 = vld [vmem:[#allocation27 + $0x1b0] sm:$0xff]  ;;  %v7611_v20 = vld [vmem:[#allocation27 + $0x198] sm:$0xff] }
0x14e2   : > { %8341 = vmatpush1.bf16.msra.mxu0 %v9643_v22  ;;  %8384 = vmatpush1.bf16.msra.mxu1 %v9645_v28  ;;  %v7684_v22 = vld [vmem:[#allocation27 + $0x3e0] sm:$0xff]  ;;  %v7681_v28 = vld [vmem:[#allocation27 + $0x3c8] sm:$0xff] }
0x14e3   : > { %8342 = vmatprep.subr.bf16.mxu0 %v9652_v51  ;;  %8385 = vmatprep.subr.bf16.mxu1 %v9654_v56  ;;  %v7685_v51 = vld [vmem:[#allocation27 + $0x3e8] sm:$0xff]  ;;  %v9707_v56 = vcombine.low %v7672_v59, %v7676_v37  ;;  %v9716_v16 = vcombine.high %v7680_v46, %v7684_v22  ;;  %v7610_v37 = vld [vmem:[#allocation27 + $0x190] sm:$0xff] }
0x14e4   : > { %v9718_v21 = vcombine.high %v7681_v28, %v7685_v51  ;;  %v9717_v10 = vcombine.low %v7681_v28, %v7685_v51  ;;  %v7622_v28 = vld [vmem:[#allocation27 + $0x1f0] sm:$0xff]  ;;  %v7619_v51 = vld [vmem:[#allocation27 + $0x1d8] sm:$0xff] }
0x14e6   : > { %8343 = vmatpush1.bf16.msra.mxu0 %v9651_v27  ;;  %8386 = vmatpush1.bf16.msra.mxu1 %v9653_v8  ;;  %v7566_v27 = vld [vmem:[#allocation27 + $0x30] sm:$0xff]  ;;  %v7563_v8 = vld [vmem:[#allocation27 + $0x18] sm:$0xff] }
0x14e7   : > { %8344 = vmatprep.subr.bf16.mxu0 %v9660_v18  ;;  %8387 = vmatprep.subr.bf16.mxu1 %v9662_v5  ;;  %v7567_v18 = vld [vmem:[#allocation27 + $0x38] sm:$0xff]  ;;  %v9715_v5 = vcombine.low %v7680_v46, %v7684_v22  ;;  %v9600_v29 = vcombine.high %v7562_v41, %v7566_v27  ;;  %v9599_v53 = vcombine.low %v7562_v41, %v7566_v27  ;;  %v7618_v22 = vld [vmem:[#allocation27 + $0x1d0] sm:$0xff] }
0x14e8   : > { %v9602_v11 = vcombine.high %v7563_v8, %v7567_v18  ;;  %v9601_v55 = vcombine.low %v7563_v8, %v7567_v18  ;;  %v7626_v27 = vld [vmem:[#allocation27 + $0x210] sm:$0xff]  ;;  %v7627_v18 = vld [vmem:[#allocation27 + $0x218] sm:$0xff] }
0x14e9   : > { %v7630_v8 = vld [vmem:[#allocation27 + $0x230] sm:$0xff] }
0x14ea   : > { %8345 = vmatpush1.bf16.msra.mxu0 %v9659_v47  ;;  %8388 = vmatpush1.bf16.msra.mxu1 %v9661_v12  ;;  %v7574_v47 = vld [vmem:[#allocation27 + $0x70] sm:$0xff]  ;;  %v13576_v12 = vpack.c.bf16 %v13566_v52, %v13563_v57 }
0x14eb   : > { %8346 = vmatprep.subr.bf16.mxu0 %v9668_v61  ;;  %8389 = vmatprep.subr.bf16.mxu1 %v9670_v33  ;;  %v7571_v61 = vld [vmem:[#allocation27 + $0x58] sm:$0xff]  ;;  %v9608_v62 = vcombine.high %v7570_v6, %v7574_v47  ;;  %v9607_v57 = vcombine.low %v7570_v6, %v7574_v47  ;;  %v7634_v47 = vld [vmem:[#allocation27 + $0x250] sm:$0xff] }
0x14ec   : > { %v7575_v33 = vld [vmem:[#allocation27 + $0x78] sm:$0xff] }
0x14ed   : > { %v9610_v48 = vcombine.high %v7571_v61, %v7575_v33  ;;  %v9609_v52 = vcombine.low %v7571_v61, %v7575_v33  ;;  %v7638_v61 = vld [vmem:[#allocation27 + $0x270] sm:$0xff]  ;;  %v7635_v33 = vld [vmem:[#allocation27 + $0x258] sm:$0xff] }
0x14ee   : > { %8347 = vmatpush1.bf16.msra.mxu0 %v9667_v15  ;;  %8390 = vmatpush1.bf16.msra.mxu1 %v9669_v24  ;;  %v7578_v15 = vld [vmem:[#allocation27 + $0x90] sm:$0xff] }
0x14ef   : > { %8348 = vmatprep.subr.bf16.mxu0 %v9676_v17  ;;  %8391 = vmatprep.subr.bf16.mxu1 %v9678_v31  ;;  %v7582_v24 = vld [vmem:[#allocation27 + $0xb0] sm:$0xff]  ;;  %v7579_v17 = vld [vmem:[#allocation27 + $0x98] sm:$0xff] }
0x14f0   : > { %v7583_v31 = vld [vmem:[#allocation27 + $0xb8] sm:$0xff]  ;;  %v9616_v26 = vcombine.high %v7578_v15, %v7582_v24 }
0x14f1   : > { %v9618_v35 = vcombine.high %v7579_v17, %v7583_v31 }
0x14f2   : > { %8349 = vmatpush1.bf16.msra.mxu0 %v9675_v40  ;;  %8392 = vmatpush1.bf16.msra.mxu1 %v9677_v1  ;;  %v7587_v40 = vld [vmem:[#allocation27 + $0xd8] sm:$0xff] }
0x14f3   : > { %8350 = vmatprep.subr.bf16.mxu0 %v9684_v32  ;;  %8393 = vmatprep.subr.bf16.mxu1 %v9686_v13  ;;  %v7591_v1 = vld [vmem:[#allocation27 + $0xf8] sm:$0xff]  ;;  %v9615_v32 = vcombine.low %v7578_v15, %v7582_v24  ;;  %v9617_v13 = vcombine.low %v7579_v17, %v7583_v31  ;;  %v7642_v24 = vld [vmem:[#allocation27 + $0x290] sm:$0xff] }
0x14f4   : > { %v9626_v9 = vcombine.high %v7587_v40, %v7591_v1  ;;  %v7646_v17 = vld [vmem:[#allocation27 + $0x2b0] sm:$0xff]  ;;  %v7643_v31 = vld [vmem:[#allocation27 + $0x298] sm:$0xff] }
0x14f6   : > { %8351 = vmatpush1.bf16.msra.mxu0 %v9683_v54  ;;  %8394 = vmatpush1.bf16.msra.mxu1 %v9685_v23  ;;  %v7595_v54 = vld [vmem:[#allocation27 + $0x118] sm:$0xff] }
0x14f7   : > { %8352 = vmatprep.subr.bf16.mxu0 %v9692_v38  ;;  %8395 = vmatprep.subr.bf16.mxu1 %v9694_v45  ;;  %v7599_v23 = vld [vmem:[#allocation27 + $0x138] sm:$0xff]  ;;  %v9623_v38 = vcombine.low %v7586_v36, %v7590_v42  ;;  %v9625_v45 = vcombine.low %v7587_v40, %v7591_v1  ;;  %v7650_v42 = vld [vmem:[#allocation27 + $0x2d0] sm:$0xff] }
0x14f8   : > { %v7654_v40 = vld [vmem:[#allocation27 + $0x2f0] sm:$0xff]  ;;  %v7651_v1 = vld [vmem:[#allocation27 + $0x2d8] sm:$0xff] }
0x14fa   : > { %8353 = vmatpush1.bf16.msra.mxu0 %v9691_v4  ;;  %8396 = vmatpush1.bf16.msra.mxu1 %v9693_v25  ;;  %v7607_v4 = vld [vmem:[#allocation27 + $0x178] sm:$0xff]  ;;  %v9631_v25 = vcombine.low %v7594_v49, %v7598_v3  ;;  %v7658_v3 = vld [vmem:[#allocation27 + $0x310] sm:$0xff] }
0x14fb   : > { %8354 = vmatprep.subr.bf16.mxu0 %v9700_v58  ;;  %8397 = vmatprep.subr.bf16.mxu1 %v9702_v34  ;;  %v9633_v58 = vcombine.low %v7595_v54, %v7599_v23  ;;  %v9640_v34 = vcombine.high %v7602_v43, %v7606_v14  ;;  %v9642_v59 = vcombine.high %v7603_v44, %v7607_v4 }
0x14fe   : > { %8355 = vmatpush1.bf16.msra.mxu0 %v9699_v39  ;;  %8398 = vmatpush1.bf16.msra.mxu1 %v9701_v7  ;;  %v7615_v39 = vld [vmem:[#allocation27 + $0x1b8] sm:$0xff]  ;;  %v9639_v7 = vcombine.low %v7602_v43, %v7606_v14  ;;  %v7666_v14 = vld [vmem:[#allocation27 + $0x350] sm:$0xff] }
0x14ff   : > { %8356 = vmatprep.subr.bf16.mxu0 %v9708_v60  ;;  %8399 = vmatprep.subr.bf16.mxu1 %v9710_v2  ;;  %v9641_v60 = vcombine.low %v7603_v44, %v7607_v4  ;;  %v9648_v2 = vcombine.high %v7610_v37, %v7614_v0  ;;  %v9650_v46 = vcombine.high %v7611_v20, %v7615_v39  ;;  %v7670_v44 = vld [vmem:[#allocation27 + $0x370] sm:$0xff]  ;;  %v7667_v4 = vld [vmem:[#allocation27 + $0x358] sm:$0xff] }
0x1502   : > { %8357 = vmatpush1.bf16.msra.mxu0 %v9707_v56  ;;  %8400 = vmatpush1.bf16.msra.mxu1 %v9709_v63  ;;  %v7623_v56 = vld [vmem:[#allocation27 + $0x1f8] sm:$0xff]  ;;  %v9647_v63 = vcombine.low %v7610_v37, %v7614_v0  ;;  %v7674_v0 = vld [vmem:[#allocation27 + $0x390] sm:$0xff] }
0x1503   : > { %8358 = vmatprep.subr.bf16.mxu0 %v9716_v16  ;;  %8401 = vmatprep.subr.bf16.mxu1 %v9718_v21  ;;  %v9649_v16 = vcombine.low %v7611_v20, %v7615_v39  ;;  %v9656_v21 = vcombine.high %v7618_v22, %v7622_v28  ;;  %v9658_v41 = vcombine.high %v7619_v51, %v7623_v56  ;;  %v7678_v20 = vld [vmem:[#allocation27 + $0x3b0] sm:$0xff]  ;;  %v7675_v39 = vld [vmem:[#allocation27 + $0x398] sm:$0xff] }
0x1506   : > { %8359 = vmatpush1.bf16.msra.mxu0 %v9715_v5  ;;  %8402 = vmatpush1.bf16.msra.mxu1 %v9717_v10  ;;  %v7631_v5 = vld [vmem:[#allocation27 + $0x238] sm:$0xff]  ;;  %v9655_v10 = vcombine.low %v7618_v22, %v7622_v28  ;;  %v7682_v28 = vld [vmem:[#allocation27 + $0x3d0] sm:$0xff] }
0x1507   : > { %8414 = vmatprep.subr.bf16.mxu0 %v9600_v29  ;;  %8457 = vmatprep.subr.bf16.mxu1 %v9602_v11  ;;  %v9657_v29 = vcombine.low %v7619_v51, %v7623_v56  ;;  %v9664_v11 = vcombine.high %v7626_v27, %v7630_v8  ;;  %v9666_v6 = vcombine.high %v7627_v18, %v7631_v5  ;;  %v7686_v51 = vld [vmem:[#allocation27 + $0x3f0] sm:$0xff]  ;;  %v7683_v56 = vld [vmem:[#allocation27 + $0x3d8] sm:$0xff] }
0x1509   : > { %8361 = vmatmul.mubr.bf16.vlgmr.msra.gmra.mrb[0].mxu0 %v13576_v12  ;;  %8404 = vmatmul.mubr.bf16.vlgmr.msra.gmra.mrb[0].mxu1 %v13576_v12 }
0x150a   : > { %8415 = vmatpush1.bf16.msra.mxu0 %v9599_v53  ;;  %8458 = vmatpush1.bf16.msra.mxu1 %v9601_v55  ;;  %v7639_v53 = vld [vmem:[#allocation27 + $0x278] sm:$0xff]  ;;  %v9663_v55 = vcombine.low %v7626_v27, %v7630_v8  ;;  %v9719_v8 = vcombine.low %v7682_v28, %v7686_v51 }
0x150b   : > { %8416 = vmatprep.subr.bf16.mxu0 %v9608_v62  ;;  %8459 = vmatprep.subr.bf16.mxu1 %v9610_v48  ;;  %v9665_v62 = vcombine.low %v7627_v18, %v7631_v5  ;;  %v9672_v48 = vcombine.high %v7634_v47, %v7638_v61  ;;  %v9674_v15 = vcombine.high %v7635_v33, %v7639_v53 }
0x150c   : > { %8446 = vmatprep.mubr.bf16.mxu0 %v13570_v19  ;;  %8489 = vmatprep.mubr.bf16.mxu1 %v13570_v19  ;;  %v9634_v19 = vcombine.high %v7595_v54, %v7599_v23  ;;  %v7662_v54 = vld [vmem:[#allocation27 + $0x330] sm:$0xff]  ;;  %v7659_v23 = vld [vmem:[#allocation27 + $0x318] sm:$0xff] }
0x150e   : > { %8417 = vmatpush1.bf16.msra.mxu0 %v9607_v57  ;;  %8460 = vmatpush1.bf16.msra.mxu1 %v9609_v52  ;;  %v7647_v57 = vld [vmem:[#allocation27 + $0x2b8] sm:$0xff]  ;;  %v9671_v52 = vcombine.low %v7634_v47, %v7638_v61 }
0x150f   : > { %8418 = vmatprep.subr.bf16.mxu0 %v9616_v26  ;;  %8461 = vmatprep.subr.bf16.mxu1 %v9618_v35  ;;  %v9673_v26 = vcombine.low %v7635_v33, %v7639_v53  ;;  %v9680_v35 = vcombine.high %v7642_v24, %v7646_v17  ;;  %v9682_v36 = vcombine.high %v7643_v31, %v7647_v57 }
0x1512   : > { %8419 = vmatpush1.bf16.msra.mxu0 %v9615_v32  ;;  %8462 = vmatpush1.bf16.msra.mxu1 %v9617_v13  ;;  %v7655_v32 = vld [vmem:[#allocation27 + $0x2f8] sm:$0xff]  ;;  %v9679_v13 = vcombine.low %v7642_v24, %v7646_v17 }
0x1513   : > { %8420 = vmatprep.subr.bf16.mxu0 %v9624_v30  ;;  %8463 = vmatprep.subr.bf16.mxu1 %v9626_v9  ;;  %v9681_v30 = vcombine.low %v7643_v31, %v7647_v57  ;;  %v9688_v9 = vcombine.high %v7650_v42, %v7654_v40  ;;  %v9690_v49 = vcombine.high %v7651_v1, %v7655_v32 }
0x1516   : > { %8421 = vmatpush1.bf16.msra.mxu0 %v9623_v38  ;;  %8464 = vmatpush1.bf16.msra.mxu1 %v9625_v45  ;;  %v7663_v38 = vld [vmem:[#allocation27 + $0x338] sm:$0xff]  ;;  %v9687_v45 = vcombine.low %v7650_v42, %v7654_v40 }
0x1517   : > { %8422 = vmatprep.subr.bf16.mxu0 %v9632_v50  ;;  %8465 = vmatprep.subr.bf16.mxu1 %v9634_v19  ;;  %v9689_v50 = vcombine.low %v7651_v1, %v7655_v32  ;;  %v9696_v19 = vcombine.high %v7658_v3, %v7662_v54  ;;  %v9698_v43 = vcombine.high %v7659_v23, %v7663_v38 }
0x151a   : > { %8423 = vmatpush1.bf16.msra.mxu0 %v9631_v25  ;;  %8466 = vmatpush1.bf16.msra.mxu1 %v9633_v58  ;;  %v7671_v25 = vld [vmem:[#allocation27 + $0x378] sm:$0xff]  ;;  %v9695_v58 = vcombine.low %v7658_v3, %v7662_v54 }
0x151b   : > { %8424 = vmatprep.subr.bf16.mxu0 %v9640_v34  ;;  %8467 = vmatprep.subr.bf16.mxu1 %v9642_v59  ;;  %v9697_v34 = vcombine.low %v7659_v23, %v7663_v38  ;;  %v9704_v59 = vcombine.high %v7666_v14, %v7670_v44  ;;  %v9706_v37 = vcombine.high %v7667_v4, %v7671_v25 }
0x151e   : > { %8425 = vmatpush1.bf16.msra.mxu0 %v9639_v7  ;;  %8468 = vmatpush1.bf16.msra.mxu1 %v9641_v60  ;;  %v7679_v7 = vld [vmem:[#allocation27 + $0x3b8] sm:$0xff]  ;;  %v9703_v60 = vcombine.low %v7666_v14, %v7670_v44 }
0x151f   : > { %8426 = vmatprep.subr.bf16.mxu0 %v9648_v2  ;;  %8469 = vmatprep.subr.bf16.mxu1 %v9650_v46  ;;  %v9705_v2 = vcombine.low %v7667_v4, %v7671_v25  ;;  %v9712_v46 = vcombine.high %v7674_v0, %v7678_v20  ;;  %v9714_v22 = vcombine.high %v7675_v39, %v7679_v7 }
0x1522   : > { %8427 = vmatpush1.bf16.msra.mxu0 %v9647_v63  ;;  %8470 = vmatpush1.bf16.msra.mxu1 %v9649_v16  ;;  %v7687_v63 = vld [vmem:[#allocation27 + $0x3f8] sm:$0xff]  ;;  %v9711_v16 = vcombine.low %v7674_v0, %v7678_v20 }
0x1523   : > { %8428 = vmatprep.subr.bf16.mxu0 %v9656_v21  ;;  %8471 = vmatprep.subr.bf16.mxu1 %v9658_v41  ;;  %v9713_v21 = vcombine.low %v7675_v39, %v7679_v7  ;;  %v9720_v41 = vcombine.high %v7682_v28, %v7686_v51  ;;  %v9722_v27 = vcombine.high %v7683_v56, %v7687_v63 }
0x1524   : > { %v9721_v18 = vcombine.low %v7683_v56, %v7687_v63 }
0x1526   : > { %8429 = vmatpush1.bf16.msra.mxu0 %v9655_v10  ;;  %8472 = vmatpush1.bf16.msra.mxu1 %v9657_v29 }
0x1527   : > { %8430 = vmatprep.subr.bf16.mxu0 %v9664_v11  ;;  %8473 = vmatprep.subr.bf16.mxu1 %v9666_v6 }
0x152a   : > { %8431 = vmatpush1.bf16.msra.mxu0 %v9663_v55  ;;  %8474 = vmatpush1.bf16.msra.mxu1 %v9665_v62 }
0x152b   : > { %8432 = vmatprep.subr.bf16.mxu0 %v9672_v48  ;;  %8475 = vmatprep.subr.bf16.mxu1 %v9674_v15 }
0x152e   : > { %8433 = vmatpush1.bf16.msra.mxu0 %v9671_v52  ;;  %8476 = vmatpush1.bf16.msra.mxu1 %v9673_v26 }
0x152f   : > { %8434 = vmatprep.subr.bf16.mxu0 %v9680_v35  ;;  %8477 = vmatprep.subr.bf16.mxu1 %v9682_v36 }
0x1532   : > { %8435 = vmatpush1.bf16.msra.mxu0 %v9679_v13  ;;  %8478 = vmatpush1.bf16.msra.mxu1 %v9681_v30 }
0x1533   : > { %8436 = vmatprep.subr.bf16.mxu0 %v9688_v9  ;;  %8479 = vmatprep.subr.bf16.mxu1 %v9690_v49 }
0x1536   : > { %8437 = vmatpush1.bf16.msra.mxu0 %v9687_v45  ;;  %8480 = vmatpush1.bf16.msra.mxu1 %v9689_v50 }
0x1537   : > { %8438 = vmatprep.subr.bf16.mxu0 %v9696_v19  ;;  %8481 = vmatprep.subr.bf16.mxu1 %v9698_v43 }
0x153a   : > { %8439 = vmatpush1.bf16.msra.mxu0 %v9695_v58  ;;  %8482 = vmatpush1.bf16.msra.mxu1 %v9697_v34 }
0x153b   : > { %8440 = vmatprep.subr.bf16.mxu0 %v9704_v59  ;;  %8483 = vmatprep.subr.bf16.mxu1 %v9706_v37 }
0x153e   : > { %8441 = vmatpush1.bf16.msra.mxu0 %v9703_v60  ;;  %8484 = vmatpush1.bf16.msra.mxu1 %v9705_v2 }
0x153f   : > { %8442 = vmatprep.subr.bf16.mxu0 %v9712_v46  ;;  %8485 = vmatprep.subr.bf16.mxu1 %v9714_v22 }
0x1542   : > { %8443 = vmatpush1.bf16.msra.mxu0 %v9711_v16  ;;  %8486 = vmatpush1.bf16.msra.mxu1 %v9713_v21 }
0x1543   : > { %8444 = vmatprep.subr.bf16.mxu0 %v9720_v41  ;;  %8487 = vmatprep.subr.bf16.mxu1 %v9722_v27 }
0x1546   : > { %8445 = vmatpush1.bf16.msra.mxu0 %v9719_v8  ;;  %8488 = vmatpush1.bf16.msra.mxu1 %v9721_v18 }
0x1549   : > { %8447 = vmatmul.mubr.bf16.vlgmr.msra.gmra.mrb[4].mxu0 %v13576_v12  ;;  %8490 = vmatmul.mubr.bf16.vlgmr.msra.gmra.mrb[4].mxu1 %v13576_v12 }
0x15dc   : > { %v8362_v5 = vpop.f32.mrb[0].mxu0  ;;  %v8405_v10 = vpop.f32.mrb[0].mxu1 }
0x15dd   : > { %8500 = vst [vmem:[%s13788_s7] sm:$0xff] %v8362_v5  ;;  %v8364_v29 = vpop.f32.mrb[1].mxu0  ;;  %8502 = vst [vmem:[%s13788_s7 + $0x10] sm:$0xff] %v8405_v10  ;;  %v8407_v11 = vpop.f32.mrb[1].mxu1 }
0x15de   : > { %8501 = vst [vmem:[%s13788_s7 + $0x8] sm:$0xff] %v8364_v29  ;;  %v8366_v6 = vpop.f32.mrb[2].mxu0  ;;  %8503 = vst [vmem:[%s13788_s7 + $0x18] sm:$0xff] %v8407_v11  ;;  %v8409_v12 = vpop.f32.mrb[2].mxu1 }
0x15df   : > { %8508 = vst [vmem:[%s13788_s7 + $0x40] sm:$0xff] %v8366_v6  ;;  %v8368_v47 = vpop.f32.mrb[3].mxu0  ;;  %8510 = vst [vmem:[%s13788_s7 + $0x50] sm:$0xff] %v8409_v12  ;;  %v8411_v61 = vpop.f32.mrb[3].mxu1 }
0x15e0   : > { %8509 = vst [vmem:[%s13788_s7 + $0x48] sm:$0xff] %v8368_v47  ;;  %8511 = vst [vmem:[%s13788_s7 + $0x58] sm:$0xff] %v8411_v61 }
0x161c   : > { %v8448_v33 = vpop.f32.mrb[4].mxu0  ;;  %v8491_v53 = vpop.f32.mrb[4].mxu1 }
0x161d   : > { %8504 = vst [vmem:[%s13788_s7 + $0x20] sm:$0xff] %v8448_v33  ;;  %v8450_v55 = vpop.f32.mrb[5].mxu0  ;;  %8506 = vst [vmem:[%s13788_s7 + $0x30] sm:$0xff] %v8491_v53  ;;  %v8493_v62 = vpop.f32.mrb[5].mxu1 }
0x161e   : > { %8505 = vst [vmem:[%s13788_s7 + $0x28] sm:$0xff] %v8450_v55  ;;  %v8452_v48 = vpop.f32.mrb[6].mxu0  ;;  %8507 = vst [vmem:[%s13788_s7 + $0x38] sm:$0xff] %v8493_v62  ;;  %v8495_v15 = vpop.f32.mrb[6].mxu1 }
0x161f   : > { %8512 = vst [vmem:[%s13788_s7 + $0x60] sm:$0xff] %v8452_v48  ;;  %v8454_v24 = vpop.f32.mrb[7].mxu0  ;;  %8514 = vst [vmem:[%s13788_s7 + $0x70] sm:$0xff] %v8495_v15  ;;  %v8497_v17 = vpop.f32.mrb[7].mxu1 }
0x1620   : > { %8513 = vst [vmem:[%s13788_s7 + $0x68] sm:$0xff] %v8454_v24  ;;  %8515 = vst [vmem:[%s13788_s7 + $0x78] sm:$0xff] %v8497_v17 }
0x1621 PF: > { %s13789_s30 = sld [smem:[#allocation35_spill]]  ;;  %s13790_s29 = sld [smem:[#allocation32_spill]] }
0x1622   : > { %s13791_s2 = sld [smem:[#allocation33_spill]]  ;;  %s13792_s6 = sld [smem:[#allocation36_spill]] }
0x1627   : > { %p34_p6 = scmp.ge.s32.totalorder %s13789_s30, 6  }
0x1629   :  { %36 = sbr.rel (!%p34_p6) target bundleno = 24 (0x18), region = 384 }
0x1630   :  { %8527 = vsyncpa [#allocation4], 1 }
0x1631   :  { %8529 = vsyncpa [#allocation4 + $0x1], 1 }
0x1632   :  { %8530 = vsyncpa [#allocation6], 1 }

</bundles_post_ra>
